<compile_context>
chip_gen: v5e
topology: v5e:2x2
jax: 0.10.0
libtpu: 0.0.40
codegen_flags: <defaults>
</compile_context>

<pallas_src>
import math
import numpy as np
import jax
import jax.numpy as jnp
from jax import lax
from jax.experimental import pallas as pl
from jax.experimental.pallas import tpu as pltpu

# ------------------------- configuration (small) -----------------------------
OUTPUT_DIM  = 16
N_MELS      = 64
N_FFT       = 256
HOP         = 64
SAMPLE_RATE = 16000
CHANNELS    = 32
KERNEL_SIZE = 7
STRIDES     = [2, 2, 2]
HIDDEN      = 128
BATCH       = 2
AUDIO_LEN   = 1024
BN_EPS      = 1e-5
LOG_EPS     = 1e-6   # TODO(synk): exact LogTransform eps in diffsynth not verified; using log(x + 1e-6)
PAD_FREQ    = 256    # n_fft//2 + 1 = 129 zero-padded to lane-aligned 256
HEAD_PAD    = 128    # Linear head lane-padded 16 -> 128 for dense output stores
ROW_PAD     = 16     # pad M = T*B rows up to a multiple of 16 (bf16 sublane packing)


# ------------------------------ fused Pallas kernel ----------------------------
def _full2(a):
    return pl.BlockSpec(a.shape, lambda i: (0, 0))


def pallas_mel_estimator(frames, stft, mel, W1, b1, W2, b2, W3, b3,
                         w_ih, b_ih, w_hh, b_hh, w_out, b_out, *, T, B):
    """frames(bf16, padded rows) -> |STFT| -> mel -> log -> global-normalize ->
       3x dense(conv+BN+ReLU) -> GRU input proj -> GRU recurrence -> Linear+sigmoid.
       One kernel launch; gi and hidden states stay in VMEM scratch."""
    M_pad  = frames.shape[0]
    M_valid = T * B
    NP     = stft.shape[1] // 2          # padded freq bins (256)
    G      = w_ih.shape[1]               # 3 * HIDDEN
    H      = HIDDEN
    HEAD   = w_out.shape[1]              # 128 (lane-padded)

    def kernel(frames_ref, stft_ref, mel_ref,
               w1_ref, b1_ref, w2_ref, b2_ref, w3_ref, b3_ref,
               wih_ref, bih_ref, whh_ref, bhh_ref, wout_ref, bout_ref,
               y_ref, gi_ref, h_ref):
        # ---------------- frontend: windowed DFT -> |.| -> mel -> log ----------------
        f = frames_ref[...]                                                    # (M, n_fft) bf16
        spec = jnp.dot(f, stft_ref[...], preferred_element_type=jnp.float32)   # (M, 2*NP)
        real = spec[:, :NP]
        imag = spec[:, NP:]
        mag = jnp.sqrt(real * real + imag * imag)                              # power = 1.0
        melv = jnp.dot(mag.astype(jnp.bfloat16), mel_ref[...],
                       preferred_element_type=jnp.float32)                     # (M, n_mels)
        x = jnp.log(melv + LOG_EPS)

        # Normalize2d('batch'): global mean/var over VALID rows only (pad rows masked).
        # TODO(synk): exact diffsynth Normalize2d semantics unverified; using global mean/var norm.
        row = lax.broadcasted_iota(jnp.int32, x.shape, 0)
        valid = (row < M_valid).astype(jnp.float32)
        cnt = float(M_valid * x.shape[1])
        mu = jnp.sum(jnp.sum(x * valid, axis=1, keepdims=True),
                     axis=0, keepdims=True) / cnt                              # (1, 1)
        d = (x - mu) * valid
        var = jnp.sum(jnp.sum(d * d, axis=1, keepdims=True),
                      axis=0, keepdims=True) / cnt
        x = (x - mu) * lax.rsqrt(var + BN_EPS)

        # Conv1d + BatchNorm(eval) + ReLU stack, pre-lowered to dense banded matmuls.
        h1 = jnp.maximum(jnp.dot(x.astype(jnp.bfloat16), w1_ref[...],
                                 preferred_element_type=jnp.float32) + b1_ref[...], 0.0)
        h2 = jnp.maximum(jnp.dot(h1.astype(jnp.bfloat16), w2_ref[...],
                                 preferred_element_type=jnp.float32) + b2_ref[...], 0.0)
        h3 = jnp.maximum(jnp.dot(h2.astype(jnp.bfloat16), w3_ref[...],
                                 preferred_element_type=jnp.float32) + b3_ref[...], 0.0)

        # GRU input projection hoisted out of the recurrence; stays in VMEM scratch.
        gi_ref[...] = jnp.dot(h3.astype(jnp.bfloat16), wih_ref[...],
                              preferred_element_type=jnp.float32) + bih_ref[...]

        # ------------- GRU recurrence (PyTorch gate order r|z|n), VMEM-resident -------------
        h_ref[...] = jnp.zeros_like(h_ref)          # also zeroes the padded tail rows
        whh = whh_ref[...]                          # (H, 3H) bf16, loaded ONCE, kept resident
        bhh = bhh_ref[...]                          # (1, 3H) f32
        h_prev = jnp.zeros((B, H), jnp.float32)
        for t in range(T):                          # static unroll; static 2-row slices
            gi_t = gi_ref[t * B:(t + 1) * B, :]                                # (B, 3H)
            gh = jnp.dot(h_prev.astype(jnp.bfloat16), whh,
                         preferred_element_type=jnp.float32) + bhh             # (B, 3H)
            # fused r|z sigmoid: one EUP call on a (B, 2H) slab
            rz = jax.nn.sigmoid(gi_t[:, :2 * H] + gh[:, :2 * H])
            r = rz[:, :H]
            z = rz[:, H:]
            n = jnp.tanh(gi_t[:, 2 * H:] + r * gh[:, 2 * H:])
            h_prev = (1.0 - z) * n + z * h_prev
            h_ref[t * B:(t + 1) * B, :] = h_prev

        # ------------- output head: Linear + sigmoid, lane-dense 128-wide store -------------
        y = jnp.dot(h_ref[...].astype(jnp.bfloat16), wout_ref[...],
                    preferred_element_type=jnp.float32) + bout_ref[...]
        y_ref[...] = jax.nn.sigmoid(y)

    cost = pl.CostEstimate(flops=100_000_000, transcendentals=40_000,
                           bytes_accessed=2_300_000)

    return pl.pallas_call(
        kernel,
        out_shape=jax.ShapeDtypeStruct((M_pad, HEAD), jnp.float32),
        grid=(1,),
        in_specs=[_full2(a) for a in (frames, stft, mel, W1, b1, W2, b2, W3, b3,
                                      w_ih, b_ih, w_hh, b_hh, w_out, b_out)],
        out_specs=pl.BlockSpec((M_pad, HEAD), lambda i: (0, 0)),
        scratch_shapes=[pltpu.VMEM((M_pad, G), jnp.float32),    # gi (GRU input proj)
                        pltpu.VMEM((M_pad, H), jnp.float32)],   # hidden states
        compiler_params=pltpu.CompilerParams(dimension_semantics=("arbitrary",)),
        cost_estimate=cost,
    )(frames, stft, mel, W1, b1, W2, b2, W3, b3, w_ih, b_ih, w_hh, b_hh, w_out, b_out)


# ---------------------------- constant bases (host) ----------------------------
def make_stft_basis_padded(n_fft, pad_freq):
    """[cos | sin] windowed DFT bases, each zero-padded 129 -> pad_freq lanes."""
    n_freq = n_fft // 2 + 1
    n = np.arange(n_fft)
    k = np.arange(n_freq)
    ang = 2.0 * np.pi * np.outer(n, k) / n_fft
    window = 0.5 - 0.5 * np.cos(2.0 * np.pi * n / n_fft)       # periodic Hann
    cosb = np.zeros((n_fft, pad_freq), np.float32)
    sinb = np.zeros((n_fft, pad_freq), np.float32)
    cosb[:, :n_freq] = np.cos(ang) * window[:, None]
    sinb[:, :n_freq] = -np.sin(ang) * window[:, None]
    return np.concatenate([cosb, sinb], axis=1)                # (n_fft, 2*pad_freq)


def make_htk_mel_fb(sr, n_fft, n_mels, fmin=0.0, fmax=None):
    if fmax is None:
        fmax = sr / 2.0
    n_freq = n_fft // 2 + 1
    hz2mel = lambda f: 2595.0 * np.log10(1.0 + f / 700.0)
    mel2hz = lambda m: 700.0 * (10.0 ** (m / 2595.0) - 1.0)
    mels = np.linspace(hz2mel(fmin), hz2mel(fmax), n_mels + 2)
    hz = mel2hz(mels)
    fft_freqs = np.linspace(0.0, sr / 2.0, n_freq)
    fb = np.zeros((n_mels, n_freq), dtype=np.float32)
    for m in range(n_mels):
        lower = (fft_freqs - hz[m]) / max(hz[m + 1] - hz[m], 1e-8)
        upper = (hz[m + 2] - fft_freqs) / max(hz[m + 2] - hz[m + 1], 1e-8)
        fb[m] = np.maximum(0.0, np.minimum(lower, upper))
    enorm = 2.0 / (hz[2:n_mels + 2] - hz[:n_mels])             # slaney-style norm
    fb *= enorm[:, None].astype(np.float32)
    return fb                                                  # (n_mels, n_freq)


def make_mel_matrix_padded(sr, n_fft, n_mels, pad_freq):
    fb = make_htk_mel_fb(sr, n_fft, n_mels)                    # (n_mels, 129)
    melT = np.zeros((pad_freq, n_mels), np.float32)
    melT[:fb.shape[1], :] = fb.T
    return melT                                                # (pad_freq, n_mels)


def conv_bn_to_dense(w, b, gamma, beta, rmean, rvar, stride, pad, L_in, eps):
    """Lower Conv1d(C_in->C_out, K, stride, pad) + BatchNorm(eval) to a dense
       (C_in*L_in, C_out*L_out) matrix (channel-major flattening, matching torch
       .view) plus a bias row; BN scale/shift and conv bias folded in."""
    w = np.asarray(w, np.float32)
    b = np.asarray(b, np.float32)
    C_out, C_in, K = w.shape
    L_out = (L_in + 2 * pad - K) // stride + 1
    W = np.zeros((C_in * L_in, C_out * L_out), dtype=np.float32)
    for p in range(L_out):
        for k in range(K):
            l = p * stride - pad + k
            if 0 <= l < L_in:
                rows = np.arange(C_in) * L_in + l
                cols = np.arange(C_out) * L_out + p
                W[np.ix_(rows, cols)] = w[:, :, k].T
    scale = gamma / np.sqrt(rvar + eps)                        # (C_out,)
    shift = beta + (b - rmean) * scale                         # (C_out,)
    Wd = W * np.repeat(scale, L_out)[None, :]
    bd = np.repeat(shift, L_out)[None, :]
    return Wd.astype(np.float32), bd.astype(np.float32), L_out


# ------------------------------- glue helpers ----------------------------------
def frame_audio_tb(audio, n_fft, hop):
    """center=True reflect padding; rows ordered (t, b) time-major; rows padded to a
       multiple of ROW_PAD with zero frames; frames pre-cast to bf16."""
    B, L = audio.shape
    pad = n_fft // 2
    audio_p = jnp.pad(audio, ((0, 0), (pad, pad)), mode="reflect")
    T = L // hop + 1
    idx = jnp.arange(T)[:, None] * hop + jnp.arange(n_fft)[None, :]
    frames = audio_p[:, idx]                                   # (B, T, n_fft)
    frames = jnp.transpose(frames, (1, 0, 2)).reshape(T * B, n_fft)
    M = T * B
    M_pad = ((M + ROW_PAD - 1) // ROW_PAD) * ROW_PAD
    frames = jnp.pad(frames, ((0, M_pad - M), (0, 0)))
    return frames.astype(jnp.bfloat16), T


# ------------------------------- parameters ------------------------------------
def init_params(key):
    ks = jax.random.split(key, 12)
    conv_w, conv_b = [], []
    c_in = 1
    L_in = N_MELS
    for i, s in enumerate(STRIDES):
        w = 0.1 * jax.random.normal(ks[i], (CHANNELS, c_in, KERNEL_SIZE), jnp.float32)
        b = 0.01 * jax.random.normal(ks[3 + i], (CHANNELS,), jnp.float32)
        gamma = np.ones((CHANNELS,), np.float32)               # BatchNorm default init
        beta = np.zeros((CHANNELS,), np.float32)
        rmean = np.zeros((CHANNELS,), np.float32)
        rvar = np.ones((CHANNELS,), np.float32)
        Wd, bd, L_out = conv_bn_to_dense(w, b, gamma, beta, rmean, rvar,
                                         s, KERNEL_SIZE // 2, L_in, BN_EPS)
        conv_w.append(jnp.asarray(Wd, jnp.bfloat16))
        conv_b.append(jnp.asarray(bd, jnp.float32))
        c_in = CHANNELS
        L_in = L_out
    l_out = L_in

    gru_in = l_out * CHANNELS
    k = 1.0 / math.sqrt(HIDDEN)
    u = lambda kk, shape: jax.random.uniform(kk, shape, jnp.float32, -k, k)

    # output head, lane-padded 16 -> HEAD_PAD (zero columns are free on the MXU)
    w_out_full = u(ks[10], (HIDDEN, OUTPUT_DIM))
    b_out_full = u(ks[11], (1, OUTPUT_DIM))
    w_out = jnp.zeros((HIDDEN, HEAD_PAD), jnp.float32).at[:, :OUTPUT_DIM].set(w_out_full)
    b_out = jnp.zeros((1, HEAD_PAD), jnp.float32).at[:, :OUTPUT_DIM].set(b_out_full)

    params = {
        "conv_w": conv_w,
        "conv_b": conv_b,
        "w_ih": u(ks[6], (gru_in, 3 * HIDDEN)).astype(jnp.bfloat16),   # pre-transposed
        "w_hh": u(ks[7], (HIDDEN, 3 * HIDDEN)).astype(jnp.bfloat16),
        "b_ih": u(ks[8], (1, 3 * HIDDEN)),
        "b_hh": u(ks[9], (1, 3 * HIDDEN)),
        "w_out": w_out.astype(jnp.bfloat16),
        "b_out": b_out,
    }
    return params, l_out


# ------------------------------- forward pass -----------------------------------
def mel_estimator_forward(params, audio, stft_basis, mel_basis):
    B = audio.shape[0]
    frames, T = frame_audio_tb(audio, N_FFT, HOP)              # (M_pad, n_fft) bf16
    y = pallas_mel_estimator(frames, stft_basis, mel_basis,
                             params["conv_w"][0], params["conv_b"][0],
                             params["conv_w"][1], params["conv_b"][1],
                             params["conv_w"][2], params["conv_b"][2],
                             params["w_ih"], params["b_ih"],
                             params["w_hh"], params["b_hh"],
                             params["w_out"], params["b_out"],
                             T=T, B=B)                         # (M_pad, HEAD_PAD)
    y = y[:T * B, :OUTPUT_DIM]                                 # drop row / lane padding
    return jnp.transpose(y.reshape(T, B, OUTPUT_DIM), (1, 0, 2))   # (B, T, output_dim)


# ------------------------------------ main ---------------------------------------
if __name__ == "__main__":
    key = jax.random.PRNGKey(0)
    k_audio, k_params = jax.random.split(key)
    audio = 0.5 * jax.random.normal(k_audio, (BATCH, AUDIO_LEN), jnp.float32)

    params, l_out = init_params(k_params)
    assert l_out == 8, l_out

    stft_basis = jnp.asarray(make_stft_basis_padded(N_FFT, PAD_FREQ), jnp.bfloat16)
    mel_basis = jnp.asarray(make_mel_matrix_padded(SAMPLE_RATE, N_FFT, N_MELS, PAD_FREQ),
                            jnp.bfloat16)

    fwd = jax.jit(mel_estimator_forward)
    out = fwd(params, audio, stft_basis, mel_basis)
    out = jax.block_until_ready(out)

    T = AUDIO_LEN // HOP + 1
    assert out.shape == (BATCH, T, OUTPUT_DIM), out.shape
    assert bool(jnp.all(jnp.isfinite(out)))
    assert bool(jnp.all((out >= 0.0) & (out <= 1.0)))          # sigmoid output
    print("KERNEL_OK")
</pallas_src>

<mosaic_0001>
module attributes {stable_mosaic.version = 11 : i64} {
  func.func @kernel(%arg0: i32, %arg1: memref<48x256xbf16, #tpu.memory_space<vmem>>, %arg2: memref<256x512xbf16, #tpu.memory_space<vmem>>, %arg3: memref<256x64xbf16, #tpu.memory_space<vmem>>, %arg4: memref<64x1024xbf16, #tpu.memory_space<vmem>>, %arg5: memref<1x1024xf32, #tpu.memory_space<vmem>>, %arg6: memref<1024x512xbf16, #tpu.memory_space<vmem>>, %arg7: memref<1x512xf32, #tpu.memory_space<vmem>>, %arg8: memref<512x256xbf16, #tpu.memory_space<vmem>>, %arg9: memref<1x256xf32, #tpu.memory_space<vmem>>, %arg10: memref<256x384xbf16, #tpu.memory_space<vmem>>, %arg11: memref<1x384xf32, #tpu.memory_space<vmem>>, %arg12: memref<128x384xbf16, #tpu.memory_space<vmem>>, %arg13: memref<1x384xf32, #tpu.memory_space<vmem>>, %arg14: memref<128x128xbf16, #tpu.memory_space<vmem>>, %arg15: memref<1x128xf32, #tpu.memory_space<vmem>>, %arg16: memref<48x128xf32, #tpu.memory_space<vmem>>, %arg17: memref<48x384xf32, #tpu.memory_space<vmem>>, %arg18: memref<48x128xf32, #tpu.memory_space<vmem>>) attributes {dimension_semantics = [#tpu.dimension_semantics<arbitrary>], iteration_bounds = array<i64: 1>, scalar_prefetch = 0 : i64, scratch_operands = 2 : i64, tpu.core_type = #tpu.core_type<tc>, window_params = [{pipeline_mode = #tpu.pipeline_mode<synchronous>, transform_indices = @transform_0, window_bounds = array<i64: 48, 256>}, {pipeline_mode = #tpu.pipeline_mode<synchronous>, transform_indices = @transform_1, window_bounds = array<i64: 256, 512>}, {pipeline_mode = #tpu.pipeline_mode<synchronous>, transform_indices = @transform_2, window_bounds = array<i64: 256, 64>}, {pipeline_mode = #tpu.pipeline_mode<synchronous>, transform_indices = @transform_3, window_bounds = array<i64: 64, 1024>}, {pipeline_mode = #tpu.pipeline_mode<synchronous>, transform_indices = @transform_4, window_bounds = array<i64: 1, 1024>}, {pipeline_mode = #tpu.pipeline_mode<synchronous>, transform_indices = @transform_5, window_bounds = array<i64: 1024, 512>}, {pipeline_mode = #tpu.pipeline_mode<synchronous>, transform_indices = @transform_6, window_bounds = array<i64: 1, 512>}, {pipeline_mode = #tpu.pipeline_mode<synchronous>, transform_indices = @transform_7, window_bounds = array<i64: 512, 256>}, {pipeline_mode = #tpu.pipeline_mode<synchronous>, transform_indices = @transform_8, window_bounds = array<i64: 1, 256>}, {pipeline_mode = #tpu.pipeline_mode<synchronous>, transform_indices = @transform_9, window_bounds = array<i64: 256, 384>}, {pipeline_mode = #tpu.pipeline_mode<synchronous>, transform_indices = @transform_10, window_bounds = array<i64: 1, 384>}, {pipeline_mode = #tpu.pipeline_mode<synchronous>, transform_indices = @transform_11, window_bounds = array<i64: 128, 384>}, {pipeline_mode = #tpu.pipeline_mode<synchronous>, transform_indices = @transform_12, window_bounds = array<i64: 1, 384>}, {pipeline_mode = #tpu.pipeline_mode<synchronous>, transform_indices = @transform_13, window_bounds = array<i64: 128, 128>}, {pipeline_mode = #tpu.pipeline_mode<synchronous>, transform_indices = @transform_14, window_bounds = array<i64: 1, 128>}, {pipeline_mode = #tpu.pipeline_mode<synchronous>, transform_indices = @transform_15, window_bounds = array<i64: 48, 128>}]} {
    %c0 = arith.constant 0 : index
    %c0_0 = arith.constant 0 : index
    %0 = vector.load %arg1[%c0, %c0_0] : memref<48x256xbf16, #tpu.memory_space<vmem>>, vector<48x256xbf16>
    %c0_1 = arith.constant 0 : index
    %c0_2 = arith.constant 0 : index
    %1 = vector.load %arg2[%c0_1, %c0_2] : memref<256x512xbf16, #tpu.memory_space<vmem>>, vector<256x512xbf16>
    %cst = arith.constant dense<0.000000e+00> : vector<48x512xf32>
    %2 = tpu.matmul %0, %1, %cst {dimension_numbers = #tpu.dot_dimension_numbers<[1], [0], [0], [1], [0, 0, 1, 1], [], []>} : vector<48x256xbf16>, vector<256x512xbf16>, vector<48x512xf32> -> vector<48x512xf32>
    %3 = vector.extract_strided_slice %2 {offsets = [0, 0], sizes = [48, 256], strides = [1, 1]} : vector<48x512xf32> to vector<48x256xf32>
    %4 = vector.extract_strided_slice %2 {offsets = [0, 256], sizes = [48, 256], strides = [1, 1]} : vector<48x512xf32> to vector<48x256xf32>
    %5 = arith.mulf %3, %3 : vector<48x256xf32>
    %6 = arith.mulf %4, %4 : vector<48x256xf32>
    %7 = arith.addf %5, %6 : vector<48x256xf32>
    %8 = math.sqrt %7 : vector<48x256xf32>
    %9 = arith.truncf %8 : vector<48x256xf32> to vector<48x256xbf16>
    %c0_3 = arith.constant 0 : index
    %c0_4 = arith.constant 0 : index
    %10 = vector.load %arg3[%c0_3, %c0_4] : memref<256x64xbf16, #tpu.memory_space<vmem>>, vector<256x64xbf16>
    %cst_5 = arith.constant dense<0.000000e+00> : vector<48x64xf32>
    %11 = tpu.matmul %9, %10, %cst_5 {dimension_numbers = #tpu.dot_dimension_numbers<[1], [0], [0], [1], [0, 0, 1, 1], [], []>} : vector<48x256xbf16>, vector<256x64xbf16>, vector<48x64xf32> -> vector<48x64xf32>
    %cst_6 = arith.constant 9.99999997E-7 : f32
    %12 = vector.broadcast %cst_6 : f32 to vector<48x64xf32>
    %13 = arith.addf %11, %12 : vector<48x64xf32>
    %14 = math.log %13 : vector<48x64xf32>
    %15 = tpu.iota {dimensions = array<i32: 0>} : vector<48x64xi32>
    %c34_i32 = arith.constant 34 : i32
    %16 = vector.broadcast %c34_i32 : i32 to vector<48x64xi32>
    %17 = arith.cmpi slt, %15, %16 : vector<48x64xi32>
    %18 = arith.extui %17 : vector<48x64xi1> to vector<48x64xi32>
    %19 = arith.sitofp %18 : vector<48x64xi32> to vector<48x64xf32>
    %20 = arith.mulf %14, %19 : vector<48x64xf32>
    %cst_7 = arith.constant dense<0.000000e+00> : vector<48xf32>
    %21 = vector.multi_reduction <add>, %20, %cst_7 [1] : vector<48x64xf32> to vector<48xf32>
    %22 = vector.shape_cast %21 : vector<48xf32> to vector<48x1xf32>
    %cst_8 = arith.constant dense<0.000000e+00> : vector<1xf32>
    %23 = vector.multi_reduction <add>, %22, %cst_8 [0] : vector<48x1xf32> to vector<1xf32>
    %24 = vector.shape_cast %23 : vector<1xf32> to vector<1x1xf32>
    %cst_9 = arith.constant 2.176000e+03 : f32
    %25 = vector.broadcast %cst_9 : f32 to vector<1x1xf32>
    %26 = arith.divf %24, %25 : vector<1x1xf32>
    %27 = vector.broadcast %26 : vector<1x1xf32> to vector<48x64xf32>
    %28 = arith.subf %14, %27 : vector<48x64xf32>
    %29 = arith.mulf %28, %19 : vector<48x64xf32>
    %30 = arith.mulf %29, %29 : vector<48x64xf32>
    %cst_10 = arith.constant dense<0.000000e+00> : vector<48xf32>
    %31 = vector.multi_reduction <add>, %30, %cst_10 [1] : vector<48x64xf32> to vector<48xf32>
    %32 = vector.shape_cast %31 : vector<48xf32> to vector<48x1xf32>
    %cst_11 = arith.constant dense<0.000000e+00> : vector<1xf32>
    %33 = vector.multi_reduction <add>, %32, %cst_11 [0] : vector<48x1xf32> to vector<1xf32>
    %34 = vector.shape_cast %33 : vector<1xf32> to vector<1x1xf32>
    %cst_12 = arith.constant 2.176000e+03 : f32
    %35 = vector.broadcast %cst_12 : f32 to vector<1x1xf32>
    %36 = arith.divf %34, %35 : vector<1x1xf32>
    %37 = vector.broadcast %26 : vector<1x1xf32> to vector<48x64xf32>
    %38 = arith.subf %14, %37 : vector<48x64xf32>
    %cst_13 = arith.constant 9.99999974E-6 : f32
    %39 = vector.broadcast %cst_13 : f32 to vector<1x1xf32>
    %40 = arith.addf %36, %39 : vector<1x1xf32>
    %41 = math.rsqrt %40 : vector<1x1xf32>
    %42 = vector.broadcast %41 : vector<1x1xf32> to vector<48x64xf32>
    %43 = arith.mulf %38, %42 : vector<48x64xf32>
    %44 = arith.truncf %43 : vector<48x64xf32> to vector<48x64xbf16>
    %c0_14 = arith.constant 0 : index
    %c0_15 = arith.constant 0 : index
    %45 = vector.load %arg4[%c0_14, %c0_15] : memref<64x1024xbf16, #tpu.memory_space<vmem>>, vector<64x1024xbf16>
    %cst_16 = arith.constant dense<0.000000e+00> : vector<48x1024xf32>
    %46 = tpu.matmul %44, %45, %cst_16 {dimension_numbers = #tpu.dot_dimension_numbers<[1], [0], [0], [1], [0, 0, 1, 1], [], []>} : vector<48x64xbf16>, vector<64x1024xbf16>, vector<48x1024xf32> -> vector<48x1024xf32>
    %c0_17 = arith.constant 0 : index
    %c0_18 = arith.constant 0 : index
    %47 = vector.load %arg5[%c0_17, %c0_18] : memref<1x1024xf32, #tpu.memory_space<vmem>>, vector<1x1024xf32>
    %48 = vector.broadcast %47 : vector<1x1024xf32> to vector<48x1024xf32>
    %49 = arith.addf %46, %48 : vector<48x1024xf32>
    %cst_19 = arith.constant 0.000000e+00 : f32
    %50 = vector.broadcast %cst_19 : f32 to vector<48x1024xf32>
    %51 = arith.maximumf %49, %50 : vector<48x1024xf32>
    %52 = arith.truncf %51 : vector<48x1024xf32> to vector<48x1024xbf16>
    %c0_20 = arith.constant 0 : index
    %c0_21 = arith.constant 0 : index
    %53 = vector.load %arg6[%c0_20, %c0_21] : memref<1024x512xbf16, #tpu.memory_space<vmem>>, vector<1024x512xbf16>
    %cst_22 = arith.constant dense<0.000000e+00> : vector<48x512xf32>
    %54 = tpu.matmul %52, %53, %cst_22 {dimension_numbers = #tpu.dot_dimension_numbers<[1], [0], [0], [1], [0, 0, 1, 1], [], []>} : vector<48x1024xbf16>, vector<1024x512xbf16>, vector<48x512xf32> -> vector<48x512xf32>
    %c0_23 = arith.constant 0 : index
    %c0_24 = arith.constant 0 : index
    %55 = vector.load %arg7[%c0_23, %c0_24] : memref<1x512xf32, #tpu.memory_space<vmem>>, vector<1x512xf32>
    %56 = vector.broadcast %55 : vector<1x512xf32> to vector<48x512xf32>
    %57 = arith.addf %54, %56 : vector<48x512xf32>
    %cst_25 = arith.constant 0.000000e+00 : f32
    %58 = vector.broadcast %cst_25 : f32 to vector<48x512xf32>
    %59 = arith.maximumf %57, %58 : vector<48x512xf32>
    %60 = arith.truncf %59 : vector<48x512xf32> to vector<48x512xbf16>
    %c0_26 = arith.constant 0 : index
    %c0_27 = arith.constant 0 : index
    %61 = vector.load %arg8[%c0_26, %c0_27] : memref<512x256xbf16, #tpu.memory_space<vmem>>, vector<512x256xbf16>
    %cst_28 = arith.constant dense<0.000000e+00> : vector<48x256xf32>
    %62 = tpu.matmul %60, %61, %cst_28 {dimension_numbers = #tpu.dot_dimension_numbers<[1], [0], [0], [1], [0, 0, 1, 1], [], []>} : vector<48x512xbf16>, vector<512x256xbf16>, vector<48x256xf32> -> vector<48x256xf32>
    %c0_29 = arith.constant 0 : index
    %c0_30 = arith.constant 0 : index
    %63 = vector.load %arg9[%c0_29, %c0_30] : memref<1x256xf32, #tpu.memory_space<vmem>>, vector<1x256xf32>
    %64 = vector.broadcast %63 : vector<1x256xf32> to vector<48x256xf32>
    %65 = arith.addf %62, %64 : vector<48x256xf32>
    %cst_31 = arith.constant 0.000000e+00 : f32
    %66 = vector.broadcast %cst_31 : f32 to vector<48x256xf32>
    %67 = arith.maximumf %65, %66 : vector<48x256xf32>
    %68 = arith.truncf %67 : vector<48x256xf32> to vector<48x256xbf16>
    %c0_32 = arith.constant 0 : index
    %c0_33 = arith.constant 0 : index
    %69 = vector.load %arg10[%c0_32, %c0_33] : memref<256x384xbf16, #tpu.memory_space<vmem>>, vector<256x384xbf16>
    %cst_34 = arith.constant dense<0.000000e+00> : vector<48x384xf32>
    %70 = tpu.matmul %68, %69, %cst_34 {dimension_numbers = #tpu.dot_dimension_numbers<[1], [0], [0], [1], [0, 0, 1, 1], [], []>} : vector<48x256xbf16>, vector<256x384xbf16>, vector<48x384xf32> -> vector<48x384xf32>
    %c0_35 = arith.constant 0 : index
    %c0_36 = arith.constant 0 : index
    %71 = vector.load %arg11[%c0_35, %c0_36] : memref<1x384xf32, #tpu.memory_space<vmem>>, vector<1x384xf32>
    %72 = vector.broadcast %71 : vector<1x384xf32> to vector<48x384xf32>
    %73 = arith.addf %70, %72 : vector<48x384xf32>
    %c0_37 = arith.constant 0 : index
    %c0_38 = arith.constant 0 : index
    %74 = vector.load %arg17[%c0_37, %c0_38] : memref<48x384xf32, #tpu.memory_space<vmem>>, vector<48x384xf32>
    tpu.vector_store %arg17[%c0_37, %c0_38], %73 {strides = array<i32>} : memref<48x384xf32, #tpu.memory_space<vmem>>, vector<48x384xf32>,
    %cst_39 = arith.constant 0.000000e+00 : f32
    %75 = vector.broadcast %cst_39 : f32 to vector<48x128xf32>
    %c0_40 = arith.constant 0 : index
    %c0_41 = arith.constant 0 : index
    %76 = vector.load %arg18[%c0_40, %c0_41] : memref<48x128xf32, #tpu.memory_space<vmem>>, vector<48x128xf32>
    tpu.vector_store %arg18[%c0_40, %c0_41], %75 {strides = array<i32>} : memref<48x128xf32, #tpu.memory_space<vmem>>, vector<48x128xf32>,
    %c0_42 = arith.constant 0 : index
    %c0_43 = arith.constant 0 : index
    %77 = vector.load %arg12[%c0_42, %c0_43] : memref<128x384xbf16, #tpu.memory_space<vmem>>, vector<128x384xbf16>
    %c0_44 = arith.constant 0 : index
    %c0_45 = arith.constant 0 : index
    %78 = vector.load %arg13[%c0_44, %c0_45] : memref<1x384xf32, #tpu.memory_space<vmem>>, vector<1x384xf32>
    %cst_46 = arith.constant 0.000000e+00 : f32
    %79 = vector.broadcast %cst_46 : f32 to vector<2x128xf32>
    %c0_47 = arith.constant 0 : index
    %c0_48 = arith.constant 0 : index
    %80 = vector.load %arg17[%c0_47, %c0_48] : memref<48x384xf32, #tpu.memory_space<vmem>>, vector<2x384xf32>
    %81 = arith.truncf %79 : vector<2x128xf32> to vector<2x128xbf16>
    %cst_49 = arith.constant dense<0.000000e+00> : vector<2x384xf32>
    %82 = tpu.matmul %81, %77, %cst_49 {dimension_numbers = #tpu.dot_dimension_numbers<[1], [0], [0], [1], [0, 0, 1, 1], [], []>} : vector<2x128xbf16>, vector<128x384xbf16>, vector<2x384xf32> -> vector<2x384xf32>
    %83 = vector.broadcast %78 : vector<1x384xf32> to vector<2x384xf32>
    %84 = arith.addf %82, %83 : vector<2x384xf32>
    %85 = vector.extract_strided_slice %80 {offsets = [0, 0], sizes = [2, 256], strides = [1, 1]} : vector<2x384xf32> to vector<2x256xf32>
    %86 = vector.extract_strided_slice %84 {offsets = [0, 0], sizes = [2, 256], strides = [1, 1]} : vector<2x384xf32> to vector<2x256xf32>
    %87 = arith.addf %85, %86 : vector<2x256xf32>
    %88 = arith.negf %87 : vector<2x256xf32>
    %89 = math.exp %88 : vector<2x256xf32>
    %cst_50 = arith.constant 1.000000e+00 : f32
    %90 = vector.broadcast %cst_50 : f32 to vector<2x256xf32>
    %91 = arith.addf %90, %89 : vector<2x256xf32>
    %92 = arith.divf %90, %91 : vector<2x256xf32>
    %93 = vector.extract_strided_slice %92 {offsets = [0, 0], sizes = [2, 128], strides = [1, 1]} : vector<2x256xf32> to vector<2x128xf32>
    %94 = vector.extract_strided_slice %92 {offsets = [0, 128], sizes = [2, 128], strides = [1, 1]} : vector<2x256xf32> to vector<2x128xf32>
    %95 = vector.extract_strided_slice %80 {offsets = [0, 256], sizes = [2, 128], strides = [1, 1]} : vector<2x384xf32> to vector<2x128xf32>
    %96 = vector.extract_strided_slice %84 {offsets = [0, 256], sizes = [2, 128], strides = [1, 1]} : vector<2x384xf32> to vector<2x128xf32>
    %97 = arith.mulf %93, %96 : vector<2x128xf32>
    %98 = arith.addf %95, %97 : vector<2x128xf32>
    %99 = math.tanh %98 : vector<2x128xf32>
    %cst_51 = arith.constant 1.000000e+00 : f32
    %100 = vector.broadcast %cst_51 : f32 to vector<2x128xf32>
    %101 = arith.subf %100, %94 : vector<2x128xf32>
    %102 = arith.mulf %101, %99 : vector<2x128xf32>
    %103 = arith.mulf %94, %79 : vector<2x128xf32>
    %104 = arith.addf %102, %103 : vector<2x128xf32>
    %c0_52 = arith.constant 0 : index
    %c0_53 = arith.constant 0 : index
    %105 = vector.load %arg18[%c0_52, %c0_53] : memref<48x128xf32, #tpu.memory_space<vmem>>, vector<2x128xf32>
    tpu.vector_store %arg18[%c0_52, %c0_53], %104 {strides = array<i32>} : memref<48x128xf32, #tpu.memory_space<vmem>>, vector<2x128xf32>,
    %c2 = arith.constant 2 : index
    %c0_54 = arith.constant 0 : index
    %106 = vector.load %arg17[%c2, %c0_54] : memref<48x384xf32, #tpu.memory_space<vmem>>, vector<2x384xf32>
    %107 = arith.truncf %104 : vector<2x128xf32> to vector<2x128xbf16>
    %cst_55 = arith.constant dense<0.000000e+00> : vector<2x384xf32>
    %108 = tpu.matmul %107, %77, %cst_55 {dimension_numbers = #tpu.dot_dimension_numbers<[1], [0], [0], [1], [0, 0, 1, 1], [], []>} : vector<2x128xbf16>, vector<128x384xbf16>, vector<2x384xf32> -> vector<2x384xf32>
    %109 = vector.broadcast %78 : vector<1x384xf32> to vector<2x384xf32>
    %110 = arith.addf %108, %109 : vector<2x384xf32>
    %111 = vector.extract_strided_slice %106 {offsets = [0, 0], sizes = [2, 256], strides = [1, 1]} : vector<2x384xf32> to vector<2x256xf32>
    %112 = vector.extract_strided_slice %110 {offsets = [0, 0], sizes = [2, 256], strides = [1, 1]} : vector<2x384xf32> to vector<2x256xf32>
    %113 = arith.addf %111, %112 : vector<2x256xf32>
    %114 = arith.negf %113 : vector<2x256xf32>
    %115 = math.exp %114 : vector<2x256xf32>
    %cst_56 = arith.constant 1.000000e+00 : f32
    %116 = vector.broadcast %cst_56 : f32 to vector<2x256xf32>
    %117 = arith.addf %116, %115 : vector<2x256xf32>
    %118 = arith.divf %116, %117 : vector<2x256xf32>
    %119 = vector.extract_strided_slice %118 {offsets = [0, 0], sizes = [2, 128], strides = [1, 1]} : vector<2x256xf32> to vector<2x128xf32>
    %120 = vector.extract_strided_slice %118 {offsets = [0, 128], sizes = [2, 128], strides = [1, 1]} : vector<2x256xf32> to vector<2x128xf32>
    %121 = vector.extract_strided_slice %106 {offsets = [0, 256], sizes = [2, 128], strides = [1, 1]} : vector<2x384xf32> to vector<2x128xf32>
    %122 = vector.extract_strided_slice %110 {offsets = [0, 256], sizes = [2, 128], strides = [1, 1]} : vector<2x384xf32> to vector<2x128xf32>
    %123 = arith.mulf %119, %122 : vector<2x128xf32>
    %124 = arith.addf %121, %123 : vector<2x128xf32>
    %125 = math.tanh %124 : vector<2x128xf32>
    %cst_57 = arith.constant 1.000000e+00 : f32
    %126 = vector.broadcast %cst_57 : f32 to vector<2x128xf32>
    %127 = arith.subf %126, %120 : vector<2x128xf32>
    %128 = arith.mulf %127, %125 : vector<2x128xf32>
    %129 = arith.mulf %120, %104 : vector<2x128xf32>
    %130 = arith.addf %128, %129 : vector<2x128xf32>
    %c2_58 = arith.constant 2 : index
    %c0_59 = arith.constant 0 : index
    %131 = vector.load %arg18[%c2_58, %c0_59] : memref<48x128xf32, #tpu.memory_space<vmem>>, vector<2x128xf32>
    tpu.vector_store %arg18[%c2_58, %c0_59], %130 {strides = array<i32>} : memref<48x128xf32, #tpu.memory_space<vmem>>, vector<2x128xf32>,
    %c4 = arith.constant 4 : index
    %c0_60 = arith.constant 0 : index
    %132 = vector.load %arg17[%c4, %c0_60] : memref<48x384xf32, #tpu.memory_space<vmem>>, vector<2x384xf32>
    %133 = arith.truncf %130 : vector<2x128xf32> to vector<2x128xbf16>
    %cst_61 = arith.constant dense<0.000000e+00> : vector<2x384xf32>
    %134 = tpu.matmul %133, %77, %cst_61 {dimension_numbers = #tpu.dot_dimension_numbers<[1], [0], [0], [1], [0, 0, 1, 1], [], []>} : vector<2x128xbf16>, vector<128x384xbf16>, vector<2x384xf32> -> vector<2x384xf32>
    %135 = vector.broadcast %78 : vector<1x384xf32> to vector<2x384xf32>
    %136 = arith.addf %134, %135 : vector<2x384xf32>
    %137 = vector.extract_strided_slice %132 {offsets = [0, 0], sizes = [2, 256], strides = [1, 1]} : vector<2x384xf32> to vector<2x256xf32>
    %138 = vector.extract_strided_slice %136 {offsets = [0, 0], sizes = [2, 256], strides = [1, 1]} : vector<2x384xf32> to vector<2x256xf32>
    %139 = arith.addf %137, %138 : vector<2x256xf32>
    %140 = arith.negf %139 : vector<2x256xf32>
    %141 = math.exp %140 : vector<2x256xf32>
    %cst_62 = arith.constant 1.000000e+00 : f32
    %142 = vector.broadcast %cst_62 : f32 to vector<2x256xf32>
    %143 = arith.addf %142, %141 : vector<2x256xf32>
    %144 = arith.divf %142, %143 : vector<2x256xf32>
    %145 = vector.extract_strided_slice %144 {offsets = [0, 0], sizes = [2, 128], strides = [1, 1]} : vector<2x256xf32> to vector<2x128xf32>
    %146 = vector.extract_strided_slice %144 {offsets = [0, 128], sizes = [2, 128], strides = [1, 1]} : vector<2x256xf32> to vector<2x128xf32>
    %147 = vector.extract_strided_slice %132 {offsets = [0, 256], sizes = [2, 128], strides = [1, 1]} : vector<2x384xf32> to vector<2x128xf32>
    %148 = vector.extract_strided_slice %136 {offsets = [0, 256], sizes = [2, 128], strides = [1, 1]} : vector<2x384xf32> to vector<2x128xf32>
    %149 = arith.mulf %145, %148 : vector<2x128xf32>
    %150 = arith.addf %147, %149 : vector<2x128xf32>
    %151 = math.tanh %150 : vector<2x128xf32>
    %cst_63 = arith.constant 1.000000e+00 : f32
    %152 = vector.broadcast %cst_63 : f32 to vector<2x128xf32>
    %153 = arith.subf %152, %146 : vector<2x128xf32>
    %154 = arith.mulf %153, %151 : vector<2x128xf32>
    %155 = arith.mulf %146, %130 : vector<2x128xf32>
    %156 = arith.addf %154, %155 : vector<2x128xf32>
    %c4_64 = arith.constant 4 : index
    %c0_65 = arith.constant 0 : index
    %157 = vector.load %arg18[%c4_64, %c0_65] : memref<48x128xf32, #tpu.memory_space<vmem>>, vector<2x128xf32>
    tpu.vector_store %arg18[%c4_64, %c0_65], %156 {strides = array<i32>} : memref<48x128xf32, #tpu.memory_space<vmem>>, vector<2x128xf32>,
    %c6 = arith.constant 6 : index
    %c0_66 = arith.constant 0 : index
    %158 = vector.load %arg17[%c6, %c0_66] : memref<48x384xf32, #tpu.memory_space<vmem>>, vector<2x384xf32>
    %159 = arith.truncf %156 : vector<2x128xf32> to vector<2x128xbf16>
    %cst_67 = arith.constant dense<0.000000e+00> : vector<2x384xf32>
    %160 = tpu.matmul %159, %77, %cst_67 {dimension_numbers = #tpu.dot_dimension_numbers<[1], [0], [0], [1], [0, 0, 1, 1], [], []>} : vector<2x128xbf16>, vector<128x384xbf16>, vector<2x384xf32> -> vector<2x384xf32>
    %161 = vector.broadcast %78 : vector<1x384xf32> to vector<2x384xf32>
    %162 = arith.addf %160, %161 : vector<2x384xf32>
    %163 = vector.extract_strided_slice %158 {offsets = [0, 0], sizes = [2, 256], strides = [1, 1]} : vector<2x384xf32> to vector<2x256xf32>
    %164 = vector.extract_strided_slice %162 {offsets = [0, 0], sizes = [2, 256], strides = [1, 1]} : vector<2x384xf32> to vector<2x256xf32>
    %165 = arith.addf %163, %164 : vector<2x256xf32>
    %166 = arith.negf %165 : vector<2x256xf32>
    %167 = math.exp %166 : vector<2x256xf32>
    %cst_68 = arith.constant 1.000000e+00 : f32
    %168 = vector.broadcast %cst_68 : f32 to vector<2x256xf32>
    %169 = arith.addf %168, %167 : vector<2x256xf32>
    %170 = arith.divf %168, %169 : vector<2x256xf32>
    %171 = vector.extract_strided_slice %170 {offsets = [0, 0], sizes = [2, 128], strides = [1, 1]} : vector<2x256xf32> to vector<2x128xf32>
    %172 = vector.extract_strided_slice %170 {offsets = [0, 128], sizes = [2, 128], strides = [1, 1]} : vector<2x256xf32> to vector<2x128xf32>
    %173 = vector.extract_strided_slice %158 {offsets = [0, 256], sizes = [2, 128], strides = [1, 1]} : vector<2x384xf32> to vector<2x128xf32>
    %174 = vector.extract_strided_slice %162 {offsets = [0, 256], sizes = [2, 128], strides = [1, 1]} : vector<2x384xf32> to vector<2x128xf32>
    %175 = arith.mulf %171, %174 : vector<2x128xf32>
    %176 = arith.addf %173, %175 : vector<2x128xf32>
    %177 = math.tanh %176 : vector<2x128xf32>
    %cst_69 = arith.constant 1.000000e+00 : f32
    %178 = vector.broadcast %cst_69 : f32 to vector<2x128xf32>
    %179 = arith.subf %178, %172 : vector<2x128xf32>
    %180 = arith.mulf %179, %177 : vector<2x128xf32>
    %181 = arith.mulf %172, %156 : vector<2x128xf32>
    %182 = arith.addf %180, %181 : vector<2x128xf32>
    %c6_70 = arith.constant 6 : index
    %c0_71 = arith.constant 0 : index
    %183 = vector.load %arg18[%c6_70, %c0_71] : memref<48x128xf32, #tpu.memory_space<vmem>>, vector<2x128xf32>
    tpu.vector_store %arg18[%c6_70, %c0_71], %182 {strides = array<i32>} : memref<48x128xf32, #tpu.memory_space<vmem>>, vector<2x128xf32>,
    %c8 = arith.constant 8 : index
    %c0_72 = arith.constant 0 : index
    %184 = vector.load %arg17[%c8, %c0_72] : memref<48x384xf32, #tpu.memory_space<vmem>>, vector<2x384xf32>
    %185 = arith.truncf %182 : vector<2x128xf32> to vector<2x128xbf16>
    %cst_73 = arith.constant dense<0.000000e+00> : vector<2x384xf32>
    %186 = tpu.matmul %185, %77, %cst_73 {dimension_numbers = #tpu.dot_dimension_numbers<[1], [0], [0], [1], [0, 0, 1, 1], [], []>} : vector<2x128xbf16>, vector<128x384xbf16>, vector<2x384xf32> -> vector<2x384xf32>
    %187 = vector.broadcast %78 : vector<1x384xf32> to vector<2x384xf32>
    %188 = arith.addf %186, %187 : vector<2x384xf32>
    %189 = vector.extract_strided_slice %184 {offsets = [0, 0], sizes = [2, 256], strides = [1, 1]} : vector<2x384xf32> to vector<2x256xf32>
    %190 = vector.extract_strided_slice %188 {offsets = [0, 0], sizes = [2, 256], strides = [1, 1]} : vector<2x384xf32> to vector<2x256xf32>
    %191 = arith.addf %189, %190 : vector<2x256xf32>
    %192 = arith.negf %191 : vector<2x256xf32>
    %193 = math.exp %192 : vector<2x256xf32>
    %cst_74 = arith.constant 1.000000e+00 : f32
    %194 = vector.broadcast %cst_74 : f32 to vector<2x256xf32>
    %195 = arith.addf %194, %193 : vector<2x256xf32>
    %196 = arith.divf %194, %195 : vector<2x256xf32>
    %197 = vector.extract_strided_slice %196 {offsets = [0, 0], sizes = [2, 128], strides = [1, 1]} : vector<2x256xf32> to vector<2x128xf32>
    %198 = vector.extract_strided_slice %196 {offsets = [0, 128], sizes = [2, 128], strides = [1, 1]} : vector<2x256xf32> to vector<2x128xf32>
    %199 = vector.extract_strided_slice %184 {offsets = [0, 256], sizes = [2, 128], strides = [1, 1]} : vector<2x384xf32> to vector<2x128xf32>
    %200 = vector.extract_strided_slice %188 {offsets = [0, 256], sizes = [2, 128], strides = [1, 1]} : vector<2x384xf32> to vector<2x128xf32>
    %201 = arith.mulf %197, %200 : vector<2x128xf32>
    %202 = arith.addf %199, %201 : vector<2x128xf32>
    %203 = math.tanh %202 : vector<2x128xf32>
    %cst_75 = arith.constant 1.000000e+00 : f32
    %204 = vector.broadcast %cst_75 : f32 to vector<2x128xf32>
    %205 = arith.subf %204, %198 : vector<2x128xf32>
    %206 = arith.mulf %205, %203 : vector<2x128xf32>
    %207 = arith.mulf %198, %182 : vector<2x128xf32>
    %208 = arith.addf %206, %207 : vector<2x128xf32>
    %c8_76 = arith.constant 8 : index
    %c0_77 = arith.constant 0 : index
    %209 = vector.load %arg18[%c8_76, %c0_77] : memref<48x128xf32, #tpu.memory_space<vmem>>, vector<2x128xf32>
    tpu.vector_store %arg18[%c8_76, %c0_77], %208 {strides = array<i32>} : memref<48x128xf32, #tpu.memory_space<vmem>>, vector<2x128xf32>,
    %c10 = arith.constant 10 : index
    %c0_78 = arith.constant 0 : index
    %210 = vector.load %arg17[%c10, %c0_78] : memref<48x384xf32, #tpu.memory_space<vmem>>, vector<2x384xf32>
    %211 = arith.truncf %208 : vector<2x128xf32> to vector<2x128xbf16>
    %cst_79 = arith.constant dense<0.000000e+00> : vector<2x384xf32>
    %212 = tpu.matmul %211, %77, %cst_79 {dimension_numbers = #tpu.dot_dimension_numbers<[1], [0], [0], [1], [0, 0, 1, 1], [], []>} : vector<2x128xbf16>, vector<128x384xbf16>, vector<2x384xf32> -> vector<2x384xf32>
    %213 = vector.broadcast %78 : vector<1x384xf32> to vector<2x384xf32>
    %214 = arith.addf %212, %213 : vector<2x384xf32>
    %215 = vector.extract_strided_slice %210 {offsets = [0, 0], sizes = [2, 256], strides = [1, 1]} : vector<2x384xf32> to vector<2x256xf32>
    %216 = vector.extract_strided_slice %214 {offsets = [0, 0], sizes = [2, 256], strides = [1, 1]} : vector<2x384xf32> to vector<2x256xf32>
    %217 = arith.addf %215, %216 : vector<2x256xf32>
    %218 = arith.negf %217 : vector<2x256xf32>
    %219 = math.exp %218 : vector<2x256xf32>
    %cst_80 = arith.constant 1.000000e+00 : f32
    %220 = vector.broadcast %cst_80 : f32 to vector<2x256xf32>
    %221 = arith.addf %220, %219 : vector<2x256xf32>
    %222 = arith.divf %220, %221 : vector<2x256xf32>
    %223 = vector.extract_strided_slice %222 {offsets = [0, 0], sizes = [2, 128], strides = [1, 1]} : vector<2x256xf32> to vector<2x128xf32>
    %224 = vector.extract_strided_slice %222 {offsets = [0, 128], sizes = [2, 128], strides = [1, 1]} : vector<2x256xf32> to vector<2x128xf32>
    %225 = vector.extract_strided_slice %210 {offsets = [0, 256], sizes = [2, 128], strides = [1, 1]} : vector<2x384xf32> to vector<2x128xf32>
    %226 = vector.extract_strided_slice %214 {offsets = [0, 256], sizes = [2, 128], strides = [1, 1]} : vector<2x384xf32> to vector<2x128xf32>
    %227 = arith.mulf %223, %226 : vector<2x128xf32>
    %228 = arith.addf %225, %227 : vector<2x128xf32>
    %229 = math.tanh %228 : vector<2x128xf32>
    %cst_81 = arith.constant 1.000000e+00 : f32
    %230 = vector.broadcast %cst_81 : f32 to vector<2x128xf32>
    %231 = arith.subf %230, %224 : vector<2x128xf32>
    %232 = arith.mulf %231, %229 : vector<2x128xf32>
    %233 = arith.mulf %224, %208 : vector<2x128xf32>
    %234 = arith.addf %232, %233 : vector<2x128xf32>
    %c10_82 = arith.constant 10 : index
    %c0_83 = arith.constant 0 : index
    %235 = vector.load %arg18[%c10_82, %c0_83] : memref<48x128xf32, #tpu.memory_space<vmem>>, vector<2x128xf32>
    tpu.vector_store %arg18[%c10_82, %c0_83], %234 {strides = array<i32>} : memref<48x128xf32, #tpu.memory_space<vmem>>, vector<2x128xf32>,
    %c12 = arith.constant 12 : index
    %c0_84 = arith.constant 0 : index
    %236 = vector.load %arg17[%c12, %c0_84] : memref<48x384xf32, #tpu.memory_space<vmem>>, vector<2x384xf32>
    %237 = arith.truncf %234 : vector<2x128xf32> to vector<2x128xbf16>
    %cst_85 = arith.constant dense<0.000000e+00> : vector<2x384xf32>
    %238 = tpu.matmul %237, %77, %cst_85 {dimension_numbers = #tpu.dot_dimension_numbers<[1], [0], [0], [1], [0, 0, 1, 1], [], []>} : vector<2x128xbf16>, vector<128x384xbf16>, vector<2x384xf32> -> vector<2x384xf32>
    %239 = vector.broadcast %78 : vector<1x384xf32> to vector<2x384xf32>
    %240 = arith.addf %238, %239 : vector<2x384xf32>
    %241 = vector.extract_strided_slice %236 {offsets = [0, 0], sizes = [2, 256], strides = [1, 1]} : vector<2x384xf32> to vector<2x256xf32>
    %242 = vector.extract_strided_slice %240 {offsets = [0, 0], sizes = [2, 256], strides = [1, 1]} : vector<2x384xf32> to vector<2x256xf32>
    %243 = arith.addf %241, %242 : vector<2x256xf32>
    %244 = arith.negf %243 : vector<2x256xf32>
    %245 = math.exp %244 : vector<2x256xf32>
    %cst_86 = arith.constant 1.000000e+00 : f32
    %246 = vector.broadcast %cst_86 : f32 to vector<2x256xf32>
    %247 = arith.addf %246, %245 : vector<2x256xf32>
    %248 = arith.divf %246, %247 : vector<2x256xf32>
    %249 = vector.extract_strided_slice %248 {offsets = [0, 0], sizes = [2, 128], strides = [1, 1]} : vector<2x256xf32> to vector<2x128xf32>
    %250 = vector.extract_strided_slice %248 {offsets = [0, 128], sizes = [2, 128], strides = [1, 1]} : vector<2x256xf32> to vector<2x128xf32>
    %251 = vector.extract_strided_slice %236 {offsets = [0, 256], sizes = [2, 128], strides = [1, 1]} : vector<2x384xf32> to vector<2x128xf32>
    %252 = vector.extract_strided_slice %240 {offsets = [0, 256], sizes = [2, 128], strides = [1, 1]} : vector<2x384xf32> to vector<2x128xf32>
    %253 = arith.mulf %249, %252 : vector<2x128xf32>
    %254 = arith.addf %251, %253 : vector<2x128xf32>
    %255 = math.tanh %254 : vector<2x128xf32>
    %cst_87 = arith.constant 1.000000e+00 : f32
    %256 = vector.broadcast %cst_87 : f32 to vector<2x128xf32>
    %257 = arith.subf %256, %250 : vector<2x128xf32>
    %258 = arith.mulf %257, %255 : vector<2x128xf32>
    %259 = arith.mulf %250, %234 : vector<2x128xf32>
    %260 = arith.addf %258, %259 : vector<2x128xf32>
    %c12_88 = arith.constant 12 : index
    %c0_89 = arith.constant 0 : index
    %261 = vector.load %arg18[%c12_88, %c0_89] : memref<48x128xf32, #tpu.memory_space<vmem>>, vector<2x128xf32>
    tpu.vector_store %arg18[%c12_88, %c0_89], %260 {strides = array<i32>} : memref<48x128xf32, #tpu.memory_space<vmem>>, vector<2x128xf32>,
    %c14 = arith.constant 14 : index
    %c0_90 = arith.constant 0 : index
    %262 = vector.load %arg17[%c14, %c0_90] : memref<48x384xf32, #tpu.memory_space<vmem>>, vector<2x384xf32>
    %263 = arith.truncf %260 : vector<2x128xf32> to vector<2x128xbf16>
    %cst_91 = arith.constant dense<0.000000e+00> : vector<2x384xf32>
    %264 = tpu.matmul %263, %77, %cst_91 {dimension_numbers = #tpu.dot_dimension_numbers<[1], [0], [0], [1], [0, 0, 1, 1], [], []>} : vector<2x128xbf16>, vector<128x384xbf16>, vector<2x384xf32> -> vector<2x384xf32>
    %265 = vector.broadcast %78 : vector<1x384xf32> to vector<2x384xf32>
    %266 = arith.addf %264, %265 : vector<2x384xf32>
    %267 = vector.extract_strided_slice %262 {offsets = [0, 0], sizes = [2, 256], strides = [1, 1]} : vector<2x384xf32> to vector<2x256xf32>
    %268 = vector.extract_strided_slice %266 {offsets = [0, 0], sizes = [2, 256], strides = [1, 1]} : vector<2x384xf32> to vector<2x256xf32>
    %269 = arith.addf %267, %268 : vector<2x256xf32>
    %270 = arith.negf %269 : vector<2x256xf32>
    %271 = math.exp %270 : vector<2x256xf32>
    %cst_92 = arith.constant 1.000000e+00 : f32
    %272 = vector.broadcast %cst_92 : f32 to vector<2x256xf32>
    %273 = arith.addf %272, %271 : vector<2x256xf32>
    %274 = arith.divf %272, %273 : vector<2x256xf32>
    %275 = vector.extract_strided_slice %274 {offsets = [0, 0], sizes = [2, 128], strides = [1, 1]} : vector<2x256xf32> to vector<2x128xf32>
    %276 = vector.extract_strided_slice %274 {offsets = [0, 128], sizes = [2, 128], strides = [1, 1]} : vector<2x256xf32> to vector<2x128xf32>
    %277 = vector.extract_strided_slice %262 {offsets = [0, 256], sizes = [2, 128], strides = [1, 1]} : vector<2x384xf32> to vector<2x128xf32>
    %278 = vector.extract_strided_slice %266 {offsets = [0, 256], sizes = [2, 128], strides = [1, 1]} : vector<2x384xf32> to vector<2x128xf32>
    %279 = arith.mulf %275, %278 : vector<2x128xf32>
    %280 = arith.addf %277, %279 : vector<2x128xf32>
    %281 = math.tanh %280 : vector<2x128xf32>
    %cst_93 = arith.constant 1.000000e+00 : f32
    %282 = vector.broadcast %cst_93 : f32 to vector<2x128xf32>
    %283 = arith.subf %282, %276 : vector<2x128xf32>
    %284 = arith.mulf %283, %281 : vector<2x128xf32>
    %285 = arith.mulf %276, %260 : vector<2x128xf32>
    %286 = arith.addf %284, %285 : vector<2x128xf32>
    %c14_94 = arith.constant 14 : index
    %c0_95 = arith.constant 0 : index
    %287 = vector.load %arg18[%c14_94, %c0_95] : memref<48x128xf32, #tpu.memory_space<vmem>>, vector<2x128xf32>
    tpu.vector_store %arg18[%c14_94, %c0_95], %286 {strides = array<i32>} : memref<48x128xf32, #tpu.memory_space<vmem>>, vector<2x128xf32>,
    %c16 = arith.constant 16 : index
    %c0_96 = arith.constant 0 : index
    %288 = vector.load %arg17[%c16, %c0_96] : memref<48x384xf32, #tpu.memory_space<vmem>>, vector<2x384xf32>
    %289 = arith.truncf %286 : vector<2x128xf32> to vector<2x128xbf16>
    %cst_97 = arith.constant dense<0.000000e+00> : vector<2x384xf32>
    %290 = tpu.matmul %289, %77, %cst_97 {dimension_numbers = #tpu.dot_dimension_numbers<[1], [0], [0], [1], [0, 0, 1, 1], [], []>} : vector<2x128xbf16>, vector<128x384xbf16>, vector<2x384xf32> -> vector<2x384xf32>
    %291 = vector.broadcast %78 : vector<1x384xf32> to vector<2x384xf32>
    %292 = arith.addf %290, %291 : vector<2x384xf32>
    %293 = vector.extract_strided_slice %288 {offsets = [0, 0], sizes = [2, 256], strides = [1, 1]} : vector<2x384xf32> to vector<2x256xf32>
    %294 = vector.extract_strided_slice %292 {offsets = [0, 0], sizes = [2, 256], strides = [1, 1]} : vector<2x384xf32> to vector<2x256xf32>
    %295 = arith.addf %293, %294 : vector<2x256xf32>
    %296 = arith.negf %295 : vector<2x256xf32>
    %297 = math.exp %296 : vector<2x256xf32>
    %cst_98 = arith.constant 1.000000e+00 : f32
    %298 = vector.broadcast %cst_98 : f32 to vector<2x256xf32>
    %299 = arith.addf %298, %297 : vector<2x256xf32>
    %300 = arith.divf %298, %299 : vector<2x256xf32>
    %301 = vector.extract_strided_slice %300 {offsets = [0, 0], sizes = [2, 128], strides = [1, 1]} : vector<2x256xf32> to vector<2x128xf32>
    %302 = vector.extract_strided_slice %300 {offsets = [0, 128], sizes = [2, 128], strides = [1, 1]} : vector<2x256xf32> to vector<2x128xf32>
    %303 = vector.extract_strided_slice %288 {offsets = [0, 256], sizes = [2, 128], strides = [1, 1]} : vector<2x384xf32> to vector<2x128xf32>
    %304 = vector.extract_strided_slice %292 {offsets = [0, 256], sizes = [2, 128], strides = [1, 1]} : vector<2x384xf32> to vector<2x128xf32>
    %305 = arith.mulf %301, %304 : vector<2x128xf32>
    %306 = arith.addf %303, %305 : vector<2x128xf32>
    %307 = math.tanh %306 : vector<2x128xf32>
    %cst_99 = arith.constant 1.000000e+00 : f32
    %308 = vector.broadcast %cst_99 : f32 to vector<2x128xf32>
    %309 = arith.subf %308, %302 : vector<2x128xf32>
    %310 = arith.mulf %309, %307 : vector<2x128xf32>
    %311 = arith.mulf %302, %286 : vector<2x128xf32>
    %312 = arith.addf %310, %311 : vector<2x128xf32>
    %c16_100 = arith.constant 16 : index
    %c0_101 = arith.constant 0 : index
    %313 = vector.load %arg18[%c16_100, %c0_101] : memref<48x128xf32, #tpu.memory_space<vmem>>, vector<2x128xf32>
    tpu.vector_store %arg18[%c16_100, %c0_101], %312 {strides = array<i32>} : memref<48x128xf32, #tpu.memory_space<vmem>>, vector<2x128xf32>,
    %c18 = arith.constant 18 : index
    %c0_102 = arith.constant 0 : index
    %314 = vector.load %arg17[%c18, %c0_102] : memref<48x384xf32, #tpu.memory_space<vmem>>, vector<2x384xf32>
    %315 = arith.truncf %312 : vector<2x128xf32> to vector<2x128xbf16>
    %cst_103 = arith.constant dense<0.000000e+00> : vector<2x384xf32>
    %316 = tpu.matmul %315, %77, %cst_103 {dimension_numbers = #tpu.dot_dimension_numbers<[1], [0], [0], [1], [0, 0, 1, 1], [], []>} : vector<2x128xbf16>, vector<128x384xbf16>, vector<2x384xf32> -> vector<2x384xf32>
    %317 = vector.broadcast %78 : vector<1x384xf32> to vector<2x384xf32>
    %318 = arith.addf %316, %317 : vector<2x384xf32>
    %319 = vector.extract_strided_slice %314 {offsets = [0, 0], sizes = [2, 256], strides = [1, 1]} : vector<2x384xf32> to vector<2x256xf32>
    %320 = vector.extract_strided_slice %318 {offsets = [0, 0], sizes = [2, 256], strides = [1, 1]} : vector<2x384xf32> to vector<2x256xf32>
    %321 = arith.addf %319, %320 : vector<2x256xf32>
    %322 = arith.negf %321 : vector<2x256xf32>
    %323 = math.exp %322 : vector<2x256xf32>
    %cst_104 = arith.constant 1.000000e+00 : f32
    %324 = vector.broadcast %cst_104 : f32 to vector<2x256xf32>
    %325 = arith.addf %324, %323 : vector<2x256xf32>
    %326 = arith.divf %324, %325 : vector<2x256xf32>
    %327 = vector.extract_strided_slice %326 {offsets = [0, 0], sizes = [2, 128], strides = [1, 1]} : vector<2x256xf32> to vector<2x128xf32>
    %328 = vector.extract_strided_slice %326 {offsets = [0, 128], sizes = [2, 128], strides = [1, 1]} : vector<2x256xf32> to vector<2x128xf32>
    %329 = vector.extract_strided_slice %314 {offsets = [0, 256], sizes = [2, 128], strides = [1, 1]} : vector<2x384xf32> to vector<2x128xf32>
    %330 = vector.extract_strided_slice %318 {offsets = [0, 256], sizes = [2, 128], strides = [1, 1]} : vector<2x384xf32> to vector<2x128xf32>
    %331 = arith.mulf %327, %330 : vector<2x128xf32>
    %332 = arith.addf %329, %331 : vector<2x128xf32>
    %333 = math.tanh %332 : vector<2x128xf32>
    %cst_105 = arith.constant 1.000000e+00 : f32
    %334 = vector.broadcast %cst_105 : f32 to vector<2x128xf32>
    %335 = arith.subf %334, %328 : vector<2x128xf32>
    %336 = arith.mulf %335, %333 : vector<2x128xf32>
    %337 = arith.mulf %328, %312 : vector<2x128xf32>
    %338 = arith.addf %336, %337 : vector<2x128xf32>
    %c18_106 = arith.constant 18 : index
    %c0_107 = arith.constant 0 : index
    %339 = vector.load %arg18[%c18_106, %c0_107] : memref<48x128xf32, #tpu.memory_space<vmem>>, vector<2x128xf32>
    tpu.vector_store %arg18[%c18_106, %c0_107], %338 {strides = array<i32>} : memref<48x128xf32, #tpu.memory_space<vmem>>, vector<2x128xf32>,
    %c20 = arith.constant 20 : index
    %c0_108 = arith.constant 0 : index
    %340 = vector.load %arg17[%c20, %c0_108] : memref<48x384xf32, #tpu.memory_space<vmem>>, vector<2x384xf32>
    %341 = arith.truncf %338 : vector<2x128xf32> to vector<2x128xbf16>
    %cst_109 = arith.constant dense<0.000000e+00> : vector<2x384xf32>
    %342 = tpu.matmul %341, %77, %cst_109 {dimension_numbers = #tpu.dot_dimension_numbers<[1], [0], [0], [1], [0, 0, 1, 1], [], []>} : vector<2x128xbf16>, vector<128x384xbf16>, vector<2x384xf32> -> vector<2x384xf32>
    %343 = vector.broadcast %78 : vector<1x384xf32> to vector<2x384xf32>
    %344 = arith.addf %342, %343 : vector<2x384xf32>
    %345 = vector.extract_strided_slice %340 {offsets = [0, 0], sizes = [2, 256], strides = [1, 1]} : vector<2x384xf32> to vector<2x256xf32>
    %346 = vector.extract_strided_slice %344 {offsets = [0, 0], sizes = [2, 256], strides = [1, 1]} : vector<2x384xf32> to vector<2x256xf32>
    %347 = arith.addf %345, %346 : vector<2x256xf32>
    %348 = arith.negf %347 : vector<2x256xf32>
    %349 = math.exp %348 : vector<2x256xf32>
    %cst_110 = arith.constant 1.000000e+00 : f32
    %350 = vector.broadcast %cst_110 : f32 to vector<2x256xf32>
    %351 = arith.addf %350, %349 : vector<2x256xf32>
    %352 = arith.divf %350, %351 : vector<2x256xf32>
    %353 = vector.extract_strided_slice %352 {offsets = [0, 0], sizes = [2, 128], strides = [1, 1]} : vector<2x256xf32> to vector<2x128xf32>
    %354 = vector.extract_strided_slice %352 {offsets = [0, 128], sizes = [2, 128], strides = [1, 1]} : vector<2x256xf32> to vector<2x128xf32>
    %355 = vector.extract_strided_slice %340 {offsets = [0, 256], sizes = [2, 128], strides = [1, 1]} : vector<2x384xf32> to vector<2x128xf32>
    %356 = vector.extract_strided_slice %344 {offsets = [0, 256], sizes = [2, 128], strides = [1, 1]} : vector<2x384xf32> to vector<2x128xf32>
    %357 = arith.mulf %353, %356 : vector<2x128xf32>
    %358 = arith.addf %355, %357 : vector<2x128xf32>
    %359 = math.tanh %358 : vector<2x128xf32>
    %cst_111 = arith.constant 1.000000e+00 : f32
    %360 = vector.broadcast %cst_111 : f32 to vector<2x128xf32>
    %361 = arith.subf %360, %354 : vector<2x128xf32>
    %362 = arith.mulf %361, %359 : vector<2x128xf32>
    %363 = arith.mulf %354, %338 : vector<2x128xf32>
    %364 = arith.addf %362, %363 : vector<2x128xf32>
    %c20_112 = arith.constant 20 : index
    %c0_113 = arith.constant 0 : index
    %365 = vector.load %arg18[%c20_112, %c0_113] : memref<48x128xf32, #tpu.memory_space<vmem>>, vector<2x128xf32>
    tpu.vector_store %arg18[%c20_112, %c0_113], %364 {strides = array<i32>} : memref<48x128xf32, #tpu.memory_space<vmem>>, vector<2x128xf32>,
    %c22 = arith.constant 22 : index
    %c0_114 = arith.constant 0 : index
    %366 = vector.load %arg17[%c22, %c0_114] : memref<48x384xf32, #tpu.memory_space<vmem>>, vector<2x384xf32>
    %367 = arith.truncf %364 : vector<2x128xf32> to vector<2x128xbf16>
    %cst_115 = arith.constant dense<0.000000e+00> : vector<2x384xf32>
    %368 = tpu.matmul %367, %77, %cst_115 {dimension_numbers = #tpu.dot_dimension_numbers<[1], [0], [0], [1], [0, 0, 1, 1], [], []>} : vector<2x128xbf16>, vector<128x384xbf16>, vector<2x384xf32> -> vector<2x384xf32>
    %369 = vector.broadcast %78 : vector<1x384xf32> to vector<2x384xf32>
    %370 = arith.addf %368, %369 : vector<2x384xf32>
    %371 = vector.extract_strided_slice %366 {offsets = [0, 0], sizes = [2, 256], strides = [1, 1]} : vector<2x384xf32> to vector<2x256xf32>
    %372 = vector.extract_strided_slice %370 {offsets = [0, 0], sizes = [2, 256], strides = [1, 1]} : vector<2x384xf32> to vector<2x256xf32>
    %373 = arith.addf %371, %372 : vector<2x256xf32>
    %374 = arith.negf %373 : vector<2x256xf32>
    %375 = math.exp %374 : vector<2x256xf32>
    %cst_116 = arith.constant 1.000000e+00 : f32
    %376 = vector.broadcast %cst_116 : f32 to vector<2x256xf32>
    %377 = arith.addf %376, %375 : vector<2x256xf32>
    %378 = arith.divf %376, %377 : vector<2x256xf32>
    %379 = vector.extract_strided_slice %378 {offsets = [0, 0], sizes = [2, 128], strides = [1, 1]} : vector<2x256xf32> to vector<2x128xf32>
    %380 = vector.extract_strided_slice %378 {offsets = [0, 128], sizes = [2, 128], strides = [1, 1]} : vector<2x256xf32> to vector<2x128xf32>
    %381 = vector.extract_strided_slice %366 {offsets = [0, 256], sizes = [2, 128], strides = [1, 1]} : vector<2x384xf32> to vector<2x128xf32>
    %382 = vector.extract_strided_slice %370 {offsets = [0, 256], sizes = [2, 128], strides = [1, 1]} : vector<2x384xf32> to vector<2x128xf32>
    %383 = arith.mulf %379, %382 : vector<2x128xf32>
    %384 = arith.addf %381, %383 : vector<2x128xf32>
    %385 = math.tanh %384 : vector<2x128xf32>
    %cst_117 = arith.constant 1.000000e+00 : f32
    %386 = vector.broadcast %cst_117 : f32 to vector<2x128xf32>
    %387 = arith.subf %386, %380 : vector<2x128xf32>
    %388 = arith.mulf %387, %385 : vector<2x128xf32>
    %389 = arith.mulf %380, %364 : vector<2x128xf32>
    %390 = arith.addf %388, %389 : vector<2x128xf32>
    %c22_118 = arith.constant 22 : index
    %c0_119 = arith.constant 0 : index
    %391 = vector.load %arg18[%c22_118, %c0_119] : memref<48x128xf32, #tpu.memory_space<vmem>>, vector<2x128xf32>
    tpu.vector_store %arg18[%c22_118, %c0_119], %390 {strides = array<i32>} : memref<48x128xf32, #tpu.memory_space<vmem>>, vector<2x128xf32>,
    %c24 = arith.constant 24 : index
    %c0_120 = arith.constant 0 : index
    %392 = vector.load %arg17[%c24, %c0_120] : memref<48x384xf32, #tpu.memory_space<vmem>>, vector<2x384xf32>
    %393 = arith.truncf %390 : vector<2x128xf32> to vector<2x128xbf16>
    %cst_121 = arith.constant dense<0.000000e+00> : vector<2x384xf32>
    %394 = tpu.matmul %393, %77, %cst_121 {dimension_numbers = #tpu.dot_dimension_numbers<[1], [0], [0], [1], [0, 0, 1, 1], [], []>} : vector<2x128xbf16>, vector<128x384xbf16>, vector<2x384xf32> -> vector<2x384xf32>
    %395 = vector.broadcast %78 : vector<1x384xf32> to vector<2x384xf32>
    %396 = arith.addf %394, %395 : vector<2x384xf32>
    %397 = vector.extract_strided_slice %392 {offsets = [0, 0], sizes = [2, 256], strides = [1, 1]} : vector<2x384xf32> to vector<2x256xf32>
    %398 = vector.extract_strided_slice %396 {offsets = [0, 0], sizes = [2, 256], strides = [1, 1]} : vector<2x384xf32> to vector<2x256xf32>
    %399 = arith.addf %397, %398 : vector<2x256xf32>
    %400 = arith.negf %399 : vector<2x256xf32>
    %401 = math.exp %400 : vector<2x256xf32>
    %cst_122 = arith.constant 1.000000e+00 : f32
    %402 = vector.broadcast %cst_122 : f32 to vector<2x256xf32>
    %403 = arith.addf %402, %401 : vector<2x256xf32>
    %404 = arith.divf %402, %403 : vector<2x256xf32>
    %405 = vector.extract_strided_slice %404 {offsets = [0, 0], sizes = [2, 128], strides = [1, 1]} : vector<2x256xf32> to vector<2x128xf32>
    %406 = vector.extract_strided_slice %404 {offsets = [0, 128], sizes = [2, 128], strides = [1, 1]} : vector<2x256xf32> to vector<2x128xf32>
    %407 = vector.extract_strided_slice %392 {offsets = [0, 256], sizes = [2, 128], strides = [1, 1]} : vector<2x384xf32> to vector<2x128xf32>
    %408 = vector.extract_strided_slice %396 {offsets = [0, 256], sizes = [2, 128], strides = [1, 1]} : vector<2x384xf32> to vector<2x128xf32>
    %409 = arith.mulf %405, %408 : vector<2x128xf32>
    %410 = arith.addf %407, %409 : vector<2x128xf32>
    %411 = math.tanh %410 : vector<2x128xf32>
    %cst_123 = arith.constant 1.000000e+00 : f32
    %412 = vector.broadcast %cst_123 : f32 to vector<2x128xf32>
    %413 = arith.subf %412, %406 : vector<2x128xf32>
    %414 = arith.mulf %413, %411 : vector<2x128xf32>
    %415 = arith.mulf %406, %390 : vector<2x128xf32>
    %416 = arith.addf %414, %415 : vector<2x128xf32>
    %c24_124 = arith.constant 24 : index
    %c0_125 = arith.constant 0 : index
    %417 = vector.load %arg18[%c24_124, %c0_125] : memref<48x128xf32, #tpu.memory_space<vmem>>, vector<2x128xf32>
    tpu.vector_store %arg18[%c24_124, %c0_125], %416 {strides = array<i32>} : memref<48x128xf32, #tpu.memory_space<vmem>>, vector<2x128xf32>,
    %c26 = arith.constant 26 : index
    %c0_126 = arith.constant 0 : index
    %418 = vector.load %arg17[%c26, %c0_126] : memref<48x384xf32, #tpu.memory_space<vmem>>, vector<2x384xf32>
    %419 = arith.truncf %416 : vector<2x128xf32> to vector<2x128xbf16>
    %cst_127 = arith.constant dense<0.000000e+00> : vector<2x384xf32>
    %420 = tpu.matmul %419, %77, %cst_127 {dimension_numbers = #tpu.dot_dimension_numbers<[1], [0], [0], [1], [0, 0, 1, 1], [], []>} : vector<2x128xbf16>, vector<128x384xbf16>, vector<2x384xf32> -> vector<2x384xf32>
    %421 = vector.broadcast %78 : vector<1x384xf32> to vector<2x384xf32>
    %422 = arith.addf %420, %421 : vector<2x384xf32>
    %423 = vector.extract_strided_slice %418 {offsets = [0, 0], sizes = [2, 256], strides = [1, 1]} : vector<2x384xf32> to vector<2x256xf32>
    %424 = vector.extract_strided_slice %422 {offsets = [0, 0], sizes = [2, 256], strides = [1, 1]} : vector<2x384xf32> to vector<2x256xf32>
    %425 = arith.addf %423, %424 : vector<2x256xf32>
    %426 = arith.negf %425 : vector<2x256xf32>
    %427 = math.exp %426 : vector<2x256xf32>
    %cst_128 = arith.constant 1.000000e+00 : f32
    %428 = vector.broadcast %cst_128 : f32 to vector<2x256xf32>
    %429 = arith.addf %428, %427 : vector<2x256xf32>
    %430 = arith.divf %428, %429 : vector<2x256xf32>
    %431 = vector.extract_strided_slice %430 {offsets = [0, 0], sizes = [2, 128], strides = [1, 1]} : vector<2x256xf32> to vector<2x128xf32>
    %432 = vector.extract_strided_slice %430 {offsets = [0, 128], sizes = [2, 128], strides = [1, 1]} : vector<2x256xf32> to vector<2x128xf32>
    %433 = vector.extract_strided_slice %418 {offsets = [0, 256], sizes = [2, 128], strides = [1, 1]} : vector<2x384xf32> to vector<2x128xf32>
    %434 = vector.extract_strided_slice %422 {offsets = [0, 256], sizes = [2, 128], strides = [1, 1]} : vector<2x384xf32> to vector<2x128xf32>
    %435 = arith.mulf %431, %434 : vector<2x128xf32>
    %436 = arith.addf %433, %435 : vector<2x128xf32>
    %437 = math.tanh %436 : vector<2x128xf32>
    %cst_129 = arith.constant 1.000000e+00 : f32
    %438 = vector.broadcast %cst_129 : f32 to vector<2x128xf32>
    %439 = arith.subf %438, %432 : vector<2x128xf32>
    %440 = arith.mulf %439, %437 : vector<2x128xf32>
    %441 = arith.mulf %432, %416 : vector<2x128xf32>
    %442 = arith.addf %440, %441 : vector<2x128xf32>
    %c26_130 = arith.constant 26 : index
    %c0_131 = arith.constant 0 : index
    %443 = vector.load %arg18[%c26_130, %c0_131] : memref<48x128xf32, #tpu.memory_space<vmem>>, vector<2x128xf32>
    tpu.vector_store %arg18[%c26_130, %c0_131], %442 {strides = array<i32>} : memref<48x128xf32, #tpu.memory_space<vmem>>, vector<2x128xf32>,
    %c28 = arith.constant 28 : index
    %c0_132 = arith.constant 0 : index
    %444 = vector.load %arg17[%c28, %c0_132] : memref<48x384xf32, #tpu.memory_space<vmem>>, vector<2x384xf32>
    %445 = arith.truncf %442 : vector<2x128xf32> to vector<2x128xbf16>
    %cst_133 = arith.constant dense<0.000000e+00> : vector<2x384xf32>
    %446 = tpu.matmul %445, %77, %cst_133 {dimension_numbers = #tpu.dot_dimension_numbers<[1], [0], [0], [1], [0, 0, 1, 1], [], []>} : vector<2x128xbf16>, vector<128x384xbf16>, vector<2x384xf32> -> vector<2x384xf32>
    %447 = vector.broadcast %78 : vector<1x384xf32> to vector<2x384xf32>
    %448 = arith.addf %446, %447 : vector<2x384xf32>
    %449 = vector.extract_strided_slice %444 {offsets = [0, 0], sizes = [2, 256], strides = [1, 1]} : vector<2x384xf32> to vector<2x256xf32>
    %450 = vector.extract_strided_slice %448 {offsets = [0, 0], sizes = [2, 256], strides = [1, 1]} : vector<2x384xf32> to vector<2x256xf32>
    %451 = arith.addf %449, %450 : vector<2x256xf32>
    %452 = arith.negf %451 : vector<2x256xf32>
    %453 = math.exp %452 : vector<2x256xf32>
    %cst_134 = arith.constant 1.000000e+00 : f32
    %454 = vector.broadcast %cst_134 : f32 to vector<2x256xf32>
    %455 = arith.addf %454, %453 : vector<2x256xf32>
    %456 = arith.divf %454, %455 : vector<2x256xf32>
    %457 = vector.extract_strided_slice %456 {offsets = [0, 0], sizes = [2, 128], strides = [1, 1]} : vector<2x256xf32> to vector<2x128xf32>
    %458 = vector.extract_strided_slice %456 {offsets = [0, 128], sizes = [2, 128], strides = [1, 1]} : vector<2x256xf32> to vector<2x128xf32>
    %459 = vector.extract_strided_slice %444 {offsets = [0, 256], sizes = [2, 128], strides = [1, 1]} : vector<2x384xf32> to vector<2x128xf32>
    %460 = vector.extract_strided_slice %448 {offsets = [0, 256], sizes = [2, 128], strides = [1, 1]} : vector<2x384xf32> to vector<2x128xf32>
    %461 = arith.mulf %457, %460 : vector<2x128xf32>
    %462 = arith.addf %459, %461 : vector<2x128xf32>
    %463 = math.tanh %462 : vector<2x128xf32>
    %cst_135 = arith.constant 1.000000e+00 : f32
    %464 = vector.broadcast %cst_135 : f32 to vector<2x128xf32>
    %465 = arith.subf %464, %458 : vector<2x128xf32>
    %466 = arith.mulf %465, %463 : vector<2x128xf32>
    %467 = arith.mulf %458, %442 : vector<2x128xf32>
    %468 = arith.addf %466, %467 : vector<2x128xf32>
    %c28_136 = arith.constant 28 : index
    %c0_137 = arith.constant 0 : index
    %469 = vector.load %arg18[%c28_136, %c0_137] : memref<48x128xf32, #tpu.memory_space<vmem>>, vector<2x128xf32>
    tpu.vector_store %arg18[%c28_136, %c0_137], %468 {strides = array<i32>} : memref<48x128xf32, #tpu.memory_space<vmem>>, vector<2x128xf32>,
    %c30 = arith.constant 30 : index
    %c0_138 = arith.constant 0 : index
    %470 = vector.load %arg17[%c30, %c0_138] : memref<48x384xf32, #tpu.memory_space<vmem>>, vector<2x384xf32>
    %471 = arith.truncf %468 : vector<2x128xf32> to vector<2x128xbf16>
    %cst_139 = arith.constant dense<0.000000e+00> : vector<2x384xf32>
    %472 = tpu.matmul %471, %77, %cst_139 {dimension_numbers = #tpu.dot_dimension_numbers<[1], [0], [0], [1], [0, 0, 1, 1], [], []>} : vector<2x128xbf16>, vector<128x384xbf16>, vector<2x384xf32> -> vector<2x384xf32>
    %473 = vector.broadcast %78 : vector<1x384xf32> to vector<2x384xf32>
    %474 = arith.addf %472, %473 : vector<2x384xf32>
    %475 = vector.extract_strided_slice %470 {offsets = [0, 0], sizes = [2, 256], strides = [1, 1]} : vector<2x384xf32> to vector<2x256xf32>
    %476 = vector.extract_strided_slice %474 {offsets = [0, 0], sizes = [2, 256], strides = [1, 1]} : vector<2x384xf32> to vector<2x256xf32>
    %477 = arith.addf %475, %476 : vector<2x256xf32>
    %478 = arith.negf %477 : vector<2x256xf32>
    %479 = math.exp %478 : vector<2x256xf32>
    %cst_140 = arith.constant 1.000000e+00 : f32
    %480 = vector.broadcast %cst_140 : f32 to vector<2x256xf32>
    %481 = arith.addf %480, %479 : vector<2x256xf32>
    %482 = arith.divf %480, %481 : vector<2x256xf32>
    %483 = vector.extract_strided_slice %482 {offsets = [0, 0], sizes = [2, 128], strides = [1, 1]} : vector<2x256xf32> to vector<2x128xf32>
    %484 = vector.extract_strided_slice %482 {offsets = [0, 128], sizes = [2, 128], strides = [1, 1]} : vector<2x256xf32> to vector<2x128xf32>
    %485 = vector.extract_strided_slice %470 {offsets = [0, 256], sizes = [2, 128], strides = [1, 1]} : vector<2x384xf32> to vector<2x128xf32>
    %486 = vector.extract_strided_slice %474 {offsets = [0, 256], sizes = [2, 128], strides = [1, 1]} : vector<2x384xf32> to vector<2x128xf32>
    %487 = arith.mulf %483, %486 : vector<2x128xf32>
    %488 = arith.addf %485, %487 : vector<2x128xf32>
    %489 = math.tanh %488 : vector<2x128xf32>
    %cst_141 = arith.constant 1.000000e+00 : f32
    %490 = vector.broadcast %cst_141 : f32 to vector<2x128xf32>
    %491 = arith.subf %490, %484 : vector<2x128xf32>
    %492 = arith.mulf %491, %489 : vector<2x128xf32>
    %493 = arith.mulf %484, %468 : vector<2x128xf32>
    %494 = arith.addf %492, %493 : vector<2x128xf32>
    %c30_142 = arith.constant 30 : index
    %c0_143 = arith.constant 0 : index
    %495 = vector.load %arg18[%c30_142, %c0_143] : memref<48x128xf32, #tpu.memory_space<vmem>>, vector<2x128xf32>
    tpu.vector_store %arg18[%c30_142, %c0_143], %494 {strides = array<i32>} : memref<48x128xf32, #tpu.memory_space<vmem>>, vector<2x128xf32>,
    %c32 = arith.constant 32 : index
    %c0_144 = arith.constant 0 : index
    %496 = vector.load %arg17[%c32, %c0_144] : memref<48x384xf32, #tpu.memory_space<vmem>>, vector<2x384xf32>
    %497 = arith.truncf %494 : vector<2x128xf32> to vector<2x128xbf16>
    %cst_145 = arith.constant dense<0.000000e+00> : vector<2x384xf32>
    %498 = tpu.matmul %497, %77, %cst_145 {dimension_numbers = #tpu.dot_dimension_numbers<[1], [0], [0], [1], [0, 0, 1, 1], [], []>} : vector<2x128xbf16>, vector<128x384xbf16>, vector<2x384xf32> -> vector<2x384xf32>
    %499 = vector.broadcast %78 : vector<1x384xf32> to vector<2x384xf32>
    %500 = arith.addf %498, %499 : vector<2x384xf32>
    %501 = vector.extract_strided_slice %496 {offsets = [0, 0], sizes = [2, 256], strides = [1, 1]} : vector<2x384xf32> to vector<2x256xf32>
    %502 = vector.extract_strided_slice %500 {offsets = [0, 0], sizes = [2, 256], strides = [1, 1]} : vector<2x384xf32> to vector<2x256xf32>
    %503 = arith.addf %501, %502 : vector<2x256xf32>
    %504 = arith.negf %503 : vector<2x256xf32>
    %505 = math.exp %504 : vector<2x256xf32>
    %cst_146 = arith.constant 1.000000e+00 : f32
    %506 = vector.broadcast %cst_146 : f32 to vector<2x256xf32>
    %507 = arith.addf %506, %505 : vector<2x256xf32>
    %508 = arith.divf %506, %507 : vector<2x256xf32>
    %509 = vector.extract_strided_slice %508 {offsets = [0, 0], sizes = [2, 128], strides = [1, 1]} : vector<2x256xf32> to vector<2x128xf32>
    %510 = vector.extract_strided_slice %508 {offsets = [0, 128], sizes = [2, 128], strides = [1, 1]} : vector<2x256xf32> to vector<2x128xf32>
    %511 = vector.extract_strided_slice %496 {offsets = [0, 256], sizes = [2, 128], strides = [1, 1]} : vector<2x384xf32> to vector<2x128xf32>
    %512 = vector.extract_strided_slice %500 {offsets = [0, 256], sizes = [2, 128], strides = [1, 1]} : vector<2x384xf32> to vector<2x128xf32>
    %513 = arith.mulf %509, %512 : vector<2x128xf32>
    %514 = arith.addf %511, %513 : vector<2x128xf32>
    %515 = math.tanh %514 : vector<2x128xf32>
    %cst_147 = arith.constant 1.000000e+00 : f32
    %516 = vector.broadcast %cst_147 : f32 to vector<2x128xf32>
    %517 = arith.subf %516, %510 : vector<2x128xf32>
    %518 = arith.mulf %517, %515 : vector<2x128xf32>
    %519 = arith.mulf %510, %494 : vector<2x128xf32>
    %520 = arith.addf %518, %519 : vector<2x128xf32>
    %c32_148 = arith.constant 32 : index
    %c0_149 = arith.constant 0 : index
    %521 = vector.load %arg18[%c32_148, %c0_149] : memref<48x128xf32, #tpu.memory_space<vmem>>, vector<2x128xf32>
    tpu.vector_store %arg18[%c32_148, %c0_149], %520 {strides = array<i32>} : memref<48x128xf32, #tpu.memory_space<vmem>>, vector<2x128xf32>,
    %c0_150 = arith.constant 0 : index
    %c0_151 = arith.constant 0 : index
    %522 = vector.load %arg18[%c0_150, %c0_151] : memref<48x128xf32, #tpu.memory_space<vmem>>, vector<48x128xf32>
    %523 = arith.truncf %522 : vector<48x128xf32> to vector<48x128xbf16>
    %c0_152 = arith.constant 0 : index
    %c0_153 = arith.constant 0 : index
    %524 = vector.load %arg14[%c0_152, %c0_153] : memref<128x128xbf16, #tpu.memory_space<vmem>>, vector<128x128xbf16>
    %cst_154 = arith.constant dense<0.000000e+00> : vector<48x128xf32>
    %525 = tpu.matmul %523, %524, %cst_154 {dimension_numbers = #tpu.dot_dimension_numbers<[1], [0], [0], [1], [0, 0, 1, 1], [], []>} : vector<48x128xbf16>, vector<128x128xbf16>, vector<48x128xf32> -> vector<48x128xf32>
    %c0_155 = arith.constant 0 : index
    %c0_156 = arith.constant 0 : index
    %526 = vector.load %arg15[%c0_155, %c0_156] : memref<1x128xf32, #tpu.memory_space<vmem>>, vector<1x128xf32>
    %527 = vector.broadcast %526 : vector<1x128xf32> to vector<48x128xf32>
    %528 = arith.addf %525, %527 : vector<48x128xf32>
    %529 = arith.negf %528 : vector<48x128xf32>
    %530 = math.exp %529 : vector<48x128xf32>
    %cst_157 = arith.constant 1.000000e+00 : f32
    %531 = vector.broadcast %cst_157 : f32 to vector<48x128xf32>
    %532 = arith.addf %531, %530 : vector<48x128xf32>
    %533 = arith.divf %531, %532 : vector<48x128xf32>
    %c0_158 = arith.constant 0 : index
    %c0_159 = arith.constant 0 : index
    %534 = vector.load %arg16[%c0_158, %c0_159] : memref<48x128xf32, #tpu.memory_space<vmem>>, vector<48x128xf32>
    tpu.vector_store %arg16[%c0_158, %c0_159], %533 {strides = array<i32>} : memref<48x128xf32, #tpu.memory_space<vmem>>, vector<48x128xf32>,
    return
  }
  func.func @transform_0(%arg0: i32) -> (i32, i32) {
    %c0_i32 = arith.constant 0 : i32
    %c0_i32_0 = arith.constant 0 : i32
    %c0_i32_1 = arith.constant 0 : i32
    return %c0_i32, %c0_i32_0 : i32, i32
  }
  func.func @transform_1(%arg0: i32) -> (i32, i32) {
    %c0_i32 = arith.constant 0 : i32
    %c0_i32_0 = arith.constant 0 : i32
    %c0_i32_1 = arith.constant 0 : i32
    return %c0_i32, %c0_i32_0 : i32, i32
  }
  func.func @transform_2(%arg0: i32) -> (i32, i32) {
    %c0_i32 = arith.constant 0 : i32
    %c0_i32_0 = arith.constant 0 : i32
    %c0_i32_1 = arith.constant 0 : i32
    return %c0_i32, %c0_i32_0 : i32, i32
  }
  func.func @transform_3(%arg0: i32) -> (i32, i32) {
    %c0_i32 = arith.constant 0 : i32
    %c0_i32_0 = arith.constant 0 : i32
    %c0_i32_1 = arith.constant 0 : i32
    return %c0_i32, %c0_i32_0 : i32, i32
  }
  func.func @transform_4(%arg0: i32) -> (i32, i32) {
    %c0_i32 = arith.constant 0 : i32
    %c0_i32_0 = arith.constant 0 : i32
    %c0_i32_1 = arith.constant 0 : i32
    return %c0_i32, %c0_i32_0 : i32, i32
  }
  func.func @transform_5(%arg0: i32) -> (i32, i32) {
    %c0_i32 = arith.constant 0 : i32
    %c0_i32_0 = arith.constant 0 : i32
    %c0_i32_1 = arith.constant 0 : i32
    return %c0_i32, %c0_i32_0 : i32, i32
  }
  func.func @transform_6(%arg0: i32) -> (i32, i32) {
    %c0_i32 = arith.constant 0 : i32
    %c0_i32_0 = arith.constant 0 : i32
    %c0_i32_1 = arith.constant 0 : i32
    return %c0_i32, %c0_i32_0 : i32, i32
  }
  func.func @transform_7(%arg0: i32) -> (i32, i32) {
    %c0_i32 = arith.constant 0 : i32
    %c0_i32_0 = arith.constant 0 : i32
    %c0_i32_1 = arith.constant 0 : i32
    return %c0_i32, %c0_i32_0 : i32, i32
  }
  func.func @transform_8(%arg0: i32) -> (i32, i32) {
    %c0_i32 = arith.constant 0 : i32
    %c0_i32_0 = arith.constant 0 : i32
    %c0_i32_1 = arith.constant 0 : i32
    return %c0_i32, %c0_i32_0 : i32, i32
  }
  func.func @transform_9(%arg0: i32) -> (i32, i32) {
    %c0_i32 = arith.constant 0 : i32
    %c0_i32_0 = arith.constant 0 : i32
    %c0_i32_1 = arith.constant 0 : i32
    return %c0_i32, %c0_i32_0 : i32, i32
  }
  func.func @transform_10(%arg0: i32) -> (i32, i32) {
    %c0_i32 = arith.constant 0 : i32
    %c0_i32_0 = arith.constant 0 : i32
    %c0_i32_1 = arith.constant 0 : i32
    return %c0_i32, %c0_i32_0 : i32, i32
  }
  func.func @transform_11(%arg0: i32) -> (i32, i32) {
    %c0_i32 = arith.constant 0 : i32
    %c0_i32_0 = arith.constant 0 : i32
    %c0_i32_1 = arith.constant 0 : i32
    return %c0_i32, %c0_i32_0 : i32, i32
  }
  func.func @transform_12(%arg0: i32) -> (i32, i32) {
    %c0_i32 = arith.constant 0 : i32
    %c0_i32_0 = arith.constant 0 : i32
    %c0_i32_1 = arith.constant 0 : i32
    return %c0_i32, %c0_i32_0 : i32, i32
  }
  func.func @transform_13(%arg0: i32) -> (i32, i32) {
    %c0_i32 = arith.constant 0 : i32
    %c0_i32_0 = arith.constant 0 : i32
    %c0_i32_1 = arith.constant 0 : i32
    return %c0_i32, %c0_i32_0 : i32, i32
  }
  func.func @transform_14(%arg0: i32) -> (i32, i32) {
    %c0_i32 = arith.constant 0 : i32
    %c0_i32_0 = arith.constant 0 : i32
    %c0_i32_1 = arith.constant 0 : i32
    return %c0_i32, %c0_i32_0 : i32, i32
  }
  func.func @transform_15(%arg0: i32) -> (i32, i32) {
    %c0_i32 = arith.constant 0 : i32
    %c0_i32_0 = arith.constant 0 : i32
    %c0_i32_1 = arith.constant 0 : i32
    return %c0_i32, %c0_i32_0 : i32, i32
  }
}

</mosaic_0001>

<bundles_post_ra>
// kernel: mel_estimator_forward.1
= control target key start
LH: loop header
LB: loop body
LE: loop exit
PB: predicated region body
PF: predicated region fallthrough
CT: control target
= control target key end

     0   :  { %20 = vsyncpa [#allocation5], 0  ;;  %s10179_s21 = smov [#allocation4]   ;;  %s10180_s23 = smov 64   ;;  %s14897_s0 = inlined_call_operand.vmem [shape: bf16[48,256], index: 0, kind: input, shape index: {}]   ;;  %s14898_s1 = inlined_call_operand.vmem [shape: bf16[256,512], index: 1, kind: input, shape index: {}]   ;;  %s14899_s2 = inlined_call_operand.vmem [shape: bf16[256,64], index: 2, kind: input, shape index: {}]   ;;  %s14900_s3 = inlined_call_operand.vmem [shape: bf16[64,1024], index: 3, kind: input, shape index: {}]   ;;  %s14901_s4 = inlined_call_operand.vmem [shape: f32[1,1024], index: 4, kind: input, shape index: {}]   ;;  %s14902_s5 = inlined_call_operand.vmem [shape: bf16[1024,512], index: 5, kind: input, shape index: {}]   ;;  %s14903_s6 = inlined_call_operand.vmem [shape: f32[1,512], index: 6, kind: input, shape index: {}]   ;;  %s14904_s7 = inlined_call_operand.vmem [shape: bf16[512,256], index: 7, kind: input, shape index: {}]   ;;  %s14905_s8 = inlined_call_operand.vmem [shape: f32[1,256], index: 8, kind: input, shape index: {}]   ;;  %s14906_s9 = inlined_call_operand.vmem [shape: bf16[256,384], index: 9, kind: input, shape index: {}]   ;;  %s14907_s10 = inlined_call_operand.vmem [shape: f32[1,384], index: 10, kind: input, shape index: {}]   ;;  %s14908_s11 = inlined_call_operand.vmem [shape: bf16[128,384], index: 11, kind: input, shape index: {}]   ;;  %s14909_s12 = inlined_call_operand.vmem [shape: f32[1,384], index: 12, kind: input, shape index: {}]   ;;  %s14910_s13 = inlined_call_operand.hbm [shape: bf16[128,128], index: 13, kind: input, shape index: {}]   ;;  %s14911_s14 = inlined_call_operand.vmem [shape: f32[1,128], index: 14, kind: input, shape index: {}]   ;;  %s14912_s15 = inlined_call_operand.vmem [shape: f32[48,128], index: 15, kind: output, shape index: {}]  }
   0x1   :  { %s51_s20 = sshll.u32 %s14910_s13, 4  ;;  %s53_s22 = sshll.u32 %s10179_s21, 4  ;;  %s52_s20 = int_to_ptr.hbm [resolvable:$true] %s51_s20  ;;  %s54_s22 = int_to_ptr.vmem [resolvable:$true] %s53_s22 }
   0x2   :  { %s10181_s24 = smov 4  }
   0x3   :  { %59 = dma.hbm_to_vmem [thread:$0]  %s52_s20, 1024, %s54_s22, [#allocation5], %s10180_s23, %s10180_s23, %s10181_s24  }
   0x4   :  { %10177 = dma.done.wait [#allocation5], 1024  }
   0x5   :  { %10178 = vsyncadd [#allocation5], 4294966272  ;;  %v7389_v0 = vld [vmem:[%s14898_s1 + $0xe0] sm:$0xf]  ;;  %v9424_v1 = vld [vmem:[%s14898_s1 + $0xec] sm:$0xf0] }
   0x6   :  { %v7517_v2 = vld [vmem:[%s14898_s1 + $0x1e0] sm:$0xf]  ;;  %v7390_v3 = vor.u32 %v9424_v1, %v7389_v0  ;;  %v9456_v4 = vld [vmem:[%s14898_s1 + $0x1ec] sm:$0xf0]  ;;  %v9422_v5 = vld [vmem:[%s14898_s1 + $0xe4] sm:$0xf] }
   0x7   :  { %v7391_v6 = vld [vmem:[%s14898_s1 + $0xf0] sm:$0xf0]  ;;  %v7518_v7 = vor.u32 %v9456_v4, %v7517_v2  ;;  %v9454_v9 = vld [vmem:[%s14898_s1 + $0x1e4] sm:$0xf]  ;;  %v7373_v11 = vld [vmem:[%s14898_s1 + $0xc0] sm:$0xf] }
   0x8   :  { %v7394_v8 = vor.u32 %v9422_v5, %v7391_v6  ;;  %v7519_v10 = vld [vmem:[%s14898_s1 + $0x1f0] sm:$0xf0]  ;;  %487 = vmatpush.bf16.msra.mxu0 %v7390_v3  ;;  %v9420_v13 = vld [vmem:[%s14898_s1 + $0xcc] sm:$0xf0]  ;;  %v7501_v14 = vld [vmem:[%s14898_s1 + $0x1c0] sm:$0xf] }
   0x9   :  { %v7522_v12 = vor.u32 %v9454_v9, %v7519_v10  ;;  %v9452_v15 = vld [vmem:[%s14898_s1 + $0x1cc] sm:$0xf0]  ;;  %511 = vmatpush.bf16.msra.mxu1 %v7518_v7  ;;  %v7374_v16 = vor.u32 %v9420_v13, %v7373_v11  ;;  %v9418_v18 = vld [vmem:[%s14898_s1 + $0xc4] sm:$0xf]  ;;  %v7375_v19 = vld [vmem:[%s14898_s1 + $0xd0] sm:$0xf0] }
   0xa   :  { %535 = vmatpush.bf16.msra.mxu2 %v7394_v8  ;;  %v7502_v17 = vor.u32 %v9452_v15, %v7501_v14  ;;  %v9450_v20 = vld [vmem:[%s14898_s1 + $0x1c4] sm:$0xf]  ;;  %v7378_v21 = vor.u32 %v9418_v18, %v7375_v19  ;;  %v7503_v22 = vld [vmem:[%s14898_s1 + $0x1d0] sm:$0xf0]  ;;  %v7357_v23 = vld [vmem:[%s14898_s1 + $0xa0] sm:$0xf] }
   0xb   :  { %559 = vmatpush.bf16.msra.mxu3 %v7522_v12  ;;  %v9416_v24 = vld [vmem:[%s14898_s1 + $0xac] sm:$0xf0]  ;;  %v7506_v25 = vor.u32 %v9450_v20, %v7503_v22  ;;  %v7485_v26 = vld [vmem:[%s14898_s1 + $0x1a0] sm:$0xf]  ;;  %v9414_v28 = vld [vmem:[%s14898_s1 + $0xa4] sm:$0xf] }
   0xc   :  { %v9448_v27 = vld [vmem:[%s14898_s1 + $0x1ac] sm:$0xf0]  ;;  %488 = vmatpush.bf16.msra.mxu0 %v7374_v16  ;;  %v7358_v29 = vor.u32 %v9416_v24, %v7357_v23  ;;  %v7359_v30 = vld [vmem:[%s14898_s1 + $0xb0] sm:$0xf0]  ;;  %v9446_v31 = vld [vmem:[%s14898_s1 + $0x1a4] sm:$0xf] }
   0xd   :  { %v7487_v32 = vld [vmem:[%s14898_s1 + $0x1b0] sm:$0xf0]  ;;  %512 = vmatpush.bf16.msra.mxu1 %v7502_v17  ;;  %v7486_v33 = vor.u32 %v9448_v27, %v7485_v26  ;;  %v7362_v34 = vor.u32 %v9414_v28, %v7359_v30  ;;  %v7341_v35 = vld [vmem:[%s14898_s1 + $0x80] sm:$0xf]  ;;  %v9412_v36 = vld [vmem:[%s14898_s1 + $0x8c] sm:$0xf0] }
   0xe   :  { %536 = vmatpush.bf16.msra.mxu2 %v7378_v21  ;;  %v7469_v37 = vld [vmem:[%s14898_s1 + $0x180] sm:$0xf]  ;;  %v7490_v38 = vor.u32 %v9446_v31, %v7487_v32  ;;  %v9444_v39 = vld [vmem:[%s14898_s1 + $0x18c] sm:$0xf0]  ;;  %v9410_v40 = vld [vmem:[%s14898_s1 + $0x84] sm:$0xf]  ;;  %v7342_v44 = vor.u32 %v9412_v36, %v7341_v35 }
   0xf   :  { %560 = vmatpush.bf16.msra.mxu3 %v7506_v25  ;;  %v7343_v41 = vld [vmem:[%s14898_s1 + $0x90] sm:$0xf0]  ;;  %v9442_v42 = vld [vmem:[%s14898_s1 + $0x184] sm:$0xf]  ;;  %v7470_v45 = vor.u32 %v9444_v39, %v7469_v37  ;;  %v7325_v47 = vld [vmem:[%s14898_s1 + $0x60] sm:$0xf] }
  0x10   :  { %v7471_v43 = vld [vmem:[%s14898_s1 + $0x190] sm:$0xf0]  ;;  %489 = vmatpush.bf16.msra.mxu0 %v7358_v29  ;;  %v7346_v46 = vor.u32 %v9410_v40, %v7343_v41  ;;  %v9408_v48 = vld [vmem:[%s14898_s1 + $0x6c] sm:$0xf0]  ;;  %v7453_v49 = vld [vmem:[%s14898_s1 + $0x160] sm:$0xf] }
  0x11   :  { %513 = vmatpush.bf16.msra.mxu1 %v7486_v33  ;;  %v7474_v50 = vor.u32 %v9442_v42, %v7471_v43  ;;  %v9440_v51 = vld [vmem:[%s14898_s1 + $0x16c] sm:$0xf0]  ;;  %v9406_v52 = vld [vmem:[%s14898_s1 + $0x64] sm:$0xf]  ;;  %v7327_v53 = vld [vmem:[%s14898_s1 + $0x70] sm:$0xf0]  ;;  %v7326_v56 = vor.u32 %v9408_v48, %v7325_v47 }
  0x12   :  { %537 = vmatpush.bf16.msra.mxu2 %v7362_v34  ;;  %v9438_v54 = vld [vmem:[%s14898_s1 + $0x164] sm:$0xf]  ;;  %v7455_v55 = vld [vmem:[%s14898_s1 + $0x170] sm:$0xf0]  ;;  %v7454_v57 = vor.u32 %v9440_v51, %v7453_v49  ;;  %v7330_v58 = vor.u32 %v9406_v52, %v7327_v53  ;;  %v7309_v59 = vld [vmem:[%s14898_s1 + $0x40] sm:$0xf] }
  0x13   :  { %561 = vmatpush.bf16.msra.mxu3 %v7490_v38  ;;  %v9404_v60 = vld [vmem:[%s14898_s1 + $0x4c] sm:$0xf0]  ;;  %v7437_v61 = vld [vmem:[%s14898_s1 + $0x140] sm:$0xf]  ;;  %v7458_v62 = vor.u32 %v9438_v54, %v7455_v55  ;;  %v9402_v0 = vld [vmem:[%s14898_s1 + $0x44] sm:$0xf] }
  0x14   :  { %490 = vmatpush.bf16.msra.mxu0 %v7342_v44  ;;  %v9436_v63 = vld [vmem:[%s14898_s1 + $0x14c] sm:$0xf0]  ;;  %v7311_v1 = vld [vmem:[%s14898_s1 + $0x50] sm:$0xf0]  ;;  %v9434_v2 = vld [vmem:[%s14898_s1 + $0x144] sm:$0xf]  ;;  %v7310_v4 = vor.u32 %v9404_v60, %v7309_v59 }
  0x15   :  { %514 = vmatpush.bf16.msra.mxu1 %v7470_v45  ;;  %v7439_v3 = vld [vmem:[%s14898_s1 + $0x150] sm:$0xf0]  ;;  %v7438_v5 = vor.u32 %v9436_v63, %v7437_v61  ;;  %v7314_v6 = vor.u32 %v9402_v0, %v7311_v1  ;;  %v7293_v7 = vld [vmem:[%s14898_s1 + $0x20] sm:$0xf]  ;;  %v9400_v8 = vld [vmem:[%s14898_s1 + $0x2c] sm:$0xf0] }
  0x16   :  { %538 = vmatpush.bf16.msra.mxu2 %v7346_v46  ;;  %v7421_v9 = vld [vmem:[%s14898_s1 + $0x120] sm:$0xf]  ;;  %v7442_v10 = vor.u32 %v9434_v2, %v7439_v3  ;;  %v9432_v11 = vld [vmem:[%s14898_s1 + $0x12c] sm:$0xf0]  ;;  %v9398_v12 = vld [vmem:[%s14898_s1 + $0x24] sm:$0xf]  ;;  %v7294_v16 = vor.u32 %v9400_v8, %v7293_v7 }
  0x17   :  { %562 = vmatpush.bf16.msra.mxu3 %v7474_v50  ;;  %v7295_v13 = vld [vmem:[%s14898_s1 + $0x30] sm:$0xf0]  ;;  %v9430_v14 = vld [vmem:[%s14898_s1 + $0x124] sm:$0xf]  ;;  %v7277_v17 = vld [vmem:[%s14898_s1] sm:$0xf]  ;;  %v7422_v19 = vor.u32 %v9432_v11, %v7421_v9 }
  0x18   :  { %491 = vmatpush.bf16.msra.mxu0 %v7326_v56  ;;  %v7423_v15 = vld [vmem:[%s14898_s1 + $0x130] sm:$0xf0]  ;;  %v9396_v18 = vld [vmem:[%s14898_s1 + $0xc] sm:$0xf0]  ;;  %v7298_v20 = vor.u32 %v9398_v12, %v7295_v13  ;;  %v7405_v21 = vld [vmem:[%s14898_s1 + $0x100] sm:$0xf] }
  0x19   :  { %515 = vmatpush.bf16.msra.mxu1 %v7454_v57  ;;  %v9428_v22 = vld [vmem:[%s14898_s1 + $0x10c] sm:$0xf0]  ;;  %v9394_v23 = vld [vmem:[%s14898_s1 + $0x4] sm:$0xf]  ;;  %v7426_v24 = vor.u32 %v9430_v14, %v7423_v15  ;;  %v7279_v25 = vld [vmem:[%s14898_s1 + $0x10] sm:$0xf0]  ;;  %v7278_v31 = vor.u32 %v9396_v18, %v7277_v17 }
  0x1a   :  { %539 = vmatpush.bf16.msra.mxu2 %v7330_v58  ;;  %v9426_v26 = vld [vmem:[%s14898_s1 + $0x104] sm:$0xf]  ;;  %v7407_v27 = vld [vmem:[%s14898_s1 + $0x110] sm:$0xf0]  ;;  %v7253_v28 = vld [vmem:[%s14897_s0] sm:$0xf]  ;;  %v7406_v35 = vor.u32 %v9428_v22, %v7405_v21  ;;  %v7282_v36 = vor.u32 %v9394_v23, %v7279_v25 }
  0x1b   :  { %563 = vmatpush.bf16.msra.mxu3 %v7458_v62  ;;  %v9423_v29 = vld [vmem:[%s14898_s1 + $0xec] sm:$0xf]  ;;  %v7399_v30 = vld [vmem:[%s14898_s1 + $0xf8] sm:$0xf0]  ;;  %v9389_v32 = vld [vmem:[%s14897_s0 + $0x4] sm:$0xf0]  ;;  %v7410_v39 = vor.u32 %v9426_v26, %v7407_v27 }
  0x1c   :  { %492 = vmatpush.bf16.msra.mxu0 %v7310_v4  ;;  %v9455_v33 = vld [vmem:[%s14898_s1 + $0x1ec] sm:$0xf]  ;;  %v7527_v34 = vld [vmem:[%s14898_s1 + $0x1f8] sm:$0xf0]  ;;  %v9388_v37 = vld [vmem:[%s14897_s0 + $0x4] sm:$0xf]  ;;  %v7402_v40 = vor.u32 %v9423_v29, %v7399_v30  ;;  %v10493_v44 = vor.u32 %v9389_v32, %v7253_v28 }
  0x1d   :  { %516 = vmatpush.bf16.msra.mxu1 %v7438_v5  ;;  %v7255_v38 = vld [vmem:[%s14897_s0 + $0x8] sm:$0xf0]  ;;  %v7397_v41 = vld [vmem:[%s14898_s1 + $0xe8] sm:$0xf]  ;;  %v9425_v42 = vld [vmem:[%s14898_s1 + $0xf4] sm:$0xf0]  ;;  %v7530_v45 = vor.u32 %v9455_v33, %v7527_v34 }
  0x1e   :  { %540 = vmatpush.bf16.msra.mxu2 %v7314_v6  ;;  %v7525_v43 = vld [vmem:[%s14898_s1 + $0x1e8] sm:$0xf]  ;;  %v9457_v46 = vld [vmem:[%s14898_s1 + $0x1f4] sm:$0xf0]  ;;  %v9419_v47 = vld [vmem:[%s14898_s1 + $0xcc] sm:$0xf]  ;;  %v10504_v49 = vor.u32 %v9388_v37, %v7255_v38  ;;  %v7398_v52 = vor.u32 %v9425_v42, %v7397_v41 }
  0x1f   :  { %564 = vmatpush.bf16.msra.mxu3 %v7442_v10  ;;  %v7383_v48 = vld [vmem:[%s14898_s1 + $0xd8] sm:$0xf0]  ;;  %v9451_v50 = vld [vmem:[%s14898_s1 + $0x1cc] sm:$0xf]  ;;  %v7526_v53 = vor.u32 %v9457_v46, %v7525_v43  ;;  %v7381_v55 = vld [vmem:[%s14898_s1 + $0xc8] sm:$0xf] }
  0x20   :  { %493 = vmatpush.bf16.msra.mxu0 %v7294_v16  ;;  %v7511_v51 = vld [vmem:[%s14898_s1 + $0x1d8] sm:$0xf0]  ;;  %v7386_v54 = vor.u32 %v9419_v47, %v7383_v48  ;;  %v9421_v56 = vld [vmem:[%s14898_s1 + $0xd4] sm:$0xf0]  ;;  %v7509_v57 = vld [vmem:[%s14898_s1 + $0x1c8] sm:$0xf] }
  0x21   :  { %517 = vmatpush.bf16.msra.mxu1 %v7422_v19  ;;  %v7514_v58 = vor.u32 %v9451_v50, %v7511_v51  ;;  %v9453_v59 = vld [vmem:[%s14898_s1 + $0x1d4] sm:$0xf0]  ;;  %v9415_v60 = vld [vmem:[%s14898_s1 + $0xac] sm:$0xf]  ;;  %v7367_v61 = vld [vmem:[%s14898_s1 + $0xb8] sm:$0xf0]  ;;  %v7382_v0 = vor.u32 %v9421_v56, %v7381_v55 }
  0x22   :  { %541 = vmatpush.bf16.msra.mxu2 %v7298_v20  ;;  %v9447_v62 = vld [vmem:[%s14898_s1 + $0x1ac] sm:$0xf]  ;;  %v7495_v63 = vld [vmem:[%s14898_s1 + $0x1b8] sm:$0xf0]  ;;  %v7510_v1 = vor.u32 %v9453_v59, %v7509_v57  ;;  %v7370_v2 = vor.u32 %v9415_v60, %v7367_v61  ;;  %v7365_v3 = vld [vmem:[%s14898_s1 + $0xa8] sm:$0xf] }
  0x23   :  { %565 = vmatpush.bf16.msra.mxu3 %v7426_v24  ;;  %v9417_v4 = vld [vmem:[%s14898_s1 + $0xb4] sm:$0xf0]  ;;  %v7493_v5 = vld [vmem:[%s14898_s1 + $0x1a8] sm:$0xf]  ;;  %v7498_v6 = vor.u32 %v9447_v62, %v7495_v63  ;;  %v9411_v8 = vld [vmem:[%s14898_s1 + $0x8c] sm:$0xf] }
  0x24   :  { %494 = vmatpush.bf16.msra.mxu0 %v7278_v31  ;;  %v9449_v7 = vld [vmem:[%s14898_s1 + $0x1b4] sm:$0xf0]  ;;  %v7351_v9 = vld [vmem:[%s14898_s1 + $0x98] sm:$0xf0]  ;;  %v9443_v10 = vld [vmem:[%s14898_s1 + $0x18c] sm:$0xf]  ;;  %v7366_v12 = vor.u32 %v9417_v4, %v7365_v3 }
  0x25   :  { %518 = vmatpush.bf16.msra.mxu1 %v7406_v35  ;;  %v7479_v11 = vld [vmem:[%s14898_s1 + $0x198] sm:$0xf0]  ;;  %v7261_v13 = vld [vmem:[%s14897_s0 + $0x10] sm:$0xf]  ;;  %v7494_v14 = vor.u32 %v9449_v7, %v7493_v5  ;;  %v7354_v15 = vor.u32 %v9411_v8, %v7351_v9  ;;  %v7349_v16 = vld [vmem:[%s14898_s1 + $0x88] sm:$0xf] }
  0x26   :  { %542 = vmatpush.bf16.msra.mxu2 %v7282_v36  ;;  %v9413_v17 = vld [vmem:[%s14898_s1 + $0x94] sm:$0xf0]  ;;  %v7477_v18 = vld [vmem:[%s14898_s1 + $0x188] sm:$0xf]  ;;  %v7482_v19 = vor.u32 %v9443_v10, %v7479_v11  ;;  %v9407_v21 = vld [vmem:[%s14898_s1 + $0x6c] sm:$0xf] }
  0x27   :  { %566 = vmatpush.bf16.msra.mxu3 %v7410_v39  ;;  %495 = vmatmul.bf16.vlgmr.msra.gmra.mxu0 %v10493_v44  ;;  %v9445_v20 = vld [vmem:[%s14898_s1 + $0x194] sm:$0xf0]  ;;  %v7335_v22 = vld [vmem:[%s14898_s1 + $0x78] sm:$0xf0]  ;;  %v9439_v24 = vld [vmem:[%s14898_s1 + $0x16c] sm:$0xf]  ;;  %v7350_v28 = vor.u32 %v9413_v17, %v7349_v16 }
  0x28   :  { %519 = vmatmul.bf16.vlgmr.msra.gmra.mxu1 %v10504_v49  ;;  %583 = vmatpush.bf16.msrb.mxu0 %v7398_v52  ;;  %v9391_v23 = vld [vmem:[%s14897_s0 + $0x14] sm:$0xf0]  ;;  %v7463_v25 = vld [vmem:[%s14898_s1 + $0x178] sm:$0xf0]  ;;  %v9390_v26 = vld [vmem:[%s14897_s0 + $0x14] sm:$0xf]  ;;  %v7478_v30 = vor.u32 %v9445_v20, %v7477_v18  ;;  %v7338_v31 = vor.u32 %v9407_v21, %v7335_v22 }
  0x29   :  { %543 = vmatmul.bf16.vlgmr.msra.gmra.mxu2 %v10493_v44  ;;  %607 = vmatpush.bf16.msrb.mxu1 %v7526_v53  ;;  %v7263_v27 = vld [vmem:[%s14897_s0 + $0x18] sm:$0xf0]  ;;  %v7333_v29 = vld [vmem:[%s14898_s1 + $0x68] sm:$0xf]  ;;  %v9409_v32 = vld [vmem:[%s14898_s1 + $0x74] sm:$0xf0]  ;;  %v10612_v35 = vor.u32 %v9391_v23, %v7261_v13  ;;  %v7466_v36 = vor.u32 %v9439_v24, %v7463_v25 }
  0x2a   :  { %631 = vmatpush.bf16.msrb.mxu2 %v7402_v40  ;;  %567 = vmatmul.bf16.vlgmr.msra.gmra.mxu3 %v10504_v49  ;;  %v7461_v33 = vld [vmem:[%s14898_s1 + $0x168] sm:$0xf]  ;;  %v9441_v34 = vld [vmem:[%s14898_s1 + $0x174] sm:$0xf0]  ;;  %v9403_v37 = vld [vmem:[%s14898_s1 + $0x4c] sm:$0xf]  ;;  %v10620_v39 = vor.u32 %v9390_v26, %v7263_v27  ;;  %v7334_v42 = vor.u32 %v9409_v32, %v7333_v29 }
  0x2b   :  { %655 = vmatpush.bf16.msrb.mxu3 %v7530_v45  ;;  %v7319_v38 = vld [vmem:[%s14898_s1 + $0x58] sm:$0xf0]  ;;  %v9435_v40 = vld [vmem:[%s14898_s1 + $0x14c] sm:$0xf]  ;;  %v7462_v43 = vor.u32 %v9441_v34, %v7461_v33  ;;  %v7317_v46 = vld [vmem:[%s14898_s1 + $0x48] sm:$0xf] }
  0x2c   :  { %584 = vmatpush.bf16.msrb.mxu0 %v7382_v0  ;;  %v7447_v41 = vld [vmem:[%s14898_s1 + $0x158] sm:$0xf0]  ;;  %v7322_v45 = vor.u32 %v9403_v37, %v7319_v38  ;;  %v9405_v47 = vld [vmem:[%s14898_s1 + $0x54] sm:$0xf0]  ;;  %v7445_v48 = vld [vmem:[%s14898_s1 + $0x148] sm:$0xf] }
  0x2d   :  { %608 = vmatpush.bf16.msrb.mxu1 %v7510_v1  ;;  %v7450_v50 = vor.u32 %v9435_v40, %v7447_v41  ;;  %v9437_v51 = vld [vmem:[%s14898_s1 + $0x154] sm:$0xf0]  ;;  %v9399_v52 = vld [vmem:[%s14898_s1 + $0x2c] sm:$0xf]  ;;  %v7303_v53 = vld [vmem:[%s14898_s1 + $0x38] sm:$0xf0]  ;;  %v7318_v56 = vor.u32 %v9405_v47, %v7317_v46 }
  0x2e   :  { %632 = vmatpush.bf16.msrb.mxu2 %v7386_v54  ;;  %v9431_v54 = vld [vmem:[%s14898_s1 + $0x12c] sm:$0xf]  ;;  %v7431_v55 = vld [vmem:[%s14898_s1 + $0x138] sm:$0xf0]  ;;  %v7446_v57 = vor.u32 %v9437_v51, %v7445_v48  ;;  %v7301_v59 = vld [vmem:[%s14898_s1 + $0x28] sm:$0xf] }
  0x2f   :  { %656 = vmatpush.bf16.msrb.mxu3 %v7514_v58  ;;  %v7306_v58 = vor.u32 %v9399_v52, %v7303_v53  ;;  %v9401_v60 = vld [vmem:[%s14898_s1 + $0x34] sm:$0xf0]  ;;  %v7429_v61 = vld [vmem:[%s14898_s1 + $0x128] sm:$0xf]  ;;  %v7434_v62 = vor.u32 %v9431_v54, %v7431_v55  ;;  %v9395_v0 = vld [vmem:[%s14898_s1 + $0xc] sm:$0xf] }
  0x30   :  { %585 = vmatpush.bf16.msrb.mxu0 %v7366_v12  ;;  %v9433_v63 = vld [vmem:[%s14898_s1 + $0x134] sm:$0xf0]  ;;  %v7287_v1 = vld [vmem:[%s14898_s1 + $0x18] sm:$0xf0]  ;;  %v7302_v4 = vor.u32 %v9401_v60, %v7301_v59  ;;  %v7285_v7 = vld [vmem:[%s14898_s1 + $0x8] sm:$0xf] }
  0x31   :  { %609 = vmatpush.bf16.msrb.mxu1 %v7494_v14  ;;  %v7415_v3 = vld [vmem:[%s14898_s1 + $0x118] sm:$0xf0]  ;;  %v7430_v5 = vor.u32 %v9433_v63, %v7429_v61  ;;  %v9397_v8 = vld [vmem:[%s14898_s1 + $0x14] sm:$0xf0]  ;;  %v7413_v10 = vld [vmem:[%s14898_s1 + $0x108] sm:$0xf] }
  0x32   :  { %633 = vmatpush.bf16.msrb.mxu2 %v7370_v2  ;;  %v9427_v2 = vld [vmem:[%s14898_s1 + $0x10c] sm:$0xf]  ;;  %v9429_v11 = vld [vmem:[%s14898_s1 + $0x114] sm:$0xf0]  ;;  %v7269_v12 = vld [vmem:[%s14897_s0 + $0x20] sm:$0xf]  ;;  %v7286_v16 = vor.u32 %v9397_v8, %v7285_v7 }
  0x33   :  { %657 = vmatpush.bf16.msrb.mxu3 %v7498_v6  ;;  %v7290_v6 = vor.u32 %v9395_v0, %v7287_v1  ;;  %v7418_v9 = vor.u32 %v9427_v2, %v7415_v3  ;;  %v9393_v13 = vld [vmem:[%s14897_s0 + $0x24] sm:$0xf0]  ;;  %v9392_v14 = vld [vmem:[%s14897_s0 + $0x24] sm:$0xf]  ;;  %v7414_v17 = vor.u32 %v9429_v11, %v7413_v10  ;;  %v9473_v25 = vld [vmem:[%s14899_s2 + $0x78] sm:$0xff] }
  0x34   :  { %586 = vmatpush.bf16.msrb.mxu0 %v7350_v28  ;;  %v7270_v18 = vor.u32 %v9393_v13, %v7269_v12  ;;  %v9464_v33 = vld [vmem:[%s14899_s2 + $0x30] sm:$0xff]  ;;  %v9463_v37 = vld [vmem:[%s14899_s2 + $0x28] sm:$0xff]  ;;  %v9461_v46 = vld [vmem:[%s14899_s2 + $0x18] sm:$0xff] }
  0x35   :  { %610 = vmatpush.bf16.msrb.mxu1 %v7478_v30  ;;  %v9472_v34 = vld [vmem:[%s14899_s2 + $0x70] sm:$0xff]  ;;  %v9471_v40 = vld [vmem:[%s14899_s2 + $0x68] sm:$0xff]  ;;  %v9469_v51 = vld [vmem:[%s14899_s2 + $0x58] sm:$0xff] }
  0x36   :  { %634 = vmatpush.bf16.msrb.mxu2 %v7354_v15  ;;  %v7271_v15 = vld [vmem:[%s14897_s0 + $0x28] sm:$0xf0]  ;;  %v9460_v52 = vld [vmem:[%s14899_s2 + $0x10] sm:$0xff]  ;;  %v9458_v61 = vld [vmem:[%s14899_s2] sm:$0xff] }
  0x37   :  { %658 = vmatpush.bf16.msrb.mxu3 %v7482_v19  ;;  %500 = vmatmul.bf16.gmra.mxu0 %v10612_v35  ;;  %v7274_v19 = vor.u32 %v9392_v14, %v7271_v15  ;;  %v9468_v53 = vld [vmem:[%s14899_s2 + $0x50] sm:$0xff]  ;;  %v9459_v55 = vld [vmem:[%s14899_s2 + $0x8] sm:$0xff] }
  0x38   :  { %524 = vmatmul.bf16.gmra.mxu1 %v10620_v39  ;;  %587 = vmatpush.bf16.msrb.mxu0 %v7334_v42  ;;  %v9462_v42 = vld [vmem:[%s14899_s2 + $0x20] sm:$0xff]  ;;  %v9467_v0 = vld [vmem:[%s14899_s2 + $0x48] sm:$0xff] }
  0x39   :  { %548 = vmatmul.bf16.gmra.mxu2 %v10612_v35  ;;  %611 = vmatpush.bf16.msrb.mxu1 %v7462_v43 }
  0x3a   :  { %635 = vmatpush.bf16.msrb.mxu2 %v7338_v31  ;;  %572 = vmatmul.bf16.gmra.mxu3 %v10620_v39 }
  0x3b   :  { %659 = vmatpush.bf16.msrb.mxu3 %v7466_v36 }
  0x3c   :  { %588 = vmatpush.bf16.msrb.mxu0 %v7318_v56 }
  0x3d   :  { %612 = vmatpush.bf16.msrb.mxu1 %v7446_v57 }
  0x3e   :  { %636 = vmatpush.bf16.msrb.mxu2 %v7322_v45  ;;  %v9470_v45 = vld [vmem:[%s14899_s2 + $0x60] sm:$0xff] }
  0x3f   :  { %660 = vmatpush.bf16.msrb.mxu3 %v7450_v50 }
  0x40   :  { %589 = vmatpush.bf16.msrb.mxu0 %v7302_v4 }
  0x41   :  { %613 = vmatpush.bf16.msrb.mxu1 %v7430_v5 }
  0x42   :  { %637 = vmatpush.bf16.msrb.mxu2 %v7306_v58 }
  0x43   :  { %661 = vmatpush.bf16.msrb.mxu3 %v7434_v62 }
  0x44   :  { %590 = vmatpush.bf16.msrb.mxu0 %v7286_v16 }
  0x45   :  { %614 = vmatpush.bf16.msrb.mxu1 %v7414_v17 }
  0x46   :  { %638 = vmatpush.bf16.msrb.mxu2 %v7290_v6 }
  0x47   :  { %662 = vmatpush.bf16.msrb.mxu3 %v7418_v9  ;;  %505 = vmatmul.bf16.gmra.mxu0 %v7270_v18  ;;  %v9466_v9 = vld [vmem:[%s14899_s2 + $0x40] sm:$0xff] }
  0x48   :  { %529 = vmatmul.bf16.gmra.mxu1 %v7274_v19 }
  0x49   :  { %553 = vmatmul.bf16.gmra.mxu2 %v7270_v18  ;;  %1017 = vmatpush.bf16.msra.mxu1 %v9473_v25 }
  0x4a   :  { %577 = vmatmul.bf16.gmra.mxu3 %v7274_v19 }
  0x4d   :  { %1018 = vmatpush.bf16.msra.mxu1 %v9472_v34 }
  0x51   :  { %1019 = vmatpush.bf16.msra.mxu1 %v9471_v40 }
  0x55   :  { %1020 = vmatpush.bf16.msra.mxu1 %v9470_v45 }
  0x57   :  { %591 = vmatmul.bf16.vlgmr.msrb.gmra.mxu0 %v10493_v44 }
  0x58   :  { %615 = vmatmul.bf16.vlgmr.msrb.gmra.mxu1 %v10504_v49 }
  0x59   :  { %639 = vmatmul.bf16.vlgmr.msrb.gmra.mxu2 %v10493_v44  ;;  %1021 = vmatpush.bf16.msra.mxu1 %v9469_v51 }
  0x5a   :  { %663 = vmatmul.bf16.vlgmr.msrb.gmra.mxu3 %v10504_v49  ;;  %v9465_v49 = vld [vmem:[%s14899_s2 + $0x38] sm:$0xff] }
  0x5b   :  { %993 = vmatpush.bf16.msra.mxu0 %v9465_v49 }
  0x5d   :  { %1022 = vmatpush.bf16.msra.mxu1 %v9468_v53 }
  0x5f   :  { %994 = vmatpush.bf16.msra.mxu0 %v9464_v33 }
  0x61   :  { %1023 = vmatpush.bf16.msra.mxu1 %v9467_v0 }
  0x63   :  { %995 = vmatpush.bf16.msra.mxu0 %v9463_v37 }
  0x65   :  { %1024 = vmatpush.bf16.msra.mxu1 %v9466_v9 }
  0x67   :  { %596 = vmatmul.bf16.gmra.mxu0 %v10612_v35 }
  0x68   :  { %620 = vmatmul.bf16.gmra.mxu1 %v10620_v39  ;;  %996 = vmatpush.bf16.msra.mxu0 %v9462_v42 }
  0x69   :  { %644 = vmatmul.bf16.gmra.mxu2 %v10612_v35 }
  0x6a   :  { %668 = vmatmul.bf16.gmra.mxu3 %v10620_v39 }
  0x6c   :  { %997 = vmatpush.bf16.msra.mxu0 %v9461_v46 }
  0x70   :  { %998 = vmatpush.bf16.msra.mxu0 %v9460_v52 }
  0x74   :  { %999 = vmatpush.bf16.msra.mxu0 %v9459_v55 }
  0x77   :  { %601 = vmatmul.bf16.gmra.mxu0 %v7270_v18 }
  0x78   :  { %625 = vmatmul.bf16.gmra.mxu1 %v7274_v19  ;;  %1000 = vmatpush.bf16.msra.mxu0 %v9458_v61 }
  0x79   :  { %649 = vmatmul.bf16.gmra.mxu2 %v7270_v18 }
  0x7a   :  { %673 = vmatmul.bf16.gmra.mxu3 %v7274_v19 }
  0xa4   :  { %v496_v20 = vpop.f32.mrf.mxu0 }
  0xa5   :  { %v520_v21 = vpop.f32.mrf.mxu1 }
  0xa6   :  { %v521_v56 = vadd.f32 %v520_v21, %v496_v20 }
  0xa8   :  { %v679_v62 = vmul.f32 %v521_v56, %v521_v56 }
  0xac   :  { %v544_v22 = vpop.f32.mrf.mxu2  ;;  %v498_v24 = vpop.f32.mrf.mxu0 }
  0xad   :  { %v568_v23 = vpop.f32.mrf.mxu3  ;;  %v522_v44 = vpop.f32.mrf.mxu1 }
  0xae   :  { %v569_v2 = vadd.f32 %v568_v23, %v544_v22  ;;  %v523_v4 = vadd.f32 %v522_v44, %v498_v24 }
  0xb0   :  { %v680_v11 = vmul.f32 %v569_v2, %v569_v2  ;;  %v681_v13 = vmul.f32 %v523_v4, %v523_v4 }
  0xb4   :  { %v10718_v26 = vpop.f32.mrf.mxu2  ;;  %v10722_v28 = vpop.f32.mrf.mxu0 }
  0xb5   :  { %v10720_v27 = vpop.f32.mrf.mxu3  ;;  %v10724_v29 = vpop.f32.mrf.mxu1 }
  0xb6   :  { %v571_v18 = vadd.f32 %v10720_v27, %v10718_v26  ;;  %v526_v21 = vadd.f32 %v10724_v29, %v10722_v28 }
  0xb8   :  { %v682_v33 = vmul.f32 %v571_v18, %v571_v18  ;;  %v683_v26 = vmul.f32 %v526_v21, %v526_v21 }
  0xbc   :  { %v10726_v30 = vpop.f32.mrf.mxu2  ;;  %v10730_v32 = vpop.f32.mrf.mxu0 }
  0xbd   :  { %v10728_v31 = vpop.f32.mrf.mxu3  ;;  %v10738_v35 = vpop.f32.mrf.mxu1 }
  0xbe   :  { %v574_v42 = vadd.f32 %v10728_v31, %v10726_v30  ;;  %v528_v46 = vadd.f32 %v10738_v35, %v10730_v32 }
  0xc4   :  { %v10740_v36 = vpop.f32.mrf.mxu2  ;;  %v10747_v39 = vpop.f32.mrf.mxu0 }
  0xc5   :  { %v10745_v38 = vpop.f32.mrf.mxu3  ;;  %v10752_v41 = vpop.f32.mrf.mxu1 }
  0xc6   :  { %v576_v51 = vadd.f32 %v10745_v38, %v10740_v36  ;;  %v531_v55 = vadd.f32 %v10752_v41, %v10747_v39  ;;  %v684_v36 = vmul.f32 %v574_v42, %v574_v42 }
  0xc8   :  { %v686_v39 = vmul.f32 %v576_v51, %v576_v51  ;;  %v687_v0 = vmul.f32 %v531_v55, %v531_v55 }
  0xcc   :  { %v10757_v43 = vpop.f32.mrf.mxu2  ;;  %v10767_v48 = vpop.f32.mrf.mxu0 }
  0xcd   :  { %v10765_v47 = vpop.f32.mrf.mxu3  ;;  %v10769_v50 = vpop.f32.mrf.mxu1 }
  0xce   :  { %v579_v56 = vadd.f32 %v10765_v47, %v10757_v43  ;;  %v10830_v2 = vadd.f32 %v10769_v50, %v10767_v48 }
  0xd4   :  { %v10780_v54 = vpop.f32.mrf.mxu2  ;;  %v592_v58 = vpop.f32.mrf.mxu0 }
  0xd5   :  { %v10785_v57 = vpop.f32.mrf.mxu3  ;;  %v616_v59 = vpop.f32.mrf.mxu1 }
  0xd6   :  { %v617_v60 = vadd.f32 %v616_v59, %v592_v58  ;;  %v10836_v4 = vadd.f32 %v10785_v57, %v10780_v54 }
  0xd8   :  { %v691_v63 = vmul.f32 %v617_v60, %v617_v60 }
  0xda   :  { %v10793_v1 = vadd.f32 %v691_v63, %v679_v62  ;;  %v685_v62 = vmul.f32 %v528_v46, %v528_v46 }
  0xdc   :  { %v640_v3 = vpop.f32.mrf.mxu2  ;;  %9917 = vrsqrt.f32 %v10793_v1  ;;  %v594_v6 = vpop.f32.mrf.mxu0  ;;  %vm722_vm0 = vcmp.eq.f32.partialorder %v10793_v1, inf  ;;  %vm724_vm1 = vcmp.eq.f32.partialorder %v10793_v1, 0.0 }
  0xdd   :  { %v664_v5 = vpop.f32.mrf.mxu3  ;;  %v618_v8 = vpop.f32.mrf.mxu1 }
  0xde   :  { %v665_v7 = vadd.f32 %v664_v5, %v640_v3  ;;  %v619_v10 = vadd.f32 %v618_v8, %v594_v6  ;;  %v10832_v3 = vmul.f32 %v579_v56, %v579_v56 }
  0xe0   :  { %v692_v12 = vmul.f32 %v665_v7, %v665_v7  ;;  %v693_v14 = vmul.f32 %v619_v10, %v619_v10 }
  0xe2   :  { %v10799_v15 = vadd.f32 %v692_v12, %v680_v11  ;;  %v9918_v16 = vpop.eup %9917  ;;  %v10801_v17 = vadd.f32 %v693_v14, %v681_v13  ;;  %v725_v11 = vand.u32 2147483648, %v10793_v1 }
  0xe3   :  { %v716_v20 = vmul.f32 %v9918_v16, %v10793_v1 }
  0xe4   :  { %9919 = vrsqrt.f32 %v10799_v15  ;;  %v642_v19 = vpop.f32.mrf.mxu2  ;;  %v597_v23 = vpop.f32.mrf.mxu0  ;;  %vm746_vm2 = vcmp.eq.f32.partialorder %v10801_v17, inf  ;;  %vm734_vm3 = vcmp.eq.f32.partialorder %v10799_v15, inf  ;;  %vm748_vm4 = vcmp.eq.f32.partialorder %v10801_v17, 0.0 }
  0xe5   :  { %9921 = vrsqrt.f32 %v10801_v17  ;;  %v666_v22 = vpop.f32.mrf.mxu3  ;;  %v621_v44 = vpop.f32.mrf.mxu1  ;;  %v717_v49 = vmul.f32 %v9918_v16, %v716_v20  ;;  %vm736_vm5 = vcmp.eq.f32.partialorder %v10799_v15, 0.0 }
  0xe6   :  { %v667_v24 = vadd.f32 %v666_v22, %v642_v19  ;;  %v622_v25 = vadd.f32 %v621_v44, %v597_v23 }
  0xe7   :  { %v718_v37 = vmul.f32 0.5, %v717_v49  ;;  %v749_v49 = vand.u32 2147483648, %v10801_v17 }
  0xe8   :  { %v694_v34 = vmul.f32 %v667_v24, %v667_v24  ;;  %v695_v27 = vmul.f32 %v622_v25, %v622_v25 }
  0xe9   :  { %v719_v28 = vsub.f32 1.5, %v718_v37 }
  0xea   :  { %v9920_v40 = vpop.eup %9919  ;;  %v10812_v45 = vadd.f32 %v694_v34, %v682_v33  ;;  %v10818_v52 = vadd.f32 %v695_v27, %v683_v26 }
  0xeb   :  { %v9922_v29 = vpop.eup %9921  ;;  %v728_v53 = vmul.f32 %v9920_v40, %v10799_v15  ;;  %v720_v60 = vmul.f32 %v9918_v16, %v719_v28 }
  0xec   :  { %9923 = vrsqrt.f32 %v10812_v45  ;;  %v645_v30 = vpop.f32.mrf.mxu2  ;;  %v740_v31 = vmul.f32 %v9922_v29, %v10801_v17  ;;  %v599_v32 = vpop.f32.mrf.mxu0  ;;  %vm758_vm6 = vcmp.eq.f32.partialorder %v10812_v45, inf  ;;  %vm760_vm7 = vcmp.eq.f32.partialorder %v10812_v45, 0.0 }
  0xed   :  { %v669_v58 = vpop.f32.mrf.mxu3  ;;  %v729_v35 = vmul.f32 %v9920_v40, %v728_v53  ;;  %9925 = vrsqrt.f32 %v10818_v52  ;;  %v623_v59 = vpop.f32.mrf.mxu1  ;;  %v721_v9 = vmul.f32 %v720_v60, %v10793_v1  ;;  %vm770_vm8 = vcmp.eq.f32.partialorder %v10818_v52, inf }
  0xee   :  { %v670_v38 = vadd.f32 %v669_v58, %v645_v30  ;;  %v741_v61 = vmul.f32 %v9922_v29, %v740_v31  ;;  %v624_v41 = vadd.f32 %v623_v59, %v599_v32  ;;  %vm772_vm9 = vcmp.eq.f32.partialorder %v10818_v52, 0.0 }
  0xef   :  { %v730_v63 = vmul.f32 0.5, %v729_v35  ;;  %v723_v22 = vsel %vm722_vm0, %v10793_v1, %v721_v9 }
  0xf0   :  { %v696_v43 = vmul.f32 %v670_v38, %v670_v38  ;;  %v742_v47 = vmul.f32 0.5, %v741_v61  ;;  %v697_v5 = vmul.f32 %v624_v41, %v624_v41 }
  0xf1   :  { %v731_v6 = vsub.f32 1.5, %v730_v63 }
  0xf2   :  { %v9924_v7 = vpop.eup %9923  ;;  %v10838_v8 = vadd.f32 %v696_v43, %v684_v36  ;;  %v743_v10 = vsub.f32 1.5, %v742_v47  ;;  %v10842_v50 = vadd.f32 %v697_v5, %v685_v62 }
  0xf3   :  { %v9926_v48 = vpop.eup %9925  ;;  %v752_v54 = vmul.f32 %v9924_v7, %v10812_v45  ;;  %v732_v13 = vmul.f32 %v9920_v40, %v731_v6  ;;  %v726_v40 = vsel %vm724_vm1, %v725_v11, %v723_v22 }
  0xf4   :  { %v647_v57 = vpop.f32.mrf.mxu2  ;;  %v744_v12 = vmul.f32 %v9922_v29, %v743_v10  ;;  %v764_v14 = vmul.f32 %v9926_v48, %v10818_v52  ;;  %9927 = vrsqrt.f32 %v10838_v8  ;;  %v602_v18 = vpop.f32.mrf.mxu0  ;;  %v689_v10 = vmul.f32 %v10830_v2, %v10830_v2 }
  0xf5   :  { %v671_v16 = vpop.f32.mrf.mxu3  ;;  %v753_v19 = vmul.f32 %v9924_v7, %v752_v54  ;;  %9929 = vrsqrt.f32 %v10842_v50  ;;  %v626_v21 = vpop.f32.mrf.mxu1  ;;  %v733_v37 = vmul.f32 %v732_v13, %v10799_v15  ;;  %vm794_vm10 = vcmp.eq.f32.partialorder %v10842_v50, inf }
  0xf6   :  { %v672_v20 = vadd.f32 %v671_v16, %v647_v57  ;;  %v745_v23 = vmul.f32 %v744_v12, %v10801_v17  ;;  %v765_v24 = vmul.f32 %v9926_v48, %v764_v14  ;;  %v627_v44 = vadd.f32 %v626_v21, %v602_v18 }
  0xf7   :  { %v754_v25 = vmul.f32 0.5, %v753_v19  ;;  %v735_v1 = vsel %vm734_vm3, %v10799_v15, %v733_v37  ;;  %v690_v16 = vmul.f32 %v10836_v4, %v10836_v4  ;;  %vm796_vm11 = vcmp.eq.f32.partialorder %v10842_v50, 0.0 }
  0xf8   :  { %v698_v33 = vmul.f32 %v672_v20, %v672_v20  ;;  %v747_v34 = vsel %vm746_vm2, %v10801_v17, %v745_v23  ;;  %v766_v26 = vmul.f32 0.5, %v765_v24  ;;  %v699_v27 = vmul.f32 %v627_v44, %v627_v44 }
  0xf9   :  { %v750_v42 = vsel %vm748_vm4, %v749_v49, %v747_v34  ;;  %v755_v28 = vsub.f32 1.5, %v754_v25  ;;  %v737_v17 = vand.u32 2147483648, %v10799_v15  ;;  %v773_v24 = vand.u32 2147483648, %v10818_v52 }
  0xfa   :  { %v9928_v29 = vpop.eup %9927  ;;  %v10862_v46 = vadd.f32 %v698_v33, %v686_v39  ;;  %v859_v51 = vpack.c.bf16 %v750_v42, %v726_v40  ;;  %v767_v53 = vsub.f32 1.5, %v766_v26  ;;  %v10865_v30 = vadd.f32 %v699_v27, %v687_v0 }
  0xfb   :  { %v9930_v55 = vpop.eup %9929  ;;  %v756_v31 = vmul.f32 %v9924_v7, %v755_v28  ;;  %v776_v56 = vmul.f32 %v9928_v29, %v10838_v8  ;;  %v761_v39 = vand.u32 2147483648, %v10812_v45  ;;  %v738_v0 = vsel %vm736_vm5, %v737_v17, %v735_v1 }
  0xfc   :  { %v650_v58 = vpop.f32.mrf.mxu2  ;;  %1001 = vmatmul.bf16.vlgmr.msra.gmra.mxu0 %v859_v51  ;;  %v768_v32 = vmul.f32 %v9926_v48, %v767_v53  ;;  %v788_v35 = vmul.f32 %v9930_v55, %v10842_v50  ;;  %9931 = vrsqrt.f32 %v10862_v46  ;;  %v604_v38 = vpop.f32.mrf.mxu0  ;;  %v797_v44 = vand.u32 2147483648, %v10842_v50 }
  0xfd   :  { %v674_v36 = vpop.f32.mrf.mxu3  ;;  %v757_v59 = vmul.f32 %v756_v31, %v10812_v45  ;;  %v777_v60 = vmul.f32 %v9928_v29, %v776_v56  ;;  %v628_v62 = vpop.f32.mrf.mxu1  ;;  %9933 = vrsqrt.f32 %v10865_v30  ;;  %vm782_vm12 = vcmp.eq.f32.partialorder %v10838_v8, inf }
  0xfe   :  { %v675_v61 = vadd.f32 %v674_v36, %v650_v58  ;;  %v789_v41 = vmul.f32 %v9930_v55, %v788_v35  ;;  %v629_v63 = vadd.f32 %v628_v62, %v604_v38  ;;  %v769_v7 = vmul.f32 %v768_v32, %v10818_v52 }
  0xff   :  { %v759_v43 = vsel %vm758_vm6, %v10812_v45, %v757_v59  ;;  %v778_v47 = vmul.f32 0.5, %v777_v60  ;;  %v785_v56 = vand.u32 2147483648, %v10838_v8  ;;  %vm806_vm13 = vcmp.eq.f32.partialorder %v10862_v46, inf }
 0x100   :  { %v700_v5 = vmul.f32 %v675_v61, %v675_v61  ;;  %v762_v6 = vsel %vm760_vm7, %v761_v39, %v759_v43  ;;  %v790_v9 = vmul.f32 0.5, %v789_v41  ;;  %v701_v48 = vmul.f32 %v629_v63, %v629_v63 }
 0x101   :  { %v860_v11 = vpack.c.bf16 %v762_v6, %v738_v0  ;;  %v779_v54 = vsub.f32 1.5, %v778_v47  ;;  %v771_v18 = vsel %vm770_vm8, %v10818_v52, %v769_v7  ;;  %v809_v32 = vand.u32 2147483648, %v10862_v46 }
 0x102   :  { %v9932_v57 = vpop.eup %9931  ;;  %v10886_v12 = vadd.f32 %v700_v5, %v10832_v3  ;;  %v791_v15 = vsub.f32 1.5, %v790_v9  ;;  %v10888_v13 = vadd.f32 %v701_v48, %v689_v10  ;;  %v774_v34 = vsel %vm772_vm9, %v773_v24, %v771_v18 }
 0x103   :  { %1025 = vmatmul.bf16.vlgmr.msra.gmra.mxu1 %v860_v11  ;;  %v800_v45 = vmul.f32 %v9932_v57, %v10862_v46  ;;  %v9934_v14 = vpop.eup %9933  ;;  %v780_v20 = vmul.f32 %v9928_v29, %v779_v54  ;;  %vm784_vm14 = vcmp.eq.f32.partialorder %v10838_v8, 0.0  ;;  %vm808_vm15 = vcmp.eq.f32.partialorder %v10862_v46, 0.0 }
 0x104   :  { %v652_v2 = vpop.f32.mrf.mxu2  ;;  %v792_v19 = vmul.f32 %v9930_v55, %v791_v15  ;;  %9935 = vrsqrt.f32 %v10886_v12  ;;  %v812_v22 = vmul.f32 %v9934_v14, %v10865_v30  ;;  %vm818_vm0 = vcmp.eq.f32.partialorder %v10865_v30, inf }
 0x105   :  { %v676_v3 = vpop.f32.mrf.mxu3  ;;  %v801_v21 = vmul.f32 %v9932_v57, %v800_v45  ;;  %9937 = vrsqrt.f32 %v10888_v13  ;;  %v781_v27 = vmul.f32 %v780_v20, %v10838_v8  ;;  %v821_v9 = vand.u32 2147483648, %v10865_v30 }
 0x106   :  { %v677_v23 = vadd.f32 %v676_v3, %v652_v2  ;;  %v793_v4 = vmul.f32 %v792_v19, %v10842_v50  ;;  %v813_v25 = vmul.f32 %v9934_v14, %v812_v22  ;;  %vm842_vm1 = vcmp.eq.f32.partialorder %v10888_v13, inf }
 0x107   :  { %v802_v49 = vmul.f32 0.5, %v801_v21  ;;  %v845_v10 = vand.u32 2147483648, %v10888_v13  ;;  %vm820_vm2 = vcmp.eq.f32.partialorder %v10865_v30, 0.0  ;;  %vm844_vm3 = vcmp.eq.f32.partialorder %v10888_v13, 0.0 }
 0x108   :  { %v702_v33 = vmul.f32 %v677_v23, %v677_v23  ;;  %v795_v37 = vsel %vm794_vm10, %v10842_v50, %v793_v4  ;;  %v814_v42 = vmul.f32 0.5, %v813_v25  ;;  %v783_v50 = vsel %vm782_vm12, %v10838_v8, %v781_v27 }
 0x109   :  { %v798_v26 = vsel %vm796_vm11, %v797_v44, %v795_v37  ;;  %v803_v40 = vsub.f32 1.5, %v802_v49  ;;  %v786_v60 = vsel %vm784_vm14, %v785_v56, %v783_v50  ;;  %vm830_vm4 = vcmp.eq.f32.partialorder %v10886_v12, inf }
 0x10a   :  { %v9936_v52 = vpop.eup %9935  ;;  %v10906_v28 = vadd.f32 %v702_v33, %v690_v16  ;;  %v861_v29 = vpack.c.bf16 %v798_v26, %v774_v34  ;;  %v815_v55 = vsub.f32 1.5, %v814_v42  ;;  %vm832_vm6 = vcmp.eq.f32.partialorder %v10886_v12, 0.0 }
 0x10b   :  { %v9938_v51 = vpop.eup %9937  ;;  %v804_v53 = vmul.f32 %v9932_v57, %v803_v40  ;;  %v824_v17 = vmul.f32 %v9936_v52, %v10886_v12  ;;  %vm1084_vm8 = vcmask 523264  }
 0x10c   :  { %1006 = vmatmul.bf16.gmra.mxu0 %v861_v29  ;;  %v836_v31 = vmul.f32 %v9938_v51, %v10888_v13  ;;  %9939 = vrsqrt.f32 %v10906_v28  ;;  %v816_v35 = vmul.f32 %v9934_v14, %v815_v55  ;;  %vm854_vm5 = vcmp.eq.f32.partialorder %v10906_v28, inf }
 0x10d   :  { %v805_v58 = vmul.f32 %v804_v53, %v10862_v46  ;;  %v825_v1 = vmul.f32 %v9936_v52, %v824_v17  ;;  %vm856_vm7 = vcmp.eq.f32.partialorder %v10906_v28, 0.0  ;;  %v10182_v29 = vmov 0.0  }
 0x10e   :  { %v837_v36 = vmul.f32 %v9938_v51, %v836_v31  ;;  %v817_v0 = vmul.f32 %v816_v35, %v10865_v30  ;;  %5118 = vst [vmem:[#allocation3 + $0x28] sm:$0xff] %v10182_v29 }
 0x10f   :  { %v807_v38 = vsel %vm806_vm13, %v10862_v46, %v805_v58  ;;  %v826_v59 = vmul.f32 0.5, %v825_v1  ;;  %5113 = vst [vmem:[#allocation3 + $0x8] sm:$0xff] %v10182_v29  ;;  %v1053_v1 = vlaneseq }
 0x110   :  { %v810_v61 = vsel %vm808_vm15, %v809_v32, %v807_v38  ;;  %v838_v62 = vmul.f32 0.5, %v837_v36  ;;  %v819_v46 = vsel %vm818_vm0, %v10865_v30, %v817_v0  ;;  %v833_v30 = vand.u32 2147483648, %v10886_v12  ;;  %5114 = vst [vmem:[#allocation3] sm:$0xff] %v10182_v29 }
 0x111   :  { %v862_v39 = vpack.c.bf16 %v810_v61, %v786_v60  ;;  %v827_v41 = vsub.f32 1.5, %v826_v59  ;;  %v822_v54 = vsel %vm820_vm2, %v821_v9, %v819_v46  ;;  %5115 = vst [vmem:[#allocation3 + $0x10] sm:$0xff] %v10182_v29  ;;  %v1054_v35 = vshrl.u32 %v1053_v1, 7 }
 0x112   :  { %v9940_v63 = vpop.eup %9939  ;;  %v839_v43 = vsub.f32 1.5, %v838_v62  ;;  %5116 = vst [vmem:[#allocation3 + $0x20] sm:$0xff] %v10182_v29 }
 0x113   :  { %1030 = vmatmul.bf16.gmra.mxu1 %v862_v39  ;;  %v848_v47 = vmul.f32 %v9940_v63, %v10906_v28  ;;  %v828_v8 = vmul.f32 %v9936_v52, %v827_v41  ;;  %5117 = vst [vmem:[#allocation3 + $0x18] sm:$0xff] %v10182_v29  ;;  %v1058_v62 = vadd.s32 32, %v1054_v35 }
 0x114   :  { %v840_v5 = vmul.f32 %v9938_v51, %v839_v43 }
 0x115   :  { %v849_v6 = vmul.f32 %v9940_v63, %v848_v47  ;;  %v829_v15 = vmul.f32 %v828_v8, %v10886_v12  ;;  %vm1064_vm9 = vcmp.lt.s32.totalorder %v1058_v62, 34  ;;  %v7696_v62 = vld [vmem:[%s14900_s3 + $0xe0] sm:$0xf0] }
 0x116   :  { %v841_v7 = vmul.f32 %v840_v5, %v10888_v13  ;;  %v7595_v5 = vsel %vm1064_vm9, 1.0, %v10182_v29 }
 0x117   :  { %v850_v48 = vmul.f32 0.5, %v849_v6  ;;  %v831_v2 = vsel %vm830_vm4, %v10886_v12, %v829_v15 }
 0x118   :  { %v843_v11 = vsel %vm842_vm1, %v10888_v13, %v841_v7  ;;  %v857_v13 = vand.u32 2147483648, %v10906_v28  ;;  %v834_v3 = vsel %vm832_vm6, %v833_v30, %v831_v2 }
 0x119   :  { %v846_v57 = vsel %vm844_vm3, %v845_v10, %v843_v11  ;;  %v851_v45 = vsub.f32 1.5, %v850_v48 }
 0x11a   :  { %v863_v14 = vpack.c.bf16 %v846_v57, %v822_v54  ;;  %v10183_v57 = vmov 2176.0  }
 0x11b   :  { %v852_v16 = vmul.f32 %v9940_v63, %v851_v45 }
 0x11c   :  { %1011 = vmatmul.bf16.gmra.mxu0 %v863_v14 }
 0x11d   :  { %v853_v18 = vmul.f32 %v852_v16, %v10906_v28 }
 0x11f   :  { %v855_v19 = vsel %vm854_vm5, %v10906_v28, %v853_v18 }
 0x120   :  { %v858_v20 = vsel %vm856_vm7, %v857_v13, %v855_v19 }
 0x121   :  { %v864_v21 = vpack.c.bf16 %v858_v20, %v834_v3 }
 0x123   :  { %1035 = vmatmul.bf16.gmra.mxu1 %v864_v21 }
 0x179   :  { %v1002_v22 = vpop.f32.mrf.mxu0 }
 0x17a   :  { %v1003_v23 = vadd.f32 1e-06, %v1002_v22 }
 0x180   :  { %v1026_v24 = vpop.f32.mrf.mxu1 }
 0x181   :  { %v1027_v4 = vadd.f32 %v1026_v24, %v1003_v23  ;;  %v1004_v44 = vpop.f32.mrf.mxu0 }
 0x182   :  { %v1005_v49 = vadd.f32 1e-06, %v1004_v44 }
 0x183   :  { %9941 = vlog2.f32 %v1027_v4 }
 0x188   :  { %v1028_v25 = vpop.f32.mrf.mxu1 }
 0x189   :  { %v9942_v33 = vpop.eup %9941  ;;  %v1029_v34 = vadd.f32 %v1028_v25, %v1005_v49  ;;  %v1007_v37 = vpop.f32.mrf.mxu0 }
 0x18a   :  { %v10941_v12 = vmul.f32 0.6931472, %v9942_v33  ;;  %v1008_v27 = vadd.f32 1e-06, %v1007_v37 }
 0x18b   :  { %9943 = vlog2.f32 %v1029_v34 }
 0x18c   :  { %v1085_v26 = vsel %vm1084_vm8, %v10941_v12, 0.0 }
 0x18d   :  { %1086 = vadd.xlane.f32.xlu0 %v1085_v26 }
 0x190   :  { %v1031_v40 = vpop.f32.mrf.mxu1 }
 0x191   :  { %v9944_v42 = vpop.eup %9943  ;;  %v1032_v52 = vadd.f32 %v1031_v40, %v1008_v27  ;;  %v1009_v28 = vpop.f32.mrf.mxu0 }
 0x192   :  { %v10945_v51 = vmul.f32 0.6931472, %v9944_v42  ;;  %v1010_v55 = vadd.f32 1e-06, %v1009_v28 }
 0x193   :  { %9945 = vlog2.f32 %v1032_v52 }
 0x194   :  { %v1088_v53 = vsel %vm1084_vm8, %v10945_v51, 0.0 }
 0x195   :  { %1089 = vadd.xlane.f32.xlu0 %v1088_v53 }
 0x198   :  { %v1033_v17 = vpop.f32.mrf.mxu1 }
 0x199   :  { %v9946_v31 = vpop.eup %9945  ;;  %v1034_v50 = vadd.f32 %v1033_v17, %v1010_v55  ;;  %v1012_v56 = vpop.f32.mrf.mxu0 }
 0x19a   :  { %v1046_v58 = vmul.f32 0.6931472, %v9946_v31  ;;  %v1013_v36 = vadd.f32 1e-06, %v1012_v56 }
 0x19b   :  { %9947 = vlog2.f32 %v1034_v50 }
 0x19c   :  { %v1091_v32 = vsel %vm1084_vm8, %v1046_v58, 0.0 }
 0x19d   :  { %1092 = vadd.xlane.f32.xlu1 %v1091_v32 }
 0x1a0   :  { %v1036_v38 = vpop.f32.mrf.mxu1 }
 0x1a1   :  { %v9948_v59 = vpop.eup %9947  ;;  %v1037_v60 = vadd.f32 %v1036_v38, %v1013_v36  ;;  %v1014_v39 = vpop.f32.mrf.mxu0  ;;  %v7694_v38 = vld [vmem:[%s14900_s3 + $0xc0] sm:$0xf] }
 0x1a2   :  { %v10950_v61 = vmul.f32 0.6931472, %v9948_v59  ;;  %v1015_v63 = vadd.f32 1e-06, %v1014_v39  ;;  %v9502_v59 = vld [vmem:[%s14900_s3 + $0xdc] sm:$0xf0] }
 0x1a3   :  { %9949 = vlog2.f32 %v1037_v60  ;;  %v9498_v60 = vld [vmem:[%s14900_s3 + $0xc4] sm:$0xf] }
 0x1a4   :  { %v1094_v41 = vsel %vm1084_vm8, %v10950_v61, 0.0  ;;  %v7699_v39 = vor.u32 %v9498_v60, %v7696_v62  ;;  %v9495_v60 = vld [vmem:[%s14900_s3 + $0xa4] sm:$0xf0] }
 0x1a5   :  { %1095 = vadd.xlane.f32.xlu1 %v1094_v41 }
 0x1a6   :  { %1437 = vmatpush.bf16.msrb.mxu0 %v7699_v39  ;;  %9906 = vmatpush.bf16.msra.mxu3 %v7699_v39  ;;  %v7678_v39 = vld [vmem:[%s14900_s3 + $0x90] sm:$0xf] }
 0x1a8   :  { %v1038_v0 = vpop.f32.mrf.mxu1 }
 0x1a9   :  { %v9950_v43 = vpop.eup %9949  ;;  %v1039_v47 = vadd.f32 %v1038_v0, %v1015_v63 }
 0x1aa   :  { %v1050_v8 = vmul.f32 0.6931472, %v9950_v43 }
 0x1ab   :  { %9951 = vlog2.f32 %v1039_v47 }
 0x1ac   :  { %v1082_v6 = vmul.f32 %v7595_v5, %v1050_v8  ;;  %9953 = vrcp.f32 %v10183_v57  ;;  %v9490_v57 = vld [vmem:[%s14900_s3 + $0x84] sm:$0xf] }
 0x1ae   :  { %v1097_v46 = vsel %vm1084_vm8, %v1082_v6, 0.0  ;;  %v7704_v6 = vld [vmem:[%s14900_s3 + $0xe8] sm:$0xf0] }
 0x1af   :  { %1098 = vadd.xlane.f32.xlu2 %v1097_v46 }
 0x1b1   :  { %v9952_v7 = vpop.eup %9951 }
 0x1b2   :  { %v1052_v9 = vmul.f32 0.6931472, %v9952_v7  ;;  %v9954_v14 = vpop.eup %9953 }
 0x1b3   :  { %v1115_v30 = vmul.f32 2176.0, %v9954_v14  ;;  %vm1119_vm10 = vweird.f32 %v9954_v14 }
 0x1b4   :  { %v1083_v10 = vmul.f32 0.0, %v1052_v9 }
 0x1b5   :  { %v1116_v3 = vsub.f32 1.0, %v1115_v30 }
 0x1b6   :  { %v1100_v48 = vsel %vm1084_vm8, %v1083_v10, 0.0 }
 0x1b7   :  { %1101 = vadd.xlane.f32.xlu2 %v1100_v48  ;;  %v1117_v23 = vmul.f32 %v9954_v14, %v1116_v3  ;;  %v9486_v3 = vld [vmem:[%s14900_s3 + $0x5c] sm:$0xf0] }
 0x1b9   :  { %v1118_v44 = vadd.f32 %v9954_v14, %v1117_v23  ;;  %v7632_v23 = vld [vmem:[%s14900_s3 + $0x60] sm:$0xf0] }
 0x1bb   :  { %v10956_v33 = vsel %vm1119_vm10, %v9954_v14, %v1118_v44  ;;  %v7664_v14 = vld [vmem:[%s14900_s3 + $0xa0] sm:$0xf0] }
 0x200   :  { %v1087_v11 = vpop.xlane.xlu0 %1086 }
 0x208   :  { %v1090_v15 = vpop.xlane.xlu0 %1089 }
 0x209   :  { %v1103_v16 = vadd.f32 %v1090_v15, %v1087_v11  ;;  %v7662_v11 = vld [vmem:[%s14900_s3 + $0x80] sm:$0xf] }
 0x210   :  { %v1093_v54 = vpop.xlane.xlu1 %1092 }
 0x211   :  { %v1104_v18 = vadd.f32 %v1103_v16, %v1093_v54  ;;  %v9494_v54 = vld [vmem:[%s14900_s3 + $0x9c] sm:$0xf0]  ;;  %v9491_v16 = vld [vmem:[%s14900_s3 + $0x8c] sm:$0xf] }
 0x218   :  { %v1096_v2 = vpop.xlane.xlu1 %1095 }
 0x219   :  { %v1105_v13 = vadd.f32 %v1104_v18, %v1096_v2  ;;  %v7672_v2 = vld [vmem:[%s14900_s3 + $0xa8] sm:$0xf0]  ;;  %v7667_v18 = vor.u32 %v9490_v57, %v7664_v14  ;;  %v7680_v14 = vld [vmem:[%s14900_s3 + $0xb0] sm:$0xf0] }
 0x21a   :  { %v7675_v30 = vor.u32 %v9491_v16, %v7672_v2  ;;  %v7646_v2 = vld [vmem:[%s14900_s3 + $0x50] sm:$0xf] }
 0x21b   :  { %1438 = vmatpush.bf16.msrb.mxu0 %v7667_v18  ;;  %9907 = vmatpush.bf16.msra.mxu3 %v7667_v18  ;;  %v9488_v18 = vld [vmem:[%s14900_s3 + $0x6c] sm:$0xf0] }
 0x222   :  { %v1099_v45 = vpop.xlane.xlu2 %1098 }
 0x223   :  { %v1106_v19 = vadd.f32 %v1105_v13, %v1099_v45  ;;  %v7663_v45 = vor.u32 %v9494_v54, %v7662_v11  ;;  %v9501_v11 = vld [vmem:[%s14900_s3 + $0xdc] sm:$0xf] }
 0x22a   :  { %v1102_v20 = vpop.xlane.xlu2 %1101 }
 0x22b   :  { %v1107_v21 = vadd.f32 %v1106_v19, %v1102_v20  ;;  %v7630_v19 = vld [vmem:[%s14900_s3 + $0x40] sm:$0xf]  ;;  %v9482_v20 = vld [vmem:[%s14900_s3 + $0x44] sm:$0xf] }
 0x22c   :  { %v7635_v44 = vor.u32 %v9482_v20, %v7632_v23  ;;  %v7648_v20 = vld [vmem:[%s14900_s3 + $0x70] sm:$0xf0]  ;;  %v7688_v23 = vld [vmem:[%s14900_s3 + $0xb8] sm:$0xf0] }
 0x22d   :  { %v1108_v22 = vrot.slane %v1107_v21, 4 }
 0x22e   :  { %1439 = vmatpush.bf16.msrb.mxu0 %v7635_v44  ;;  %9908 = vmatpush.bf16.msra.mxu3 %v7635_v44 }
 0x22f   :  { %v1109_v24 = vadd.f32 %v1108_v22, %v1107_v21  ;;  %v7631_v22 = vor.u32 %v9486_v3, %v7630_v19  ;;  %v7647_v19 = vor.u32 %v9488_v18, %v7646_v2  ;;  %v9484_v3 = vld [vmem:[%s14900_s3 + $0x54] sm:$0xf]  ;;  %v7830_v18 = vld [vmem:[%s14902_s5 + $0xa0] sm:$0xf] }
 0x230   :  { %v7651_v44 = vor.u32 %v9484_v3, %v7648_v20  ;;  %v8230_v3 = vld [vmem:[%s14902_s5 + $0x3c0] sm:$0xf]  ;;  %v9628_v20 = vld [vmem:[%s14902_s5 + $0x3cc] sm:$0xf0] }
 0x231   :  { %v1110_v4 = vrot.slane %v1109_v24, 2 }
 0x233   :  { %v1111_v49 = vadd.f32 %v1110_v4, %v1109_v24  ;;  %v9483_v24 = vld [vmem:[%s14900_s3 + $0x4c] sm:$0xf] }
 0x234   :  { %v7640_v4 = vld [vmem:[%s14900_s3 + $0x68] sm:$0xf0] }
 0x235   :  { %v1112_v25 = vrot.slane %v1111_v49, 1 }
 0x237   :  { %v1113_v34 = vadd.f32 %v1112_v25, %v1111_v49  ;;  %v7598_v49 = vld [vmem:[%s14900_s3] sm:$0xf] }
 0x238   :  { %v9478_v25 = vld [vmem:[%s14900_s3 + $0x1c] sm:$0xf0] }
 0x239   :  { %v1121_v37 = vmul.f32 %v10956_v33, %v1113_v34  ;;  %v9474_v34 = vld [vmem:[%s14900_s3 + $0x4] sm:$0xf] }
 0x23b   :  { %v10959_v26 = vsub.f32 %v1046_v58, %v1121_v37  ;;  %v10962_v27 = vsub.f32 %v10945_v51, %v1121_v37  ;;  %v10965_v40 = vsub.f32 %v10941_v12, %v1121_v37  ;;  %v10967_v42 = vsub.f32 %v1052_v9, %v1121_v37 }
 0x23c   :  { %v10969_v52 = vsub.f32 %v1050_v8, %v1121_v37  ;;  %v10983_v50 = vsub.f32 %v10950_v61, %v1121_v37  ;;  %v7695_v61 = vor.u32 %v9502_v59, %v7694_v38  ;;  %v9499_v8 = vld [vmem:[%s14900_s3 + $0xcc] sm:$0xf]  ;;  %v7643_v37 = vor.u32 %v9483_v24, %v7640_v4  ;;  %v7670_v38 = vld [vmem:[%s14900_s3 + $0x88] sm:$0xf] }
 0x23d   :  { %v1136_v28 = vmul.f32 %v10959_v26, %v10959_v26  ;;  %v1135_v29 = vmul.f32 %v10962_v27, %v10962_v27  ;;  %v1134_v53 = vmul.f32 %v10965_v40, %v10965_v40  ;;  %v1133_v55 = vmul.f32 0.0, %v10967_v42 }
 0x23e   :  { %v1132_v31 = vmul.f32 %v7595_v5, %v10969_v52  ;;  %v1137_v1 = vmul.f32 %v10983_v50, %v10983_v50  ;;  %1413 = vmatpush.bf16.msra.mxu2 %v7695_v61  ;;  %v7707_v7 = vor.u32 %v9499_v8, %v7704_v6  ;;  %v7671_v62 = vor.u32 %v9495_v60, %v7670_v38  ;;  %v7606_v6 = vld [vmem:[%s14900_s3 + $0x8] sm:$0xf]  ;;  %v9489_v38 = vld [vmem:[%s14900_s3 + $0x74] sm:$0xf0]  ;;  %v9477_v60 = vld [vmem:[%s14900_s3 + $0x1c] sm:$0xf] }
 0x23f   :  { %v1146_v51 = vsel %vm1084_vm8, %v1136_v28, 0.0  ;;  %v1143_v12 = vsel %vm1084_vm8, %v1135_v29, 0.0  ;;  %v1140_v17 = vsel %vm1084_vm8, %v1134_v53, 0.0  ;;  %v1139_v56 = vmul.f32 %v1133_v55, %v1133_v55  ;;  %v7600_v53 = vld [vmem:[%s14900_s3 + $0x20] sm:$0xf0] }
 0x240   :  { %1147 = vadd.xlane.f32.xlu2 %v1146_v51  ;;  %1144 = vadd.xlane.f32.xlu1 %v1143_v12  ;;  %v1138_v58 = vmul.f32 %v1132_v31, %v1132_v31  ;;  %v1149_v36 = vsel %vm1084_vm8, %v1137_v1, 0.0  ;;  %v7599_v29 = vor.u32 %v9478_v25, %v7598_v49  ;;  %v9475_v55 = vld [vmem:[%s14900_s3 + $0xc] sm:$0xf]  ;;  %v7603_v51 = vor.u32 %v9474_v34, %v7600_v53  ;;  %v7710_v1 = vld [vmem:[%s14900_s3 + $0xd0] sm:$0xf] }
 0x241   :  { %1141 = vadd.xlane.f32.xlu0 %v1140_v17  ;;  %v1155_v32 = vsel %vm1084_vm8, %v1139_v56, 0.0  ;;  %1485 = vmatpush.bf16.msrb.mxu1 %v7707_v7  ;;  %v7608_v12 = vld [vmem:[%s14900_s3 + $0x28] sm:$0xf0]  ;;  %v7702_v56 = vld [vmem:[%s14900_s3 + $0xc8] sm:$0xf] }
 0x242   :  { %v1152_v35 = vsel %vm1084_vm8, %v1138_v58, 0.0  ;;  %1414 = vmatpush.bf16.msra.mxu2 %v7663_v45  ;;  %v7611_v31 = vor.u32 %v9475_v55, %v7608_v12  ;;  %v9503_v58 = vld [vmem:[%s14900_s3 + $0xe4] sm:$0xf0]  ;;  %1440 = vmatpush.bf16.msrb.mxu0 %v7603_v51  ;;  %v9492_v45 = vld [vmem:[%s14900_s3 + $0x94] sm:$0xf] }
 0x243   :  { %9909 = vmatpush.bf16.msra.mxu3 %v7603_v51  ;;  %v7718_v49 = vld [vmem:[%s14900_s3 + $0xd8] sm:$0xf] }
 0x244   :  { %v9505_v34 = vld [vmem:[%s14900_s3 + $0xf4] sm:$0xf0] }
 0x245   :  { %1486 = vmatpush.bf16.msrb.mxu1 %v7675_v30 }
 0x246   :  { %1415 = vmatpush.bf16.msra.mxu2 %v7631_v22  ;;  %v9493_v22 = vld [vmem:[%s14900_s3 + $0x9c] sm:$0xf] }
 0x247   :  { %v7691_v24 = vor.u32 %v9493_v22, %v7688_v23  ;;  %v8102_v22 = vld [vmem:[%s14902_s5 + $0x2c0] sm:$0xf]  ;;  %v9596_v23 = vld [vmem:[%s14902_s5 + $0x2cc] sm:$0xf0] }
 0x248   :  { %1156 = vadd.xlane.f32.xlu2 %v1155_v32  ;;  %1153 = vadd.xlane.f32.xlu1 %v1152_v35  ;;  %v7703_v35 = vor.u32 %v9503_v58, %v7702_v56  ;;  %v7686_v58 = vld [vmem:[%s14900_s3 + $0x98] sm:$0xf] }
 0x249   :  { %1150 = vadd.xlane.f32.xlu0 %v1149_v36  ;;  %1487 = vmatpush.bf16.msrb.mxu1 %v7643_v37  ;;  %v9504_v36 = vld [vmem:[%s14900_s3 + $0xec] sm:$0xf0]  ;;  %v9476_v37 = vld [vmem:[%s14900_s3 + $0x14] sm:$0xf] }
 0x24a   :  { %1416 = vmatpush.bf16.msra.mxu2 %v7599_v29  ;;  %v7711_v59 = vor.u32 %v9504_v36, %v7710_v1  ;;  %1461 = vmatpush.bf16.msra.mxu0 %v7703_v35  ;;  %v9485_v35 = vld [vmem:[%s14900_s3 + $0x5c] sm:$0xf] }
 0x24b   :  { %v7656_v36 = vld [vmem:[%s14900_s3 + $0x78] sm:$0xf0] }
 0x24d   :  { %1488 = vmatpush.bf16.msrb.mxu1 %v7611_v31  ;;  %v7719_v31 = vor.u32 %v9505_v34, %v7718_v49  ;;  %v9624_v49 = vld [vmem:[%s14902_s5 + $0x3ac] sm:$0xf0]  ;;  %v7814_v34 = vld [vmem:[%s14902_s5 + $0x80] sm:$0xf] }
 0x24e   :  { %1509 = vmatpush.bf16.msrb.mxu2 %v7711_v59  ;;  %1462 = vmatpush.bf16.msra.mxu0 %v7671_v62  ;;  %v7659_v59 = vor.u32 %v9485_v35, %v7656_v36 }
 0x2b3   :  { %v1145_v41 = vpop.xlane.xlu1 %1144  ;;  %v1148_v0 = vpop.xlane.xlu2 %1147 }
 0x2b4   :  { %v1142_v63 = vpop.xlane.xlu0 %1141 }
 0x2b5   :  { %v1158_v43 = vadd.f32 %v1145_v41, %v1142_v63  ;;  %v7638_v41 = vld [vmem:[%s14900_s3 + $0x48] sm:$0xf] }
 0x2b6   :  { %v9487_v63 = vld [vmem:[%s14900_s3 + $0x64] sm:$0xf0] }
 0x2b7   :  { %v1159_v47 = vadd.f32 %v1158_v43, %v1148_v0  ;;  %v9496_v0 = vld [vmem:[%s14900_s3 + $0xac] sm:$0xf0]  ;;  %v7639_v8 = vor.u32 %v9487_v63, %v7638_v41 }
 0x2b9   :  { %1463 = vmatpush.bf16.msra.mxu0 %v7639_v8  ;;  %v7990_v8 = vld [vmem:[%s14902_s5 + $0x1e0] sm:$0xf] }
 0x2bb   :  { %v1154_v9 = vpop.xlane.xlu1 %1153  ;;  %v1157_v48 = vpop.xlane.xlu2 %1156 }
 0x2bc   :  { %v1151_v5 = vpop.xlane.xlu0 %1150 }
 0x2bd   :  { %v1160_v46 = vadd.f32 %v1159_v47, %v1151_v5  ;;  %v7679_v47 = vor.u32 %v9496_v0, %v7678_v39 }
 0x2bf   :  { %v1161_v10 = vadd.f32 %v1160_v46, %v1154_v9  ;;  %v9479_v46 = vld [vmem:[%s14900_s3 + $0x24] sm:$0xf0]  ;;  %1510 = vmatpush.bf16.msrb.mxu2 %v7679_v47  ;;  %v7862_v47 = vld [vmem:[%s14902_s5 + $0xe0] sm:$0xf] }
 0x2c0   :  { %v7607_v7 = vor.u32 %v9479_v46, %v7606_v6  ;;  %v9568_v46 = vld [vmem:[%s14902_s5 + $0x1ec] sm:$0xf0] }
 0x2c1   :  { %v1162_v15 = vadd.f32 %v1161_v10, %v1157_v48  ;;  %v7712_v48 = vld [vmem:[%s14900_s3 + $0xf0] sm:$0xf0] }
 0x2c2   :  { %1464 = vmatpush.bf16.msra.mxu0 %v7607_v7  ;;  %v7846_v7 = vld [vmem:[%s14902_s5 + $0xc0] sm:$0xf] }
 0x2c3   :  { %v1163_v13 = vrot.slane %v1162_v15, 4  ;;  %1511 = vmatpush.bf16.msrb.mxu2 %v7647_v19  ;;  %v9560_v19 = vld [vmem:[%s14902_s5 + $0x1ac] sm:$0xf0] }
 0x2c5   :  { %v1164_v21 = vadd.f32 %v1163_v13, %v1162_v15  ;;  %v7720_v15 = vld [vmem:[%s14900_s3 + $0xf8] sm:$0xf0]  ;;  %v7683_v13 = vor.u32 %v9492_v45, %v7680_v14  ;;  %v9632_v45 = vld [vmem:[%s14902_s5 + $0x3ec] sm:$0xf0] }
 0x2c6   :  { %v7723_v16 = vor.u32 %v9501_v11, %v7720_v15  ;;  %v8118_v11 = vld [vmem:[%s14902_s5 + $0x2e0] sm:$0xf] }
 0x2c7   :  { %v1165_v28 = vrot.slane %v1164_v21, 2  ;;  %v8246_v15 = vld [vmem:[%s14902_s5 + $0x3e0] sm:$0xf] }
 0x2c8   :  { %1581 = vmatpush.bf16.msra.mxu1 %v7723_v16  ;;  %v8247_v2 = vor.u32 %v9632_v45, %v8246_v15  ;;  %v7878_v15 = vld [vmem:[%s14902_s5 + $0x100] sm:$0xf] }
 0x2c9   :  { %v1166_v17 = vadd.f32 %v1165_v28, %v1164_v21  ;;  %v7616_v28 = vld [vmem:[%s14900_s3 + $0x30] sm:$0xf0] }
 0x2ca   :  { %v7619_v56 = vor.u32 %v9476_v37, %v7616_v28  ;;  %v9524_v37 = vld [vmem:[%s14902_s5 + $0x8c] sm:$0xf0]  ;;  %v8086_v28 = vld [vmem:[%s14902_s5 + $0x2a0] sm:$0xf] }
 0x2cb   :  { %v1167_v32 = vrot.slane %v1166_v17, 1 }
 0x2cc   :  { %1582 = vmatpush.bf16.msra.mxu1 %v7691_v24 }
 0x2cd   :  { %v1168_v61 = vadd.f32 %v1167_v32, %v1166_v17  ;;  %v7654_v32 = vld [vmem:[%s14900_s3 + $0x58] sm:$0xf] }
 0x2ce   :  { %v7655_v39 = vor.u32 %v9489_v38, %v7654_v32  ;;  %v9552_v32 = vld [vmem:[%s14902_s5 + $0x16c] sm:$0xf0]  ;;  %v8182_v38 = vld [vmem:[%s14902_s5 + $0x360] sm:$0xf] }
 0x2cf   :  { %v1169_v43 = vmul.f32 %v1168_v61, %v10956_v33  ;;  %v9500_v33 = vld [vmem:[%s14900_s3 + $0xd4] sm:$0xf]  ;;  %v7624_v61 = vld [vmem:[%s14900_s3 + $0x38] sm:$0xf0] }
 0x2d0   :  { %v7715_v57 = vor.u32 %v9500_v33, %v7712_v48  ;;  %1583 = vmatpush.bf16.msra.mxu1 %v7659_v59  ;;  %v7627_v62 = vor.u32 %v9477_v60, %v7624_v61  ;;  %v7974_v33 = vld [vmem:[%s14902_s5 + $0x1c0] sm:$0xf]  ;;  %v9564_v48 = vld [vmem:[%s14902_s5 + $0x1cc] sm:$0xf0] }
 0x2d1   :  { %v1170_v5 = vadd.f32 1e-05, %v1169_v43  ;;  %v7622_v43 = vld [vmem:[%s14900_s3 + $0x18] sm:$0xf]  ;;  %v7975_v14 = vor.u32 %v9564_v48, %v7974_v33  ;;  %v9616_v59 = vld [vmem:[%s14902_s5 + $0x36c] sm:$0xf0] }
 0x2d2   :  { %1533 = vmatpush.bf16.msrb.mxu3 %v7715_v57  ;;  %v9600_v57 = vld [vmem:[%s14902_s5 + $0x2ec] sm:$0xf0]  ;;  %v8070_v60 = vld [vmem:[%s14902_s5 + $0x280] sm:$0xf] }
 0x2d3   :  { %9955 = vrsqrt.f32 %v1170_v5  ;;  %vm1177_vm12 = vweird.f32 %v1170_v5  ;;  %v8119_v16 = vor.u32 %v9600_v57, %v8118_v11  ;;  %v9588_v61 = vld [vmem:[%s14902_s5 + $0x28c] sm:$0xf0] }
 0x2d4   :  { %1584 = vmatpush.bf16.msra.mxu1 %v7627_v62  ;;  %v7782_v62 = vld [vmem:[%s14902_s5 + $0x40] sm:$0xf]  ;;  %v9608_v33 = vld [vmem:[%s14902_s5 + $0x32c] sm:$0xf0] }
 0x2d5   :  { %v9512_v57 = vld [vmem:[%s14902_s5 + $0x2c] sm:$0xf0] }
 0x2d6   :  { %1534 = vmatpush.bf16.msrb.mxu3 %v7683_v13  ;;  %v7958_v13 = vld [vmem:[%s14902_s5 + $0x1a0] sm:$0xf] }
 0x2d9   :  { %v9956_v9 = vpop.eup %9955 }
 0x2da   :  { %v1172_v10 = vmul.f32 %v9956_v9, %v1170_v5  ;;  %vm1178_vm11 = vweird.f32 %v9956_v9  ;;  %1535 = vmatpush.bf16.msrb.mxu3 %v7651_v44  ;;  %v9536_v5 = vld [vmem:[%s14902_s5 + $0xec] sm:$0xf0]  ;;  %v8214_v44 = vld [vmem:[%s14902_s5 + $0x3a0] sm:$0xf] }
 0x2db   :  { %vm1179_vm13 = vmor %vm1177_vm12, %vm1178_vm11  ;;  %v7863_v6 = vor.u32 %v9536_v5, %v7862_v47  ;;  %v9612_v47 = vld [vmem:[%s14902_s5 + $0x34c] sm:$0xf0] }
 0x2dc   :  { %v1173_v54 = vmul.f32 %v9956_v9, %v1172_v10  ;;  %v7991_v10 = vor.u32 %v9568_v46, %v7990_v8  ;;  %v8054_v8 = vld [vmem:[%s14902_s5 + $0x260] sm:$0xf] }
 0x2dd   :  { %v7894_v46 = vld [vmem:[%s14902_s5 + $0x120] sm:$0xf] }
 0x2de   :  { %v1174_v30 = vmul.f32 0.5, %v1173_v54  ;;  %1536 = vmatpush.bf16.msrb.mxu3 %v7619_v56  ;;  %v8198_v56 = vld [vmem:[%s14902_s5 + $0x380] sm:$0xf] }
 0x2e0   :  { %v1175_v21 = vsub.f32 1.5, %v1174_v30  ;;  %v9528_v30 = vld [vmem:[%s14902_s5 + $0xac] sm:$0xf0] }
 0x2e1   :  { %v7831_v24 = vor.u32 %v9528_v30, %v7830_v18 }
 0x2e2   :  { %v1176_v4 = vmul.f32 %v9956_v9, %v1175_v21  ;;  %v8231_v21 = vor.u32 %v9628_v20, %v8230_v3  ;;  %v7750_v20 = vld [vmem:[%s14902_s5] sm:$0xf] }
 0x2e4   :  { %v1180_v25 = vsel %vm1179_vm13, %v9956_v9, %v1176_v4  ;;  %v9532_v9 = vld [vmem:[%s14902_s5 + $0xcc] sm:$0xf0]  ;;  %v8103_v4 = vor.u32 %v9596_v23, %v8102_v22  ;;  %v8022_v23 = vld [vmem:[%s14902_s5 + $0x220] sm:$0xf] }
 0x2e5   :  { %v1181_v29 = vmul.f32 %v1180_v25, %v10965_v40  ;;  %v1182_v53 = vmul.f32 %v1180_v25, %v10962_v27  ;;  %v1183_v55 = vmul.f32 %v1180_v25, %v10959_v26  ;;  %v1184_v51 = vmul.f32 %v1180_v25, %v10983_v50  ;;  %v9497_v40 = vld [vmem:[%s14900_s3 + $0xb4] sm:$0xf0]  ;;  %v7614_v26 = vld [vmem:[%s14900_s3 + $0x10] sm:$0xf] }
 0x2e6   :  { %v9480_v27 = vld [vmem:[%s14900_s3 + $0x2c] sm:$0xf0]  ;;  %v7687_v50 = vor.u32 %v9497_v40, %v7686_v58  ;;  %v1185_v41 = vmul.f32 %v1180_v25, %v10969_v52  ;;  %v1186_v63 = vmul.f32 %v1180_v25, %v10967_v42  ;;  %v9481_v42 = vld [vmem:[%s14900_s3 + $0x34] sm:$0xf0]  ;;  %v7847_v54 = vor.u32 %v9532_v9, %v7846_v7  ;;  %v7798_v40 = vld [vmem:[%s14902_s5 + $0x60] sm:$0xf] }
 0x2e7   :  { %v1187_v12 = vpack.c.bf16 %v1182_v53, %v1181_v29  ;;  %v11151_v17 = vpack.c.bf16 %v1184_v51, %v1183_v55  ;;  %v7615_v1 = vor.u32 %v9480_v27, %v7614_v26  ;;  %v7623_v52 = vor.u32 %v9481_v42, %v7622_v43  ;;  %v9592_v29 = vld [vmem:[%s14902_s5 + $0x2ac] sm:$0xf0]  ;;  %v7942_v55 = vld [vmem:[%s14902_s5 + $0x180] sm:$0xf] }
 0x2e8   :  { %v11190_v0 = vpack.c.bf16 %v1186_v63, %v1185_v41  ;;  %v7959_v25 = vor.u32 %v9560_v19, %v7958_v13  ;;  %v8215_v53 = vor.u32 %v9624_v49, %v8214_v44  ;;  %v9556_v51 = vld [vmem:[%s14902_s5 + $0x18c] sm:$0xf0]  ;;  %v7910_v63 = vld [vmem:[%s14902_s5 + $0x140] sm:$0xf] }
 0x2e9   :  { %7724 = vmatmul.msk.bf16.vlgmr.msra.gmra.mxu2 %vm1084_vm8, %v1187_v12  ;;  %7727 = vmatmul.msk.bf16.vlgmr.msrb.gmra.mxu0 %vm1084_vm8, %v1187_v12  ;;  %v9620_v58 = vld [vmem:[%s14902_s5 + $0x38c] sm:$0xf0]  ;;  %v7943_v27 = vor.u32 %v9556_v51, %v7942_v55  ;;  %v8038_v13 = vld [vmem:[%s14902_s5 + $0x240] sm:$0xf] }
 0x2ea   :  { %7728 = vmatmul.msk.bf16.vlgmr.msra.gmra.mxu3 %vm1084_vm8, %v11151_v17  ;;  %7733 = vmatmul.msk.bf16.vlgmr.msrb.gmra.mxu1 %vm1084_vm8, %v1187_v12  ;;  %v9520_v26 = vld [vmem:[%s14902_s5 + $0x6c] sm:$0xf0]  ;;  %v8358_v55 = vld [vmem:[%s14902_s5 + $0x4c0] sm:$0xf] }
 0x2eb   :  { %1557 = vmatpush.bf16.msrb.mxu0 %v7719_v31  ;;  %1512 = vmatpush.bf16.msrb.mxu2 %v7615_v1  ;;  %v7815_v31 = vor.u32 %v9524_v37, %v7814_v34  ;;  %v7926_v1 = vld [vmem:[%s14902_s5 + $0x160] sm:$0xf]  ;;  %v7799_v35 = vor.u32 %v9520_v26, %v7798_v40  ;;  %v9516_v41 = vld [vmem:[%s14902_s5 + $0x4c] sm:$0xf0] }
 0x2ec   :  { %3243 = vmatpush.bf16.msra.mxu3 %v7991_v10  ;;  %3291 = vmatpush.bf16.msrb.mxu1 %v8247_v2  ;;  %v7927_v36 = vor.u32 %v9552_v32, %v7926_v1  ;;  %v7783_v43 = vor.u32 %v9516_v41, %v7782_v62  ;;  %v9544_v9 = vld [vmem:[%s14902_s5 + $0x12c] sm:$0xf0]  ;;  %v8150_v10 = vld [vmem:[%s14902_s5 + $0x320] sm:$0xf] }
 0x2ed   :  { %v7895_v48 = vor.u32 %v9544_v9, %v7894_v46  ;;  %v8151_v11 = vor.u32 %v9608_v33, %v8150_v10  ;;  %v9604_v2 = vld [vmem:[%s14902_s5 + $0x30c] sm:$0xf0]  ;;  %v8502_v34 = vld [vmem:[%s14902_s5 + $0x5e0] sm:$0xf] }
 0x2ee   :  { %v9580_v19 = vld [vmem:[%s14902_s5 + $0x24c] sm:$0xf0]  ;;  %v8758_v1 = vld [vmem:[%s14902_s5 + $0x7e0] sm:$0xf] }
 0x2ef   :  { %1558 = vmatpush.bf16.msrb.mxu0 %v7687_v50  ;;  %3219 = vmatpush.bf16.msra.mxu2 %v7863_v6  ;;  %v8199_v50 = vor.u32 %v9620_v58, %v8198_v56  ;;  %v9584_v6 = vld [vmem:[%s14902_s5 + $0x26c] sm:$0xf0]  ;;  %v8039_v3 = vor.u32 %v9580_v19, %v8038_v13  ;;  %v11452_v58 = vld [vmem:[%s14901_s4] sm:$0xff] }
 0x2f0   :  { %3244 = vmatpush.bf16.msra.mxu3 %v7975_v14  ;;  %3292 = vmatpush.bf16.msrb.mxu1 %v8231_v21  ;;  %v8055_v7 = vor.u32 %v9584_v6, %v8054_v8  ;;  %v9540_v14 = vld [vmem:[%s14902_s5 + $0x10c] sm:$0xf0]  ;;  %v8614_v6 = vld [vmem:[%s14902_s5 + $0x6c0] sm:$0xf]  ;;  %v11501_v33 = vperm.slane %v11452_v58, 0 }
 0x2f1   :  { %v7879_v18 = vor.u32 %v9540_v14, %v7878_v15  ;;  %v9508_v21 = vld [vmem:[%s14902_s5 + $0xc] sm:$0xf0] }
 0x2f2   :  { %v7751_v22 = vor.u32 %v9508_v21, %v7750_v20  ;;  %v9664_v49 = vld [vmem:[%s14902_s5 + $0x4ec] sm:$0xf0] }
 0x2f3   :  { %1559 = vmatpush.bf16.msrb.mxu0 %v7655_v39  ;;  %3220 = vmatpush.bf16.msra.mxu2 %v7847_v54  ;;  %v8071_v39 = vor.u32 %v9588_v61, %v8070_v60  ;;  %v7766_v54 = vld [vmem:[%s14902_s5 + $0x20] sm:$0xf]  ;;  %v9696_v37 = vld [vmem:[%s14902_s5 + $0x5ec] sm:$0xf0] }
 0x2f4   :  { %3245 = vmatpush.bf16.msra.mxu3 %v7959_v25  ;;  %3293 = vmatpush.bf16.msrb.mxu1 %v8215_v53  ;;  %v7767_v45 = vor.u32 %v9512_v57, %v7766_v54  ;;  %v9572_v53 = vld [vmem:[%s14902_s5 + $0x20c] sm:$0xf0]  ;;  %v8342_v61 = vld [vmem:[%s14902_s5 + $0x4a0] sm:$0xf] }
 0x2f5   :  { %v9692_v56 = vld [vmem:[%s14902_s5 + $0x5cc] sm:$0xf0]  ;;  %v8326_v57 = vld [vmem:[%s14902_s5 + $0x480] sm:$0xf] }
 0x2f6   :  { %v9760_v32 = vld [vmem:[%s14902_s5 + $0x7ec] sm:$0xf0] }
 0x2f7   :  { %1560 = vmatpush.bf16.msrb.mxu0 %v7623_v52  ;;  %3221 = vmatpush.bf16.msra.mxu2 %v7831_v24  ;;  %v8166_v52 = vld [vmem:[%s14902_s5 + $0x340] sm:$0xf]  ;;  %v9576_v24 = vld [vmem:[%s14902_s5 + $0x22c] sm:$0xf0] }
 0x2f8   :  { %3246 = vmatpush.bf16.msra.mxu3 %v7943_v27  ;;  %3294 = vmatpush.bf16.msrb.mxu1 %v8199_v50  ;;  %v8167_v5 = vor.u32 %v9612_v47, %v8166_v52  ;;  %v8023_v44 = vor.u32 %v9576_v24, %v8022_v23  ;;  %v9656_v62 = vld [vmem:[%s14902_s5 + $0x4ac] sm:$0xf0]  ;;  %v8454_v23 = vld [vmem:[%s14902_s5 + $0x580] sm:$0xf] }
 0x2f9   :  { %7725 = vmatmul.msk.bf16.gmra.mxu2 %vm1084_vm8, %v11151_v17  ;;  %7730 = vmatmul.msk.bf16.vlgmr.msra.gmra.mxu0 %vm1084_vm8, %v1187_v12  ;;  %v9724_v46 = vld [vmem:[%s14902_s5 + $0x6cc] sm:$0xf0] }
 0x2fa   :  { %7729 = vmatmul.msk.bf16.gmra.mxu3 %vm1084_vm8, %v11190_v0  ;;  %7734 = vmatmul.msk.bf16.gmra.mxu1 %vm1084_vm8, %v11151_v17  ;;  %v8615_v10 = vor.u32 %v9724_v46, %v8614_v6  ;;  %v9652_v15 = vld [vmem:[%s14902_s5 + $0x48c] sm:$0xf0]  ;;  %v8678_v6 = vld [vmem:[%s14902_s5 + $0x740] sm:$0xf] }
 0x2fb   :  { %3267 = vmatpush.bf16.msra.mxu0 %v8119_v16  ;;  %3222 = vmatpush.bf16.msra.mxu2 %v7815_v31  ;;  %v8134_v16 = vld [vmem:[%s14902_s5 + $0x300] sm:$0xf]  ;;  %v9684_v24 = vld [vmem:[%s14902_s5 + $0x58c] sm:$0xf0] }
 0x2fc   :  { %3247 = vmatpush.bf16.msra.mxu3 %v7927_v36  ;;  %v8135_v30 = vor.u32 %v9604_v2, %v8134_v16  ;;  %v8486_v31 = vld [vmem:[%s14902_s5 + $0x5c0] sm:$0xf]  ;;  %v8759_v36 = vor.u32 %v9760_v32, %v8758_v1  ;;  %v8327_v16 = vor.u32 %v9652_v15, %v8326_v57  ;;  %v11558_v32 = vperm.slane %v11452_v58, 2  ;;  %v9740_v46 = vld [vmem:[%s14902_s5 + $0x74c] sm:$0xf0] }
 0x2fd   :  { %v8487_v27 = vor.u32 %v9692_v56, %v8486_v31  ;;  %v8726_v2 = vld [vmem:[%s14902_s5 + $0x7a0] sm:$0xf] }
 0x2ff   :  { %3268 = vmatpush.bf16.msra.mxu0 %v8103_v4  ;;  %3223 = vmatpush.bf16.msra.mxu2 %v7799_v35  ;;  %v8374_v4 = vld [vmem:[%s14902_s5 + $0x4e0] sm:$0xf]  ;;  %v11461_v35 = vperm.slane %v11452_v58, 1 }
 0x300   :  { %v8375_v25 = vor.u32 %v9664_v49, %v8374_v4  ;;  %v8598_v4 = vld [vmem:[%s14902_s5 + $0x6a0] sm:$0xf] }
 0x303   :  { %3224 = vmatpush.bf16.msra.mxu2 %v7783_v43  ;;  %v8742_v43 = vld [vmem:[%s14902_s5 + $0x7c0] sm:$0xf] }
 0x307   :  { %3225 = vmatpush.bf16.msra.mxu2 %v7767_v45 }
 0x309   :  { %7726 = vmatmul.msk.bf16.gmra.mxu2 %vm1084_vm8, %v11190_v0  ;;  %7731 = vmatmul.msk.bf16.gmra.mxu0 %vm1084_vm8, %v11151_v17 }
 0x30a   :  { %7735 = vmatmul.msk.bf16.gmra.mxu1 %vm1084_vm8, %v11190_v0  ;;  %7739 = vmatmul.msk.bf16.vlgmr.msrb.gmra.mxu3 %vm1084_vm8, %v1187_v12 }
 0x30b   :  { %3226 = vmatpush.bf16.msra.mxu2 %v7751_v22 }
 0x319   :  { %7732 = vmatmul.msk.bf16.gmra.mxu0 %vm1084_vm8, %v11190_v0  ;;  %7736 = vmatmul.msk.bf16.vlgmr.msrb.gmra.mxu2 %vm1084_vm8, %v1187_v12 }
 0x31a   :  { %7740 = vmatmul.msk.bf16.gmra.mxu3 %vm1084_vm8, %v11151_v17  ;;  %7745 = vmatmul.msk.bf16.vlgmr.msra.gmra.mxu1 %vm1084_vm8, %v1187_v12 }
 0x31b   :  { %3315 = vmatpush.bf16.msrb.mxu2 %v8375_v25  ;;  %v8455_v25 = vor.u32 %v9684_v24, %v8454_v23 }
 0x329   :  { %7737 = vmatmul.msk.bf16.gmra.mxu2 %vm1084_vm8, %v11151_v17  ;;  %7742 = vmatmul.msk.bf16.vlgmr.msrb.gmra.mxu0 %vm1084_vm8, %v1187_v12  ;;  %v8087_v12 = vor.u32 %v9592_v29, %v8086_v28  ;;  %v8503_v28 = vor.u32 %v9696_v37, %v8502_v34  ;;  %v8006_v29 = vld [vmem:[%s14902_s5 + $0x200] sm:$0xf]  ;;  %v9720_v34 = vld [vmem:[%s14902_s5 + $0x6ac] sm:$0xf0] }
 0x32a   :  { %7741 = vmatmul.msk.bf16.gmra.mxu3 %vm1084_vm8, %v11190_v0  ;;  %7746 = vmatmul.msk.bf16.gmra.mxu1 %vm1084_vm8, %v11151_v17  ;;  %v8007_v51 = vor.u32 %v9572_v53, %v8006_v29  ;;  %v8710_v37 = vld [vmem:[%s14902_s5 + $0x780] sm:$0xf]  ;;  %v8599_v53 = vor.u32 %v9720_v34, %v8598_v4 }
 0x32b   :  { %3269 = vmatpush.bf16.msra.mxu0 %v8087_v12  ;;  %v9660_v12 = vld [vmem:[%s14902_s5 + $0x4cc] sm:$0xf0]  ;;  %v8662_v4 = vld [vmem:[%s14902_s5 + $0x720] sm:$0xf] }
 0x32c   :  { %v8359_v26 = vor.u32 %v9660_v12, %v8358_v55  ;;  %v9648_v12 = vld [vmem:[%s14902_s5 + $0x46c] sm:$0xf0] }
 0x32e   :  { %3316 = vmatpush.bf16.msrb.mxu2 %v8359_v26 }
 0x32f   :  { %3270 = vmatpush.bf16.msra.mxu0 %v8071_v39  ;;  %v8470_v39 = vld [vmem:[%s14902_s5 + $0x5a0] sm:$0xf] }
 0x333   :  { %3271 = vmatpush.bf16.msra.mxu0 %v8055_v7 }
 0x337   :  { %3272 = vmatpush.bf16.msra.mxu0 %v8039_v3 }
 0x339   :  { %7738 = vmatmul.msk.bf16.gmra.mxu2 %vm1084_vm8, %v11190_v0  ;;  %7743 = vmatmul.msk.bf16.gmra.mxu0 %vm1084_vm8, %v11151_v17  ;;  %v8183_v17 = vor.u32 %v9616_v59, %v8182_v38  ;;  %v11464_v38 = vperm.slane %v11452_v58, 3  ;;  %v8630_v59 = vld [vmem:[%s14902_s5 + $0x6e0] sm:$0xf] }
 0x33a   :  { %7747 = vmatmul.msk.bf16.gmra.mxu1 %vm1084_vm8, %v11190_v0 }
 0x33b   :  { %3295 = vmatpush.bf16.msrb.mxu1 %v8183_v17  ;;  %3273 = vmatpush.bf16.msra.mxu0 %v8023_v44  ;;  %v9728_v17 = vld [vmem:[%s14902_s5 + $0x6ec] sm:$0xf0] }
 0x33c   :  { %v8631_v60 = vor.u32 %v9728_v17, %v8630_v59  ;;  %v8694_v59 = vld [vmem:[%s14902_s5 + $0x760] sm:$0xf]  ;;  %v9744_v17 = vld [vmem:[%s14902_s5 + $0x76c] sm:$0xf0] }
 0x33f   :  { %3296 = vmatpush.bf16.msrb.mxu1 %v8167_v5  ;;  %3274 = vmatpush.bf16.msra.mxu0 %v8007_v51  ;;  %v8310_v51 = vld [vmem:[%s14902_s5 + $0x460] sm:$0xf] }
 0x340   :  { %v8311_v26 = vor.u32 %v9648_v12, %v8310_v51  ;;  %v8390_v51 = vld [vmem:[%s14902_s5 + $0x500] sm:$0xf] }
 0x343   :  { %3297 = vmatpush.bf16.msrb.mxu1 %v8151_v11  ;;  %3363 = vmatpush.bf16.msrb.mxu0 %v8631_v60  ;;  %v8695_v60 = vor.u32 %v9744_v17, %v8694_v59  ;;  %v8550_v59 = vld [vmem:[%s14902_s5 + $0x640] sm:$0xf]  ;;  %v9708_v17 = vld [vmem:[%s14902_s5 + $0x64c] sm:$0xf0] }
 0x347   :  { %3298 = vmatpush.bf16.msrb.mxu1 %v8135_v30  ;;  %3364 = vmatpush.bf16.msrb.mxu0 %v8615_v10  ;;  %v8679_v10 = vor.u32 %v9740_v46, %v8678_v6  ;;  %v9534_v6 = vld [vmem:[%s14902_s5 + $0xe4] sm:$0xf] }
 0x349   :  { %7744 = vmatmul.msk.bf16.gmra.mxu0 %vm1084_vm8, %v11190_v0  ;;  %v9548_v0 = vld [vmem:[%s14902_s5 + $0x14c] sm:$0xf0] }
 0x34a   :  { %v7911_v42 = vor.u32 %v9548_v0, %v7910_v63  ;;  %v8343_v63 = vor.u32 %v9656_v62, %v8342_v61  ;;  %v9688_v0 = vld [vmem:[%s14902_s5 + $0x5ac] sm:$0xf0]  ;;  %v8582_v61 = vld [vmem:[%s14902_s5 + $0x680] sm:$0xf] }
 0x34b   :  { %3387 = vmatpush.bf16.msra.mxu1 %v8759_v36  ;;  %v8471_v5 = vor.u32 %v9688_v0, %v8470_v39  ;;  %3365 = vmatpush.bf16.msrb.mxu0 %v8599_v53  ;;  %v9716_v62 = vld [vmem:[%s14902_s5 + $0x68c] sm:$0xf0]  ;;  %v8278_v53 = vld [vmem:[%s14902_s5 + $0x420] sm:$0xf] }
 0x34c   :  { %3248 = vmatpush.bf16.msra.mxu3 %v7911_v42  ;;  %v9756_v42 = vld [vmem:[%s14902_s5 + $0x7cc] sm:$0xf0]  ;;  %3317 = vmatpush.bf16.msrb.mxu2 %v8343_v63  ;;  %v8294_v63 = vld [vmem:[%s14902_s5 + $0x440] sm:$0xf] }
 0x34d   :  { %v8743_v8 = vor.u32 %v9756_v42, %v8742_v43  ;;  %v9644_v0 = vld [vmem:[%s14902_s5 + $0x44c] sm:$0xf0]  ;;  %v8422_v43 = vld [vmem:[%s14902_s5 + $0x540] sm:$0xf] }
 0x34f   :  { %3388 = vmatpush.bf16.msra.mxu1 %v8743_v8  ;;  %v9676_v8 = vld [vmem:[%s14902_s5 + $0x54c] sm:$0xf0] }
 0x350   :  { %3249 = vmatpush.bf16.msra.mxu3 %v7895_v48  ;;  %3318 = vmatpush.bf16.msrb.mxu2 %v8327_v16  ;;  %v8566_v16 = vld [vmem:[%s14902_s5 + $0x660] sm:$0xf] }
 0x354   :  { %3250 = vmatpush.bf16.msra.mxu3 %v7879_v18  ;;  %v9752_v18 = vld [vmem:[%s14902_s5 + $0x7ac] sm:$0xf0]  ;;  %3319 = vmatpush.bf16.msrb.mxu2 %v8311_v26  ;;  %v8646_v26 = vld [vmem:[%s14902_s5 + $0x700] sm:$0xf] }
 0x355   :  { %v8727_v19 = vor.u32 %v9752_v18, %v8726_v2  ;;  %v9712_v2 = vld [vmem:[%s14902_s5 + $0x66c] sm:$0xf0] }
 0x357   :  { %3389 = vmatpush.bf16.msra.mxu1 %v8727_v19  ;;  %v8406_v19 = vld [vmem:[%s14902_s5 + $0x520] sm:$0xf] }
 0x358   :  { %3339 = vmatpush.bf16.msrb.mxu3 %v8503_v28  ;;  %v9748_v28 = vld [vmem:[%s14902_s5 + $0x78c] sm:$0xf0] }
 0x359   :  { %v8711_v55 = vor.u32 %v9748_v28, %v8710_v37 }
 0x35b   :  { %3390 = vmatpush.bf16.msra.mxu1 %v8711_v55  ;;  %v9640_v55 = vld [vmem:[%s14902_s5 + $0x42c] sm:$0xf0] }
 0x35c   :  { %3340 = vmatpush.bf16.msrb.mxu3 %v8487_v27  ;;  %v8438_v27 = vld [vmem:[%s14902_s5 + $0x560] sm:$0xf] }
 0x35f   :  { %3391 = vmatpush.bf16.msra.mxu1 %v8695_v60 }
 0x360   :  { %3341 = vmatpush.bf16.msrb.mxu3 %v8471_v5  ;;  %v8295_v5 = vor.u32 %v9644_v0, %v8294_v63  ;;  %v8262_v0 = vld [vmem:[%s14902_s5 + $0x400] sm:$0xf] }
 0x362   :  { %3320 = vmatpush.bf16.msrb.mxu2 %v8295_v5  ;;  %v8534_v5 = vld [vmem:[%s14902_s5 + $0x620] sm:$0xf] }
 0x363   :  { %3392 = vmatpush.bf16.msra.mxu1 %v8679_v10 }
 0x364   :  { %3342 = vmatpush.bf16.msrb.mxu3 %v8455_v25 }
 0x366   :  { %v1442_v40 = vpop.f32.mrf.mxu0 }
 0x367   :  { %v1490_v50 = vpop.f32.mrf.mxu1  ;;  %v1443_v52 = vadd.f32 %v1442_v40, %v11461_v35 }
 0x368   :  { %v1491_v7 = vadd.f32 %v1490_v50, %v11464_v38  ;;  %v9680_v50 = vld [vmem:[%s14902_s5 + $0x56c] sm:$0xf0] }
 0x369   :  { %v1602_v45 = vmax.f32 %v1443_v52, 0.0  ;;  %v8439_v36 = vor.u32 %v9680_v50, %v8438_v27  ;;  %v9732_v27 = vld [vmem:[%s14902_s5 + $0x70c] sm:$0xf0] }
 0x36a   :  { %v1604_v30 = vmax.f32 %v1491_v7, 0.0 }
 0x36b   :  { %3343 = vmatpush.bf16.msrb.mxu3 %v8439_v36 }
 0x36c   :  { %v1418_v41 = vpop.f32.mrf.mxu2 }
 0x36d   :  { %v11491_v47 = vpop.f32.mrf.mxu3  ;;  %v1419_v3 = vadd.f32 %v1418_v41, %v11501_v33  ;;  %v8583_v41 = vor.u32 %v9716_v62, %v8582_v61 }
 0x36e   :  { %v1444_v9 = vpop.f32.mrf.mxu0  ;;  %v1448_v42 = vadd.f32 %v11491_v47, %v11461_v35  ;;  %v8423_v47 = vor.u32 %v9676_v8, %v8422_v43  ;;  %v9636_v43 = vld [vmem:[%s14902_s5 + $0x40c] sm:$0xf0] }
 0x36f   :  { %v1445_v48 = vadd.f32 %v1444_v9, %v11461_v35  ;;  %v1492_v11 = vpop.f32.mrf.mxu1  ;;  %v1601_v31 = vmax.f32 %v1419_v3, 0.0  ;;  %3366 = vmatpush.bf16.msrb.mxu0 %v8583_v41  ;;  %v9672_v3 = vld [vmem:[%s14902_s5 + $0x52c] sm:$0xf0]  ;;  %v8551_v41 = vor.u32 %v9708_v17, %v8550_v59  ;;  %v9630_v59 = vld [vmem:[%s14902_s5 + $0x3e4] sm:$0xf] }
 0x370   :  { %v1493_v54 = vadd.f32 %v1492_v11, %v11464_v38  ;;  %3344 = vmatpush.bf16.msrb.mxu3 %v8423_v47  ;;  %v8407_v24 = vor.u32 %v9672_v3, %v8406_v19  ;;  %v9704_v8 = vld [vmem:[%s14902_s5 + $0x62c] sm:$0xf0]  ;;  %v7864_v47 = vld [vmem:[%s14902_s5 + $0xf0] sm:$0xf0] }
 0x371   :  { %v1610_v14 = vmax.f32 %v1445_v48, 0.0  ;;  %v8248_v17 = vld [vmem:[%s14902_s5 + $0x3f0] sm:$0xf0] }
 0x372   :  { %v1612_v13 = vmax.f32 %v1493_v54, 0.0 }
 0x373   :  { %v11518_v20 = vpack.c.bf16 %v1610_v14, %v1602_v45  ;;  %v1618_v45 = vmax.f32 %v1448_v42, 0.0 }
 0x374   :  { %v11520_v21 = vpack.c.bf16 %v1612_v13, %v1604_v30  ;;  %v1420_v22 = vpop.f32.mrf.mxu2  ;;  %v8567_v13 = vor.u32 %v9712_v2, %v8566_v16  ;;  %3345 = vmatpush.bf16.msrb.mxu3 %v8407_v24 }
 0x375   :  { %v1421_v44 = vadd.f32 %v1420_v22, %v11501_v33  ;;  %v1449_v49 = vpop.f32.mrf.mxu3  ;;  %3251 = vmatmul.bf16.vlgmr.msra.gmra.mxu3 %v11518_v20 }
 0x376   :  { %3299 = vmatmul.bf16.vlgmr.msrb.gmra.mxu1 %v11520_v21  ;;  %v1466_v29 = vpop.f32.mrf.mxu0  ;;  %v1450_v39 = vadd.f32 %v1449_v49, %v11461_v35  ;;  %3367 = vmatpush.bf16.msrb.mxu0 %v8567_v13 }
 0x377   :  { %v1609_v56 = vmax.f32 %v1421_v44, 0.0  ;;  %v1495_v40 = vpop.f32.mrf.mxu1  ;;  %v1467_v7 = vadd.f32 %v1466_v29, %v11558_v32  ;;  %v9736_v44 = vld [vmem:[%s14902_s5 + $0x72c] sm:$0xf0] }
 0x378   :  { %v1496_v48 = vadd.f32 %v1495_v40, %v11464_v38  ;;  %v1626_v54 = vmax.f32 %v1450_v39, 0.0  ;;  %v8663_v37 = vor.u32 %v9736_v44, %v8662_v4  ;;  %v9668_v40 = vld [vmem:[%s14902_s5 + $0x50c] sm:$0xf0]  ;;  %v8647_v39 = vor.u32 %v9732_v27, %v8646_v26 }
 0x379   :  { %v11555_v1 = vpack.c.bf16 %v1609_v56, %v1601_v31  ;;  %v1603_v18 = vmax.f32 %v1467_v7, 0.0  ;;  %v8279_v56 = vor.u32 %v9640_v55, %v8278_v53  ;;  %v8391_v36 = vor.u32 %v9668_v40, %v8390_v51 }
 0x37a   :  { %v1620_v22 = vmax.f32 %v1496_v48, 0.0  ;;  %v11618_v49 = vpack.c.bf16 %v1626_v54, %v1618_v45  ;;  %3393 = vmatpush.bf16.msra.mxu1 %v8663_v37  ;;  %3368 = vmatpush.bf16.msrb.mxu0 %v8551_v41  ;;  %v8535_v7 = vor.u32 %v9704_v8, %v8534_v5  ;;  %v7867_v54 = vor.u32 %v9534_v6, %v7864_v47  ;;  %v9700_v37 = vld [vmem:[%s14902_s5 + $0x60c] sm:$0xf0]  ;;  %v9598_v41 = vld [vmem:[%s14902_s5 + $0x2e4] sm:$0xf] }
 0x37b   :  { %3227 = vmatmul.bf16.vlgmr.msra.gmra.mxu2 %v11555_v1  ;;  %3346 = vmatpush.bf16.msrb.mxu3 %v8391_v36  ;;  %v7832_v5 = vld [vmem:[%s14902_s5 + $0xb0] sm:$0xf0]  ;;  %v9558_v8 = vld [vmem:[%s14902_s5 + $0x1a4] sm:$0xf] }
 0x37c   :  { %v1423_v52 = vpop.f32.mrf.mxu2  ;;  %3321 = vmatpush.bf16.msrb.mxu2 %v8279_v56  ;;  %v7976_v56 = vld [vmem:[%s14902_s5 + $0x1d0] sm:$0xf0]  ;;  %v9626_v47 = vld [vmem:[%s14902_s5 + $0x3c4] sm:$0xf] }
 0x37d   :  { %v11595_v9 = vpop.f32.mrf.mxu3  ;;  %v1424_v25 = vadd.f32 %v1423_v52, %v11501_v33  ;;  %v8263_v52 = vor.u32 %v9636_v43, %v8262_v0  ;;  %v8120_v0 = vld [vmem:[%s14902_s5 + $0x2f0] sm:$0xf0] }
 0x37e   :  { %v1468_v11 = vpop.f32.mrf.mxu0  ;;  %3394 = vmatpush.bf16.msra.mxu1 %v8647_v39  ;;  %v1453_v10 = vadd.f32 %v11595_v9, %v11461_v35  ;;  %3369 = vmatpush.bf16.msrb.mxu0 %v8535_v7  ;;  %v7992_v9 = vld [vmem:[%s14902_s5 + $0x1f0] sm:$0xf0]  ;;  %v11730_v39 = vperm.slane %v11452_v58, 7 }
 0x37f   :  { %v1469_v57 = vadd.f32 %v1468_v11, %v11558_v32  ;;  %v1497_v15 = vpop.f32.mrf.mxu1  ;;  %v1617_v60 = vmax.f32 %v1424_v25, 0.0  ;;  %v8518_v25 = vld [vmem:[%s14902_s5 + $0x600] sm:$0xf]  ;;  %v7960_v7 = vld [vmem:[%s14902_s5 + $0x1b0] sm:$0xf0] }
 0x380   :  { %v1498_v14 = vadd.f32 %v1497_v15, %v11464_v38  ;;  %3322 = vmatpush.bf16.msrb.mxu2 %v8263_v52  ;;  %v8519_v51 = vor.u32 %v9700_v37, %v8518_v25  ;;  %v9526_v52 = vld [vmem:[%s14902_s5 + $0xa4] sm:$0xf] }
 0x381   :  { %v1611_v30 = vmax.f32 %v1469_v57, 0.0 }
 0x382   :  { %v1628_v23 = vmax.f32 %v1498_v14, 0.0  ;;  %3370 = vmatpush.bf16.msrb.mxu0 %v8519_v51 }
 0x383   :  { %v11621_v34 = vpack.c.bf16 %v1611_v30, %v1603_v18  ;;  %v1634_v18 = vmax.f32 %v1453_v10, 0.0  ;;  %v8232_v10 = vld [vmem:[%s14902_s5 + $0x3d0] sm:$0xf0] }
 0x384   :  { %v11623_v28 = vpack.c.bf16 %v1628_v23, %v1620_v22  ;;  %v1425_v29 = vpop.f32.mrf.mxu2  ;;  %3411 = vmatpush.bf16.msra.mxu2 %v7867_v54 }
 0x385   :  { %v1426_v12 = vadd.f32 %v1425_v29, %v11501_v33  ;;  %v1454_v31 = vpop.f32.mrf.mxu3  ;;  %3256 = vmatmul.bf16.gmra.mxu3 %v11618_v49  ;;  %3275 = vmatmul.bf16.vlgmr.msra.gmra.mxu0 %v11621_v34  ;;  %v9530_v29 = vld [vmem:[%s14902_s5 + $0xc4] sm:$0xf] }
 0x386   :  { %3304 = vmatmul.bf16.gmra.mxu1 %v11623_v28  ;;  %v1471_v50 = vpop.f32.mrf.mxu0  ;;  %v1455_v42 = vadd.f32 %v1454_v31, %v11461_v35  ;;  %v9566_v35 = vld [vmem:[%s14902_s5 + $0x1e4] sm:$0xf] }
 0x387   :  { %v1625_v61 = vmax.f32 %v1426_v12, 0.0  ;;  %v1500_v62 = vpop.f32.mrf.mxu1  ;;  %v1472_v48 = vadd.f32 %v1471_v50, %v11558_v32  ;;  %v7995_v19 = vor.u32 %v9566_v35, %v7992_v9  ;;  %v7848_v12 = vld [vmem:[%s14902_s5 + $0xd0] sm:$0xf0]  ;;  %v9562_v31 = vld [vmem:[%s14902_s5 + $0x1c4] sm:$0xf] }
 0x388   :  { %v1501_v57 = vadd.f32 %v1500_v62, %v11464_v38  ;;  %v1642_v45 = vmax.f32 %v1455_v42, 0.0  ;;  %v7851_v40 = vor.u32 %v9530_v29, %v7848_v12  ;;  %v7979_v26 = vor.u32 %v9562_v31, %v7976_v56 }
 0x389   :  { %v11653_v63 = vpack.c.bf16 %v1625_v61, %v1617_v60  ;;  %v1619_v30 = vmax.f32 %v1472_v48, 0.0  ;;  %3435 = vmatpush.bf16.msra.mxu3 %v7995_v19  ;;  %v11725_v60 = vperm.slane %v11452_v58, 5  ;;  %v8251_v62 = vor.u32 %v9630_v59, %v8248_v17  ;;  %v9522_v19 = vld [vmem:[%s14902_s5 + $0x84] sm:$0xf] }
 0x38a   :  { %v1636_v3 = vmax.f32 %v1501_v57, 0.0  ;;  %v11689_v23 = vpack.c.bf16 %v1642_v45, %v1634_v18  ;;  %3412 = vmatpush.bf16.msra.mxu2 %v7851_v40  ;;  %v8123_v42 = vor.u32 %v9598_v41, %v8120_v0  ;;  %v8235_v45 = vor.u32 %v9626_v47, %v8232_v10  ;;  %v9618_v41 = vld [vmem:[%s14902_s5 + $0x384] sm:$0xf]  ;;  %v8200_v0 = vld [vmem:[%s14902_s5 + $0x390] sm:$0xf0] }
 0x38b   :  { %3232 = vmatmul.bf16.gmra.mxu2 %v11653_v63  ;;  %3483 = vmatpush.bf16.msrb.mxu1 %v8251_v62  ;;  %v11771_v18 = vperm.slane %v11452_v58, 4  ;;  %v8088_v62 = vld [vmem:[%s14902_s5 + $0x2b0] sm:$0xf0]  ;;  %v9550_v10 = vld [vmem:[%s14902_s5 + $0x164] sm:$0xf] }
 0x38c   :  { %v1428_v46 = vpop.f32.mrf.mxu2  ;;  %3459 = vmatpush.bf16.msra.mxu0 %v8123_v42 }
 0x38d   :  { %v11678_v11 = vpop.f32.mrf.mxu3  ;;  %v1429_v24 = vadd.f32 %v1428_v46, %v11501_v33  ;;  %3436 = vmatpush.bf16.msra.mxu3 %v7979_v26  ;;  %v7835_v46 = vor.u32 %v9526_v52, %v7832_v5  ;;  %v9554_v26 = vld [vmem:[%s14902_s5 + $0x184] sm:$0xf]  ;;  %v8203_v52 = vor.u32 %v9618_v41, %v8200_v0  ;;  %v7896_v41 = vld [vmem:[%s14902_s5 + $0x130] sm:$0xf0] }
 0x38e   :  { %v1473_v15 = vpop.f32.mrf.mxu0  ;;  %v1539_v48 = vadd.f32 %v11678_v11, %v11725_v60  ;;  %v9518_v5 = vld [vmem:[%s14902_s5 + $0x64] sm:$0xf] }
 0x38f   :  { %v1474_v14 = vadd.f32 %v1473_v15, %v11558_v32  ;;  %v1502_v16 = vpop.f32.mrf.mxu1  ;;  %v1633_v27 = vmax.f32 %v1429_v24, 0.0  ;;  %v7963_v15 = vor.u32 %v9558_v8, %v7960_v7  ;;  %3413 = vmatpush.bf16.msra.mxu2 %v7835_v46  ;;  %3484 = vmatpush.bf16.msrb.mxu1 %v8235_v45  ;;  %v7800_v8 = vld [vmem:[%s14902_s5 + $0x70] sm:$0xf0] }
 0x390   :  { %v1503_v2 = vadd.f32 %v1502_v16, %v11464_v38  ;;  %v8104_v16 = vld [vmem:[%s14902_s5 + $0x2d0] sm:$0xf0]  ;;  %v1606_v25 = vmax.f32 %v1539_v48, 0.0  ;;  %v7803_v47 = vor.u32 %v9518_v5, %v7800_v8 }
 0x391   :  { %v1627_v13 = vmax.f32 %v1474_v14, 0.0  ;;  %v9594_v14 = vld [vmem:[%s14902_s5 + $0x2c4] sm:$0xf]  ;;  %3437 = vmatpush.bf16.msra.mxu3 %v7963_v15  ;;  %v7928_v48 = vld [vmem:[%s14902_s5 + $0x170] sm:$0xf0]  ;;  %v11831_v15 = vperm.slane %v11452_v58, 6 }
 0x392   :  { %v1644_v22 = vmax.f32 %v1503_v2, 0.0  ;;  %v8107_v11 = vor.u32 %v9594_v14, %v8104_v16  ;;  %v7931_v45 = vor.u32 %v9550_v10, %v7928_v48  ;;  %v9614_v14 = vld [vmem:[%s14902_s5 + $0x364] sm:$0xf]  ;;  %v8184_v16 = vld [vmem:[%s14902_s5 + $0x370] sm:$0xf0] }
 0x393   :  { %v11692_v4 = vpack.c.bf16 %v1627_v13, %v1619_v30  ;;  %v8072_v58 = vld [vmem:[%s14902_s5 + $0x290] sm:$0xf0]  ;;  %v9510_v48 = vld [vmem:[%s14902_s5 + $0x24] sm:$0xf] }
 0x394   :  { %v11694_v38 = vpack.c.bf16 %v1644_v22, %v1636_v3  ;;  %v1430_v44 = vpop.f32.mrf.mxu2  ;;  %v7816_v3 = vld [vmem:[%s14902_s5 + $0x90] sm:$0xf0]  ;;  %3460 = vmatpush.bf16.msra.mxu0 %v8107_v11 }
 0x395   :  { %v1431_v53 = vadd.f32 %v1430_v44, %v11501_v33  ;;  %v1540_v55 = vpop.f32.mrf.mxu3  ;;  %3261 = vmatmul.bf16.gmra.mxu3 %v11689_v23  ;;  %3280 = vmatmul.bf16.gmra.mxu0 %v11692_v4  ;;  %v7819_v24 = vor.u32 %v9522_v19, %v7816_v3  ;;  %v9622_v44 = vld [vmem:[%s14902_s5 + $0x3a4] sm:$0xf]  ;;  %v8152_v5 = vld [vmem:[%s14902_s5 + $0x330] sm:$0xf0] }
 0x396   :  { %3309 = vmatmul.bf16.gmra.mxu1 %v11694_v38  ;;  %v1476_v33 = vpop.f32.mrf.mxu0  ;;  %v1541_v43 = vadd.f32 %v1540_v55, %v11725_v60  ;;  %v9546_v19 = vld [vmem:[%s14902_s5 + $0x144] sm:$0xf] }
 0x397   :  { %v1641_v50 = vmax.f32 %v1431_v53, 0.0  ;;  %v1586_v36 = vpop.f32.mrf.mxu1  ;;  %v1477_v54 = vadd.f32 %v1476_v33, %v11558_v32  ;;  %3414 = vmatpush.bf16.msra.mxu2 %v7819_v24 }
 0x398   :  { %v1587_v2 = vadd.f32 %v1586_v36, %v11730_v39  ;;  %v1614_v9 = vmax.f32 %v1541_v43, 0.0 }
 0x399   :  { %v11727_v61 = vpack.c.bf16 %v1641_v50, %v1633_v27  ;;  %v1635_v37 = vmax.f32 %v1477_v54, 0.0  ;;  %v7944_v27 = vld [vmem:[%s14902_s5 + $0x190] sm:$0xf0]  ;;  %v9590_v50 = vld [vmem:[%s14902_s5 + $0x2a4] sm:$0xf] }
 0x39a   :  { %v1608_v55 = vmax.f32 %v1587_v2, 0.0  ;;  %v11787_v12 = vpack.c.bf16 %v1614_v9, %v1606_v25  ;;  %v7947_v17 = vor.u32 %v9554_v26, %v7944_v27  ;;  %v8091_v42 = vor.u32 %v9590_v50, %v8088_v62  ;;  %v8168_v25 = vld [vmem:[%s14902_s5 + $0x350] sm:$0xf0]  ;;  %v9542_v62 = vld [vmem:[%s14902_s5 + $0x124] sm:$0xf] }
 0x39b   :  { %3237 = vmatmul.bf16.gmra.mxu2 %v11727_v61  ;;  %v8187_v2 = vor.u32 %v9614_v14, %v8184_v16  ;;  %v9538_v14 = vld [vmem:[%s14902_s5 + $0x104] sm:$0xf] }
 0x39c   :  { %v1514_v6 = vpop.f32.mrf.mxu2  ;;  %3438 = vmatpush.bf16.msra.mxu3 %v7947_v17  ;;  %3461 = vmatpush.bf16.msra.mxu0 %v8091_v42  ;;  %v7899_v42 = vor.u32 %v9542_v62, %v7896_v41 }
 0x39d   :  { %v11761_v57 = vpop.f32.mrf.mxu3  ;;  %v1515_v31 = vadd.f32 %v1514_v6, %v11771_v18  ;;  %3415 = vmatpush.bf16.msra.mxu2 %v7803_v47 }
 0x39e   :  { %v1478_v35 = vpop.f32.mrf.mxu0  ;;  %v1544_v3 = vadd.f32 %v11761_v57, %v11725_v60 }
 0x39f   :  { %v1479_v30 = vadd.f32 %v1478_v35, %v11558_v32  ;;  %v1588_v13 = vpop.f32.mrf.mxu1  ;;  %v8216_v32 = vld [vmem:[%s14902_s5 + $0x3b0] sm:$0xf0]  ;;  %v1605_v6 = vmax.f32 %v1515_v31, 0.0  ;;  %v9586_v35 = vld [vmem:[%s14902_s5 + $0x284] sm:$0xf] }
 0x3a0   :  { %v1589_v22 = vadd.f32 %v1588_v13, %v11730_v39  ;;  %v8219_v53 = vor.u32 %v9622_v44, %v8216_v32  ;;  %3439 = vmatpush.bf16.msra.mxu3 %v7931_v45  ;;  %v8075_v9 = vor.u32 %v9586_v35, %v8072_v58  ;;  %v7784_v13 = vld [vmem:[%s14902_s5 + $0x50] sm:$0xf0]  ;;  %v9610_v32 = vld [vmem:[%s14902_s5 + $0x344] sm:$0xf] }
 0x3a1   :  { %v1643_v29 = vmax.f32 %v1479_v30, 0.0  ;;  %v9514_v30 = vld [vmem:[%s14902_s5 + $0x44] sm:$0xf]  ;;  %v7912_v44 = vld [vmem:[%s14902_s5 + $0x150] sm:$0xf0]  ;;  %v8171_v57 = vor.u32 %v9610_v32, %v8168_v25 }
 0x3a2   :  { %v1616_v51 = vmax.f32 %v1589_v22, 0.0  ;;  %3485 = vmatpush.bf16.msrb.mxu1 %v8219_v53  ;;  %v7787_v24 = vor.u32 %v9514_v30, %v7784_v13  ;;  %3462 = vmatpush.bf16.msra.mxu0 %v8075_v9  ;;  %v9582_v53 = vld [vmem:[%s14902_s5 + $0x264] sm:$0xf]  ;;  %v7768_v45 = vld [vmem:[%s14902_s5 + $0x30] sm:$0xf0] }
 0x3a3   :  { %v11790_v56 = vpack.c.bf16 %v1643_v29, %v1635_v37  ;;  %v7915_v29 = vor.u32 %v9546_v19, %v7912_v44  ;;  %v7771_v35 = vor.u32 %v9510_v48, %v7768_v45  ;;  %v7880_v58 = vld [vmem:[%s14902_s5 + $0x110] sm:$0xf0]  ;;  %v9690_v48 = vld [vmem:[%s14902_s5 + $0x5c4] sm:$0xf] }
 0x3a4   :  { %v11792_v33 = vpack.c.bf16 %v1616_v51, %v1608_v55  ;;  %v1516_v40 = vpop.f32.mrf.mxu2  ;;  %v8056_v55 = vld [vmem:[%s14902_s5 + $0x270] sm:$0xf0]  ;;  %3416 = vmatpush.bf16.msra.mxu2 %v7787_v24  ;;  %v7883_v13 = vor.u32 %v9538_v14, %v7880_v58  ;;  %v9506_v24 = vld [vmem:[%s14902_s5 + $0x4] sm:$0xf] }
 0x3a5   :  { %v1517_v36 = vadd.f32 %v1516_v40, %v11771_v18  ;;  %v1545_v59 = vpop.f32.mrf.mxu3  ;;  %3285 = vmatmul.bf16.gmra.mxu0 %v11790_v56  ;;  %3347 = vmatmul.bf16.vlgmr.msrb.gmra.mxu3 %v11787_v12  ;;  %v8059_v26 = vor.u32 %v9582_v53, %v8056_v55  ;;  %v8136_v9 = vld [vmem:[%s14902_s5 + $0x310] sm:$0xf0] }
 0x3a6   :  { %3395 = vmatmul.bf16.vlgmr.msra.gmra.mxu1 %v11792_v33  ;;  %v1562_v43 = vpop.f32.mrf.mxu0  ;;  %v1546_v11 = vadd.f32 %v1545_v59, %v11725_v60  ;;  %3440 = vmatpush.bf16.msra.mxu3 %v7915_v29  ;;  %v1622_v59 = vmax.f32 %v1544_v3, 0.0  ;;  %v9578_v3 = vld [vmem:[%s14902_s5 + $0x244] sm:$0xf]  ;;  %v7752_v25 = vld [vmem:[%s14902_s5 + $0x10] sm:$0xf0] }
 0x3a7   :  { %v1613_v46 = vmax.f32 %v1517_v36, 0.0  ;;  %v1591_v7 = vpop.f32.mrf.mxu1  ;;  %3486 = vmatpush.bf16.msrb.mxu1 %v8203_v52  ;;  %v1563_v37 = vadd.f32 %v1562_v43, %v11831_v15  ;;  %3463 = vmatpush.bf16.msra.mxu0 %v8059_v26  ;;  %v9606_v52 = vld [vmem:[%s14902_s5 + $0x324] sm:$0xf]  ;;  %v8024_v29 = vld [vmem:[%s14902_s5 + $0x230] sm:$0xf0] }
 0x3a8   :  { %v1592_v51 = vadd.f32 %v1591_v7, %v11730_v39  ;;  %v1630_v27 = vmax.f32 %v1546_v11, 0.0  ;;  %v9602_v11 = vld [vmem:[%s14902_s5 + $0x304] sm:$0xf]  ;;  %3417 = vmatpush.bf16.msra.mxu2 %v7771_v35 }
 0x3a9   :  { %v11828_v54 = vpack.c.bf16 %v1613_v46, %v1605_v6  ;;  %v1607_v0 = vmax.f32 %v1563_v37, 0.0  ;;  %v8155_v46 = vor.u32 %v9606_v52, %v8152_v5  ;;  %v8139_v19 = vor.u32 %v9602_v11, %v8136_v9  ;;  %v9574_v37 = vld [vmem:[%s14902_s5 + $0x224] sm:$0xf] }
 0x3aa   :  { %v1624_v8 = vmax.f32 %v1592_v51, 0.0  ;;  %v11891_v7 = vpack.c.bf16 %v1630_v27, %v1622_v59  ;;  %3441 = vmatpush.bf16.msra.mxu3 %v7899_v42  ;;  %v7755_v51 = vor.u32 %v9506_v24, %v7752_v25  ;;  %v8027_v26 = vor.u32 %v9574_v37, %v8024_v29  ;;  %v8376_v59 = vld [vmem:[%s14902_s5 + $0x4f0] sm:$0xf0] }
 0x3ab   :  { %3323 = vmatmul.bf16.vlgmr.msrb.gmra.mxu2 %v11828_v54  ;;  %3487 = vmatpush.bf16.msrb.mxu1 %v8187_v2  ;;  %v8008_v42 = vld [vmem:[%s14902_s5 + $0x210] sm:$0xf0] }
 0x3ac   :  { %v1519_v22 = vpop.f32.mrf.mxu2  ;;  %3418 = vmatpush.bf16.msra.mxu2 %v7755_v51 }
 0x3ad   :  { %v11875_v31 = vpop.f32.mrf.mxu3  ;;  %v1520_v47 = vadd.f32 %v1519_v22, %v11771_v18  ;;  %v8040_v22 = vld [vmem:[%s14902_s5 + $0x250] sm:$0xf0] }
 0x3ae   :  { %v1564_v40 = vpop.f32.mrf.mxu0  ;;  %v8043_v32 = vor.u32 %v9578_v3, %v8040_v22  ;;  %3442 = vmatpush.bf16.msra.mxu3 %v7883_v13  ;;  %v1549_v52 = vadd.f32 %v11875_v31, %v11725_v60  ;;  %v8488_v31 = vld [vmem:[%s14902_s5 + $0x5d0] sm:$0xf0] }
 0x3af   :  { %v1565_v50 = vadd.f32 %v1564_v40, %v11831_v15  ;;  %v1593_v36 = vpop.f32.mrf.mxu1  ;;  %3488 = vmatpush.bf16.msrb.mxu1 %v8171_v57  ;;  %v1621_v57 = vmax.f32 %v1520_v47, 0.0  ;;  %v8360_v47 = vld [vmem:[%s14902_s5 + $0x4d0] sm:$0xf0]  ;;  %v8491_v11 = vor.u32 %v9690_v48, %v8488_v31 }
 0x3b0   :  { %v1594_v17 = vadd.f32 %v1593_v36, %v11730_v39  ;;  %3464 = vmatpush.bf16.msra.mxu0 %v8043_v32  ;;  %v9662_v36 = vld [vmem:[%s14902_s5 + $0x4e4] sm:$0xf]  ;;  %v8328_v48 = vld [vmem:[%s14902_s5 + $0x490] sm:$0xf0] }
 0x3b1   :  { %v1615_v43 = vmax.f32 %v1565_v50, 0.0  ;;  %v8379_v41 = vor.u32 %v9662_v36, %v8376_v59  ;;  %v8344_v59 = vld [vmem:[%s14902_s5 + $0x4b0] sm:$0xf0] }
 0x3b2   :  { %v1632_v6 = vmax.f32 %v1594_v17, 0.0  ;;  %v9694_v17 = vld [vmem:[%s14902_s5 + $0x5e4] sm:$0xf] }
 0x3b3   :  { %v11894_v10 = vpack.c.bf16 %v1615_v43, %v1607_v0  ;;  %3489 = vmatpush.bf16.msrb.mxu1 %v8155_v46  ;;  %v8504_v0 = vld [vmem:[%s14902_s5 + $0x5f0] sm:$0xf0]  ;;  %v9570_v43 = vld [vmem:[%s14902_s5 + $0x204] sm:$0xf]  ;;  %3507 = vmatpush.bf16.msrb.mxu2 %v8379_v41 }
 0x3b4   :  { %v11905_v16 = vpack.c.bf16 %v1632_v6, %v1624_v8  ;;  %v1521_v2 = vpop.f32.mrf.mxu2  ;;  %3465 = vmatpush.bf16.msra.mxu0 %v8027_v26  ;;  %v8507_v8 = vor.u32 %v9694_v17, %v8504_v0  ;;  %v8011_v6 = vor.u32 %v9570_v43, %v8008_v42  ;;  %v9658_v46 = vld [vmem:[%s14902_s5 + $0x4c4] sm:$0xf]  ;;  %v8760_v26 = vld [vmem:[%s14902_s5 + $0x7f0] sm:$0xf0] }
 0x3b5   :  { %v1522_v30 = vadd.f32 %v1521_v2, %v11771_v18  ;;  %3352 = vmatmul.bf16.gmra.mxu3 %v11891_v7  ;;  %3371 = vmatmul.bf16.vlgmr.msrb.gmra.mxu0 %v11894_v10  ;;  %v1550_v40 = vpop.f32.mrf.mxu3  ;;  %v9686_v17 = vld [vmem:[%s14902_s5 + $0x5a4] sm:$0xf] }
 0x3b6   :  { %3400 = vmatmul.bf16.gmra.mxu1 %v11905_v16  ;;  %v1567_v44 = vpop.f32.mrf.mxu0  ;;  %v1551_v50 = vadd.f32 %v1550_v40, %v11725_v60  ;;  %v8363_v60 = vor.u32 %v9658_v46, %v8360_v47  ;;  %3531 = vmatpush.bf16.msrb.mxu3 %v8507_v8  ;;  %v9754_v42 = vld [vmem:[%s14902_s5 + $0x7c4] sm:$0xf] }
 0x3b7   :  { %v1629_v53 = vmax.f32 %v1522_v30, 0.0  ;;  %v1596_v55 = vpop.f32.mrf.mxu1  ;;  %3490 = vmatpush.bf16.msrb.mxu1 %v8139_v19  ;;  %v1568_v5 = vadd.f32 %v1567_v44, %v11831_v15  ;;  %v1638_v30 = vmax.f32 %v1549_v52, 0.0  ;;  %v8744_v52 = vld [vmem:[%s14902_s5 + $0x7d0] sm:$0xf0]  ;;  %v9722_v8 = vld [vmem:[%s14902_s5 + $0x6c4] sm:$0xf] }
 0x3b8   :  { %v1597_v45 = vadd.f32 %v1596_v55, %v11730_v39  ;;  %v1646_v2 = vmax.f32 %v1551_v50, 0.0  ;;  %3466 = vmatpush.bf16.msra.mxu0 %v8011_v6  ;;  %3508 = vmatpush.bf16.msrb.mxu2 %v8363_v60  ;;  %v9758_v55 = vld [vmem:[%s14902_s5 + $0x7e4] sm:$0xf]  ;;  %v8616_v6 = vld [vmem:[%s14902_s5 + $0x6d0] sm:$0xf0] }
 0x3b9   :  { %v11938_v27 = vpack.c.bf16 %v1629_v53, %v1621_v57  ;;  %v1623_v13 = vmax.f32 %v1568_v5, 0.0  ;;  %v9726_v57 = vld [vmem:[%s14902_s5 + $0x6e4] sm:$0xf]  ;;  %v8632_v53 = vld [vmem:[%s14902_s5 + $0x6f0] sm:$0xf0]  ;;  %v8763_v36 = vor.u32 %v9758_v55, %v8760_v26  ;;  %v8747_v5 = vor.u32 %v9754_v42, %v8744_v52 }
 0x3ba   :  { %v1640_v3 = vmax.f32 %v1597_v45, 0.0  ;;  %v11978_v24 = vpack.c.bf16 %v1646_v2, %v1638_v30  ;;  %3532 = vmatpush.bf16.msrb.mxu3 %v8491_v11  ;;  %v8635_v40 = vor.u32 %v9726_v57, %v8632_v53  ;;  %v9654_v50 = vld [vmem:[%s14902_s5 + $0x4a4] sm:$0xf]  ;;  %v8619_v47 = vor.u32 %v9722_v8, %v8616_v6  ;;  %v8312_v53 = vld [vmem:[%s14902_s5 + $0x470] sm:$0xf0] }
 0x3bb   :  { %3328 = vmatmul.bf16.gmra.mxu2 %v11938_v27  ;;  %v8347_v0 = vor.u32 %v9654_v50, %v8344_v59  ;;  %3579 = vmatpush.bf16.msra.mxu1 %v8763_v36  ;;  %v9650_v46 = vld [vmem:[%s14902_s5 + $0x484] sm:$0xf]  ;;  %v8696_v50 = vld [vmem:[%s14902_s5 + $0x770] sm:$0xf0] }
 0x3bc   :  { %v1524_v62 = vpop.f32.mrf.mxu2  ;;  %3555 = vmatpush.bf16.msrb.mxu0 %v8635_v40  ;;  %v9750_v45 = vld [vmem:[%s14902_s5 + $0x7a4] sm:$0xf]  ;;  %v8331_v31 = vor.u32 %v9650_v46, %v8328_v48  ;;  %v8584_v59 = vld [vmem:[%s14902_s5 + $0x690] sm:$0xf0] }
 0x3bd   :  { %v1525_v44 = vadd.f32 %v1524_v62, %v11771_v18  ;;  %v8472_v62 = vld [vmem:[%s14902_s5 + $0x5b0] sm:$0xf0]  ;;  %3509 = vmatpush.bf16.msrb.mxu2 %v8347_v0  ;;  %v9682_v2 = vld [vmem:[%s14902_s5 + $0x584] sm:$0xf] }
 0x3be   :  { %v1569_v14 = vpop.f32.mrf.mxu0  ;;  %v8475_v43 = vor.u32 %v9686_v17, %v8472_v62  ;;  %v9742_v40 = vld [vmem:[%s14902_s5 + $0x764] sm:$0xf]  ;;  %v8680_v46 = vld [vmem:[%s14902_s5 + $0x750] sm:$0xf0] }
 0x3bf   :  { %v1570_v35 = vadd.f32 %v1569_v14, %v11831_v15  ;;  %v1598_v58 = vpop.f32.mrf.mxu1  ;;  %v8728_v14 = vld [vmem:[%s14902_s5 + $0x7b0] sm:$0xf0]  ;;  %3580 = vmatpush.bf16.msra.mxu1 %v8747_v5  ;;  %v9714_v36 = vld [vmem:[%s14902_s5 + $0x684] sm:$0xf]  ;;  %v8699_v17 = vor.u32 %v9742_v40, %v8696_v50 }
 0x3c0   :  { %v1599_v9 = vadd.f32 %v1598_v58, %v11730_v39  ;;  %3533 = vmatpush.bf16.msrb.mxu3 %v8475_v43  ;;  %v9718_v58 = vld [vmem:[%s14902_s5 + $0x6a4] sm:$0xf]  ;;  %3556 = vmatpush.bf16.msrb.mxu0 %v8619_v47  ;;  %v8587_v62 = vor.u32 %v9714_v36, %v8584_v59  ;;  %v8296_v43 = vld [vmem:[%s14902_s5 + $0x450] sm:$0xf0]  ;;  %v7870_v36 = vld [vmem:[%s14902_s5 + $0xe8] sm:$0xf] }
 0x3c1   :  { %v1631_v19 = vmax.f32 %v1570_v35, 0.0  ;;  %v8456_v35 = vld [vmem:[%s14902_s5 + $0x590] sm:$0xf0]  ;;  %3510 = vmatpush.bf16.msrb.mxu2 %v8331_v31  ;;  %v9642_v0 = vld [vmem:[%s14902_s5 + $0x444] sm:$0xf] }
 0x3c2   :  { %v1648_v22 = vmax.f32 %v1599_v9, 0.0  ;;  %v8731_v9 = vor.u32 %v9750_v45, %v8728_v14  ;;  %v8459_v30 = vor.u32 %v9682_v2, %v8456_v35  ;;  %v8299_v42 = vor.u32 %v9642_v0, %v8296_v43  ;;  %v9674_v52 = vld [vmem:[%s14902_s5 + $0x544] sm:$0xf]  ;;  %v8424_v5 = vld [vmem:[%s14902_s5 + $0x550] sm:$0xf0] }
 0x3c3   :  { %v11981_v32 = vpack.c.bf16 %v1631_v19, %v1623_v13  ;;  %v8600_v13 = vld [vmem:[%s14902_s5 + $0x6b0] sm:$0xf0]  ;;  %v9738_v8 = vld [vmem:[%s14902_s5 + $0x744] sm:$0xf]  ;;  %v8427_v6 = vor.u32 %v9674_v52, %v8424_v5  ;;  %v9537_v59 = vld [vmem:[%s14902_s5 + $0xf4] sm:$0xf0] }
 0x3c4   :  { %v11983_v25 = vpack.c.bf16 %v1648_v22, %v1640_v3  ;;  %v1526_v37 = vpop.f32.mrf.mxu2  ;;  %v8603_v3 = vor.u32 %v9718_v58, %v8600_v13  ;;  %3534 = vmatpush.bf16.msrb.mxu3 %v8459_v30  ;;  %3581 = vmatpush.bf16.msra.mxu1 %v8731_v9  ;;  %v9710_v47 = vld [vmem:[%s14902_s5 + $0x664] sm:$0xf]  ;;  %v8568_v48 = vld [vmem:[%s14902_s5 + $0x670] sm:$0xf0]  ;;  %v8683_v45 = vor.u32 %v9738_v8, %v8680_v46  ;;  %v9569_v0 = vld [vmem:[%s14902_s5 + $0x1f4] sm:$0xf0] }
 0x3c5   :  { %v1527_v29 = vadd.f32 %v1526_v37, %v11771_v18  ;;  %3357 = vmatmul.bf16.gmra.mxu3 %v11978_v24  ;;  %3376 = vmatmul.bf16.gmra.mxu0 %v11981_v32  ;;  %v1637_v18 = vmax.f32 %v1525_v44, 0.0  ;;  %v8571_v14 = vor.u32 %v9710_v47, %v8568_v48  ;;  %v8408_v31 = vld [vmem:[%s14902_s5 + $0x530] sm:$0xf0]  ;;  %v9734_v2 = vld [vmem:[%s14902_s5 + $0x724] sm:$0xf] }
 0x3c6   :  { %3405 = vmatmul.bf16.gmra.mxu1 %v11983_v25  ;;  %v1572_v39 = vpop.f32.mrf.mxu0  ;;  %3557 = vmatpush.bf16.msrb.mxu0 %v8603_v3  ;;  %v8664_v58 = vld [vmem:[%s14902_s5 + $0x730] sm:$0xf0]  ;;  %v9702_v40 = vld [vmem:[%s14902_s5 + $0x624] sm:$0xf]  ;;  %v7854_v8 = vld [vmem:[%s14902_s5 + $0xc8] sm:$0xf] }
 0x3c7   :  { %v1645_v51 = vmax.f32 %v1527_v29, 0.0  ;;  %v1573_v60 = vadd.f32 %v1572_v39, %v11831_v15  ;;  %v9746_v29 = vld [vmem:[%s14902_s5 + $0x784] sm:$0xf]  ;;  %v8712_v39 = vld [vmem:[%s14902_s5 + $0x790] sm:$0xf0]  ;;  %v8667_v30 = vor.u32 %v9734_v2, %v8664_v58 }
 0x3c8   :  { %v8715_v57 = vor.u32 %v9746_v29, %v8712_v39  ;;  %v8280_v9 = vld [vmem:[%s14902_s5 + $0x430] sm:$0xf0]  ;;  %v9706_v39 = vld [vmem:[%s14902_s5 + $0x644] sm:$0xf]  ;;  %v7982_v48 = vld [vmem:[%s14902_s5 + $0x1c8] sm:$0xf] }
 0x3c9   :  { %v12013_v41 = vpack.c.bf16 %v1645_v51, %v1637_v18  ;;  %v1639_v22 = vmax.f32 %v1573_v60, 0.0  ;;  %v9678_v18 = vld [vmem:[%s14902_s5 + $0x564] sm:$0xf]  ;;  %v8440_v51 = vld [vmem:[%s14902_s5 + $0x570] sm:$0xf0] }
 0x3ca   :  { %3582 = vmatpush.bf16.msra.mxu1 %v8715_v57  ;;  %v8443_v26 = vor.u32 %v9678_v18, %v8440_v51  ;;  %3558 = vmatpush.bf16.msrb.mxu0 %v8587_v62  ;;  %v9670_v60 = vld [vmem:[%s14902_s5 + $0x524] sm:$0xf]  ;;  %v8392_v3 = vld [vmem:[%s14902_s5 + $0x510] sm:$0xf0]  ;;  %v7871_v62 = vor.u32 %v9537_v59, %v7870_v36  ;;  %v9601_v2 = vld [vmem:[%s14902_s5 + $0x2f4] sm:$0xf0] }
 0x3cb   :  { %3333 = vmatmul.bf16.gmra.mxu2 %v12013_v41  ;;  %v8411_v35 = vor.u32 %v9670_v60, %v8408_v31  ;;  %v8648_v29 = vld [vmem:[%s14902_s5 + $0x710] sm:$0xf0]  ;;  %v12204_v60 = vld [vmem:[%s14903_s6] sm:$0xf]  ;;  %v8126_v31 = vld [vmem:[%s14902_s5 + $0x2e8] sm:$0xf] }
 0x3cc   :  { %3535 = vmatpush.bf16.msrb.mxu3 %v8443_v26  ;;  %v8264_v18 = vld [vmem:[%s14902_s5 + $0x410] sm:$0xf0]  ;;  %v8254_v58 = vld [vmem:[%s14902_s5 + $0x3e8] sm:$0xf] }
 0x3cd   :  { %v8536_v26 = vld [vmem:[%s14902_s5 + $0x630] sm:$0xf0] }
 0x3ce   :  { %v1574_v11 = vpop.f32.mrf.mxu0  ;;  %3583 = vmatpush.bf16.msra.mxu1 %v8699_v17  ;;  %3559 = vmatpush.bf16.msrb.mxu0 %v8571_v14  ;;  %v8539_v50 = vor.u32 %v9702_v40, %v8536_v26  ;;  %v7998_v17 = vld [vmem:[%s14902_s5 + $0x1e8] sm:$0xf]  ;;  %v8520_v52 = vld [vmem:[%s14902_s5 + $0x610] sm:$0xf0]  ;;  %v9525_v26 = vld [vmem:[%s14902_s5 + $0x94] sm:$0xf0] }
 0x3cf   :  { %v1575_v19 = vadd.f32 %v1574_v11, %v11831_v15  ;;  %v9646_v15 = vld [vmem:[%s14902_s5 + $0x464] sm:$0xf]  ;;  %v7999_v43 = vor.u32 %v9569_v0, %v7998_v17  ;;  %v7822_v40 = vld [vmem:[%s14902_s5 + $0x88] sm:$0xf]  ;;  %v9625_v0 = vld [vmem:[%s14902_s5 + $0x3b4] sm:$0xf0] }
 0x3d0   :  { %v8315_v55 = vor.u32 %v9646_v15, %v8312_v53  ;;  %3536 = vmatpush.bf16.msrb.mxu3 %v8427_v6  ;;  %v9638_v11 = vld [vmem:[%s14902_s5 + $0x424] sm:$0xf]  ;;  %v8552_v15 = vld [vmem:[%s14902_s5 + $0x650] sm:$0xf0]  ;;  %v9533_v6 = vld [vmem:[%s14902_s5 + $0xd4] sm:$0xf0]  ;;  %v7823_v36 = vor.u32 %v9525_v26, %v7822_v40 }
 0x3d1   :  { %v1647_v44 = vmax.f32 %v1575_v19, 0.0  ;;  %v8283_v13 = vor.u32 %v9638_v11, %v8280_v9  ;;  %v9666_v19 = vld [vmem:[%s14902_s5 + $0x504] sm:$0xf]  ;;  %v8555_v53 = vor.u32 %v9706_v39, %v8552_v15  ;;  %v7855_v46 = vor.u32 %v9533_v6, %v7854_v8  ;;  %v9633_v11 = vld [vmem:[%s14902_s5 + $0x3f4] sm:$0xf0] }
 0x3d2   :  { %3511 = vmatpush.bf16.msrb.mxu2 %v8315_v55  ;;  %3584 = vmatpush.bf16.msra.mxu1 %v8683_v45  ;;  %v9634_v55 = vld [vmem:[%s14902_s5 + $0x404] sm:$0xf]  ;;  %v9565_v45 = vld [vmem:[%s14902_s5 + $0x1d4] sm:$0xf0]  ;;  %v7838_v9 = vld [vmem:[%s14902_s5 + $0xa8] sm:$0xf] }
 0x3d3   :  { %v12054_v37 = vpack.c.bf16 %v1647_v44, %v1639_v22  ;;  %v9730_v22 = vld [vmem:[%s14902_s5 + $0x704] sm:$0xf]  ;;  %v8395_v44 = vor.u32 %v9666_v19, %v8392_v3  ;;  %v8267_v51 = vor.u32 %v9634_v55, %v8264_v18  ;;  %3560 = vmatpush.bf16.msrb.mxu0 %v8555_v53  ;;  %v7983_v14 = vor.u32 %v9565_v45, %v7982_v48  ;;  %v9529_v19 = vld [vmem:[%s14902_s5 + $0xb4] sm:$0xf0]  ;;  %v7966_v3 = vld [vmem:[%s14902_s5 + $0x1a8] sm:$0xf] }
 0x3d4   :  { %3537 = vmatpush.bf16.msrb.mxu3 %v8411_v35  ;;  %v8651_v57 = vor.u32 %v9730_v22, %v8648_v29  ;;  %v8127_v35 = vor.u32 %v9601_v2, %v8126_v31  ;;  %v9561_v22 = vld [vmem:[%s14902_s5 + $0x1b4] sm:$0xf0]  ;;  %v12231_v39 = vperm.slane %v12204_v60, 0  ;;  %v8110_v55 = vld [vmem:[%s14902_s5 + $0x2c8] sm:$0xf] }
 0x3d5   :  { %3381 = vmatmul.bf16.gmra.mxu0 %v12054_v37  ;;  %3443 = vmatmul.bf16.vlgmr.msra.gmra.mxu3 %v11518_v20  ;;  %v7967_v29 = vor.u32 %v9561_v22, %v7966_v3  ;;  %v9629_v53 = vld [vmem:[%s14902_s5 + $0x3d4] sm:$0xf0]  ;;  %v8094_v8 = vld [vmem:[%s14902_s5 + $0x2a8] sm:$0xf] }
 0x3d6   :  { %3491 = vmatmul.bf16.vlgmr.msrb.gmra.mxu1 %v11520_v21  ;;  %3512 = vmatpush.bf16.msrb.mxu2 %v8299_v42  ;;  %v9698_v42 = vld [vmem:[%s14902_s5 + $0x604] sm:$0xf]  ;;  %v9593_v6 = vld [vmem:[%s14902_s5 + $0x2b4] sm:$0xf0]  ;;  %v7934_v22 = vld [vmem:[%s14902_s5 + $0x168] sm:$0xf] }
 0x3d7   :  { %3585 = vmatpush.bf16.msra.mxu1 %v8667_v30  ;;  %3561 = vmatpush.bf16.msrb.mxu0 %v8539_v50  ;;  %v8523_v5 = vor.u32 %v9698_v42, %v8520_v52  ;;  %v8095_v45 = vor.u32 %v9593_v6, %v8094_v8  ;;  %v9589_v40 = vld [vmem:[%s14902_s5 + $0x294] sm:$0xf0]  ;;  %v7790_v26 = vld [vmem:[%s14902_s5 + $0x48] sm:$0xf] }
 0x3d8   :  { %3538 = vmatpush.bf16.msrb.mxu3 %v8395_v44  ;;  %v7839_v44 = vor.u32 %v9529_v19, %v7838_v9  ;;  %v9613_v6 = vld [vmem:[%s14902_s5 + $0x354] sm:$0xf0] }
 0x3da   :  { %3513 = vmatpush.bf16.msrb.mxu2 %v8283_v13  ;;  %v8255_v13 = vor.u32 %v9633_v11, %v8254_v58  ;;  %v9621_v58 = vld [vmem:[%s14902_s5 + $0x394] sm:$0xf0]  ;;  %v7806_v11 = vld [vmem:[%s14902_s5 + $0x68] sm:$0xf] }
 0x3db   :  { %3419 = vmatmul.bf16.vlgmr.msra.gmra.mxu2 %v11555_v1  ;;  %3586 = vmatpush.bf16.msra.mxu1 %v8651_v57  ;;  %v8238_v57 = vld [vmem:[%s14902_s5 + $0x3c8] sm:$0xf] }
 0x3dc   :  { %3627 = vmatpush.bf16.msra.mxu3 %v7999_v43  ;;  %3562 = vmatpush.bf16.msrb.mxu0 %v8523_v5  ;;  %v8239_v18 = vor.u32 %v9629_v53, %v8238_v57  ;;  %v7950_v43 = vld [vmem:[%s14902_s5 + $0x188] sm:$0xf]  ;;  %v9557_v5 = vld [vmem:[%s14902_s5 + $0x194] sm:$0xf0] }
 0x3dd   :  { %v7951_v48 = vor.u32 %v9557_v5, %v7950_v43  ;;  %v9617_v53 = vld [vmem:[%s14902_s5 + $0x374] sm:$0xf0] }
 0x3de   :  { %3514 = vmatpush.bf16.msrb.mxu2 %v8267_v51  ;;  %v9597_v51 = vld [vmem:[%s14902_s5 + $0x2d4] sm:$0xf0] }
 0x3df   :  { %3675 = vmatpush.bf16.msrb.mxu1 %v8255_v13  ;;  %v8111_v50 = vor.u32 %v9597_v51, %v8110_v55  ;;  %v8078_v55 = vld [vmem:[%s14902_s5 + $0x288] sm:$0xf]  ;;  %v9549_v5 = vld [vmem:[%s14902_s5 + $0x154] sm:$0xf0] }
 0x3e0   :  { %3628 = vmatpush.bf16.msra.mxu3 %v7983_v14 }
 0x3e2   :  { %3603 = vmatpush.bf16.msra.mxu2 %v7871_v62  ;;  %v8222_v62 = vld [vmem:[%s14902_s5 + $0x3a8] sm:$0xf] }
 0x3e3   :  { %3676 = vmatpush.bf16.msrb.mxu1 %v8239_v18  ;;  %v8223_v52 = vor.u32 %v9625_v0, %v8222_v62 }
 0x3e4   :  { %3629 = vmatpush.bf16.msra.mxu3 %v7967_v29 }
 0x3e5   :  { %3448 = vmatmul.bf16.gmra.mxu3 %v11618_v49  ;;  %3467 = vmatmul.bf16.vlgmr.msra.gmra.mxu0 %v11621_v34 }
 0x3e6   :  { %3496 = vmatmul.bf16.gmra.mxu1 %v11623_v28  ;;  %3604 = vmatpush.bf16.msra.mxu2 %v7855_v46 }
 0x3e7   :  { %3651 = vmatpush.bf16.msra.mxu0 %v8127_v35  ;;  %3677 = vmatpush.bf16.msrb.mxu1 %v8223_v52  ;;  %v8206_v35 = vld [vmem:[%s14902_s5 + $0x388] sm:$0xf] }
 0x3e8   :  { %3630 = vmatpush.bf16.msra.mxu3 %v7951_v48  ;;  %v8207_v9 = vor.u32 %v9621_v58, %v8206_v35  ;;  %v7918_v52 = vld [vmem:[%s14902_s5 + $0x148] sm:$0xf]  ;;  %v9585_v48 = vld [vmem:[%s14902_s5 + $0x274] sm:$0xf0] }
 0x3e9   :  { %v7919_v8 = vor.u32 %v9549_v5, %v7918_v52  ;;  %v8046_v52 = vld [vmem:[%s14902_s5 + $0x248] sm:$0xf]  ;;  %v9581_v5 = vld [vmem:[%s14902_s5 + $0x254] sm:$0xf0] }
 0x3ea   :  { %3605 = vmatpush.bf16.msra.mxu2 %v7839_v44  ;;  %v9553_v44 = vld [vmem:[%s14902_s5 + $0x174] sm:$0xf0] }
 0x3eb   :  { %3424 = vmatmul.bf16.gmra.mxu2 %v11653_v63  ;;  %3652 = vmatpush.bf16.msra.mxu0 %v8111_v50  ;;  %v7935_v57 = vor.u32 %v9553_v44, %v7934_v22  ;;  %v9517_v50 = vld [vmem:[%s14902_s5 + $0x54] sm:$0xf0]  ;;  %v7774_v22 = vld [vmem:[%s14902_s5 + $0x28] sm:$0xf] }
 0x3ec   :  { %3678 = vmatpush.bf16.msrb.mxu1 %v8207_v9  ;;  %v9545_v9 = vld [vmem:[%s14902_s5 + $0x134] sm:$0xf0] }
 0x3ed   :  { %3631 = vmatpush.bf16.msra.mxu3 %v7935_v57  ;;  %v9513_v44 = vld [vmem:[%s14902_s5 + $0x34] sm:$0xf0] }
 0x3ee   :  { %3606 = vmatpush.bf16.msra.mxu2 %v7823_v36 }
 0x3ef   :  { %3653 = vmatpush.bf16.msra.mxu0 %v8095_v45 }
 0x3f1   :  { %3632 = vmatpush.bf16.msra.mxu3 %v7919_v8  ;;  %v8047_v8 = vor.u32 %v9581_v5, %v8046_v52 }
 0x3f3   :  { %v12190_v47 = vpop.f32.mrf.mxu1 }
 0x3f5   :  { %3453 = vmatmul.bf16.gmra.mxu3 %v11689_v23  ;;  %3472 = vmatmul.bf16.gmra.mxu0 %v11692_v4 }
 0x3f6   :  { %3501 = vmatmul.bf16.gmra.mxu1 %v11694_v38 }
 0x3f8   :  { %v3252_v30 = vpop.f32.mrf.mxu3 }
 0x3fb   :  { %v12233_v15 = vpop.f32.mrf.mxu1  ;;  %3429 = vmatmul.bf16.gmra.mxu2 %v11727_v61 }
 0x3fe   :  { %v3228_v59 = vpop.f32.mrf.mxu2 }
 0x3ff   :  { %v3229_v17 = vadd.f32 %v3228_v59, %v12231_v39  ;;  %v8079_v59 = vor.u32 %v9589_v40, %v8078_v55  ;;  %v7886_v40 = vld [vmem:[%s14902_s5 + $0x108] sm:$0xf] }
 0x400   :  { %v3254_v42 = vpop.f32.mrf.mxu3 }
 0x401   :  { %v3253_v46 = vadd.f32 %v3252_v30, %v3229_v17  ;;  %v9521_v30 = vld [vmem:[%s14902_s5 + $0x74] sm:$0xf0]  ;;  %v7791_v17 = vor.u32 %v9517_v50, %v7790_v26  ;;  %3654 = vmatpush.bf16.msra.mxu0 %v8079_v59 }
 0x402   :  { %v3276_v14 = vpop.f32.mrf.mxu0  ;;  %v7807_v13 = vor.u32 %v9521_v30, %v7806_v11  ;;  %v7902_v11 = vld [vmem:[%s14902_s5 + $0x128] sm:$0xf]  ;;  %v9541_v26 = vld [vmem:[%s14902_s5 + $0x114] sm:$0xf0] }
 0x403   :  { %v3277_v31 = vadd.f32 %v3276_v14, %v3253_v46  ;;  %v12273_v2 = vpop.f32.mrf.mxu1  ;;  %v8062_v46 = vld [vmem:[%s14902_s5 + $0x268] sm:$0xf]  ;;  %v7887_v50 = vor.u32 %v9541_v26, %v7886_v40  ;;  %v9573_v40 = vld [vmem:[%s14902_s5 + $0x214] sm:$0xf0] }
 0x404   :  { %3607 = vmatpush.bf16.msra.mxu2 %v7807_v13  ;;  %v8063_v14 = vor.u32 %v9585_v48, %v8062_v46  ;;  %v8158_v30 = vld [vmem:[%s14902_s5 + $0x328] sm:$0xf]  ;;  %v9577_v48 = vld [vmem:[%s14902_s5 + $0x234] sm:$0xf0] }
 0x405   :  { %3477 = vmatmul.bf16.gmra.mxu0 %v11790_v56  ;;  %3539 = vmatmul.bf16.vlgmr.msrb.gmra.mxu3 %v11787_v12  ;;  %v12290_v19 = vadd.f32 %v12190_v47, %v3277_v31  ;;  %v8190_v47 = vld [vmem:[%s14902_s5 + $0x368] sm:$0xf] }
 0x406   :  { %3587 = vmatmul.bf16.vlgmr.msra.gmra.mxu1 %v11792_v33  ;;  %v3230_v3 = vpop.f32.mrf.mxu2  ;;  %v8191_v51 = vor.u32 %v9617_v53, %v8190_v47  ;;  %3655 = vmatpush.bf16.msra.mxu0 %v8063_v14  ;;  %v7775_v47 = vor.u32 %v9513_v44, %v7774_v22  ;;  %v8030_v46 = vld [vmem:[%s14902_s5 + $0x228] sm:$0xf] }
 0x407   :  { %v3231_v29 = vadd.f32 %v3230_v3, %v12231_v39  ;;  %v9609_v3 = vld [vmem:[%s14902_s5 + $0x334] sm:$0xf0] }
 0x408   :  { %v3257_v18 = vpop.f32.mrf.mxu3  ;;  %3679 = vmatpush.bf16.msrb.mxu1 %v8191_v51  ;;  %3608 = vmatpush.bf16.msra.mxu2 %v7791_v17  ;;  %v8159_v57 = vor.u32 %v9609_v3, %v8158_v30 }
 0x409   :  { %v3255_v36 = vadd.f32 %v3254_v42, %v3231_v29  ;;  %v8174_v42 = vld [vmem:[%s14902_s5 + $0x348] sm:$0xf] }
 0x40a   :  { %v3278_v62 = vpop.f32.mrf.mxu0  ;;  %v8175_v45 = vor.u32 %v9613_v6, %v8174_v42  ;;  %v9509_v6 = vld [vmem:[%s14902_s5 + $0x14] sm:$0xf0]  ;;  %3656 = vmatpush.bf16.msra.mxu0 %v8047_v8 }
 0x40b   :  { %v3279_v0 = vadd.f32 %v3278_v62, %v3255_v36  ;;  %v12318_v43 = vpop.f32.mrf.mxu1  ;;  %3515 = vmatmul.bf16.vlgmr.msrb.gmra.mxu2 %v11828_v54  ;;  %v9605_v36 = vld [vmem:[%s14902_s5 + $0x314] sm:$0xf0] }
 0x40c   :  { %3680 = vmatpush.bf16.msrb.mxu1 %v8175_v45  ;;  %3609 = vmatpush.bf16.msra.mxu2 %v7775_v47  ;;  %v9693_v8 = vld [vmem:[%s14902_s5 + $0x5d4] sm:$0xf0] }
 0x40d   :  { %v12340_v31 = vadd.f32 %v12233_v15, %v3279_v0  ;;  %v7903_v15 = vor.u32 %v9545_v9, %v7902_v11 }
 0x40e   :  { %v3233_v35 = vpop.f32.mrf.mxu2 }
 0x40f   :  { %v3234_v58 = vadd.f32 %v3233_v35, %v12231_v39  ;;  %3633 = vmatpush.bf16.msra.mxu3 %v7903_v15 }
 0x410   :  { %v3259_v13 = vpop.f32.mrf.mxu3  ;;  %3681 = vmatpush.bf16.msrb.mxu1 %v8159_v57  ;;  %v8510_v57 = vld [vmem:[%s14902_s5 + $0x5e8] sm:$0xf] }
 0x411   :  { %v3258_v29 = vadd.f32 %v3257_v18, %v3234_v58  ;;  %v8142_v18 = vld [vmem:[%s14902_s5 + $0x308] sm:$0xf]  ;;  %v8031_v58 = vor.u32 %v9577_v48, %v8030_v46 }
 0x412   :  { %v3281_v53 = vpop.f32.mrf.mxu0  ;;  %v8143_v62 = vor.u32 %v9605_v36, %v8142_v18  ;;  %v8766_v48 = vld [vmem:[%s14902_s5 + $0x7e8] sm:$0xf] }
 0x413   :  { %v3282_v55 = vadd.f32 %v3281_v53, %v3258_v29  ;;  %v3310_v51 = vpop.f32.mrf.mxu1  ;;  %3634 = vmatpush.bf16.msra.mxu3 %v7887_v50  ;;  %3657 = vmatpush.bf16.msra.mxu0 %v8031_v58  ;;  %v9665_v29 = vld [vmem:[%s14902_s5 + $0x4f4] sm:$0xf0] }
 0x414   :  { %3682 = vmatpush.bf16.msrb.mxu1 %v8143_v62  ;;  %v9697_v53 = vld [vmem:[%s14902_s5 + $0x5f4] sm:$0xf0] }
 0x415   :  { %3544 = vmatmul.bf16.gmra.mxu3 %v11891_v7  ;;  %3563 = vmatmul.bf16.vlgmr.msrb.gmra.mxu0 %v11894_v10  ;;  %v12376_v59 = vadd.f32 %v12273_v2, %v3282_v55  ;;  %v7758_v2 = vld [vmem:[%s14902_s5 + $0x8] sm:$0xf]  ;;  %v8511_v50 = vor.u32 %v9697_v53, %v8510_v57  ;;  %v9661_v62 = vld [vmem:[%s14902_s5 + $0x4d4] sm:$0xf0] }
 0x416   :  { %3592 = vmatmul.bf16.gmra.mxu1 %v11905_v16  ;;  %v3235_v17 = vpop.f32.mrf.mxu2  ;;  %v7759_v14 = vor.u32 %v9509_v6, %v7758_v2  ;;  %v8014_v55 = vld [vmem:[%s14902_s5 + $0x208] sm:$0xf]  ;;  %v9757_v53 = vld [vmem:[%s14902_s5 + $0x7d4] sm:$0xf0] }
 0x417   :  { %v3236_v0 = vadd.f32 %v3235_v17, %v12231_v39  ;;  %v8015_v36 = vor.u32 %v9573_v40, %v8014_v55  ;;  %v8366_v17 = vld [vmem:[%s14902_s5 + $0x4c8] sm:$0xf]  ;;  %3723 = vmatpush.bf16.msrb.mxu3 %v8511_v50 }
 0x418   :  { %v3262_v42 = vpop.f32.mrf.mxu3  ;;  %3610 = vmatpush.bf16.msra.mxu2 %v7759_v14 }
 0x419   :  { %v3260_v45 = vadd.f32 %v3259_v13, %v3236_v0  ;;  %v8382_v13 = vld [vmem:[%s14902_s5 + $0x4e8] sm:$0xf]  ;;  %v8367_v0 = vor.u32 %v9661_v62, %v8366_v17  ;;  %3658 = vmatpush.bf16.msra.mxu0 %v8015_v36  ;;  %v9725_v17 = vld [vmem:[%s14902_s5 + $0x6d4] sm:$0xf0] }
 0x41a   :  { %v3283_v35 = vpop.f32.mrf.mxu0  ;;  %v8383_v47 = vor.u32 %v9665_v29, %v8382_v13  ;;  %v8622_v36 = vld [vmem:[%s14902_s5 + $0x6c8] sm:$0xf] }
 0x41b   :  { %v3284_v11 = vadd.f32 %v3283_v35, %v3260_v45  ;;  %v3312_v9 = vpop.f32.mrf.mxu1  ;;  %3520 = vmatmul.bf16.gmra.mxu2 %v11938_v27  ;;  %v9761_v45 = vld [vmem:[%s14902_s5 + $0x7f4] sm:$0xf0]  ;;  %v8334_v62 = vld [vmem:[%s14902_s5 + $0x488] sm:$0xf] }
 0x41c   :  { %3699 = vmatpush.bf16.msrb.mxu2 %v8383_v47  ;;  %v8767_v58 = vor.u32 %v9761_v45, %v8766_v48  ;;  %v8750_v47 = vld [vmem:[%s14902_s5 + $0x7c8] sm:$0xf] }
 0x41d   :  { %v12400_v30 = vadd.f32 %v12318_v43, %v3284_v11  ;;  %v8350_v11 = vld [vmem:[%s14902_s5 + $0x4a8] sm:$0xf]  ;;  %v8751_v55 = vor.u32 %v9757_v53, %v8750_v47  ;;  %v9649_v47 = vld [vmem:[%s14902_s5 + $0x474] sm:$0xf0] }
 0x41e   :  { %v3238_v15 = vpop.f32.mrf.mxu2  ;;  %3771 = vmatpush.bf16.msra.mxu1 %v8767_v58  ;;  %v8606_v48 = vld [vmem:[%s14902_s5 + $0x6a8] sm:$0xf] }
 0x41f   :  { %v3239_v3 = vadd.f32 %v3238_v15, %v12231_v39  ;;  %v9657_v15 = vld [vmem:[%s14902_s5 + $0x4b4] sm:$0xf0] }
 0x420   :  { %v3264_v22 = vpop.f32.mrf.mxu3  ;;  %3700 = vmatpush.bf16.msrb.mxu2 %v8367_v0  ;;  %v8351_v13 = vor.u32 %v9657_v15, %v8350_v11  ;;  %v8718_v15 = vld [vmem:[%s14902_s5 + $0x788] sm:$0xf] }
 0x421   :  { %v3263_v44 = vadd.f32 %v3262_v42, %v3239_v3  ;;  %v8494_v42 = vld [vmem:[%s14902_s5 + $0x5c8] sm:$0xf] }
 0x422   :  { %v3286_v43 = vpop.f32.mrf.mxu0  ;;  %v8495_v46 = vor.u32 %v9693_v8, %v8494_v42  ;;  %v8478_v3 = vld [vmem:[%s14902_s5 + $0x5a8] sm:$0xf]  ;;  %3772 = vmatpush.bf16.msra.mxu1 %v8751_v55 }
 0x423   :  { %v3287_v26 = vadd.f32 %v3286_v43, %v3263_v44  ;;  %v12421_v18 = vpop.f32.mrf.mxu1  ;;  %v8446_v55 = vld [vmem:[%s14902_s5 + $0x568] sm:$0xf] }
 0x424   :  { %3724 = vmatpush.bf16.msrb.mxu3 %v8495_v46  ;;  %3701 = vmatpush.bf16.msrb.mxu2 %v8351_v13  ;;  %v8462_v46 = vld [vmem:[%s14902_s5 + $0x588] sm:$0xf] }
 0x425   :  { %3549 = vmatmul.bf16.gmra.mxu3 %v11978_v24  ;;  %3568 = vmatmul.bf16.gmra.mxu0 %v11981_v32  ;;  %v12431_v52 = vadd.f32 %v3310_v51, %v3287_v26  ;;  %v8638_v51 = vld [vmem:[%s14902_s5 + $0x6e8] sm:$0xf] }
 0x426   :  { %3597 = vmatmul.bf16.gmra.mxu1 %v11983_v25  ;;  %v3240_v5 = vpop.f32.mrf.mxu2 }
 0x427   :  { %v3241_v2 = vadd.f32 %v3240_v5, %v12231_v39  ;;  %v9729_v39 = vld [vmem:[%s14902_s5 + $0x6f4] sm:$0xf0] }
 0x428   :  { %v3348_v6 = vpop.f32.mrf.mxu3  ;;  %v8639_v35 = vor.u32 %v9729_v39, %v8638_v51  ;;  %v9653_v5 = vld [vmem:[%s14902_s5 + $0x494] sm:$0xf0] }
 0x429   :  { %v3265_v14 = vadd.f32 %v3264_v22, %v3241_v2  ;;  %v9689_v22 = vld [vmem:[%s14902_s5 + $0x5b4] sm:$0xf0]  ;;  %v8335_v8 = vor.u32 %v9653_v5, %v8334_v62  ;;  %v8590_v62 = vld [vmem:[%s14902_s5 + $0x688] sm:$0xf] }
 0x42a   :  { %v3288_v44 = vpop.f32.mrf.mxu0  ;;  %3747 = vmatpush.bf16.msrb.mxu0 %v8639_v35  ;;  %v8479_v43 = vor.u32 %v9689_v22, %v8478_v3  ;;  %v9753_v2 = vld [vmem:[%s14902_s5 + $0x7b4] sm:$0xf0] }
 0x42b   :  { %v3289_v29 = vadd.f32 %v3288_v44, %v3265_v14  ;;  %v12465_v57 = vpop.f32.mrf.mxu1  ;;  %3525 = vmatmul.bf16.gmra.mxu2 %v12013_v41  ;;  %v9685_v39 = vld [vmem:[%s14902_s5 + $0x594] sm:$0xf0] }
 0x42c   :  { %3725 = vmatpush.bf16.msrb.mxu3 %v8479_v43  ;;  %v8463_v14 = vor.u32 %v9685_v39, %v8462_v46  ;;  %3702 = vmatpush.bf16.msrb.mxu2 %v8335_v8  ;;  %v9749_v3 = vld [vmem:[%s14902_s5 + $0x794] sm:$0xf0]  ;;  %v8318_v43 = vld [vmem:[%s14902_s5 + $0x468] sm:$0xf] }
 0x42d   :  { %v12474_v40 = vadd.f32 %v3312_v9, %v3289_v29  ;;  %v8623_v9 = vor.u32 %v9725_v17, %v8622_v36  ;;  %v8719_v13 = vor.u32 %v9749_v3, %v8718_v15  ;;  %v8319_v53 = vor.u32 %v9649_v47, %v8318_v43  ;;  %v9745_v17 = vld [vmem:[%s14902_s5 + $0x774] sm:$0xf0]  ;;  %v8430_v39 = vld [vmem:[%s14902_s5 + $0x548] sm:$0xf] }
 0x42e   :  { %v3324_v26 = vpop.f32.mrf.mxu2 }
 0x42f   :  { %v3325_v50 = vadd.f32 %v3324_v26, %v12290_v19  ;;  %v8734_v19 = vld [vmem:[%s14902_s5 + $0x7a8] sm:$0xf]  ;;  %3748 = vmatpush.bf16.msrb.mxu0 %v8623_v9  ;;  %v9681_v26 = vld [vmem:[%s14902_s5 + $0x574] sm:$0xf0] }
 0x430   :  { %v3350_v0 = vpop.f32.mrf.mxu3  ;;  %v8735_v51 = vor.u32 %v9753_v2, %v8734_v19  ;;  %3726 = vmatpush.bf16.msrb.mxu3 %v8463_v14  ;;  %v8447_v36 = vor.u32 %v9681_v26, %v8446_v55  ;;  %v9717_v9 = vld [vmem:[%s14902_s5 + $0x694] sm:$0xf0]  ;;  %3703 = vmatpush.bf16.msrb.mxu2 %v8319_v53  ;;  %v8414_v53 = vld [vmem:[%s14902_s5 + $0x528] sm:$0xf] }
 0x431   :  { %v3349_v42 = vadd.f32 %v3348_v6, %v3325_v50  ;;  %v9721_v6 = vld [vmem:[%s14902_s5 + $0x6b4] sm:$0xf0]  ;;  %v8591_v2 = vor.u32 %v9717_v9, %v8590_v62 }
 0x432   :  { %v3372_v45 = vpop.f32.mrf.mxu0  ;;  %v8607_v11 = vor.u32 %v9721_v6, %v8606_v48  ;;  %3773 = vmatpush.bf16.msra.mxu1 %v8735_v51  ;;  %v9677_v48 = vld [vmem:[%s14902_s5 + $0x554] sm:$0xf0] }
 0x433   :  { %v3373_v35 = vadd.f32 %v3372_v45, %v3349_v42  ;;  %v12507_v58 = vpop.f32.mrf.mxu1  ;;  %v9645_v42 = vld [vmem:[%s14902_s5 + $0x454] sm:$0xf0]  ;;  %v8686_v45 = vld [vmem:[%s14902_s5 + $0x748] sm:$0xf]  ;;  %v8431_v6 = vor.u32 %v9677_v48, %v8430_v39 }
 0x434   :  { %3749 = vmatpush.bf16.msrb.mxu0 %v8607_v11  ;;  %3727 = vmatpush.bf16.msrb.mxu3 %v8447_v36  ;;  %v8286_v36 = vld [vmem:[%s14902_s5 + $0x428] sm:$0xf]  ;;  %v9709_v48 = vld [vmem:[%s14902_s5 + $0x654] sm:$0xf0] }
 0x435   :  { %v3397_v44 = vadd.f32 %v12421_v18, %v3373_v35  ;;  %3573 = vmatmul.bf16.gmra.mxu0 %v12054_v37  ;;  %3635 = vmatmul.bf16.vlgmr.msra.gmra.mxu3 %v11518_v20  ;;  %v9741_v35 = vld [vmem:[%s14902_s5 + $0x754] sm:$0xf0]  ;;  %v8558_v39 = vld [vmem:[%s14902_s5 + $0x648] sm:$0xf] }
 0x436   :  { %3683 = vmatmul.bf16.vlgmr.msrb.gmra.mxu1 %v11520_v21  ;;  %v3326_v22 = vpop.f32.mrf.mxu2  ;;  %v8687_v15 = vor.u32 %v9741_v35, %v8686_v45  ;;  %v8270_v35 = vld [vmem:[%s14902_s5 + $0x408] sm:$0xf] }
 0x437   :  { %v3327_v29 = vadd.f32 %v3326_v22, %v12340_v31  ;;  %3774 = vmatpush.bf16.msra.mxu1 %v8719_v13  ;;  %v8702_v31 = vld [vmem:[%s14902_s5 + $0x768] sm:$0xf]  ;;  %v3987_v3 = vmax.f32 %v3397_v44, 0.0 }
 0x438   :  { %v3353_v18 = vpop.f32.mrf.mxu3  ;;  %v8703_v19 = vor.u32 %v9745_v17, %v8702_v31  ;;  %3750 = vmatpush.bf16.msrb.mxu0 %v8591_v2  ;;  %3728 = vmatpush.bf16.msrb.mxu3 %v8431_v6  ;;  %v8670_v44 = vld [vmem:[%s14902_s5 + $0x728] sm:$0xf]  ;;  %v9641_v17 = vld [vmem:[%s14902_s5 + $0x434] sm:$0xf0]  ;;  %v8559_v6 = vor.u32 %v9709_v48, %v8558_v39 }
 0x439   :  { %v3351_v50 = vadd.f32 %v3350_v0, %v3327_v29  ;;  %v8302_v0 = vld [vmem:[%s14902_s5 + $0x448] sm:$0xf] }
 0x43a   :  { %v3374_v5 = vpop.f32.mrf.mxu0  ;;  %v8303_v46 = vor.u32 %v9645_v42, %v8302_v0  ;;  %v8574_v29 = vld [vmem:[%s14902_s5 + $0x668] sm:$0xf]  ;;  %v9669_v0 = vld [vmem:[%s14902_s5 + $0x514] sm:$0xf0] }
 0x43b   :  { %v3375_v8 = vadd.f32 %v3374_v5, %v3351_v50  ;;  %v12550_v51 = vpop.f32.mrf.mxu1  ;;  %3611 = vmatmul.bf16.vlgmr.msra.gmra.mxu2 %v11555_v1  ;;  %3775 = vmatpush.bf16.msra.mxu1 %v8703_v19  ;;  %v9737_v50 = vld [vmem:[%s14902_s5 + $0x734] sm:$0xf0]  ;;  %v8287_v5 = vor.u32 %v9641_v17, %v8286_v36  ;;  %v8654_v42 = vld [vmem:[%s14902_s5 + $0x708] sm:$0xf] }
 0x43c   :  { %3704 = vmatpush.bf16.msrb.mxu2 %v8303_v46  ;;  %v8671_v9 = vor.u32 %v9737_v50, %v8670_v44  ;;  %v9733_v46 = vld [vmem:[%s14902_s5 + $0x714] sm:$0xf0]  ;;  %v8000_v50 = vld [vmem:[%s14902_s5 + $0x1f8] sm:$0xf0] }
 0x43d   :  { %v3399_v14 = vadd.f32 %v12465_v57, %v3375_v8  ;;  %v9713_v57 = vld [vmem:[%s14902_s5 + $0x674] sm:$0xf0] }
 0x43e   :  { %v3329_v11 = vpop.f32.mrf.mxu2  ;;  %v8575_v47 = vor.u32 %v9713_v57, %v8574_v29  ;;  %v9705_v29 = vld [vmem:[%s14902_s5 + $0x634] sm:$0xf0] }
 0x43f   :  { %v3991_v13 = vmax.f32 %v3399_v14, 0.0  ;;  %v3330_v22 = vadd.f32 %v3329_v11, %v12376_v59  ;;  %3776 = vmatpush.bf16.msra.mxu1 %v8687_v15  ;;  %v9673_v59 = vld [vmem:[%s14902_s5 + $0x534] sm:$0xf0]  ;;  %v8655_v14 = vor.u32 %v9733_v46, %v8654_v42  ;;  %v7856_v46 = vld [vmem:[%s14902_s5 + $0xd8] sm:$0xf0] }
 0x440   :  { %v3355_v43 = vpop.f32.mrf.mxu3  ;;  %v8415_v31 = vor.u32 %v9673_v59, %v8414_v53  ;;  %3751 = vmatpush.bf16.msrb.mxu0 %v8575_v47  ;;  %3705 = vmatpush.bf16.msrb.mxu2 %v8287_v5  ;;  %v9637_v11 = vld [vmem:[%s14902_s5 + $0x414] sm:$0xf0] }
 0x441   :  { %v12582_v55 = vpack.c.bf16 %v3991_v13, %v3987_v3  ;;  %v3354_v26 = vadd.f32 %v3353_v18, %v3330_v22  ;;  %v8398_v18 = vld [vmem:[%s14902_s5 + $0x508] sm:$0xf]  ;;  %v8271_v3 = vor.u32 %v9637_v11, %v8270_v35  ;;  %v9563_v35 = vld [vmem:[%s14902_s5 + $0x1cc] sm:$0xf]  ;;  %v7984_v11 = vld [vmem:[%s14902_s5 + $0x1d8] sm:$0xf0] }
 0x442   :  { %v3377_v62 = vpop.f32.mrf.mxu0  ;;  %3729 = vmatpush.bf16.msrb.mxu3 %v8415_v31  ;;  %v8399_v8 = vor.u32 %v9669_v0, %v8398_v18  ;;  %v8542_v22 = vld [vmem:[%s14902_s5 + $0x628] sm:$0xf]  ;;  %v9701_v0 = vld [vmem:[%s14902_s5 + $0x614] sm:$0xf0] }
 0x443   :  { %v3378_v19 = vadd.f32 %v3377_v62, %v3354_v26  ;;  %v12593_v2 = vpop.f32.mrf.mxu1  ;;  %3777 = vmatpush.bf16.msra.mxu1 %v8671_v9  ;;  %v8543_v47 = vor.u32 %v9705_v29, %v8542_v22  ;;  %v7872_v26 = vld [vmem:[%s14902_s5 + $0xf8] sm:$0xf0]  ;;  %v8526_v18 = vld [vmem:[%s14902_s5 + $0x608] sm:$0xf] }
 0x444   :  { %3752 = vmatpush.bf16.msrb.mxu0 %v8559_v6  ;;  %3706 = vmatpush.bf16.msrb.mxu2 %v8271_v3  ;;  %v8128_v22 = vld [vmem:[%s14902_s5 + $0x2f8] sm:$0xf0] }
 0x445   :  { %v3402_v45 = vadd.f32 %v12507_v58, %v3378_v19  ;;  %3640 = vmatmul.bf16.gmra.mxu3 %v11618_v49  ;;  %3659 = vmatmul.bf16.vlgmr.msra.gmra.mxu0 %v11621_v34 }
 0x446   :  { %3688 = vmatmul.bf16.gmra.mxu1 %v11623_v28  ;;  %v3331_v15 = vpop.f32.mrf.mxu2  ;;  %3730 = vmatpush.bf16.msrb.mxu3 %v8399_v8  ;;  %v8527_v8 = vor.u32 %v9701_v0, %v8526_v18  ;;  %v8240_v18 = vld [vmem:[%s14902_s5 + $0x3d8] sm:$0xf0] }
 0x447   :  { %v3332_v58 = vadd.f32 %v3331_v15, %v12400_v30  ;;  %3778 = vmatpush.bf16.msra.mxu1 %v8655_v14  ;;  %v9535_v30 = vld [vmem:[%s14902_s5 + $0xec] sm:$0xf]  ;;  %v3995_v9 = vmax.f32 %v3402_v45, 0.0  ;;  %v7987_v15 = vor.u32 %v9563_v35, %v7984_v11 }
 0x448   :  { %v3358_v13 = vpop.f32.mrf.mxu3  ;;  %3753 = vmatpush.bf16.msrb.mxu0 %v8543_v47  ;;  %v7875_v31 = vor.u32 %v9535_v30, %v7872_v26  ;;  %v8256_v47 = vld [vmem:[%s14902_s5 + $0x3f8] sm:$0xf0]  ;;  %v9527_v30 = vld [vmem:[%s14902_s5 + $0xac] sm:$0xf] }
 0x449   :  { %v3356_v57 = vadd.f32 %v3355_v43, %v3332_v58  ;;  %v9567_v43 = vld [vmem:[%s14902_s5 + $0x1ec] sm:$0xf]  ;;  %v7840_v26 = vld [vmem:[%s14902_s5 + $0xb8] sm:$0xf0] }
 0x44a   :  { %v3379_v53 = vpop.f32.mrf.mxu0  ;;  %v8003_v17 = vor.u32 %v9567_v43, %v8000_v50  ;;  %3795 = vmatpush.bf16.msra.mxu2 %v7875_v31  ;;  %v7843_v31 = vor.u32 %v9527_v30, %v7840_v26  ;;  %v7968_v50 = vld [vmem:[%s14902_s5 + $0x1b8] sm:$0xf0] }
 0x44b   :  { %v3380_v59 = vadd.f32 %v3379_v53, %v3356_v57  ;;  %v12630_v44 = vpop.f32.mrf.mxu1  ;;  %3616 = vmatmul.bf16.gmra.mxu2 %v11653_v63 }
 0x44c   :  { %3819 = vmatpush.bf16.msra.mxu3 %v8003_v17  ;;  %3754 = vmatpush.bf16.msrb.mxu0 %v8527_v8  ;;  %v12699_v17 = vperm.slane %v12204_v60, 1  ;;  %v9595_v60 = vld [vmem:[%s14902_s5 + $0x2cc] sm:$0xf] }
 0x44d   :  { %v3404_v36 = vadd.f32 %v12550_v51, %v3380_v59  ;;  %v9531_v51 = vld [vmem:[%s14902_s5 + $0xcc] sm:$0xf] }
 0x44e   :  { %v3334_v62 = vpop.f32.mrf.mxu2  ;;  %v7859_v39 = vor.u32 %v9531_v51, %v7856_v46  ;;  %v9523_v8 = vld [vmem:[%s14902_s5 + $0x8c] sm:$0xf]  ;;  %v7824_v51 = vld [vmem:[%s14902_s5 + $0x98] sm:$0xf0] }
 0x44f   :  { %v3999_v5 = vmax.f32 %v3404_v36, 0.0  ;;  %v3335_v19 = vadd.f32 %v3334_v62, %v12431_v52 }
 0x450   :  { %v3360_v42 = vpop.f32.mrf.mxu3  ;;  %3796 = vmatpush.bf16.msra.mxu2 %v7859_v39  ;;  %3820 = vmatpush.bf16.msra.mxu3 %v7987_v15  ;;  %v7827_v39 = vor.u32 %v9523_v8, %v7824_v51  ;;  %v9623_v15 = vld [vmem:[%s14902_s5 + $0x3ac] sm:$0xf]  ;;  %v8192_v51 = vld [vmem:[%s14902_s5 + $0x378] sm:$0xf0] }
 0x451   :  { %v3359_v52 = vadd.f32 %v3358_v13, %v3335_v19  ;;  %v12659_v48 = vpack.c.bf16 %v3999_v5, %v3995_v9  ;;  %v9599_v13 = vld [vmem:[%s14902_s5 + $0x2ec] sm:$0xf] }
 0x452   :  { %v3382_v45 = vpop.f32.mrf.mxu0  ;;  %v8131_v57 = vor.u32 %v9599_v13, %v8128_v22  ;;  %v9627_v19 = vld [vmem:[%s14902_s5 + $0x3cc] sm:$0xf] }
 0x453   :  { %v3383_v14 = vadd.f32 %v3382_v45, %v3359_v52  ;;  %v12661_v6 = vpop.f32.mrf.mxu1  ;;  %v8243_v0 = vor.u32 %v9627_v19, %v8240_v18  ;;  %v9555_v22 = vld [vmem:[%s14902_s5 + $0x18c] sm:$0xf] }
 0x454   :  { %3843 = vmatpush.bf16.msra.mxu0 %v8131_v57  ;;  %3797 = vmatpush.bf16.msra.mxu2 %v7843_v31  ;;  %v9619_v31 = vld [vmem:[%s14902_s5 + $0x38c] sm:$0xf] }
 0x455   :  { %v3407_v3 = vadd.f32 %v12593_v2, %v3383_v14  ;;  %3645 = vmatmul.bf16.gmra.mxu3 %v11689_v23  ;;  %3664 = vmatmul.bf16.gmra.mxu0 %v11692_v4  ;;  %v9631_v2 = vld [vmem:[%s14902_s5 + $0x3ec] sm:$0xf] }
 0x456   :  { %3693 = vmatmul.bf16.gmra.mxu1 %v11694_v38  ;;  %v3336_v58 = vpop.f32.mrf.mxu2  ;;  %v8259_v59 = vor.u32 %v9631_v2, %v8256_v47  ;;  %v8096_v47 = vld [vmem:[%s14902_s5 + $0x2b8] sm:$0xf0] }
 0x457   :  { %v3337_v29 = vadd.f32 %v3336_v58, %v12474_v40  ;;  %v9559_v40 = vld [vmem:[%s14902_s5 + $0x1ac] sm:$0xf]  ;;  %v4003_v14 = vmax.f32 %v3407_v3, 0.0  ;;  %v8224_v58 = vld [vmem:[%s14902_s5 + $0x3b8] sm:$0xf0] }
 0x458   :  { %v3444_v53 = vpop.f32.mrf.mxu3  ;;  %3867 = vmatpush.bf16.msrb.mxu1 %v8259_v59  ;;  %v7971_v62 = vor.u32 %v9559_v40, %v7968_v50  ;;  %3798 = vmatpush.bf16.msra.mxu2 %v7827_v39  ;;  %v7952_v3 = vld [vmem:[%s14902_s5 + $0x198] sm:$0xf0]  ;;  %v9519_v50 = vld [vmem:[%s14902_s5 + $0x6c] sm:$0xf] }
 0x459   :  { %v3361_v43 = vadd.f32 %v3360_v42, %v3337_v29  ;;  %v8112_v42 = vld [vmem:[%s14902_s5 + $0x2d8] sm:$0xf0]  ;;  %v9591_v29 = vld [vmem:[%s14902_s5 + $0x2ac] sm:$0xf]  ;;  %v7955_v2 = vor.u32 %v9555_v22, %v7952_v3 }
 0x45a   :  { %v3384_v36 = vpop.f32.mrf.mxu0  ;;  %3821 = vmatpush.bf16.msra.mxu3 %v7971_v62  ;;  %v8115_v52 = vor.u32 %v9595_v60, %v8112_v42  ;;  %v8099_v26 = vor.u32 %v9591_v29, %v8096_v47  ;;  %v7808_v62 = vld [vmem:[%s14902_s5 + $0x78] sm:$0xf0]  ;;  %v9551_v60 = vld [vmem:[%s14902_s5 + $0x16c] sm:$0xf] }
 0x45b   :  { %v3385_v9 = vadd.f32 %v3384_v36, %v3361_v43  ;;  %v12701_v5 = vpop.f32.mrf.mxu1  ;;  %3621 = vmatmul.bf16.gmra.mxu2 %v11727_v61  ;;  %v9547_v29 = vld [vmem:[%s14902_s5 + $0x14c] sm:$0xf]  ;;  %v8176_v47 = vld [vmem:[%s14902_s5 + $0x358] sm:$0xf0] }
 0x45c   :  { %3868 = vmatpush.bf16.msrb.mxu1 %v8243_v0  ;;  %3844 = vmatpush.bf16.msra.mxu0 %v8115_v52  ;;  %v7936_v0 = vld [vmem:[%s14902_s5 + $0x178] sm:$0xf0] }
 0x45d   :  { %v3409_v46 = vadd.f32 %v12630_v44, %v3385_v9  ;;  %v8227_v44 = vor.u32 %v9623_v15, %v8224_v58  ;;  %v7811_v9 = vor.u32 %v9519_v50, %v7808_v62  ;;  %v7939_v8 = vor.u32 %v9551_v60, %v7936_v0  ;;  %v9543_v62 = vld [vmem:[%s14902_s5 + $0x12c] sm:$0xf]  ;;  %v8160_v0 = vld [vmem:[%s14902_s5 + $0x338] sm:$0xf0] }
 0x45e   :  { %v3420_v45 = vpop.f32.mrf.mxu2  ;;  %3822 = vmatpush.bf16.msra.mxu3 %v7955_v2 }
 0x45f   :  { %v4007_v35 = vmax.f32 %v3409_v46, 0.0  ;;  %v3421_v11 = vadd.f32 %v3420_v45, %v12699_v17  ;;  %3799 = vmatpush.bf16.msra.mxu2 %v7811_v9  ;;  %v9587_v46 = vld [vmem:[%s14902_s5 + $0x28c] sm:$0xf]  ;;  %v8080_v45 = vld [vmem:[%s14902_s5 + $0x298] sm:$0xf0] }
 0x460   :  { %v3446_v13 = vpop.f32.mrf.mxu3  ;;  %3869 = vmatpush.bf16.msrb.mxu1 %v8227_v44  ;;  %3845 = vmatpush.bf16.msra.mxu0 %v8099_v26  ;;  %v8083_v15 = vor.u32 %v9587_v46, %v8080_v45  ;;  %v8064_v26 = vld [vmem:[%s14902_s5 + $0x278] sm:$0xf0] }
 0x461   :  { %v3445_v57 = vadd.f32 %v3444_v53, %v3421_v11  ;;  %v12742_v59 = vpack.c.bf16 %v4007_v35, %v4003_v14  ;;  %v8208_v53 = vld [vmem:[%s14902_s5 + $0x398] sm:$0xf0]  ;;  %v9515_v14 = vld [vmem:[%s14902_s5 + $0x4c] sm:$0xf] }
 0x462   :  { %v3468_v30 = vpop.f32.mrf.mxu0  ;;  %v8211_v36 = vor.u32 %v9619_v31, %v8208_v53  ;;  %v7792_v35 = vld [vmem:[%s14902_s5 + $0x58] sm:$0xf0]  ;;  %3823 = vmatpush.bf16.msra.mxu3 %v7939_v8 }
 0x463   :  { %v3469_v40 = vadd.f32 %v3468_v30, %v3445_v57  ;;  %v12744_v43 = vpop.f32.mrf.mxu1  ;;  %v7795_v58 = vor.u32 %v9515_v14, %v7792_v35  ;;  %v7920_v57 = vld [vmem:[%s14902_s5 + $0x158] sm:$0xf0]  ;;  %v9583_v30 = vld [vmem:[%s14902_s5 + $0x26c] sm:$0xf] }
 0x464   :  { %3870 = vmatpush.bf16.msrb.mxu1 %v8211_v36  ;;  %3846 = vmatpush.bf16.msra.mxu0 %v8083_v15  ;;  %v7923_v2 = vor.u32 %v9547_v29, %v7920_v57  ;;  %v8067_v31 = vor.u32 %v9583_v30, %v8064_v26  ;;  %v7904_v9 = vld [vmem:[%s14902_s5 + $0x138] sm:$0xf0]  ;;  %v9539_v35 = vld [vmem:[%s14902_s5 + $0x10c] sm:$0xf] }
 0x465   :  { %3669 = vmatmul.bf16.gmra.mxu0 %v11790_v56  ;;  %3731 = vmatmul.bf16.vlgmr.msrb.gmra.mxu3 %v11787_v12  ;;  %v12761_v19 = vadd.f32 %v12661_v6, %v3469_v40  ;;  %v9615_v6 = vld [vmem:[%s14902_s5 + $0x36c] sm:$0xf]  ;;  %v7776_v8 = vld [vmem:[%s14902_s5 + $0x38] sm:$0xf0] }
 0x466   :  { %3779 = vmatmul.bf16.vlgmr.msra.gmra.mxu1 %v11792_v33  ;;  %v3422_v18 = vpop.f32.mrf.mxu2  ;;  %v8195_v39 = vor.u32 %v9615_v6, %v8192_v51  ;;  %3800 = vmatpush.bf16.msra.mxu2 %v7795_v58  ;;  %v8144_v58 = vld [vmem:[%s14902_s5 + $0x318] sm:$0xf0] }
 0x467   :  { %v3423_v42 = vadd.f32 %v3422_v18, %v12699_v17  ;;  %3824 = vmatpush.bf16.msra.mxu3 %v7923_v2  ;;  %v9607_v18 = vld [vmem:[%s14902_s5 + $0x32c] sm:$0xf]  ;;  %v8048_v2 = vld [vmem:[%s14902_s5 + $0x258] sm:$0xf0] }
 0x468   :  { %v3449_v52 = vpop.f32.mrf.mxu3  ;;  %3871 = vmatpush.bf16.msrb.mxu1 %v8195_v39  ;;  %3847 = vmatpush.bf16.msra.mxu0 %v8067_v31  ;;  %v8163_v51 = vor.u32 %v9607_v18, %v8160_v0  ;;  %v7760_v26 = vld [vmem:[%s14902_s5 + $0x18] sm:$0xf0] }
 0x469   :  { %v3447_v11 = vadd.f32 %v3446_v13, %v3423_v42  ;;  %v9611_v13 = vld [vmem:[%s14902_s5 + $0x34c] sm:$0xf]  ;;  %v8032_v31 = vld [vmem:[%s14902_s5 + $0x238] sm:$0xf0] }
 0x46a   :  { %v3470_v44 = vpop.f32.mrf.mxu0  ;;  %v8179_v40 = vor.u32 %v9611_v13, %v8176_v47  ;;  %v9511_v42 = vld [vmem:[%s14902_s5 + $0x2c] sm:$0xf] }
 0x46b   :  { %v3471_v22 = vadd.f32 %v3470_v44, %v3447_v11  ;;  %v12789_v3 = vpop.f32.mrf.mxu1  ;;  %3707 = vmatmul.bf16.vlgmr.msrb.gmra.mxu2 %v11828_v54  ;;  %v7779_v46 = vor.u32 %v9511_v42, %v7776_v8  ;;  %v7888_v11 = vld [vmem:[%s14902_s5 + $0x118] sm:$0xf0]  ;;  %v9579_v13 = vld [vmem:[%s14902_s5 + $0x24c] sm:$0xf] }
 0x46c   :  { %3872 = vmatpush.bf16.msrb.mxu1 %v8179_v40  ;;  %v7891_v15 = vor.u32 %v9539_v35, %v7888_v11  ;;  %v8051_v30 = vor.u32 %v9579_v13, %v8048_v2  ;;  %v9575_v40 = vld [vmem:[%s14902_s5 + $0x22c] sm:$0xf]  ;;  %v8512_v35 = vld [vmem:[%s14902_s5 + $0x5f8] sm:$0xf0] }
 0x46d   :  { %v12811_v53 = vadd.f32 %v12701_v5, %v3471_v22  ;;  %v7907_v5 = vor.u32 %v9543_v62, %v7904_v9  ;;  %3801 = vmatpush.bf16.msra.mxu2 %v7779_v46  ;;  %v8035_v9 = vor.u32 %v9575_v40, %v8032_v31  ;;  %v8384_v46 = vld [vmem:[%s14902_s5 + $0x4f8] sm:$0xf0]  ;;  %v9571_v11 = vld [vmem:[%s14902_s5 + $0x20c] sm:$0xf] }
 0x46e   :  { %v3425_v50 = vpop.f32.mrf.mxu2  ;;  %3848 = vmatpush.bf16.msra.mxu0 %v8051_v30  ;;  %v8368_v13 = vld [vmem:[%s14902_s5 + $0x4d8] sm:$0xf0] }
 0x46f   :  { %v3426_v36 = vadd.f32 %v3425_v50, %v12699_v17  ;;  %3825 = vmatpush.bf16.msra.mxu3 %v7907_v5  ;;  %v8496_v40 = vld [vmem:[%s14902_s5 + $0x5d8] sm:$0xf0] }
 0x470   :  { %v3451_v60 = vpop.f32.mrf.mxu3  ;;  %3873 = vmatpush.bf16.msrb.mxu1 %v8163_v51 }
 0x471   :  { %v3450_v6 = vadd.f32 %v3449_v52, %v3426_v36  ;;  %v9603_v52 = vld [vmem:[%s14902_s5 + $0x30c] sm:$0xf] }
 0x472   :  { %v3473_v39 = vpop.f32.mrf.mxu0  ;;  %v8147_v29 = vor.u32 %v9603_v52, %v8144_v58  ;;  %3849 = vmatpush.bf16.msra.mxu0 %v8035_v9  ;;  %v8016_v52 = vld [vmem:[%s14902_s5 + $0x218] sm:$0xf0] }
 0x473   :  { %v3474_v45 = vadd.f32 %v3473_v39, %v3450_v6  ;;  %v3502_v14 = vpop.f32.mrf.mxu1  ;;  %3826 = vmatpush.bf16.msra.mxu3 %v7891_v15  ;;  %v9695_v39 = vld [vmem:[%s14902_s5 + $0x5ec] sm:$0xf] }
 0x474   :  { %3874 = vmatpush.bf16.msrb.mxu1 %v8147_v29  ;;  %v8019_v29 = vor.u32 %v9571_v11, %v8016_v52  ;;  %v9755_v11 = vld [vmem:[%s14902_s5 + $0x7cc] sm:$0xf]  ;;  %v8752_v52 = vld [vmem:[%s14902_s5 + $0x7d8] sm:$0xf0] }
 0x475   :  { %3736 = vmatmul.bf16.gmra.mxu3 %v11891_v7  ;;  %3755 = vmatmul.bf16.vlgmr.msrb.gmra.mxu0 %v11894_v10  ;;  %v12847_v44 = vadd.f32 %v12744_v43, %v3474_v45  ;;  %v9507_v43 = vld [vmem:[%s14902_s5 + $0xc] sm:$0xf] }
 0x476   :  { %3784 = vmatmul.bf16.gmra.mxu1 %v11905_v16  ;;  %v3427_v22 = vpop.f32.mrf.mxu2  ;;  %v7763_v36 = vor.u32 %v9507_v43, %v7760_v26  ;;  %3850 = vmatpush.bf16.msra.mxu0 %v8019_v29  ;;  %v9691_v26 = vld [vmem:[%s14902_s5 + $0x5cc] sm:$0xf] }
 0x477   :  { %v3428_v57 = vadd.f32 %v3427_v22, %v12699_v17  ;;  %v8515_v22 = vor.u32 %v9695_v39, %v8512_v35 }
 0x478   :  { %v3454_v47 = vpop.f32.mrf.mxu3  ;;  %3802 = vmatpush.bf16.msra.mxu2 %v7763_v36  ;;  %v9759_v36 = vld [vmem:[%s14902_s5 + $0x7ec] sm:$0xf] }
 0x479   :  { %v3452_v50 = vadd.f32 %v3451_v60, %v3428_v57  ;;  %v9663_v60 = vld [vmem:[%s14902_s5 + $0x4ec] sm:$0xf]  ;;  %3915 = vmatpush.bf16.msrb.mxu3 %v8515_v22 }
 0x47a   :  { %v3475_v62 = vpop.f32.mrf.mxu0  ;;  %v8387_v45 = vor.u32 %v9663_v60, %v8384_v46  ;;  %v9659_v57 = vld [vmem:[%s14902_s5 + $0x4cc] sm:$0xf] }
 0x47b   :  { %v3476_v18 = vadd.f32 %v3475_v62, %v3452_v50  ;;  %v3504_v5 = vpop.f32.mrf.mxu1  ;;  %3712 = vmatmul.bf16.gmra.mxu2 %v11938_v27  ;;  %v8371_v2 = vor.u32 %v9659_v57, %v8368_v13  ;;  %v8499_v50 = vor.u32 %v9691_v26, %v8496_v40  ;;  %v8768_v62 = vld [vmem:[%s14902_s5 + $0x7f8] sm:$0xf0]  ;;  %v9687_v60 = vld [vmem:[%s14902_s5 + $0x5ac] sm:$0xf] }
 0x47c   :  { %3891 = vmatpush.bf16.msrb.mxu2 %v8387_v45  ;;  %v9723_v13 = vld [vmem:[%s14902_s5 + $0x6cc] sm:$0xf]  ;;  %v8336_v26 = vld [vmem:[%s14902_s5 + $0x498] sm:$0xf0] }
 0x47d   :  { %v12871_v0 = vadd.f32 %v12789_v3, %v3476_v18  ;;  %3916 = vmatpush.bf16.msrb.mxu3 %v8499_v50  ;;  %v8736_v40 = vld [vmem:[%s14902_s5 + $0x7b8] sm:$0xf0] }
 0x47e   :  { %v3430_v42 = vpop.f32.mrf.mxu2 }
 0x47f   :  { %v3431_v8 = vadd.f32 %v3430_v42, %v12699_v17  ;;  %v8771_v42 = vor.u32 %v9759_v36, %v8768_v62  ;;  %v9683_v36 = vld [vmem:[%s14902_s5 + $0x58c] sm:$0xf]  ;;  %v8464_v62 = vld [vmem:[%s14902_s5 + $0x598] sm:$0xf0] }
 0x480   :  { %v3456_v6 = vpop.f32.mrf.mxu3  ;;  %3892 = vmatpush.bf16.msrb.mxu2 %v8371_v2  ;;  %v8624_v2 = vld [vmem:[%s14902_s5 + $0x6d8] sm:$0xf0] }
 0x481   :  { %v3455_v51 = vadd.f32 %v3454_v47, %v3431_v8  ;;  %v9655_v8 = vld [vmem:[%s14902_s5 + $0x4ac] sm:$0xf]  ;;  %3963 = vmatpush.bf16.msra.mxu1 %v8771_v42  ;;  %v8467_v42 = vor.u32 %v9683_v36, %v8464_v62 }
 0x482   :  { %v3478_v3 = vpop.f32.mrf.mxu0  ;;  %v9675_v62 = vld [vmem:[%s14902_s5 + $0x54c] sm:$0xf] }
 0x483   :  { %v3479_v15 = vadd.f32 %v3478_v3, %v3455_v51  ;;  %v12892_v58 = vpop.f32.mrf.mxu1  ;;  %v8352_v51 = vld [vmem:[%s14902_s5 + $0x4b8] sm:$0xf0] }
 0x484   :  { %v8355_v39 = vor.u32 %v9655_v8, %v8352_v51 }
 0x485   :  { %3741 = vmatmul.bf16.gmra.mxu3 %v11978_v24  ;;  %3760 = vmatmul.bf16.gmra.mxu0 %v11981_v32  ;;  %v12902_v43 = vadd.f32 %v3502_v14, %v3479_v15  ;;  %v9727_v14 = vld [vmem:[%s14902_s5 + $0x6ec] sm:$0xf]  ;;  %v8755_v15 = vor.u32 %v9755_v11, %v8752_v52 }
 0x486   :  { %3789 = vmatmul.bf16.gmra.mxu1 %v11983_v25  ;;  %v3432_v47 = vpop.f32.mrf.mxu2  ;;  %3893 = vmatpush.bf16.msrb.mxu2 %v8355_v39  ;;  %v8720_v39 = vld [vmem:[%s14902_s5 + $0x798] sm:$0xf0]  ;;  %v9647_v52 = vld [vmem:[%s14902_s5 + $0x46c] sm:$0xf] }
 0x487   :  { %v3433_v30 = vadd.f32 %v3432_v47, %v12699_v17  ;;  %v8640_v17 = vld [vmem:[%s14902_s5 + $0x6f8] sm:$0xf0]  ;;  %v9651_v47 = vld [vmem:[%s14902_s5 + $0x48c] sm:$0xf]  ;;  %3964 = vmatpush.bf16.msra.mxu1 %v8755_v15 }
 0x488   :  { %v3540_v31 = vpop.f32.mrf.mxu3  ;;  %v8643_v18 = vor.u32 %v9727_v14, %v8640_v17  ;;  %v8339_v50 = vor.u32 %v9651_v47, %v8336_v26  ;;  %v8320_v15 = vld [vmem:[%s14902_s5 + $0x478] sm:$0xf0]  ;;  %v9715_v47 = vld [vmem:[%s14902_s5 + $0x68c] sm:$0xf] }
 0x489   :  { %v3457_v9 = vadd.f32 %v3456_v6, %v3433_v30  ;;  %v8480_v6 = vld [vmem:[%s14902_s5 + $0x5b8] sm:$0xf0] }
 0x48a   :  { %v3480_v46 = vpop.f32.mrf.mxu0  ;;  %3939 = vmatpush.bf16.msrb.mxu0 %v8643_v18  ;;  %v8483_v35 = vor.u32 %v9687_v60, %v8480_v6  ;;  %3894 = vmatpush.bf16.msrb.mxu2 %v8339_v50 }
 0x48b   :  { %v3481_v3 = vadd.f32 %v3480_v46, %v3457_v9  ;;  %v12936_v45 = vpop.f32.mrf.mxu1  ;;  %3717 = vmatmul.bf16.gmra.mxu2 %v12013_v41  ;;  %v9719_v9 = vld [vmem:[%s14902_s5 + $0x6ac] sm:$0xf] }
 0x48c   :  { %3917 = vmatpush.bf16.msrb.mxu3 %v8483_v35  ;;  %v9747_v46 = vld [vmem:[%s14902_s5 + $0x78c] sm:$0xf] }
 0x48d   :  { %v12945_v22 = vadd.f32 %v3504_v5, %v3481_v3  ;;  %v8627_v5 = vor.u32 %v9723_v13, %v8624_v2  ;;  %v8723_v3 = vor.u32 %v9747_v46, %v8720_v39  ;;  %v8704_v2 = vld [vmem:[%s14902_s5 + $0x778] sm:$0xf0] }
 0x48e   :  { %v3516_v29 = vpop.f32.mrf.mxu2 }
 0x48f   :  { %v3517_v57 = vadd.f32 %v3516_v29, %v12761_v19  ;;  %v9751_v19 = vld [vmem:[%s14902_s5 + $0x7ac] sm:$0xf]  ;;  %3940 = vmatpush.bf16.msrb.mxu0 %v8627_v5  ;;  %v8323_v29 = vor.u32 %v9647_v52, %v8320_v15  ;;  %v8592_v5 = vld [vmem:[%s14902_s5 + $0x698] sm:$0xf0] }
 0x490   :  { %v3542_v30 = vpop.f32.mrf.mxu3  ;;  %v8739_v17 = vor.u32 %v9751_v19, %v8736_v40  ;;  %3918 = vmatpush.bf16.msrb.mxu3 %v8467_v42  ;;  %v8595_v40 = vor.u32 %v9715_v47, %v8592_v5  ;;  %v9671_v15 = vld [vmem:[%s14902_s5 + $0x52c] sm:$0xf] }
 0x491   :  { %v3541_v14 = vadd.f32 %v3540_v31, %v3517_v57  ;;  %v8608_v31 = vld [vmem:[%s14902_s5 + $0x6b8] sm:$0xf0]  ;;  %3895 = vmatpush.bf16.msrb.mxu2 %v8323_v29 }
 0x492   :  { %v3564_v18 = vpop.f32.mrf.mxu0  ;;  %v8611_v60 = vor.u32 %v9719_v9, %v8608_v31  ;;  %3965 = vmatpush.bf16.msra.mxu1 %v8739_v17  ;;  %v8432_v9 = vld [vmem:[%s14902_s5 + $0x558] sm:$0xf0] }
 0x493   :  { %v3565_v8 = vadd.f32 %v3564_v18, %v3541_v14  ;;  %v12978_v51 = vpop.f32.mrf.mxu1  ;;  %v8304_v14 = vld [vmem:[%s14902_s5 + $0x458] sm:$0xf0]  ;;  %v9739_v18 = vld [vmem:[%s14902_s5 + $0x74c] sm:$0xf]  ;;  %v8435_v31 = vor.u32 %v9675_v62, %v8432_v9 }
 0x494   :  { %3941 = vmatpush.bf16.msrb.mxu0 %v8611_v60  ;;  %v8560_v62 = vld [vmem:[%s14902_s5 + $0x658] sm:$0xf0] }
 0x495   :  { %v3589_v6 = vadd.f32 %v12892_v58, %v3565_v8  ;;  %3765 = vmatmul.bf16.gmra.mxu0 %v12054_v37  ;;  %3827 = vmatmul.bf16.vlgmr.msra.gmra.mxu3 %v11518_v20  ;;  %v9679_v20 = vld [vmem:[%s14902_s5 + $0x56c] sm:$0xf] }
 0x496   :  { %3875 = vmatmul.bf16.vlgmr.msrb.gmra.mxu1 %v11520_v21  ;;  %v3518_v35 = vpop.f32.mrf.mxu2  ;;  %v8448_v21 = vld [vmem:[%s14902_s5 + $0x578] sm:$0xf0] }
 0x497   :  { %v3519_v11 = vadd.f32 %v3518_v35, %v12811_v53  ;;  %3966 = vmatpush.bf16.msra.mxu1 %v8723_v3  ;;  %v9743_v53 = vld [vmem:[%s14902_s5 + $0x76c] sm:$0xf]  ;;  %v8451_v13 = vor.u32 %v9679_v20, %v8448_v21  ;;  %v3988_v46 = vmax.f32 %v3589_v6, 0.0 }
 0x498   :  { %v3545_v58 = vpop.f32.mrf.mxu3  ;;  %v8707_v19 = vor.u32 %v9743_v53, %v8704_v2  ;;  %3942 = vmatpush.bf16.msrb.mxu0 %v8595_v40  ;;  %v9711_v35 = vld [vmem:[%s14902_s5 + $0x66c] sm:$0xf]  ;;  %v8672_v53 = vld [vmem:[%s14902_s5 + $0x738] sm:$0xf0] }
 0x499   :  { %v3543_v57 = vadd.f32 %v3542_v30, %v3519_v11  ;;  %v9643_v30 = vld [vmem:[%s14902_s5 + $0x44c] sm:$0xf]  ;;  %3919 = vmatpush.bf16.msrb.mxu3 %v8451_v13  ;;  %v8288_v13 = vld [vmem:[%s14902_s5 + $0x438] sm:$0xf0] }
 0x49a   :  { %v3566_v26 = vpop.f32.mrf.mxu0  ;;  %v8307_v36 = vor.u32 %v9643_v30, %v8304_v14  ;;  %v9735_v6 = vld [vmem:[%s14902_s5 + $0x72c] sm:$0xf]  ;;  %v8400_v40 = vld [vmem:[%s14902_s5 + $0x518] sm:$0xf0] }
 0x49b   :  { %v3567_v50 = vadd.f32 %v3566_v26, %v3543_v57  ;;  %v13021_v17 = vpop.f32.mrf.mxu1  ;;  %3803 = vmatmul.bf16.vlgmr.msra.gmra.mxu2 %v11555_v1  ;;  %3967 = vmatpush.bf16.msra.mxu1 %v8707_v19  ;;  %v8688_v1 = vld [vmem:[%s14902_s5 + $0x758] sm:$0xf0]  ;;  %v9639_v57 = vld [vmem:[%s14902_s5 + $0x42c] sm:$0xf]  ;;  %v8675_v47 = vor.u32 %v9735_v6, %v8672_v53 }
 0x49c   :  { %3896 = vmatpush.bf16.msrb.mxu2 %v8307_v36  ;;  %v8691_v60 = vor.u32 %v9739_v18, %v8688_v1  ;;  %v8291_v5 = vor.u32 %v9639_v57, %v8288_v13  ;;  %v9731_v30 = vld [vmem:[%s14902_s5 + $0x70c] sm:$0xf]  ;;  %v8272_v1 = vld [vmem:[%s14902_s5 + $0x418] sm:$0xf0] }
 0x49d   :  { %v3591_v42 = vadd.f32 %v12936_v45, %v3567_v50  ;;  %3920 = vmatpush.bf16.msrb.mxu3 %v8435_v31  ;;  %v8576_v45 = vld [vmem:[%s14902_s5 + $0x678] sm:$0xf0]  ;;  %v9707_v36 = vld [vmem:[%s14902_s5 + $0x64c] sm:$0xf] }
 0x49e   :  { %v3521_v8 = vpop.f32.mrf.mxu2  ;;  %v8579_v52 = vor.u32 %v9711_v35, %v8576_v45  ;;  %v8656_v50 = vld [vmem:[%s14902_s5 + $0x718] sm:$0xf0]  ;;  %v9635_v31 = vld [vmem:[%s14902_s5 + $0x40c] sm:$0xf] }
 0x49f   :  { %v3992_v39 = vmax.f32 %v3591_v42, 0.0  ;;  %v3522_v3 = vadd.f32 %v3521_v8, %v12847_v44  ;;  %3968 = vmatpush.bf16.msra.mxu1 %v8691_v60  ;;  %v8416_v44 = vld [vmem:[%s14902_s5 + $0x538] sm:$0xf0]  ;;  %v8659_v18 = vor.u32 %v9731_v30, %v8656_v50  ;;  %v8563_v42 = vor.u32 %v9707_v36, %v8560_v62  ;;  %v8830_v50 = vld [vmem:[%s14904_s7 + $0x70] sm:$0xf] }
 0x4a0   :  { %v3547_v11 = vpop.f32.mrf.mxu3  ;;  %v8419_v21 = vor.u32 %v9671_v15, %v8416_v44  ;;  %3943 = vmatpush.bf16.msrb.mxu0 %v8579_v52  ;;  %3897 = vmatpush.bf16.msrb.mxu2 %v8291_v5  ;;  %v8275_v60 = vor.u32 %v9635_v31, %v8272_v1  ;;  %v9777_v62 = vld [vmem:[%s14904_s7 + $0x74] sm:$0xf0]  ;;  %v8878_v1 = vld [vmem:[%s14904_s7 + $0xd0] sm:$0xf] }
 0x4a1   :  { %v13053_v29 = vpack.c.bf16 %v3992_v39, %v3988_v46  ;;  %v3546_v20 = vadd.f32 %v3545_v58, %v3522_v3  ;;  %v9667_v58 = vld [vmem:[%s14902_s5 + $0x50c] sm:$0xf]  ;;  %v8544_v46 = vld [vmem:[%s14902_s5 + $0x638] sm:$0xf0] }
 0x4a2   :  { %v3569_v2 = vpop.f32.mrf.mxu0  ;;  %3921 = vmatpush.bf16.msrb.mxu3 %v8419_v21  ;;  %v8403_v14 = vor.u32 %v9667_v58, %v8400_v40  ;;  %v9793_v58 = vld [vmem:[%s14904_s7 + $0xf4] sm:$0xf0] }
 0x4a3   :  { %v3570_v26 = vadd.f32 %v3569_v2, %v3546_v20  ;;  %v3598_v19 = vpop.f32.mrf.mxu1  ;;  %3969 = vmatpush.bf16.msra.mxu1 %v8675_v47  ;;  %v9699_v20 = vld [vmem:[%s14902_s5 + $0x60c] sm:$0xf] }
 0x4a4   :  { %3944 = vmatpush.bf16.msrb.mxu0 %v8563_v42  ;;  %3898 = vmatpush.bf16.msrb.mxu2 %v8275_v60 }
 0x4a5   :  { %v3594_v9 = vadd.f32 %v12978_v51, %v3570_v26  ;;  %3832 = vmatmul.bf16.gmra.mxu3 %v11618_v49  ;;  %3851 = vmatmul.bf16.vlgmr.msra.gmra.mxu0 %v11621_v34  ;;  %v9703_v34 = vld [vmem:[%s14902_s5 + $0x62c] sm:$0xf]  ;;  %v8894_v26 = vld [vmem:[%s14904_s7 + $0xf0] sm:$0xf] }
 0x4a6   :  { %3880 = vmatmul.bf16.gmra.mxu1 %v11623_v28  ;;  %v3523_v8 = vpop.f32.mrf.mxu2  ;;  %3922 = vmatpush.bf16.msrb.mxu3 %v8403_v14  ;;  %v8547_v3 = vor.u32 %v9703_v34, %v8544_v46  ;;  %v9775_v34 = vld [vmem:[%s14904_s7 + $0x64] sm:$0xf0] }
 0x4a7   :  { %v3524_v51 = vadd.f32 %v3523_v8, %v12871_v0  ;;  %3970 = vmatpush.bf16.msra.mxu1 %v8659_v18  ;;  %v3996_v15 = vmax.f32 %v3594_v9, 0.0  ;;  %v8831_v18 = vor.u32 %v9777_v62, %v8830_v50  ;;  %v9789_v8 = vld [vmem:[%s14904_s7 + $0xd4] sm:$0xf0]  ;;  %v8846_v50 = vld [vmem:[%s14904_s7 + $0x90] sm:$0xf] }
 0x4a8   :  { %v3550_v49 = vpop.f32.mrf.mxu3  ;;  %3945 = vmatpush.bf16.msrb.mxu0 %v8547_v3  ;;  %v8942_v62 = vld [vmem:[%s14904_s7 + $0x150] sm:$0xf] }
 0x4a9   :  { %v3548_v39 = vadd.f32 %v3547_v11, %v3524_v51  ;;  %v8528_v11 = vld [vmem:[%s14902_s5 + $0x618] sm:$0xf0]  ;;  %4413 = vmatpush.bf16.msra.mxu2 %v8831_v18  ;;  %v8879_v51 = vor.u32 %v9789_v8, %v8878_v1  ;;  %v9767_v1 = vld [vmem:[%s14904_s7 + $0x24] sm:$0xf0] }
 0x4aa   :  { %v3571_v28 = vpop.f32.mrf.mxu0  ;;  %v8531_v53 = vor.u32 %v9699_v20, %v8528_v11  ;;  %v8862_v20 = vld [vmem:[%s14904_s7 + $0xb0] sm:$0xf]  ;;  %v9785_v11 = vld [vmem:[%s14904_s7 + $0xb4] sm:$0xf0] }
 0x4ab   :  { %v3572_v35 = vadd.f32 %v3571_v28, %v3548_v39  ;;  %v3600_v45 = vpop.f32.mrf.mxu1  ;;  %3808 = vmatmul.bf16.gmra.mxu2 %v11653_v63 }
 0x4ac   :  { %3946 = vmatpush.bf16.msrb.mxu0 %v8531_v53  ;;  %v8806_v53 = vld [vmem:[%s14904_s7 + $0x40] sm:$0xf] }
 0x4ad   :  { %v3596_v0 = vadd.f32 %v13021_v17, %v3572_v35  ;;  %v8870_v35 = vld [vmem:[%s14904_s7 + $0xc0] sm:$0xf] }
 0x4ae   :  { %v3526_v52 = vpop.f32.mrf.mxu2 }
 0x4af   :  { %v4000_v44 = vmax.f32 %v3596_v0, 0.0  ;;  %v3527_v6 = vadd.f32 %v3526_v52, %v12902_v43  ;;  %v8814_v0 = vld [vmem:[%s14904_s7 + $0x50] sm:$0xf] }
 0x4b0   :  { %v3552_v21 = vpop.f32.mrf.mxu3 }
 0x4b1   :  { %v3551_v57 = vadd.f32 %v3550_v49, %v3527_v6  ;;  %v13108_v63 = vpack.c.bf16 %v4000_v44, %v3996_v15  ;;  %v8822_v49 = vld [vmem:[%s14904_s7 + $0x60] sm:$0xf]  ;;  %v9773_v15 = vld [vmem:[%s14904_s7 + $0x54] sm:$0xf0] }
 0x4b2   :  { %v3574_v13 = vpop.f32.mrf.mxu0  ;;  %v8823_v46 = vor.u32 %v9775_v34, %v8822_v49  ;;  %v8815_v44 = vor.u32 %v9773_v15, %v8814_v0 }
 0x4b3   :  { %v3575_v17 = vadd.f32 %v3574_v13, %v3551_v57  ;;  %v13110_v2 = vpop.f32.mrf.mxu1  ;;  %v9771_v57 = vld [vmem:[%s14904_s7 + $0x44] sm:$0xf0] }
 0x4b4   :  { %4414 = vmatpush.bf16.msra.mxu2 %v8823_v46  ;;  %v8838_v46 = vld [vmem:[%s14904_s7 + $0x80] sm:$0xf] }
 0x4b5   :  { %v3599_v47 = vadd.f32 %v3598_v19, %v3575_v17  ;;  %3837 = vmatmul.bf16.gmra.mxu3 %v11689_v23  ;;  %3856 = vmatmul.bf16.gmra.mxu0 %v11692_v4  ;;  %v8895_v19 = vor.u32 %v9793_v58, %v8894_v26  ;;  %v8807_v17 = vor.u32 %v9771_v57, %v8806_v53  ;;  %v9783_v26 = vld [vmem:[%s14904_s7 + $0xa4] sm:$0xf0]  ;;  %v8950_v58 = vld [vmem:[%s14904_s7 + $0x160] sm:$0xf] }
 0x4b6   :  { %3885 = vmatmul.bf16.gmra.mxu1 %v11694_v38  ;;  %v3528_v43 = vpop.f32.mrf.mxu2  ;;  %v8886_v38 = vld [vmem:[%s14904_s7 + $0xe0] sm:$0xf]  ;;  %v9763_v53 = vld [vmem:[%s14904_s7 + $0x4] sm:$0xf0] }
 0x4b7   :  { %v3529_v5 = vadd.f32 %v3528_v43, %v12945_v22  ;;  %4437 = vmatpush.bf16.msra.mxu3 %v8895_v19  ;;  %v9791_v22 = vld [vmem:[%s14904_s7 + $0xe4] sm:$0xf0]  ;;  %v4004_v42 = vmax.f32 %v3599_v47, 0.0 }
 0x4b8   :  { %v13122_v40 = vpop.f32.mrf.mxu3  ;;  %v8887_v36 = vor.u32 %v9791_v22, %v8886_v38  ;;  %4415 = vmatpush.bf16.msra.mxu2 %v8815_v44 }
 0x4b9   :  { %v3553_v30 = vadd.f32 %v3552_v21, %v3529_v5  ;;  %v8863_v21 = vor.u32 %v9785_v11, %v8862_v20  ;;  %v8854_v5 = vld [vmem:[%s14904_s7 + $0xa0] sm:$0xf]  ;;  %v8782_v20 = vld [vmem:[%s14904_s7 + $0x10] sm:$0xf] }
 0x4ba   :  { %v3576_v23 = vpop.f32.mrf.mxu0  ;;  %v8855_v19 = vor.u32 %v9783_v26, %v8854_v5  ;;  %v8926_v11 = vld [vmem:[%s14904_s7 + $0x130] sm:$0xf]  ;;  %v8918_v5 = vld [vmem:[%s14904_s7 + $0x120] sm:$0xf]  ;;  %v9799_v26 = vld [vmem:[%s14904_s7 + $0x124] sm:$0xf0] }
 0x4bb   :  { %v3577_v4 = vadd.f32 %v3576_v23, %v3553_v30  ;;  %v13124_v14 = vpop.f32.mrf.mxu1  ;;  %3813 = vmatmul.bf16.gmra.mxu2 %v11727_v61  ;;  %4438 = vmatpush.bf16.msra.mxu3 %v8887_v36  ;;  %v9807_v30 = vld [vmem:[%s14904_s7 + $0x164] sm:$0xf0]  ;;  %v9769_v23 = vld [vmem:[%s14904_s7 + $0x34] sm:$0xf0] }
 0x4bc   :  { %4416 = vmatpush.bf16.msra.mxu2 %v8807_v17  ;;  %v9781_v36 = vld [vmem:[%s14904_s7 + $0x94] sm:$0xf0] }
 0x4bd   :  { %v3601_v9 = vadd.f32 %v3600_v45, %v3577_v4  ;;  %v9787_v45 = vld [vmem:[%s14904_s7 + $0xc4] sm:$0xf0]  ;;  %v8951_v4 = vor.u32 %v9807_v30, %v8950_v58  ;;  %v8847_v18 = vor.u32 %v9781_v36, %v8846_v50  ;;  %v8919_v58 = vor.u32 %v9799_v26, %v8918_v5  ;;  %v13300_v30 = vld [vmem:[%s14903_s6] sm:$0xf] }
 0x4be   :  { %v13139_v61 = vpop.f32.mrf.mxu2  ;;  %v8871_v52 = vor.u32 %v9787_v45, %v8870_v35  ;;  %v9779_v35 = vld [vmem:[%s14904_s7 + $0x84] sm:$0xf0]  ;;  %v8934_v45 = vld [vmem:[%s14904_s7 + $0x140] sm:$0xf] }
 0x4bf   :  { %v4008_v31 = vmax.f32 %v3601_v9, 0.0  ;;  %4439 = vmatpush.bf16.msra.mxu3 %v8879_v51  ;;  %v8839_v0 = vor.u32 %v9779_v35, %v8838_v46 }
 0x4c0   :  { %v13147_v60 = vpop.f32.mrf.mxu3 }
 0x4c1   :  { %v13155_v39 = vpack.c.bf16 %v4008_v31, %v4004_v42  ;;  %v9805_v42 = vld [vmem:[%s14904_s7 + $0x154] sm:$0xf0]  ;;  %v8790_v31 = vld [vmem:[%s14904_s7 + $0x20] sm:$0xf] }
 0x4c2   :  { %v13157_v3 = vpop.f32.mrf.mxu0  ;;  %v8943_v8 = vor.u32 %v9805_v42, %v8942_v62  ;;  %v8791_v51 = vor.u32 %v9767_v1, %v8790_v31  ;;  %v9795_v42 = vld [vmem:[%s14904_s7 + $0x104] sm:$0xf0] }
 0x4c3   :  { %v13159_v28 = vpop.f32.mrf.mxu1  ;;  %4440 = vmatpush.bf16.msra.mxu3 %v8871_v52  ;;  %v9803_v52 = vld [vmem:[%s14904_s7 + $0x144] sm:$0xf0] }
 0x4c4   :  { %v8935_v44 = vor.u32 %v9803_v52, %v8934_v45  ;;  %v9790_v45 = vld [vmem:[%s14904_s7 + $0xe4] sm:$0xf] }
 0x4c5   :  { %3861 = vmatmul.bf16.gmra.mxu0 %v11790_v56  ;;  %3923 = vmatmul.bf16.vlgmr.msrb.gmra.mxu3 %v11787_v12  ;;  %v8958_v56 = vld [vmem:[%s14904_s7 + $0x170] sm:$0xf] }
 0x4c6   :  { %3971 = vmatmul.bf16.vlgmr.msra.gmra.mxu1 %v11792_v33  ;;  %v13176_v6 = vpop.f32.mrf.mxu2  ;;  %v9809_v33 = vld [vmem:[%s14904_s7 + $0x174] sm:$0xf0] }
 0x4c7   :  { %v8959_v13 = vor.u32 %v9809_v33, %v8958_v56  ;;  %4441 = vmatpush.bf16.msra.mxu3 %v8863_v21  ;;  %v8774_v33 = vld [vmem:[%s14904_s7] sm:$0xf] }
 0x4c8   :  { %v13187_v12 = vpop.f32.mrf.mxu3  ;;  %v8775_v57 = vor.u32 %v9763_v53, %v8774_v33 }
 0x4c9   :  { %4461 = vmatpush.bf16.msra.mxu0 %v8959_v13 }
 0x4ca   :  { %v13198_v47 = vpop.f32.mrf.mxu0 }
 0x4cb   :  { %v13200_v43 = vpop.f32.mrf.mxu1  ;;  %3899 = vmatmul.bf16.vlgmr.msrb.gmra.mxu2 %v11828_v54  ;;  %v8798_v54 = vld [vmem:[%s14904_s7 + $0x30] sm:$0xf]  ;;  %4442 = vmatpush.bf16.msra.mxu3 %v8855_v19 }
 0x4cc   :  { %v8799_v38 = vor.u32 %v9769_v23, %v8798_v54  ;;  %v8910_v23 = vld [vmem:[%s14904_s7 + $0x110] sm:$0xf] }
 0x4cd   :  { %4462 = vmatpush.bf16.msra.mxu0 %v8951_v4  ;;  %v9797_v4 = vld [vmem:[%s14904_s7 + $0x114] sm:$0xf0] }
 0x4ce   :  { %v13221_v22 = vpop.f32.mrf.mxu2  ;;  %4417 = vmatpush.bf16.msra.mxu2 %v8799_v38  ;;  %v8911_v38 = vor.u32 %v9797_v4, %v8910_v23  ;;  %v9786_v23 = vld [vmem:[%s14904_s7 + $0xc4] sm:$0xf]  ;;  %v8872_v4 = vld [vmem:[%s14904_s7 + $0xc8] sm:$0xf0] }
 0x4cf   :  { %4443 = vmatpush.bf16.msra.mxu3 %v8847_v18  ;;  %v8902_v18 = vld [vmem:[%s14904_s7 + $0x100] sm:$0xf] }
 0x4d0   :  { %v13232_v9 = vpop.f32.mrf.mxu3  ;;  %v8903_v31 = vor.u32 %v9795_v42, %v8902_v18  ;;  %v9772_v18 = vld [vmem:[%s14904_s7 + $0x54] sm:$0xf]  ;;  %v8816_v42 = vld [vmem:[%s14904_s7 + $0x58] sm:$0xf0] }
 0x4d1   :  { %4463 = vmatpush.bf16.msra.mxu0 %v8943_v8  ;;  %v9792_v8 = vld [vmem:[%s14904_s7 + $0xf4] sm:$0xf] }
 0x4d2   :  { %v13243_v49 = vpop.f32.mrf.mxu0  ;;  %4418 = vmatpush.bf16.msra.mxu2 %v8791_v51  ;;  %v8896_v51 = vld [vmem:[%s14904_s7 + $0xf8] sm:$0xf0] }
 0x4d3   :  { %v13245_v34 = vpop.f32.mrf.mxu1  ;;  %4444 = vmatpush.bf16.msra.mxu3 %v8839_v0  ;;  %v8888_v0 = vld [vmem:[%s14904_s7 + $0xe8] sm:$0xf0] }
 0x4d5   :  { %3928 = vmatmul.bf16.gmra.mxu3 %v11891_v7  ;;  %3947 = vmatmul.bf16.vlgmr.msrb.gmra.mxu0 %v11894_v10  ;;  %v9765_v7 = vld [vmem:[%s14904_s7 + $0x14] sm:$0xf0] }
 0x4d6   :  { %3976 = vmatmul.bf16.gmra.mxu1 %v11905_v16  ;;  %v13262_v15 = vpop.f32.mrf.mxu2  ;;  %v8783_v10 = vor.u32 %v9765_v7, %v8782_v20  ;;  %v9801_v16 = vld [vmem:[%s14904_s7 + $0x134] sm:$0xf0]  ;;  %4464 = vmatpush.bf16.msra.mxu0 %v8935_v44 }
 0x4d7   :  { %v8927_v21 = vor.u32 %v9801_v16, %v8926_v11 }
 0x4d8   :  { %v13276_v56 = vpop.f32.mrf.mxu3  ;;  %4419 = vmatpush.bf16.msra.mxu2 %v8783_v10  ;;  %v9788_v10 = vld [vmem:[%s14904_s7 + $0xd4] sm:$0xf] }
 0x4da   :  { %v13284_v13 = vpop.f32.mrf.mxu0  ;;  %4465 = vmatpush.bf16.msra.mxu0 %v8927_v21  ;;  %v9774_v21 = vld [vmem:[%s14904_s7 + $0x64] sm:$0xf] }
 0x4db   :  { %v13286_v17 = vpop.f32.mrf.mxu1  ;;  %3904 = vmatmul.bf16.gmra.mxu2 %v11938_v27  ;;  %v13303_v27 = vperm.slane %v13300_v30, 2 }
 0x4dc   :  { %4420 = vmatpush.bf16.msra.mxu2 %v8775_v57 }
 0x4dd   :  { %v3613_v36 = vadd.f32 %v13139_v61, %v13303_v27  ;;  %v3618_v26 = vadd.f32 %v13221_v22, %v13303_v27 }
 0x4de   :  { %v13295_v19 = vpop.f32.mrf.mxu2  ;;  %4466 = vmatpush.bf16.msra.mxu0 %v8919_v58 }
 0x4df   :  { %v3637_v61 = vadd.f32 %v13122_v40, %v3613_v36  ;;  %v8875_v36 = vor.u32 %v9786_v23, %v8872_v4  ;;  %v8848_v23 = vld [vmem:[%s14904_s7 + $0x98] sm:$0xf0] }
 0x4e0   :  { %v13305_v54 = vpop.f32.mrf.mxu3 }
 0x4e2   :  { %v13313_v50 = vpop.f32.mrf.mxu0  ;;  %4467 = vmatpush.bf16.msra.mxu0 %v8911_v38 }
 0x4e3   :  { %v13317_v62 = vpop.f32.mrf.mxu1 }
 0x4e5   :  { %3933 = vmatmul.bf16.gmra.mxu3 %v11978_v24  ;;  %3952 = vmatmul.bf16.gmra.mxu0 %v11981_v32  ;;  %v8899_v24 = vor.u32 %v9792_v8, %v8896_v51  ;;  %v3615_v32 = vadd.f32 %v13176_v6, %v13303_v27  ;;  %v8891_v6 = vor.u32 %v9790_v45, %v8888_v0  ;;  %v8864_v8 = vld [vmem:[%s14904_s7 + $0xb8] sm:$0xf0] }
 0x4e6   :  { %3981 = vmatmul.bf16.gmra.mxu1 %v11983_v25  ;;  %v13328_v1 = vpop.f32.mrf.mxu2  ;;  %4468 = vmatpush.bf16.msra.mxu0 %v8903_v31  ;;  %v3661_v25 = vadd.f32 %v13157_v3, %v3637_v61  ;;  %v9776_v3 = vld [vmem:[%s14904_s7 + $0x74] sm:$0xf]  ;;  %v3642_v31 = vadd.f32 %v13187_v12, %v3618_v26  ;;  %v8960_v12 = vld [vmem:[%s14904_s7 + $0x178] sm:$0xf0] }
 0x4e7   :  { %4533 = vmatpush.bf16.msrb.mxu3 %v8899_v24  ;;  %v3639_v52 = vadd.f32 %v13147_v60, %v3615_v32  ;;  %v8880_v60 = vld [vmem:[%s14904_s7 + $0xd8] sm:$0xf0]  ;;  %v9808_v24 = vld [vmem:[%s14904_s7 + $0x174] sm:$0xf]  ;;  %v9770_v32 = vld [vmem:[%s14904_s7 + $0x44] sm:$0xf] }
 0x4e8   :  { %v3732_v46 = vpop.f32.mrf.mxu3  ;;  %v3685_v20 = vadd.f32 %v13110_v2, %v3661_v25  ;;  %v8883_v16 = vor.u32 %v9788_v10, %v8880_v60  ;;  %v8824_v2 = vld [vmem:[%s14904_s7 + $0x68] sm:$0xf0]  ;;  %v3620_v25 = vadd.f32 %v13262_v15, %v13303_v27  ;;  %v9782_v15 = vld [vmem:[%s14904_s7 + $0xa4] sm:$0xf]  ;;  %v9780_v26 = vld [vmem:[%s14904_s7 + $0x94] sm:$0xf] }
 0x4e9   :  { %v3663_v33 = vadd.f32 %v13198_v47, %v3639_v52  ;;  %v8827_v5 = vor.u32 %v9774_v21, %v8824_v2  ;;  %v8963_v52 = vor.u32 %v9808_v24, %v8960_v12  ;;  %v8856_v10 = vld [vmem:[%s14904_s7 + $0xa8] sm:$0xf0]  ;;  %v9806_v60 = vld [vmem:[%s14904_s7 + $0x164] sm:$0xf] }
 0x4ea   :  { %v13339_v35 = vpop.f32.mrf.mxu0  ;;  %v8859_v21 = vor.u32 %v9782_v15, %v8856_v10  ;;  %v8952_v2 = vld [vmem:[%s14904_s7 + $0x168] sm:$0xf0]  ;;  %v9800_v10 = vld [vmem:[%s14904_s7 + $0x134] sm:$0xf] }
 0x4eb   :  { %v13342_v40 = vpop.f32.mrf.mxu1  ;;  %3909 = vmatmul.bf16.gmra.mxu2 %v12013_v41  ;;  %v8832_v41 = vld [vmem:[%s14904_s7 + $0x78] sm:$0xf0]  ;;  %4534 = vmatpush.bf16.msrb.mxu3 %v8891_v6  ;;  %v3687_v47 = vadd.f32 %v13124_v14, %v3663_v33  ;;  %v9784_v14 = vld [vmem:[%s14904_s7 + $0xb4] sm:$0xf]  ;;  %v8808_v6 = vld [vmem:[%s14904_s7 + $0x48] sm:$0xf0] }
 0x4ec   :  { %v8835_v7 = vor.u32 %v9776_v3, %v8832_v41  ;;  %v8811_v3 = vor.u32 %v9770_v32, %v8808_v6  ;;  %v3666_v41 = vadd.f32 %v13243_v49, %v3642_v31  ;;  %4557 = vmatpush.bf16.msrb.mxu0 %v8963_v52  ;;  %v3644_v49 = vadd.f32 %v13232_v9, %v3620_v25  ;;  %v8800_v9 = vld [vmem:[%s14904_s7 + $0x38] sm:$0xf0]  ;;  %v8840_v12 = vld [vmem:[%s14904_s7 + $0x88] sm:$0xf0]  ;;  %v9802_v32 = vld [vmem:[%s14904_s7 + $0x144] sm:$0xf] }
 0x4ee   :  { %v3708_v44 = vpop.f32.mrf.mxu2  ;;  %4509 = vmatpush.bf16.msrb.mxu2 %v8835_v7 }
 0x4ef   :  { %v3709_v53 = vadd.f32 %v3708_v44, %v3685_v20  ;;  %4535 = vmatpush.bf16.msrb.mxu3 %v8883_v16 }
 0x4f0   :  { %v3734_v11 = vpop.f32.mrf.mxu3 }
 0x4f1   :  { %v3733_v38 = vadd.f32 %v3732_v46, %v3709_v53  ;;  %v8867_v46 = vor.u32 %v9784_v14, %v8864_v8  ;;  %v8955_v53 = vor.u32 %v9806_v60, %v8952_v2  ;;  %v3623_v8 = vadd.f32 %v13295_v19, %v13303_v27  ;;  %v8936_v19 = vld [vmem:[%s14904_s7 + $0x148] sm:$0xf0] }
 0x4f2   :  { %v3756_v57 = vpop.f32.mrf.mxu0  ;;  %4510 = vmatpush.bf16.msrb.mxu2 %v8827_v5 }
 0x4f3   :  { %v13374_v58 = vpop.f32.mrf.mxu1  ;;  %4536 = vmatpush.bf16.msrb.mxu3 %v8875_v36  ;;  %v3757_v45 = vadd.f32 %v3756_v57, %v3733_v38  ;;  %v9768_v57 = vld [vmem:[%s14904_s7 + $0x34] sm:$0xf]  ;;  %4558 = vmatpush.bf16.msrb.mxu0 %v8955_v53  ;;  %v8851_v38 = vor.u32 %v9780_v26, %v8848_v23  ;;  %v9766_v36 = vld [vmem:[%s14904_s7 + $0x24] sm:$0xf] }
 0x4f5   :  { %3957 = vmatmul.bf16.gmra.mxu0 %v12054_v37  ;;  %4445 = vmatmul.bf16.vlgmr.msra.gmra.mxu3 %v13053_v29  ;;  %v8819_v37 = vor.u32 %v9772_v18, %v8816_v42 }
 0x4f6   :  { %v3710_v22 = vpop.f32.mrf.mxu2 }
 0x4f7   :  { %v3711_v61 = vadd.f32 %v3710_v22, %v3687_v47  ;;  %4511 = vmatpush.bf16.msrb.mxu2 %v8819_v37  ;;  %4537 = vmatpush.bf16.msrb.mxu3 %v8867_v46  ;;  %v9804_v47 = vld [vmem:[%s14904_s7 + $0x154] sm:$0xf]  ;;  %v3668_v22 = vadd.f32 %v13284_v13, %v3644_v49  ;;  %v9778_v13 = vld [vmem:[%s14904_s7 + $0x84] sm:$0xf] }
 0x4f8   :  { %v13398_v51 = vpop.f32.mrf.mxu3  ;;  %v8843_v25 = vor.u32 %v9778_v13, %v8840_v12 }
 0x4f9   :  { %v3735_v0 = vadd.f32 %v3734_v11, %v3711_v61  ;;  %v3781_v11 = vadd.f32 %v13317_v62, %v3757_v45  ;;  %v3690_v62 = vadd.f32 %v13159_v28, %v3666_v41  ;;  %v8944_v28 = vld [vmem:[%s14904_s7 + $0x158] sm:$0xf0]  ;;  %v8792_v61 = vld [vmem:[%s14904_s7 + $0x28] sm:$0xf0]  ;;  %v9764_v45 = vld [vmem:[%s14904_s7 + $0x14] sm:$0xf]  ;;  %v3692_v6 = vadd.f32 %v13200_v43, %v3668_v22 }
 0x4fa   :  { %v3758_v44 = vpop.f32.mrf.mxu0  ;;  %v8947_v31 = vor.u32 %v9804_v47, %v8944_v28  ;;  %v8795_v14 = vor.u32 %v9766_v36, %v8792_v61  ;;  %v9762_v43 = vld [vmem:[%s14904_s7 + $0x4] sm:$0xf]  ;;  %v8912_v47 = vld [vmem:[%s14904_s7 + $0x118] sm:$0xf0]  ;;  %v9022_v61 = vld [vmem:[%s14904_s7 + $0x1f0] sm:$0xf] }
 0x4fb   :  { %v3759_v20 = vadd.f32 %v3758_v44, %v3735_v0  ;;  %v13415_v7 = vpop.f32.mrf.mxu1  ;;  %4421 = vmatmul.bf16.vlgmr.msra.gmra.mxu2 %v12582_v55  ;;  %4538 = vmatpush.bf16.msrb.mxu3 %v8859_v21  ;;  %v3989_v18 = vmax.f32 %v3781_v11, 0.0  ;;  %v8784_v0 = vld [vmem:[%s14904_s7 + $0x18] sm:$0xf0]  ;;  %v8939_v44 = vor.u32 %v9802_v32, %v8936_v19  ;;  %v3625_v11 = vadd.f32 %v13328_v1, %v13303_v27  ;;  %v9014_v19 = vld [vmem:[%s14904_s7 + $0x1e0] sm:$0xf] }
 0x4fc   :  { %4512 = vmatpush.bf16.msrb.mxu2 %v8811_v3  ;;  %4559 = vmatpush.bf16.msrb.mxu0 %v8947_v31  ;;  %v8787_v41 = vor.u32 %v9764_v45, %v8784_v0  ;;  %v8904_v31 = vld [vmem:[%s14904_s7 + $0x108] sm:$0xf0]  ;;  %v9823_v45 = vld [vmem:[%s14904_s7 + $0x1e4] sm:$0xf0] }
 0x4fd   :  { %v3783_v16 = vadd.f32 %v13342_v40, %v3759_v20  ;;  %v8803_v40 = vor.u32 %v9768_v57, %v8800_v9  ;;  %v3647_v20 = vadd.f32 %v13276_v56, %v3623_v8  ;;  %v8776_v56 = vld [vmem:[%s14904_s7 + $0x8] sm:$0xf0]  ;;  %v3649_v1 = vadd.f32 %v13305_v54, %v3625_v11 }
 0x4fe   :  { %v3713_v33 = vpop.f32.mrf.mxu2 }
 0x4ff   :  { %v3993_v5 = vmax.f32 %v3783_v16, 0.0  ;;  %v3714_v42 = vadd.f32 %v3713_v33, %v3690_v62  ;;  %4539 = vmatpush.bf16.msrb.mxu3 %v8851_v38  ;;  %v8779_v33 = vor.u32 %v9762_v43, %v8776_v56  ;;  %v3671_v53 = vadd.f32 %v13313_v50, %v3647_v20  ;;  %v8920_v62 = vld [vmem:[%s14904_s7 + $0x128] sm:$0xf0]  ;;  %v9796_v38 = vld [vmem:[%s14904_s7 + $0x114] sm:$0xf] }
 0x500   :  { %v3739_v4 = vpop.f32.mrf.mxu3  ;;  %4513 = vmatpush.bf16.msrb.mxu2 %v8803_v40  ;;  %4560 = vmatpush.bf16.msrb.mxu0 %v8939_v44  ;;  %v8915_v54 = vor.u32 %v9796_v38, %v8912_v47  ;;  %v8974_v47 = vld [vmem:[%s14904_s7 + $0x190] sm:$0xf] }
 0x501   :  { %v13461_v46 = vpack.c.bf16 %v3993_v5, %v3989_v18  ;;  %v3738_v52 = vadd.f32 %v13398_v51, %v3714_v42  ;;  %v8928_v51 = vld [vmem:[%s14904_s7 + $0x138] sm:$0xf0]  ;;  %v9798_v5 = vld [vmem:[%s14904_s7 + $0x124] sm:$0xf] }
 0x502   :  { %v3761_v37 = vpop.f32.mrf.mxu0  ;;  %v8931_v49 = vor.u32 %v9800_v10, %v8928_v51  ;;  %v8923_v27 = vor.u32 %v9798_v5, %v8920_v62  ;;  %v9006_v51 = vld [vmem:[%s14904_s7 + $0x1d0] sm:$0xf]  ;;  %v9817_v62 = vld [vmem:[%s14904_s7 + $0x1b4] sm:$0xf0] }
 0x503   :  { %v13463_v24 = vpop.f32.mrf.mxu1  ;;  %4540 = vmatpush.bf16.msrb.mxu3 %v8843_v25  ;;  %v3762_v16 = vadd.f32 %v3761_v37, %v3738_v52  ;;  %v9825_v37 = vld [vmem:[%s14904_s7 + $0x1f4] sm:$0xf0]  ;;  %v8990_v5 = vld [vmem:[%s14904_s7 + $0x1b0] sm:$0xf] }
 0x504   :  { %4514 = vmatpush.bf16.msrb.mxu2 %v8795_v14  ;;  %4561 = vmatpush.bf16.msrb.mxu0 %v8931_v49  ;;  %v9023_v13 = vor.u32 %v9825_v37, %v9022_v61  ;;  %v9811_v61 = vld [vmem:[%s14904_s7 + $0x184] sm:$0xf0] }
 0x505   :  { %4450 = vmatmul.bf16.gmra.mxu3 %v13108_v63  ;;  %4469 = vmatmul.bf16.vlgmr.msra.gmra.mxu0 %v13461_v46  ;;  %v3786_v40 = vadd.f32 %v13374_v58, %v3762_v16  ;;  %v3673_v58 = vadd.f32 %v13339_v35, %v3649_v1  ;;  %v8991_v1 = vor.u32 %v9817_v62, %v8990_v5 }
 0x506   :  { %v3715_v3 = vpop.f32.mrf.mxu2  ;;  %4485 = vmatpush.bf16.msrb.mxu1 %v9023_v13 }
 0x507   :  { %v3716_v15 = vadd.f32 %v3715_v3, %v3692_v6  ;;  %v3997_v36 = vmax.f32 %v3786_v40, 0.0  ;;  %v3697_v8 = vadd.f32 %v13286_v17, %v3673_v58  ;;  %v9015_v6 = vor.u32 %v9823_v45, %v9014_v19 }
 0x508   :  { %v3742_v60 = vpop.f32.mrf.mxu3  ;;  %4515 = vmatpush.bf16.msrb.mxu2 %v8787_v41  ;;  %4562 = vmatpush.bf16.msrb.mxu0 %v8923_v27 }
 0x509   :  { %v3740_v21 = vadd.f32 %v3739_v4, %v3716_v15  ;;  %v3695_v4 = vadd.f32 %v13245_v34, %v3671_v53  ;;  %v9794_v34 = vld [vmem:[%s14904_s7 + $0x104] sm:$0xf] }
 0x50a   :  { %v3763_v2 = vpop.f32.mrf.mxu0  ;;  %v8907_v35 = vor.u32 %v9794_v34, %v8904_v31  ;;  %4486 = vmatpush.bf16.msrb.mxu1 %v9015_v6  ;;  %v8966_v31 = vld [vmem:[%s14904_s7 + $0x180] sm:$0xf] }
 0x50b   :  { %v3764_v57 = vadd.f32 %v3763_v2, %v3740_v21  ;;  %v3792_v9 = vpop.f32.mrf.mxu1  ;;  %4426 = vmatmul.bf16.gmra.mxu2 %v12659_v48  ;;  %v8998_v21 = vld [vmem:[%s14904_s7 + $0x1c0] sm:$0xf]  ;;  %v9819_v2 = vld [vmem:[%s14904_s7 + $0x1c4] sm:$0xf0] }
 0x50c   :  { %4516 = vmatpush.bf16.msrb.mxu2 %v8779_v33  ;;  %4563 = vmatpush.bf16.msrb.mxu0 %v8915_v54  ;;  %v8999_v33 = vor.u32 %v9819_v2, %v8998_v21 }
 0x50d   :  { %v3788_v50 = vadd.f32 %v13415_v7, %v3764_v57 }
 0x50e   :  { %v3718_v26 = vpop.f32.mrf.mxu2 }
 0x50f   :  { %v4001_v23 = vmax.f32 %v3788_v50, 0.0  ;;  %v3719_v7 = vadd.f32 %v3718_v26, %v3695_v4  ;;  %v8982_v50 = vld [vmem:[%s14904_s7 + $0x1a0] sm:$0xf] }
 0x510   :  { %v3744_v28 = vpop.f32.mrf.mxu3  ;;  %4564 = vmatpush.bf16.msrb.mxu0 %v8907_v35 }
 0x511   :  { %v13523_v42 = vpack.c.bf16 %v4001_v23, %v3997_v36  ;;  %v3743_v14 = vadd.f32 %v3742_v60, %v3719_v7  ;;  %v9821_v60 = vld [vmem:[%s14904_s7 + $0x1d4] sm:$0xf0] }
 0x512   :  { %v3766_v22 = vpop.f32.mrf.mxu0  ;;  %v9007_v43 = vor.u32 %v9821_v60, %v9006_v51 }
 0x513   :  { %v13521_v18 = vpop.f32.mrf.mxu1  ;;  %v3767_v0 = vadd.f32 %v3766_v22, %v3743_v14  ;;  %v9824_v14 = vld [vmem:[%s14904_s7 + $0x1f4] sm:$0xf] }
 0x514   :  { %4487 = vmatpush.bf16.msrb.mxu1 %v9007_v43 }
 0x515   :  { %4455 = vmatmul.bf16.gmra.mxu3 %v13155_v39  ;;  %4474 = vmatmul.bf16.gmra.mxu0 %v13523_v42  ;;  %v3791_v41 = vadd.f32 %v13463_v24, %v3767_v0 }
 0x516   :  { %v3720_v12 = vpop.f32.mrf.mxu2 }
 0x517   :  { %v3721_v32 = vadd.f32 %v3720_v12, %v3697_v8  ;;  %v4005_v56 = vmax.f32 %v3791_v41, 0.0  ;;  %v9024_v8 = vld [vmem:[%s14904_s7 + $0x1f8] sm:$0xf0]  ;;  %v9820_v41 = vld [vmem:[%s14904_s7 + $0x1d4] sm:$0xf] }
 0x518   :  { %v13540_v25 = vpop.f32.mrf.mxu3  ;;  %4488 = vmatpush.bf16.msrb.mxu1 %v8999_v33  ;;  %v9027_v12 = vor.u32 %v9824_v14, %v9024_v8  ;;  %v9818_v33 = vld [vmem:[%s14904_s7 + $0x1c4] sm:$0xf] }
 0x519   :  { %v3745_v52 = vadd.f32 %v3744_v28, %v3721_v32  ;;  %v9813_v28 = vld [vmem:[%s14904_s7 + $0x194] sm:$0xf0]  ;;  %v9822_v32 = vld [vmem:[%s14904_s7 + $0x1e4] sm:$0xf] }
 0x51a   :  { %v3768_v44 = vpop.f32.mrf.mxu0  ;;  %v8975_v58 = vor.u32 %v9813_v28, %v8974_v47 }
 0x51b   :  { %v3769_v17 = vadd.f32 %v3768_v44, %v3745_v52  ;;  %v13548_v3 = vpop.f32.mrf.mxu1  ;;  %4431 = vmatmul.bf16.gmra.mxu2 %v12742_v59 }
 0x51c   :  { %4489 = vmatpush.bf16.msrb.mxu1 %v8991_v1 }
 0x51d   :  { %v3793_v20 = vadd.f32 %v3792_v9, %v3769_v17 }
 0x51e   :  { %v3804_v15 = vpop.f32.mrf.mxu2 }
 0x51f   :  { %v4009_v10 = vmax.f32 %v3793_v20, 0.0  ;;  %v9008_v20 = vld [vmem:[%s14904_s7 + $0x1d8] sm:$0xf0] }
 0x520   :  { %v13558_v49 = vpop.f32.mrf.mxu3 }
 0x521   :  { %v13562_v24 = vpack.c.bf16 %v4009_v10, %v4005_v56  ;;  %v9011_v10 = vor.u32 %v9820_v41, %v9008_v20 }
 0x522   :  { %v3852_v11 = vpop.f32.mrf.mxu0 }
 0x523   :  { %v13560_v16 = vpop.f32.mrf.mxu1 }
 0x525   :  { %4479 = vmatmul.bf16.gmra.mxu0 %v13562_v24  ;;  %4541 = vmatmul.bf16.vlgmr.msrb.gmra.mxu3 %v13053_v29 }
 0x526   :  { %v3806_v53 = vpop.f32.mrf.mxu2 }
 0x528   :  { %v13572_v57 = vpop.f32.mrf.mxu3 }
 0x52a   :  { %v3854_v9 = vpop.f32.mrf.mxu0 }
 0x52b   :  { %4517 = vmatmul.bf16.vlgmr.msrb.gmra.mxu2 %v12582_v55  ;;  %v13581_v27 = vpop.f32.mrf.mxu1  ;;  %v9815_v55 = vld [vmem:[%s14904_s7 + $0x1a4] sm:$0xf0] }
 0x52c   :  { %v8983_v26 = vor.u32 %v9815_v55, %v8982_v50 }
 0x52e   :  { %v3809_v40 = vpop.f32.mrf.mxu2  ;;  %4490 = vmatpush.bf16.msrb.mxu1 %v8983_v26 }
 0x530   :  { %v13583_v29 = vpop.f32.mrf.mxu3 }
 0x532   :  { %v13591_v23 = vpop.f32.mrf.mxu0  ;;  %4491 = vmatpush.bf16.msrb.mxu1 %v8975_v58 }
 0x533   :  { %v13595_v4 = vpop.f32.mrf.mxu1 }
 0x535   :  { %4546 = vmatmul.bf16.gmra.mxu3 %v13108_v63  ;;  %4565 = vmatmul.bf16.vlgmr.msrb.gmra.mxu0 %v13461_v46  ;;  %v13609_v63 = vperm.slane %v13300_v30, 3  ;;  %v8967_v30 = vor.u32 %v9811_v61, %v8966_v31 }
 0x536   :  { %v3811_v38 = vpop.f32.mrf.mxu2 }
 0x537   :  { %v3805_v34 = vadd.f32 %v3804_v15, %v13609_v63  ;;  %4492 = vmatpush.bf16.msrb.mxu1 %v8967_v30 }
 0x538   :  { %v13603_v54 = vpop.f32.mrf.mxu3 }
 0x539   :  { %v3829_v35 = vadd.f32 %v13540_v25, %v3805_v34  ;;  %v3807_v25 = vadd.f32 %v3806_v53, %v13609_v63  ;;  %v9000_v53 = vld [vmem:[%s14904_s7 + $0x1c8] sm:$0xf0] }
 0x53a   :  { %v13605_v36 = vpop.f32.mrf.mxu0 }
 0x53b   :  { %4522 = vmatmul.bf16.gmra.mxu2 %v12659_v48  ;;  %v13613_v7 = vpop.f32.mrf.mxu1  ;;  %4581 = vmatpush.bf16.msra.mxu1 %v9027_v12  ;;  %v3831_v52 = vadd.f32 %v13558_v49, %v3807_v25 }
 0x53d   :  { %v3855_v51 = vadd.f32 %v3854_v9, %v3831_v52  ;;  %v9003_v9 = vor.u32 %v9818_v33, %v9000_v53 }
 0x53e   :  { %v13611_v46 = vpop.f32.mrf.mxu2 }
 0x53f   :  { %v3879_v56 = vadd.f32 %v13548_v3, %v3855_v51 }
 0x540   :  { %v13615_v22 = vpop.f32.mrf.mxu3 }
 0x542   :  { %v13624_v48 = vpop.f32.mrf.mxu0 }
 0x543   :  { %v3972_v19 = vpop.f32.mrf.mxu1 }
 0x545   :  { %4551 = vmatmul.bf16.gmra.mxu3 %v13155_v39  ;;  %4570 = vmatmul.bf16.gmra.mxu0 %v13523_v42  ;;  %v9016_v39 = vld [vmem:[%s14904_s7 + $0x1e8] sm:$0xf0]  ;;  %v3853_v42 = vadd.f32 %v3852_v11, %v3829_v35  ;;  %v3815_v35 = vadd.f32 %v13611_v46, %v13609_v63  ;;  %v8976_v46 = vld [vmem:[%s14904_s7 + $0x198] sm:$0xf0] }
 0x546   :  { %v13629_v37 = vpop.f32.mrf.mxu2  ;;  %v9019_v0 = vor.u32 %v9822_v32, %v9016_v39 }
 0x547   :  { %v3877_v6 = vadd.f32 %v13521_v18, %v3853_v42  ;;  %v3839_v39 = vadd.f32 %v13603_v54, %v3815_v35  ;;  %v3817_v54 = vadd.f32 %v13629_v37, %v13609_v63  ;;  %v9842_v35 = vld [vmem:[%s14906_s9 + $0x80] sm:$0xf0] }
 0x548   :  { %v3924_v13 = vpop.f32.mrf.mxu3  ;;  %4582 = vmatpush.bf16.msra.mxu1 %v9019_v0 }
 0x54a   :  { %v13644_v45 = vpop.f32.mrf.mxu0 }
 0x54b   :  { %4527 = vmatmul.bf16.gmra.mxu2 %v12742_v59  ;;  %v3810_v59 = vadd.f32 %v3809_v40, %v13609_v63  ;;  %v3974_v18 = vpop.f32.mrf.mxu1 }
 0x54c   :  { %4583 = vmatpush.bf16.msra.mxu1 %v9011_v10  ;;  %v8968_v10 = vld [vmem:[%s14904_s7 + $0x188] sm:$0xf0] }
 0x54d   :  { %v3834_v43 = vadd.f32 %v13572_v57, %v3810_v59  ;;  %v3812_v57 = vadd.f32 %v3811_v38, %v13609_v63  ;;  %v8992_v38 = vld [vmem:[%s14904_s7 + $0x1b8] sm:$0xf0]  ;;  %v3841_v59 = vadd.f32 %v13615_v22, %v3817_v54  ;;  %v9068_v54 = vld [vmem:[%s14906_s9 + $0x54] sm:$0xf0] }
 0x54e   :  { %v3900_v44 = vpop.f32.mrf.mxu2 }
 0x54f   :  { %v3901_v17 = vadd.f32 %v3900_v44, %v3877_v6  ;;  %v3858_v5 = vadd.f32 %v13591_v23, %v3834_v43  ;;  %v3836_v50 = vadd.f32 %v13583_v29, %v3812_v57  ;;  %v9816_v23 = vld [vmem:[%s14904_s7 + $0x1b4] sm:$0xf]  ;;  %v9814_v29 = vld [vmem:[%s14904_s7 + $0x1a4] sm:$0xf]  ;;  %v3863_v44 = vadd.f32 %v13624_v48, %v3839_v39  ;;  %v9839_v39 = vld [vmem:[%s14906_s9 + $0x68] sm:$0xf0] }
 0x550   :  { %v3926_v15 = vpop.f32.mrf.mxu3  ;;  %4584 = vmatpush.bf16.msra.mxu1 %v9003_v9  ;;  %v8995_v61 = vor.u32 %v9816_v23, %v8992_v38  ;;  %v9845_v23 = vld [vmem:[%s14906_s9 + $0x98] sm:$0xf0]  ;;  %v9844_v38 = vld [vmem:[%s14906_s9 + $0x94] sm:$0xf] }
 0x551   :  { %v3925_v49 = vadd.f32 %v3924_v13, %v3901_v17  ;;  %v3882_v26 = vadd.f32 %v13560_v16, %v3858_v5  ;;  %v8984_v16 = vld [vmem:[%s14904_s7 + $0x1a8] sm:$0xf0]  ;;  %v3860_v30 = vadd.f32 %v13605_v36, %v3836_v50  ;;  %v9812_v36 = vld [vmem:[%s14904_s7 + $0x194] sm:$0xf] }
 0x552   :  { %v3948_v60 = vpop.f32.mrf.mxu0  ;;  %v8987_v13 = vor.u32 %v9814_v29, %v8984_v16  ;;  %v8979_v6 = vor.u32 %v9812_v36, %v8976_v46  ;;  %v9104_v29 = vld [vmem:[%s14906_s9 + $0x9c] sm:$0xf0]  ;;  %v9066_v46 = vld [vmem:[%s14906_s9 + $0x48] sm:$0xf] }
 0x553   :  { %v3949_v21 = vadd.f32 %v3948_v60, %v3925_v49  ;;  %v3977_v47 = vpop.f32.mrf.mxu1  ;;  %v3884_v42 = vadd.f32 %v13581_v27, %v3860_v30  ;;  %v3887_v60 = vadd.f32 %v13595_v4, %v3863_v44  ;;  %v9107_v16 = vor.u32 %v9844_v38, %v9104_v29  ;;  %v9090_v30 = vld [vmem:[%s14906_s9 + $0x78] sm:$0xf]  ;;  %v9869_v38 = vld [vmem:[%s14906_s9 + $0x158] sm:$0xf0] }
 0x554   :  { %4585 = vmatpush.bf16.msra.mxu1 %v8995_v61 }
 0x555   :  { %4575 = vmatmul.bf16.gmra.mxu0 %v13562_v24  ;;  %v3973_v3 = vadd.f32 %v3972_v19, %v3949_v21 }
 0x556   :  { %v3902_v11 = vpop.f32.mrf.mxu2 }
 0x557   :  { %v3903_v2 = vadd.f32 %v3902_v11, %v3879_v56  ;;  %v3990_v58 = vmax.f32 %v3973_v3, 0.0  ;;  %v3865_v56 = vadd.f32 %v13644_v45, %v3841_v59 }
 0x558   :  { %v3929_v24 = vpop.f32.mrf.mxu3  ;;  %4586 = vmatpush.bf16.msra.mxu1 %v8987_v13  ;;  %v9092_v13 = vld [vmem:[%s14906_s9 + $0x84] sm:$0xf0] }
 0x559   :  { %v3927_v62 = vadd.f32 %v3926_v15, %v3903_v2  ;;  %v9810_v15 = vld [vmem:[%s14904_s7 + $0x184] sm:$0xf]  ;;  %v3889_v53 = vadd.f32 %v13613_v7, %v3865_v56  ;;  %v9114_v7 = vld [vmem:[%s14906_s9 + $0xa8] sm:$0xf] }
 0x55a   :  { %v3950_v1 = vpop.f32.mrf.mxu0  ;;  %v8971_v51 = vor.u32 %v9810_v15, %v8968_v10  ;;  %v9832_v15 = vld [vmem:[%s14906_s9 + $0x34] sm:$0xf]  ;;  %v9056_v10 = vld [vmem:[%s14906_s9 + $0x3c] sm:$0xf0] }
 0x55b   :  { %v3951_v40 = vadd.f32 %v3950_v1, %v3927_v62  ;;  %v3979_v52 = vpop.f32.mrf.mxu1 }
 0x55c   :  { %4587 = vmatpush.bf16.msra.mxu1 %v8979_v6  ;;  %v9835_v6 = vld [vmem:[%s14906_s9 + $0x4c] sm:$0xf] }
 0x55d   :  { %v3975_v55 = vadd.f32 %v3974_v18, %v3951_v40 }
 0x55e   :  { %v3905_v28 = vpop.f32.mrf.mxu2 }
 0x55f   :  { %v3994_v34 = vmax.f32 %v3975_v55, 0.0  ;;  %v3906_v31 = vadd.f32 %v3905_v28, %v3882_v26  ;;  %v9848_v26 = vld [vmem:[%s14906_s9 + $0xb0] sm:$0xf0]  ;;  %v9847_v28 = vld [vmem:[%s14906_s9 + $0xac] sm:$0xf] }
 0x560   :  { %v3931_v32 = vpop.f32.mrf.mxu3  ;;  %4588 = vmatpush.bf16.msra.mxu1 %v8971_v51 }
 0x561   :  { %v4014_v14 = vpack.c.bf16 %v3994_v34, %v3990_v58  ;;  %v3930_v12 = vadd.f32 %v3929_v24, %v3906_v31  ;;  %v9116_v58 = vld [vmem:[%s14906_s9 + $0xb4] sm:$0xf0]  ;;  %v9102_v31 = vld [vmem:[%s14906_s9 + $0x90] sm:$0xf] }
 0x562   :  { %v3953_v8 = vpop.f32.mrf.mxu0  ;;  %v9119_v34 = vor.u32 %v9847_v28, %v9116_v58  ;;  %v9103_v61 = vor.u32 %v9845_v23, %v9102_v31  ;;  %v9865_v28 = vld [vmem:[%s14906_s9 + $0x13c] sm:$0xf]  ;;  %v9188_v31 = vld [vmem:[%s14906_s9 + $0x144] sm:$0xf0]  ;;  %v9198_v23 = vld [vmem:[%s14906_s9 + $0x150] sm:$0xf] }
 0x563   :  { %4493 = vmatmul.bf16.vlgmr.msrb.gmra.mxu1 %v4014_v14  ;;  %v3954_v19 = vadd.f32 %v3953_v8, %v3930_v12  ;;  %v3982_v21 = vpop.f32.mrf.mxu1  ;;  %v9091_v8 = vor.u32 %v9842_v35, %v9090_v30  ;;  %v9191_v29 = vor.u32 %v9865_v28, %v9188_v31  ;;  %v9849_v30 = vld [vmem:[%s14906_s9 + $0xb8] sm:$0xf0]  ;;  %v9199_v35 = vor.u32 %v9869_v38, %v9198_v23  ;;  %v9860_v31 = vld [vmem:[%s14906_s9 + $0x110] sm:$0xf0]  ;;  %v9074_v23 = vld [vmem:[%s14906_s9 + $0x50] sm:$0xf] }
 0x564   :  { %4999 = vmatpush.bf16.msra.mxu0 %v9119_v34 }
 0x565   :  { %v3978_v41 = vadd.f32 %v3977_v47, %v3954_v19  ;;  %v9115_v47 = vor.u32 %v9848_v26, %v9114_v7  ;;  %v9080_v19 = vld [vmem:[%s14906_s9 + $0x6c] sm:$0xf0]  ;;  %v9210_v26 = vld [vmem:[%s14906_s9 + $0x168] sm:$0xf] }
 0x566   :  { %v3907_v25 = vpop.f32.mrf.mxu2 }
 0x567   :  { %v3908_v0 = vadd.f32 %v3907_v25, %v3884_v42  ;;  %v3998_v49 = vmax.f32 %v3978_v41, 0.0  ;;  %4951 = vmatpush.bf16.msra.mxu2 %v9115_v47  ;;  %v9838_v42 = vld [vmem:[%s14906_s9 + $0x64] sm:$0xf]  ;;  %v9872_v47 = vld [vmem:[%s14906_s9 + $0x170] sm:$0xf0] }
 0x568   :  { %v3934_v63 = vpop.f32.mrf.mxu3  ;;  %5000 = vmatpush.bf16.msra.mxu0 %v9107_v16  ;;  %v9211_v34 = vor.u32 %v9872_v47, %v9210_v26  ;;  %v9122_v16 = vld [vmem:[%s14906_s9 + $0xb0] sm:$0xf] }
 0x569   :  { %v3932_v27 = vadd.f32 %v3931_v32, %v3908_v0  ;;  %v9078_v32 = vld [vmem:[%s14906_s9 + $0x60] sm:$0xf]  ;;  %v9083_v0 = vor.u32 %v9838_v42, %v9080_v19  ;;  %v9862_v42 = vld [vmem:[%s14906_s9 + $0x124] sm:$0xf] }
 0x56a   :  { %v3955_v17 = vpop.f32.mrf.mxu0  ;;  %v9079_v25 = vor.u32 %v9839_v39, %v9078_v32  ;;  %4975 = vmatpush.bf16.msra.mxu3 %v9211_v34  ;;  %v9162_v34 = vld [vmem:[%s14906_s9 + $0x108] sm:$0xf] }
 0x56b   :  { %v3956_v20 = vadd.f32 %v3955_v17, %v3932_v27  ;;  %v3984_v3 = vpop.f32.mrf.mxu1  ;;  %4952 = vmatpush.bf16.msra.mxu2 %v9103_v61  ;;  %v9054_v27 = vld [vmem:[%s14906_s9 + $0x30] sm:$0xf]  ;;  %v9833_v17 = vld [vmem:[%s14906_s9 + $0x38] sm:$0xf0]  ;;  %v9163_v38 = vor.u32 %v9860_v31, %v9162_v34 }
 0x56c   :  { %v9055_v51 = vor.u32 %v9833_v17, %v9054_v27  ;;  %v9859_v27 = vld [vmem:[%s14906_s9 + $0x10c] sm:$0xf]  ;;  %v9164_v17 = vld [vmem:[%s14906_s9 + $0x114] sm:$0xf0] }
 0x56d   :  { %v3980_v48 = vadd.f32 %v3979_v52, %v3956_v20  ;;  %v9836_v52 = vld [vmem:[%s14906_s9 + $0x50] sm:$0xf0]  ;;  %v9071_v20 = vor.u32 %v9835_v6, %v9068_v54  ;;  %v9846_v54 = vld [vmem:[%s14906_s9 + $0xa0] sm:$0xf0] }
 0x56e   :  { %v3910_v37 = vpop.f32.mrf.mxu2  ;;  %v9067_v44 = vor.u32 %v9836_v52, %v9066_v46  ;;  %4976 = vmatpush.bf16.msra.mxu3 %v9199_v35  ;;  %v9866_v46 = vld [vmem:[%s14906_s9 + $0x140] sm:$0xf0]  ;;  %v9110_v52 = vld [vmem:[%s14906_s9 + $0x98] sm:$0xf]  ;;  %v9140_v35 = vld [vmem:[%s14906_s9 + $0xe4] sm:$0xf0] }
 0x56f   :  { %v4002_v18 = vmax.f32 %v3980_v48, 0.0  ;;  %v3911_v43 = vadd.f32 %v3910_v37, %v3887_v60  ;;  %4953 = vmatpush.bf16.msra.mxu2 %v9091_v8  ;;  %v9059_v48 = vor.u32 %v9832_v15, %v9056_v10  ;;  %v9830_v37 = vld [vmem:[%s14906_s9 + $0x20] sm:$0xf0]  ;;  %v9167_v15 = vor.u32 %v9859_v27, %v9164_v17 }
 0x570   :  { %v3936_v57 = vpop.f32.mrf.mxu3 }
 0x571   :  { %v4018_v11 = vpack.c.bf16 %v4002_v18, %v3998_v49  ;;  %v3935_v33 = vadd.f32 %v3934_v63, %v3911_v43  ;;  %v9042_v63 = vld [vmem:[%s14906_s9 + $0x18] sm:$0xf]  ;;  %v9829_v49 = vld [vmem:[%s14906_s9 + $0x1c] sm:$0xf]  ;;  %v9044_v43 = vld [vmem:[%s14906_s9 + $0x24] sm:$0xf0] }
 0x572   :  { %v3958_v2 = vpop.f32.mrf.mxu0  ;;  %v9043_v18 = vor.u32 %v9830_v37, %v9042_v63  ;;  %v9047_v56 = vor.u32 %v9829_v49, %v9044_v43  ;;  %v9843_v63 = vld [vmem:[%s14906_s9 + $0x88] sm:$0xf0]  ;;  %v9174_v43 = vld [vmem:[%s14906_s9 + $0x120] sm:$0xf] }
 0x573   :  { %4498 = vmatmul.bf16.gmra.mxu1 %v4018_v11  ;;  %v3959_v22 = vadd.f32 %v3958_v2, %v3935_v33  ;;  %4954 = vmatpush.bf16.msra.mxu2 %v9079_v25  ;;  %v9826_v2 = vld [vmem:[%s14906_s9 + $0x4] sm:$0xf]  ;;  %v9176_v25 = vld [vmem:[%s14906_s9 + $0x12c] sm:$0xf0] }
 0x575   :  { %v3983_v24 = vadd.f32 %v3982_v21, %v3959_v22  ;;  %v9827_v21 = vld [vmem:[%s14906_s9 + $0x8] sm:$0xf0] }
 0x576   :  { %v3912_v9 = vpop.f32.mrf.mxu2 }
 0x577   :  { %v3913_v5 = vadd.f32 %v3912_v9, %v3889_v53  ;;  %v4006_v50 = vmax.f32 %v3983_v24, 0.0  ;;  %4955 = vmatpush.bf16.msra.mxu2 %v9067_v44  ;;  %v9032_v9 = vld [vmem:[%s14906_s9 + $0xc] sm:$0xf0] }
 0x578   :  { %v4446_v41 = vpop.f32.mrf.mxu3  ;;  %v9035_v22 = vor.u32 %v9826_v2, %v9032_v9  ;;  %v9086_v2 = vld [vmem:[%s14906_s9 + $0x68] sm:$0xf] }
 0x579   :  { %v3937_v4 = vadd.f32 %v3936_v57, %v3913_v5  ;;  %v9871_v5 = vld [vmem:[%s14906_s9 + $0x16c] sm:$0xf]  ;;  %v9212_v57 = vld [vmem:[%s14906_s9 + $0x174] sm:$0xf0] }
 0x57a   :  { %v3960_v62 = vpop.f32.mrf.mxu0 }
 0x57b   :  { %v3961_v1 = vadd.f32 %v3960_v62, %v3937_v4  ;;  %4956 = vmatpush.bf16.msra.mxu2 %v9055_v51  ;;  %v9215_v62 = vor.u32 %v9871_v5, %v9212_v57  ;;  %v9152_v57 = vld [vmem:[%s14906_s9 + $0xfc] sm:$0xf0] }
 0x57d   :  { %v3985_v40 = vadd.f32 %v3984_v3, %v3961_v1  ;;  %5023 = vmatpush.bf16.msrb.mxu1 %v9215_v62  ;;  %v9868_v1 = vld [vmem:[%s14906_s9 + $0x154] sm:$0xf]  ;;  %v9200_v3 = vld [vmem:[%s14906_s9 + $0x15c] sm:$0xf0] }
 0x57e   :  { %v4422_v36 = vpop.f32.mrf.mxu2  ;;  %v9896_v62 = vld [vmem:[%s14908_s11 + $0xb0] sm:$0xf0] }
 0x57f   :  { %v4010_v55 = vmax.f32 %v3985_v40, 0.0  ;;  %4957 = vmatpush.bf16.msra.mxu2 %v9043_v18  ;;  %v9203_v40 = vor.u32 %v9868_v1, %v9200_v3 }
 0x580   :  { %v4448_v33 = vpop.f32.mrf.mxu3 }
 0x581   :  { %v4022_v45 = vpack.c.bf16 %v4010_v55, %v4006_v50  ;;  %v13820_v50 = vld [vmem:[%s14905_s8] sm:$0x3]  ;;  %5024 = vmatpush.bf16.msrb.mxu1 %v9203_v40 }
 0x582   :  { %v13777_v59 = vpop.f32.mrf.mxu0 }
 0x583   :  { %4503 = vmatmul.bf16.gmra.mxu1 %v4022_v45 }
 0x585   :  { %5025 = vmatpush.bf16.msrb.mxu1 %v9191_v29 }
 0x586   :  { %v4424_v60 = vpop.f32.mrf.mxu2 }
 0x588   :  { %v13822_v55 = vpop.f32.mrf.mxu3 }
 0x58a   :  { %v4472_v4 = vpop.f32.mrf.mxu0 }
 0x58e   :  { %v13809_v24 = vpop.f32.mrf.mxu2 }
 0x590   :  { %v4453_v32 = vpop.f32.mrf.mxu3 }
 0x592   :  { %v13827_v7 = vpop.f32.mrf.mxu0 }
 0x593   :  { %4589 = vmatmul.bf16.vlgmr.msra.gmra.mxu1 %v4014_v14  ;;  %v9841_v14 = vld [vmem:[%s14906_s9 + $0x7c] sm:$0xf] }
 0x594   :  { %v9095_v12 = vor.u32 %v9841_v14, %v9092_v13  ;;  %v9123_v14 = vor.u32 %v9849_v30, %v9122_v16  ;;  %v9893_v16 = vld [vmem:[%s14908_s11 + $0x98] sm:$0xf0] }
 0x595   :  { %v9853_v30 = vld [vmem:[%s14906_s9 + $0xdc] sm:$0xf] }
 0x596   :  { %5001 = vmatpush.bf16.msra.mxu0 %v9095_v12  ;;  %v4429_v58 = vpop.f32.mrf.mxu2 }
 0x59a   :  { %5002 = vmatpush.bf16.msra.mxu0 %v9083_v0  ;;  %v13861_v19 = vpop.f32.mrf.mxu0  ;;  %v9179_v0 = vor.u32 %v9862_v42, %v9176_v25 }
 0x59c   :  { %5026 = vmatpush.bf16.msrb.mxu1 %v9179_v0  ;;  %v9834_v0 = vld [vmem:[%s14906_s9 + $0x40] sm:$0xf0] }
 0x59e   :  { %5003 = vmatpush.bf16.msra.mxu0 %v9071_v20  ;;  %v9111_v20 = vor.u32 %v9846_v54, %v9110_v52 }
 0x5a0   :  { %5027 = vmatpush.bf16.msrb.mxu1 %v9167_v15  ;;  %v9854_v15 = vld [vmem:[%s14906_s9 + $0xe0] sm:$0xf0] }
 0x5a2   :  { %5004 = vmatpush.bf16.msra.mxu0 %v9059_v48  ;;  %v13921_v3 = vpop.f32.mrf.mxu0 }
 0x5a3   :  { %4594 = vmatmul.bf16.gmra.mxu1 %v4018_v11  ;;  %v9030_v11 = vld [vmem:[%s14906_s9] sm:$0xf] }
 0x5a4   :  { %v9031_v53 = vor.u32 %v9827_v21, %v9030_v11  ;;  %v13896_v11 = vpop.f32.mrf.mxu3 }
 0x5a6   :  { %5005 = vmatpush.bf16.msra.mxu0 %v9047_v56  ;;  %4958 = vmatpush.bf16.msra.mxu2 %v9031_v53  ;;  %v9863_v56 = vld [vmem:[%s14906_s9 + $0x128] sm:$0xf0]  ;;  %v9856_v53 = vld [vmem:[%s14906_s9 + $0xf4] sm:$0xf] }
 0x5a7   :  { %v9175_v21 = vor.u32 %v9863_v56, %v9174_v43  ;;  %v9850_v56 = vld [vmem:[%s14906_s9 + $0xc4] sm:$0xf] }
 0x5aa   :  { %5006 = vmatpush.bf16.msra.mxu0 %v9035_v22  ;;  %5047 = vmatpush.bf16.msrb.mxu2 %v9123_v14 }
 0x5ac   :  { %v4458_v25 = vpop.f32.mrf.mxu3 }
 0x5ae   :  { %5048 = vmatpush.bf16.msrb.mxu2 %v9111_v20  ;;  %v9138_v20 = vld [vmem:[%s14906_s9 + $0xd8] sm:$0xf] }
 0x5b3   :  { %4599 = vmatmul.bf16.gmra.mxu1 %v4022_v45  ;;  %v13825_v45 = vperm.slane %v13820_v50, 0 }
 0x5b5   :  { %v4423_v61 = vadd.f32 %v4422_v36, %v13825_v45  ;;  %v4425_v8 = vadd.f32 %v4424_v60, %v13825_v45  ;;  %v9186_v36 = vld [vmem:[%s14906_s9 + $0x138] sm:$0xf]  ;;  %v9098_v60 = vld [vmem:[%s14906_s9 + $0x80] sm:$0xf]  ;;  %v4428_v9 = vadd.f32 %v13809_v24, %v13825_v45  ;;  %v4430_v1 = vadd.f32 %v4429_v58, %v13825_v45 }
 0x5b6   :  { %v9187_v44 = vor.u32 %v9866_v46, %v9186_v36  ;;  %v9099_v18 = vor.u32 %v9843_v63, %v9098_v60  ;;  %v9155_v24 = vor.u32 %v9856_v53, %v9152_v57  ;;  %v9282_v36 = vld [vmem:[%s14908_s11 + $0x78] sm:$0xf]  ;;  %v9890_v46 = vld [vmem:[%s14908_s11 + $0x80] sm:$0xf0]  ;;  %v9831_v60 = vld [vmem:[%s14906_s9 + $0x28] sm:$0xf0] }
 0x5b7   :  { %v4447_v12 = vadd.f32 %v4446_v41, %v4423_v61  ;;  %v4449_v39 = vadd.f32 %v4448_v33, %v4425_v8  ;;  %v13882_v41 = vpop.f32.mrf.mxu2  ;;  %v9840_v33 = vld [vmem:[%s14906_s9 + $0x70] sm:$0xf0]  ;;  %v4452_v28 = vadd.f32 %v13822_v55, %v4428_v9  ;;  %v4454_v58 = vadd.f32 %v4453_v32, %v4430_v1  ;;  %v9837_v61 = vld [vmem:[%s14906_s9 + $0x58] sm:$0xf0]  ;;  %v9294_v55 = vld [vmem:[%s14908_s11 + $0x90] sm:$0xf] }
 0x5b8   :  { %4977 = vmatpush.bf16.msra.mxu3 %v9187_v44  ;;  %5049 = vmatpush.bf16.msrb.mxu2 %v9099_v18  ;;  %v9087_v5 = vor.u32 %v9840_v33, %v9086_v2  ;;  %v9075_v29 = vor.u32 %v9837_v61, %v9074_v23  ;;  %v13956_v8 = vor.u32 %v9893_v16, %v9294_v55  ;;  %v9857_v32 = vld [vmem:[%s14906_s9 + $0xf8] sm:$0xf0]  ;;  %v4482_v44 = vpop.f32.mrf.mxu0  ;;  %v9126_v33 = vld [vmem:[%s14906_s9 + $0xc0] sm:$0xf]  ;;  %v9038_v9 = vld [vmem:[%s14906_s9 + $0x8] sm:$0xf] }
 0x5b9   :  { %v4471_v6 = vadd.f32 %v13777_v59, %v4447_v12  ;;  %v4473_v10 = vadd.f32 %v4472_v4, %v4449_v39  ;;  %v9306_v4 = vld [vmem:[%s14908_s11 + $0xa8] sm:$0xf]  ;;  %5028 = vmatpush.bf16.msrb.mxu1 %v9155_v24  ;;  %v4476_v14 = vadd.f32 %v13827_v7, %v4452_v28  ;;  %v9150_v12 = vld [vmem:[%s14906_s9 + $0xf0] sm:$0xf]  ;;  %v9062_v39 = vld [vmem:[%s14906_s9 + $0x38] sm:$0xf]  ;;  %v4478_v42 = vadd.f32 %v13861_v19, %v4454_v58 }
 0x5ba   :  { %v13923_v40 = vor.u32 %v9896_v62, %v9306_v4  ;;  %v9151_v7 = vor.u32 %v9857_v32, %v9150_v12  ;;  %v9063_v19 = vor.u32 %v9834_v0, %v9062_v39  ;;  %v4433_v18 = vadd.f32 %v13882_v41, %v13825_v45  ;;  %v9851_v41 = vld [vmem:[%s14906_s9 + $0xc8] sm:$0xf0]  ;;  %v9258_v1 = vld [vmem:[%s14908_s11 + $0x48] sm:$0xf]  ;;  %v9884_v24 = vld [vmem:[%s14908_s11 + $0x50] sm:$0xf0] }
 0x5bb   :  { %v9127_v4 = vor.u32 %v9851_v41, %v9126_v33  ;;  %v9308_v58 = vld [vmem:[%s14908_s11 + $0xb4] sm:$0xf0]  ;;  %v9246_v61 = vld [vmem:[%s14908_s11 + $0x30] sm:$0xf]  ;;  %v9881_v55 = vld [vmem:[%s14908_s11 + $0x38] sm:$0xf0] }
 0x5bc   :  { %4978 = vmatpush.bf16.msra.mxu3 %v9175_v21  ;;  %5290 = vmatpush.bf16.msrb.mxu0 %v13923_v40  ;;  %v9128_v21 = vld [vmem:[%s14906_s9 + $0xcc] sm:$0xf0]  ;;  %v4457_v34 = vadd.f32 %v13896_v11, %v4433_v18  ;;  %v14059_v11 = vor.u32 %v9881_v55, %v9246_v61  ;;  %v9892_v16 = vld [vmem:[%s14908_s11 + $0x94] sm:$0xf]  ;;  %v9878_v12 = vld [vmem:[%s14908_s11 + $0x20] sm:$0xf0] }
 0x5bd   :  { %5050 = vmatpush.bf16.msrb.mxu2 %v9087_v5  ;;  %v9131_v53 = vor.u32 %v9850_v56, %v9128_v21  ;;  %v9828_v5 = vld [vmem:[%s14906_s9 + $0x10] sm:$0xf0]  ;;  %v9897_v18 = vld [vmem:[%s14908_s11 + $0xb8] sm:$0xf0] }
 0x5be   :  { %v9039_v62 = vor.u32 %v9828_v5, %v9038_v9  ;;  %v9886_v9 = vld [vmem:[%s14908_s11 + $0x64] sm:$0xf]  ;;  %v9272_v5 = vld [vmem:[%s14908_s11 + $0x6c] sm:$0xf0] }
 0x5bf   :  { %v13927_v26 = vpop.f32.mrf.mxu2 }
 0x5c0   :  { %4979 = vmatpush.bf16.msra.mxu3 %v9163_v38  ;;  %5291 = vmatpush.bf16.msrb.mxu0 %v13956_v8  ;;  %v4435_v57 = vadd.f32 %v13927_v26, %v13825_v45  ;;  %v14038_v45 = vor.u32 %v9884_v24, %v9258_v1  ;;  %v9895_v26 = vld [vmem:[%s14908_s11 + $0xac] sm:$0xf]  ;;  %v14049_v23 = vpop.f32.mrf.mxu0  ;;  %v9302_v24 = vld [vmem:[%s14908_s11 + $0x98] sm:$0xf] }
 0x5c1   :  { %5051 = vmatpush.bf16.msrb.mxu2 %v9075_v29  ;;  %v14047_v31 = vor.u32 %v9895_v26, %v9308_v58  ;;  %v9867_v1 = vld [vmem:[%s14906_s9 + $0x148] sm:$0xf0]  ;;  %v9894_v26 = vld [vmem:[%s14908_s11 + $0xa0] sm:$0xf0] }
 0x5c2   :  { %v4459_v38 = vadd.f32 %v4458_v25, %v4435_v57  ;;  %v9883_v58 = vld [vmem:[%s14908_s11 + $0x4c] sm:$0xf] }
 0x5c4   :  { %4980 = vmatpush.bf16.msra.mxu3 %v9151_v7  ;;  %v4483_v32 = vadd.f32 %v4482_v44, %v4459_v38 }
 0x5c5   :  { %5052 = vmatpush.bf16.msrb.mxu2 %v9063_v19  ;;  %v9873_v19 = vld [vmem:[%s14906_s9 + $0x178] sm:$0xf0] }
 0x5c7   :  { %v13980_v17 = vpop.f32.mrf.mxu2 }
 0x5c8   :  { %v4568_v44 = vpop.f32.mrf.mxu0 }
 0x5cf   :  { %v4520_v29 = vpop.f32.mrf.mxu2 }
 0x5d0   :  { %v14160_v38 = vpop.f32.mrf.mxu0 }
 0x5e0   :  { %v4494_v13 = vpop.f32.mrf.mxu1 }
 0x5e1   :  { %v4495_v51 = vadd.f32 %v4494_v13, %v4471_v6  ;;  %v9143_v13 = vor.u32 %v9853_v30, %v9140_v35  ;;  %v13978_v6 = vor.u32 %v9890_v46, %v9282_v36  ;;  %v9296_v30 = vld [vmem:[%s14908_s11 + $0x9c] sm:$0xf0]  ;;  %v4481_v35 = vadd.f32 %v13921_v3, %v4457_v34  ;;  %v9260_v34 = vld [vmem:[%s14908_s11 + $0x54] sm:$0xf0] }
 0x5e2   :  { %v14081_v3 = vperm.slane %v13820_v50, 1  ;;  %v9222_v50 = vld [vmem:[%s14908_s11] sm:$0xf]  ;;  %v14165_v61 = vor.u32 %v9883_v58, %v9260_v34  ;;  %v9855_v34 = vld [vmem:[%s14906_s9 + $0xe8] sm:$0xf0] }
 0x5e3   :  { %v4605_v37 = vmax.f32 %v4495_v51, 0.0  ;;  %5029 = vmatpush.bf16.msrb.mxu1 %v9143_v13  ;;  %5292 = vmatpush.bf16.msrb.mxu0 %v13978_v6  ;;  %v9234_v13 = vld [vmem:[%s14908_s11 + $0x18] sm:$0xf]  ;;  %v9146_v58 = vld [vmem:[%s14906_s9 + $0xe0] sm:$0xf] }
 0x5e4   :  { %v14078_v25 = vor.u32 %v9878_v12, %v9234_v13  ;;  %v4521_v56 = vadd.f32 %v4520_v29, %v14081_v3  ;;  %v9290_v13 = vld [vmem:[%s14908_s11 + $0x80] sm:$0xf]  ;;  %v9891_v12 = vld [vmem:[%s14908_s11 + $0x88] sm:$0xf0] }
 0x5e7   :  { %5030 = vmatpush.bf16.msrb.mxu1 %v9131_v53 }
 0x5e8   :  { %v4496_v59 = vpop.f32.mrf.mxu1 }
 0x5e9   :  { %v4497_v48 = vadd.f32 %v4496_v59, %v4473_v10  ;;  %v9050_v10 = vld [vmem:[%s14906_s9 + $0x20] sm:$0xf] }
 0x5ea   :  { %v9051_v63 = vor.u32 %v9831_v60, %v9050_v10  ;;  %v9870_v60 = vld [vmem:[%s14906_s9 + $0x160] sm:$0xf0] }
 0x5eb   :  { %v4607_v49 = vmax.f32 %v4497_v48, 0.0  ;;  %v9139_v48 = vor.u32 %v9854_v15, %v9138_v20  ;;  %5303 = vmatpush.bf16.msra.mxu1 %v14047_v31  ;;  %v9889_v20 = vld [vmem:[%s14908_s11 + $0x7c] sm:$0xf]  ;;  %v4519_v15 = vadd.f32 %v13980_v17, %v14081_v3 }
 0x5ec   :  { %5053 = vmatpush.bf16.msrb.mxu2 %v9051_v63  ;;  %v4523_v63 = vpop.f32.mrf.mxu2 }
 0x5ed   :  { %v13909_v22 = vpack.c.bf16 %v4607_v49, %v4605_v37  ;;  %v9270_v37 = vld [vmem:[%s14908_s11 + $0x60] sm:$0xf]  ;;  %v9887_v49 = vld [vmem:[%s14908_s11 + $0x68] sm:$0xf0]  ;;  %4981 = vmatpush.bf16.msra.mxu3 %v9139_v48  ;;  %v9206_v48 = vld [vmem:[%s14906_s9 + $0x158] sm:$0xf] }
 0x5ee   :  { %v14011_v2 = vor.u32 %v9887_v49, %v9270_v37  ;;  %v9207_v17 = vor.u32 %v9870_v60, %v9206_v48  ;;  %v9314_v49 = vld [vmem:[%s14908_s11 + $0xb0] sm:$0xf]  ;;  %v4573_v48 = vpop.f32.mrf.mxu0 }
 0x5ef   :  { %4959 = vmatmul.bf16.vlgmr.msra.gmra.mxu2 %v13909_v22  ;;  %5007 = vmatmul.bf16.vlgmr.msra.gmra.mxu0 %v13909_v22  ;;  %v14125_v21 = vor.u32 %v9897_v18, %v9314_v49  ;;  %v9861_v49 = vld [vmem:[%s14906_s9 + $0x118] sm:$0xf0]  ;;  %v9266_v18 = vld [vmem:[%s14908_s11 + $0x50] sm:$0xf] }
 0x5f0   :  { %v4499_v47 = vpop.f32.mrf.mxu1  ;;  %5293 = vmatpush.bf16.msrb.mxu0 %v14011_v2  ;;  %5054 = vmatpush.bf16.msrb.mxu2 %v9039_v62  ;;  %v9194_v62 = vld [vmem:[%s14906_s9 + $0x140] sm:$0xf] }
 0x5f1   :  { %v4500_v52 = vadd.f32 %v4499_v47, %v4476_v14  ;;  %v14035_v47 = vpop.f32.mrf.mxu3  ;;  %4982 = vmatpush.bf16.msra.mxu3 %v9127_v4  ;;  %v14068_v14 = vor.u32 %v9892_v16, %v9296_v30  ;;  %v14138_v4 = vor.u32 %v9886_v9, %v9272_v5 }
 0x5f2   :  { %v4543_v53 = vadd.f32 %v14035_v47, %v4519_v15 }
 0x5f3   :  { %v4609_v51 = vmax.f32 %v4500_v52, 0.0  ;;  %5304 = vmatpush.bf16.msra.mxu1 %v14068_v14  ;;  %v9218_v52 = vld [vmem:[%s14906_s9 + $0x170] sm:$0xf] }
 0x5f4   :  { %5294 = vmatpush.bf16.msrb.mxu0 %v14038_v45  ;;  %5316 = vmatpush.bf16.msra.mxu2 %v14125_v21  ;;  %v4567_v47 = vadd.f32 %v14049_v23, %v4543_v53  ;;  %v14163_v23 = vor.u32 %v9894_v26, %v9302_v24  ;;  %v4525_v16 = vpop.f32.mrf.mxu2  ;;  %v9877_v53 = vld [vmem:[%s14908_s11 + $0x1c] sm:$0xf]  ;;  %v9254_v24 = vld [vmem:[%s14908_s11 + $0x38] sm:$0xf]  ;;  %v9882_v26 = vld [vmem:[%s14908_s11 + $0x40] sm:$0xf0] }
 0x5f8   :  { %v4501_v54 = vpop.f32.mrf.mxu1  ;;  %5295 = vmatpush.bf16.msrb.mxu0 %v14059_v11  ;;  %5317 = vmatpush.bf16.msra.mxu2 %v14163_v23 }
 0x5f9   :  { %v4502_v27 = vadd.f32 %v4501_v54, %v4478_v42  ;;  %v4544_v0 = vpop.f32.mrf.mxu3  ;;  %v9219_v54 = vor.u32 %v9873_v19, %v9218_v52  ;;  %v9888_v52 = vld [vmem:[%s14908_s11 + $0x70] sm:$0xf0] }
 0x5fa   :  { %v4545_v41 = vadd.f32 %v4544_v0, %v4521_v56  ;;  %v9864_v0 = vld [vmem:[%s14906_s9 + $0x130] sm:$0xf0] }
 0x5fb   :  { %v4611_v59 = vmax.f32 %v4502_v27, 0.0  ;;  %v9875_v27 = vld [vmem:[%s14908_s11 + $0x8] sm:$0xf0]  ;;  %5071 = vmatpush.bf16.msrb.mxu3 %v9219_v54  ;;  %v9880_v19 = vld [vmem:[%s14908_s11 + $0x34] sm:$0xf] }
 0x5fc   :  { %5296 = vmatpush.bf16.msrb.mxu0 %v14078_v25  ;;  %v4569_v55 = vadd.f32 %v4568_v44, %v4545_v41  ;;  %v4524_v44 = vadd.f32 %v4523_v63, %v14081_v3  ;;  %v10184_v63 = vmov 0   ;;  %v9236_v41 = vld [vmem:[%s14908_s11 + $0x24] sm:$0xf0]  ;;  %v4528_v9 = vpop.f32.mrf.mxu2 }
 0x5fd   :  { %v14003_v43 = vpack.c.bf16 %v4611_v59, %v4609_v51  ;;  %v14103_v51 = vor.u32 %v9875_v27, %v9222_v50  ;;  %v9284_v59 = vld [vmem:[%s14908_s11 + $0x84] sm:$0xf0]  ;;  %v9248_v27 = vld [vmem:[%s14908_s11 + $0x3c] sm:$0xf0] }
 0x5fe   :  { %v14114_v37 = vor.u32 %v9889_v20, %v9284_v59  ;;  %v14203_v15 = vor.u32 %v9880_v19, %v9248_v27  ;;  %v4526_v59 = vadd.f32 %v4525_v16, %v14081_v3  ;;  %v9874_v16 = vld [vmem:[%s14908_s11 + $0x4] sm:$0xf]  ;;  %v9852_v19 = vld [vmem:[%s14906_s9 + $0xd0] sm:$0xf0]  ;;  %v9230_v27 = vld [vmem:[%s14908_s11 + $0x8] sm:$0xf] }
 0x5ff   :  { %4964 = vmatmul.bf16.gmra.mxu2 %v14003_v43  ;;  %5012 = vmatmul.bf16.gmra.mxu0 %v14003_v43 }
 0x600   :  { %v4504_v28 = vpop.f32.mrf.mxu1  ;;  %5297 = vmatpush.bf16.msrb.mxu0 %v14103_v51  ;;  %5305 = vmatpush.bf16.msra.mxu1 %v14114_v37 }
 0x601   :  { %v4505_v39 = vadd.f32 %v4504_v28, %v4481_v35  ;;  %5072 = vmatpush.bf16.msrb.mxu3 %v9207_v17  ;;  %v4547_v57 = vpop.f32.mrf.mxu3  ;;  %v9195_v28 = vor.u32 %v9867_v1, %v9194_v62  ;;  %v9170_v17 = vld [vmem:[%s14906_s9 + $0x110] sm:$0xf]  ;;  %v9158_v62 = vld [vmem:[%s14906_s9 + $0xf8] sm:$0xf]  ;;  %v9858_v1 = vld [vmem:[%s14906_s9 + $0x100] sm:$0xf0] }
 0x602   :  { %v4548_v56 = vadd.f32 %v4547_v57, %v4524_v44  ;;  %v14232_v57 = vor.u32 %v9877_v53, %v9236_v41  ;;  %v4576_v44 = vpop.f32.mrf.mxu0 }
 0x603   :  { %v4613_v36 = vmax.f32 %v4505_v39, 0.0 }
 0x604   :  { %5394 = vmatpush.bf16.msra.mxu0 %v14047_v31  ;;  %5306 = vmatpush.bf16.msra.mxu1 %v14138_v4 }
 0x605   :  { %5073 = vmatpush.bf16.msrb.mxu3 %v9195_v28  ;;  %v9159_v28 = vor.u32 %v9858_v1, %v9158_v62 }
 0x608   :  { %v4506_v42 = vpop.f32.mrf.mxu1  ;;  %5395 = vmatpush.bf16.msra.mxu0 %v14068_v14  ;;  %5307 = vmatpush.bf16.msra.mxu1 %v14165_v61 }
 0x609   :  { %v4507_v7 = vadd.f32 %v4506_v42, %v4483_v32  ;;  %v14176_v42 = vor.u32 %v9891_v12, %v9290_v13  ;;  %v4549_v20 = vpop.f32.mrf.mxu3 }
 0x60b   :  { %v4615_v46 = vmax.f32 %v4507_v7, 0.0  ;;  %v9182_v7 = vld [vmem:[%s14906_s9 + $0x128] sm:$0xf]  ;;  %5318 = vmatpush.bf16.msra.mxu2 %v14176_v42 }
 0x60c   :  { %5396 = vmatpush.bf16.msra.mxu0 %v14114_v37  ;;  %5308 = vmatpush.bf16.msra.mxu1 %v14203_v15 }
 0x60d   :  { %v14101_v10 = vpack.c.bf16 %v4615_v46, %v4613_v36  ;;  %v9183_v36 = vor.u32 %v9864_v0, %v9182_v7  ;;  %v9278_v46 = vld [vmem:[%s14908_s11 + $0x68] sm:$0xf] }
 0x60e   :  { %v14197_v50 = vor.u32 %v9888_v52, %v9278_v46  ;;  %v9134_v52 = vld [vmem:[%s14906_s9 + $0xc8] sm:$0xf] }
 0x60f   :  { %4969 = vmatmul.bf16.gmra.mxu2 %v14101_v10  ;;  %5017 = vmatmul.bf16.gmra.mxu0 %v14101_v10 }
 0x610   :  { %v4590_v33 = vpop.f32.mrf.mxu1  ;;  %5397 = vmatpush.bf16.msra.mxu0 %v14138_v4  ;;  %5074 = vmatpush.bf16.msrb.mxu3 %v9183_v36 }
 0x611   :  { %v4591_v29 = vadd.f32 %v4590_v33, %v4567_v47  ;;  %5319 = vmatpush.bf16.msra.mxu2 %v14197_v50  ;;  %v9885_v33 = vld [vmem:[%s14908_s11 + $0x58] sm:$0xf0]  ;;  %v4550_v47 = vadd.f32 %v4549_v20, %v4526_v59  ;;  %5309 = vmatpush.bf16.msra.mxu1 %v14232_v57  ;;  %v4552_v7 = vpop.f32.mrf.mxu3  ;;  %v9876_v20 = vld [vmem:[%s14908_s11 + $0x10] sm:$0xf0] }
 0x612   :  { %v14230_v5 = vor.u32 %v9885_v33, %v9266_v18 }
 0x613   :  { %v4606_v32 = vmax.f32 %v4591_v29, 0.0  ;;  %v14256_v29 = vor.u32 %v9882_v26, %v9254_v24  ;;  %v4574_v12 = vadd.f32 %v4573_v48, %v4550_v47 }
 0x614   :  { %5398 = vmatpush.bf16.msra.mxu0 %v14165_v61 }
 0x615   :  { %5320 = vmatpush.bf16.msra.mxu2 %v14230_v5 }
 0x618   :  { %v4592_v30 = vpop.f32.mrf.mxu1  ;;  %5399 = vmatpush.bf16.msra.mxu0 %v14203_v15 }
 0x619   :  { %v4593_v35 = vadd.f32 %v4592_v30, %v4569_v55  ;;  %v4572_v55 = vadd.f32 %v14160_v38, %v4548_v56  ;;  %v9224_v30 = vld [vmem:[%s14908_s11 + $0xc] sm:$0xf0]  ;;  %v9879_v38 = vld [vmem:[%s14908_s11 + $0x28] sm:$0xf0]  ;;  %5321 = vmatpush.bf16.msra.mxu2 %v14256_v29  ;;  %v14295_v56 = vor.u32 %v9876_v20, %v9230_v27  ;;  %v4554_v41 = vpop.f32.mrf.mxu3 }
 0x61a   :  { %v14270_v13 = vor.u32 %v9874_v16, %v9224_v30 }
 0x61b   :  { %v4608_v39 = vmax.f32 %v4593_v35, 0.0  ;;  %v9242_v35 = vld [vmem:[%s14908_s11 + $0x20] sm:$0xf] }
 0x61c   :  { %v14274_v46 = vor.u32 %v9879_v38, %v9242_v35  ;;  %5310 = vmatpush.bf16.msra.mxu1 %v14270_v13  ;;  %5400 = vmatpush.bf16.msra.mxu0 %v14232_v57 }
 0x61d   :  { %v14194_v54 = vpack.c.bf16 %v4608_v39, %v4606_v32  ;;  %v9147_v39 = vor.u32 %v9855_v34, %v9146_v58 }
 0x61e   :  { %5322 = vmatpush.bf16.msra.mxu2 %v14274_v46 }
 0x61f   :  { %4983 = vmatmul.bf16.vlgmr.msra.gmra.mxu3 %v14194_v54  ;;  %5031 = vmatmul.bf16.vlgmr.msrb.gmra.mxu1 %v14194_v54 }
 0x620   :  { %5055 = vmatmul.bf16.vlgmr.msrb.gmra.mxu2 %v13909_v22  ;;  %v4595_v60 = vpop.f32.mrf.mxu1  ;;  %5298 = vmatmul.bf16.vlgmr.msrb.gmra.mxu0 %v10184_v63  ;;  %v9171_v22 = vor.u32 %v9861_v49, %v9170_v17  ;;  %v9135_v17 = vor.u32 %v9852_v19, %v9134_v52  ;;  %v4529_v49 = vadd.f32 %v4528_v9, %v14081_v3 }
 0x621   :  { %v4596_v32 = vadd.f32 %v4595_v60, %v4572_v55  ;;  %5407 = vmatpush.bf16.msrb.mxu1 %v14125_v21  ;;  %v4530_v60 = vpop.f32.mrf.mxu2  ;;  %5401 = vmatpush.bf16.msra.mxu0 %v14270_v13 }
 0x622   :  { %5075 = vmatpush.bf16.msrb.mxu3 %v9171_v22  ;;  %v4531_v22 = vadd.f32 %v4530_v60, %v14081_v3  ;;  %v4553_v53 = vadd.f32 %v4552_v7, %v4529_v49  ;;  %5323 = vmatpush.bf16.msra.mxu2 %v14295_v56  ;;  %v4578_v3 = vpop.f32.mrf.mxu0 }
 0x623   :  { %v4610_v59 = vmax.f32 %v4596_v32, 0.0  ;;  %v14366_v32 = vld [vmem:[%s14907_s10] sm:$0x7] }
 0x624   :  { %v4555_v9 = vadd.f32 %v4554_v41, %v4531_v22  ;;  %v4577_v62 = vadd.f32 %v4576_v44, %v4553_v53  ;;  %v4690_v7 = vperm.slane %v14366_v32, 1  ;;  %v4689_v19 = vperm.slane %v14366_v32, 0  ;;  %v14373_v22 = vld [vmem:[%s14909_s12] sm:$0x7] }
 0x625   :  { %5408 = vmatpush.bf16.msrb.mxu1 %v14163_v23  ;;  %5513 = vmatpush.bf16.msrb.mxu0 %v14125_v21  ;;  %v14376_v53 = vperm.slane %v14373_v22, 0 }
 0x626   :  { %5076 = vmatpush.bf16.msrb.mxu3 %v9159_v28  ;;  %5487 = vmatpush.bf16.msrb.mxu2 %v13923_v40 }
 0x628   :  { %v4597_v0 = vpop.f32.mrf.mxu1 }
 0x629   :  { %v4598_v36 = vadd.f32 %v4597_v0, %v4574_v12  ;;  %5409 = vmatpush.bf16.msrb.mxu1 %v14176_v42  ;;  %5514 = vmatpush.bf16.msrb.mxu0 %v14163_v23 }
 0x62a   :  { %5077 = vmatpush.bf16.msrb.mxu3 %v9147_v39  ;;  %5488 = vmatpush.bf16.msrb.mxu2 %v13956_v8 }
 0x62b   :  { %v4612_v48 = vmax.f32 %v4598_v36, 0.0 }
 0x62d   :  { %v14292_v18 = vpack.c.bf16 %v4612_v48, %v4610_v59  ;;  %5410 = vmatpush.bf16.msrb.mxu1 %v14197_v50  ;;  %5515 = vmatpush.bf16.msrb.mxu0 %v14176_v42 }
 0x62e   :  { %5078 = vmatpush.bf16.msrb.mxu3 %v9135_v17  ;;  %5489 = vmatpush.bf16.msrb.mxu2 %v13978_v6 }
 0x62f   :  { %4988 = vmatmul.bf16.gmra.mxu3 %v14292_v18  ;;  %5036 = vmatmul.bf16.gmra.mxu1 %v14292_v18 }
 0x630   :  { %5060 = vmatmul.bf16.gmra.mxu2 %v14003_v43  ;;  %v4600_v33 = vpop.f32.mrf.mxu1  ;;  %v4579_v43 = vadd.f32 %v4578_v3, %v4555_v9 }
 0x631   :  { %v4601_v1 = vadd.f32 %v4600_v33, %v4577_v62  ;;  %5411 = vmatpush.bf16.msrb.mxu1 %v14230_v5  ;;  %5516 = vmatpush.bf16.msrb.mxu0 %v14197_v50 }
 0x632   :  { %5381 = vmatpush.bf16.msra.mxu3 %v13923_v40  ;;  %5490 = vmatpush.bf16.msrb.mxu2 %v14011_v2 }
 0x633   :  { %v4614_v28 = vmax.f32 %v4601_v1, 0.0 }
 0x635   :  { %5412 = vmatpush.bf16.msrb.mxu1 %v14256_v29  ;;  %5517 = vmatpush.bf16.msrb.mxu0 %v14230_v5 }
 0x636   :  { %5382 = vmatpush.bf16.msra.mxu3 %v13956_v8  ;;  %5491 = vmatpush.bf16.msrb.mxu2 %v14038_v45 }
 0x638   :  { %v4602_v24 = vpop.f32.mrf.mxu1 }
 0x639   :  { %v4603_v47 = vadd.f32 %v4602_v24, %v4579_v43  ;;  %5413 = vmatpush.bf16.msrb.mxu1 %v14274_v46  ;;  %5518 = vmatpush.bf16.msrb.mxu0 %v14256_v29 }
 0x63a   :  { %5383 = vmatpush.bf16.msra.mxu3 %v13978_v6  ;;  %5492 = vmatpush.bf16.msrb.mxu2 %v14059_v11 }
 0x63b   :  { %v4616_v26 = vmax.f32 %v4603_v47, 0.0 }
 0x63d   :  { %v4622_v58 = vpack.c.bf16 %v4616_v26, %v4614_v28  ;;  %5414 = vmatpush.bf16.msrb.mxu1 %v14295_v56  ;;  %5519 = vmatpush.bf16.msrb.mxu0 %v14274_v46 }
 0x63e   :  { %5384 = vmatpush.bf16.msra.mxu3 %v14011_v2  ;;  %5493 = vmatpush.bf16.msrb.mxu2 %v14078_v25 }
 0x63f   :  { %4993 = vmatmul.bf16.gmra.mxu3 %v4622_v58  ;;  %5041 = vmatmul.bf16.gmra.mxu1 %v4622_v58 }
 0x640   :  { %5065 = vmatmul.bf16.gmra.mxu2 %v14101_v10 }
 0x641   :  { %5520 = vmatpush.bf16.msrb.mxu0 %v14295_v56 }
 0x642   :  { %5385 = vmatpush.bf16.msra.mxu3 %v14038_v45  ;;  %5494 = vmatpush.bf16.msrb.mxu2 %v14103_v51 }
 0x646   :  { %5386 = vmatpush.bf16.msra.mxu3 %v14059_v11 }
 0x64a   :  { %5387 = vmatpush.bf16.msra.mxu3 %v14078_v25 }
 0x64e   :  { %5388 = vmatpush.bf16.msra.mxu3 %v14103_v51 }
 0x64f   :  { %5079 = vmatmul.bf16.vlgmr.msrb.gmra.mxu3 %v14194_v54  ;;  %5311 = vmatmul.bf16.vlgmr.msra.gmra.mxu1 %v10184_v63 }
 0x650   :  { %5324 = vmatmul.bf16.vlgmr.msra.gmra.mxu2 %v10184_v63  ;;  %5593 = vmatpush.bf16.msra.mxu1 %v13923_v40 }
 0x651   :  { %5606 = vmatpush.bf16.msra.mxu2 %v14047_v31 }
 0x652   :  { %5500 = vmatpush.bf16.msrb.mxu3 %v14047_v31 }
 0x654   :  { %5594 = vmatpush.bf16.msra.mxu1 %v13956_v8 }
 0x655   :  { %5607 = vmatpush.bf16.msra.mxu2 %v14068_v14 }
 0x656   :  { %5501 = vmatpush.bf16.msrb.mxu3 %v14068_v14 }
 0x658   :  { %5595 = vmatpush.bf16.msra.mxu1 %v13978_v6 }
 0x659   :  { %5608 = vmatpush.bf16.msra.mxu2 %v14114_v37 }
 0x65a   :  { %5502 = vmatpush.bf16.msrb.mxu3 %v14114_v37 }
 0x65c   :  { %5596 = vmatpush.bf16.msra.mxu1 %v14011_v2 }
 0x65d   :  { %5609 = vmatpush.bf16.msra.mxu2 %v14138_v4 }
 0x65e   :  { %5503 = vmatpush.bf16.msrb.mxu3 %v14138_v4 }
 0x65f   :  { %5084 = vmatmul.bf16.gmra.mxu3 %v14292_v18 }
 0x660   :  { %5597 = vmatpush.bf16.msra.mxu1 %v14038_v45 }
 0x661   :  { %5610 = vmatpush.bf16.msra.mxu2 %v14165_v61 }
 0x662   :  { %5504 = vmatpush.bf16.msrb.mxu3 %v14165_v61 }
 0x664   :  { %5598 = vmatpush.bf16.msra.mxu1 %v14059_v11 }
 0x665   :  { %5611 = vmatpush.bf16.msra.mxu2 %v14203_v15 }
 0x666   :  { %5505 = vmatpush.bf16.msrb.mxu3 %v14203_v15 }
 0x668   :  { %5599 = vmatpush.bf16.msra.mxu1 %v14078_v25 }
 0x669   :  { %5612 = vmatpush.bf16.msra.mxu2 %v14232_v57 }
 0x66a   :  { %5506 = vmatpush.bf16.msrb.mxu3 %v14232_v57 }
 0x66c   :  { %v5008_v10 = vpop.f32.mrf.mxu0  ;;  %5600 = vmatpush.bf16.msra.mxu1 %v14103_v51 }
 0x66d   :  { %5613 = vmatpush.bf16.msra.mxu2 %v14270_v13  ;;  %v5009_v36 = vadd.f32 %v5008_v10, %v4690_v7 }
 0x66e   :  { %5507 = vmatpush.bf16.msrb.mxu3 %v14270_v13 }
 0x66f   :  { %5089 = vmatmul.bf16.gmra.mxu3 %v4622_v58 }
 0x672   :  { %v4960_v54 = vpop.f32.mrf.mxu2 }
 0x673   :  { %v4961_v20 = vadd.f32 %v4960_v54, %v4689_v19 }
 0x674   :  { %v5010_v63 = vpop.f32.mrf.mxu0 }
 0x675   :  { %v5011_v48 = vadd.f32 %v5010_v63, %v4690_v7 }
 0x67a   :  { %v4962_v34 = vpop.f32.mrf.mxu2 }
 0x67b   :  { %v4963_v41 = vadd.f32 %v4962_v34, %v4689_v19 }
 0x67c   :  { %v5013_v55 = vpop.f32.mrf.mxu0 }
 0x67d   :  { %v5014_v3 = vadd.f32 %v5013_v55, %v4690_v7 }
 0x682   :  { %v4965_v16 = vpop.f32.mrf.mxu2 }
 0x683   :  { %v4966_v58 = vadd.f32 %v4965_v16, %v4689_v19 }
 0x684   :  { %v5015_v30 = vpop.f32.mrf.mxu0 }
 0x685   :  { %v5016_v54 = vadd.f32 %v5015_v30, %v4690_v7 }
 0x68a   :  { %v4967_v35 = vpop.f32.mrf.mxu2 }
 0x68c   :  { %v5018_v38 = vpop.f32.mrf.mxu0 }
 0x692   :  { %v4970_v12 = vpop.f32.mrf.mxu2 }
 0x693   :  { %v4971_v30 = vadd.f32 %v4970_v12, %v4689_v19 }
 0x694   :  { %v5020_v39 = vpop.f32.mrf.mxu0 }
 0x69a   :  { %v4972_v0 = vpop.f32.mrf.mxu2 }
 0x69c   :  { %v5032_v52 = vpop.f32.mrf.mxu1 }
 0x69d   :  { %v5033_v44 = vadd.f32 %v5032_v52, %v5009_v36  ;;  %v5299_v27 = vpop.f32.mrf.mxu0  ;;  %v4968_v36 = vadd.f32 %v4967_v35, %v4689_v19  ;;  %v14386_v35 = vperm.slane %v14373_v22, 1 }
 0x69e   :  { %v5300_v1 = vadd.f32 %v5299_v27, %v14376_v53 }
 0x69f   :  { %5096 = vst [vmem:[#allocation2 + $0x38] sm:$0xff] %v5033_v44  ;;  %v5019_v44 = vadd.f32 %v5018_v38, %v4690_v7 }
 0x6a2   :  { %v4984_v59 = vpop.f32.mrf.mxu3 }
 0x6a3   :  { %v4985_v60 = vadd.f32 %v4984_v59, %v4961_v20  ;;  %v5056_v17 = vpop.f32.mrf.mxu2 }
 0x6a4   :  { %v5034_v49 = vpop.f32.mrf.mxu1 }
 0x6a5   :  { %5095 = vst [vmem:[#allocation2] sm:$0xff] %v4985_v60  ;;  %v5035_v18 = vadd.f32 %v5034_v49, %v5011_v48  ;;  %v5301_v33 = vpop.f32.mrf.mxu0 }
 0x6a6   :  { %v5153_v19 = vld [vmem:[#allocation2 + $0x38] sm:$0x3] }
 0x6a7   :  { %5099 = vst [vmem:[#allocation2 + $0x20] sm:$0xff] %v5035_v18 }
 0x6aa   :  { %v4986_v9 = vpop.f32.mrf.mxu3 }
 0x6ab   :  { %v4987_v62 = vadd.f32 %v4986_v9, %v4963_v41  ;;  %v5058_v43 = vpop.f32.mrf.mxu2 }
 0x6ac   :  { %v5037_v24 = vpop.f32.mrf.mxu1  ;;  %v5152_v47 = vld [vmem:[#allocation2] sm:$0x3] }
 0x6ad   :  { %5098 = vst [vmem:[#allocation2 + $0x58] sm:$0xff] %v4987_v62  ;;  %v5038_v28 = vadd.f32 %v5037_v24, %v5014_v3  ;;  %v5329_v26 = vadd.f32 %v5300_v1, %v5152_v47  ;;  %v14389_v62 = vperm.slane %v14366_v32, 2 }
 0x6af   :  { %5102 = vst [vmem:[#allocation2 + $0x80] sm:$0xff] %v5038_v28  ;;  %v9316_v0 = vmul.f32 -1.442695, %v5329_v26  ;;  %v5057_v47 = vadd.f32 %v5056_v17, %v14389_v62  ;;  %v5059_v32 = vadd.f32 %v5058_v43, %v14389_v62 }
 0x6b1   :  { %9957 = vpow2.f32 %v9316_v0 }
 0x6b2   :  { %v4989_v10 = vpop.f32.mrf.mxu3 }
 0x6b3   :  { %v4990_v63 = vadd.f32 %v4989_v10, %v4966_v58  ;;  %v14379_v39 = vpop.f32.mrf.mxu2 }
 0x6b4   :  { %v5039_v34 = vpop.f32.mrf.mxu1 }
 0x6b5   :  { %5101 = vst [vmem:[#allocation2 + $0x70] sm:$0xff] %v4990_v63  ;;  %v5040_v55 = vadd.f32 %v5039_v34, %v5016_v54 }
 0x6b7   :  { %5105 = vst [vmem:[#allocation2 + $0x50] sm:$0xff] %v5040_v55  ;;  %v9958_v48 = vpop.eup %9957 }
 0x6b8   :  { %v5337_v60 = vadd.f32 1.0, %v9958_v48 }
 0x6ba   :  { %v4991_v52 = vpop.f32.mrf.mxu3  ;;  %9959 = vrcp.f32 %v5337_v60  ;;  %v5350_v17 = vand.u32 2147483648, %v5337_v60  ;;  %vm5344_vm15 = vweird.f32 %v5337_v60 }
 0x6bb   :  { %v4992_v27 = vadd.f32 %v4991_v52, %v4968_v36  ;;  %v14381_v20 = vpop.f32.mrf.mxu2  ;;  %v14395_v36 = vperm.slane %v14373_v22, 2  ;;  %v5062_v22 = vadd.f32 %v14379_v39, %v14389_v62 }
 0x6bc   :  { %v5042_v59 = vpop.f32.mrf.mxu1 }
 0x6bd   :  { %5104 = vst [vmem:[#allocation2 + $0x40] sm:$0xff] %v4992_v27  ;;  %v5043_v16 = vadd.f32 %v5042_v59, %v5019_v44 }
 0x6bf   :  { %5108 = vst [vmem:[#allocation2 + $0x48] sm:$0xff] %v5043_v16  ;;  %v5348_v16 = vand.u32 2147483647, %v5337_v60 }
 0x6c0   :  { %v9960_v7 = vpop.eup %9959 }
 0x6c1   :  { %v5340_v1 = vmul.f32 %v9960_v7, %v5337_v60  ;;  %vm5345_vm14 = vweird.f32 %v9960_v7  ;;  %vm5349_vm1 = vcmp.eq.f32.partialorder %v5348_v16, 8.507059e+37 }
 0x6c2   :  { %v4994_v49 = vpop.f32.mrf.mxu3  ;;  %vm5346_vm0 = vmor %vm5344_vm15, %vm5345_vm14 }
 0x6c3   :  { %v4995_v18 = vadd.f32 %v4994_v49, %v4971_v30  ;;  %v14383_v33 = vpop.f32.mrf.mxu2  ;;  %v5341_v58 = vsub.f32 1.0, %v5340_v1  ;;  %v5351_v49 = vor.u32 1.1754944e-38, %v5350_v17 }
 0x6c4   :  { %v5044_v41 = vpop.f32.mrf.mxu1 }
 0x6c5   :  { %5107 = vst [vmem:[#allocation2 + $0x10] sm:$0xff] %v4995_v18  ;;  %v5342_v0 = vmul.f32 %v9960_v7, %v5341_v58 }
 0x6c7   :  { %v5343_v52 = vadd.f32 %v9960_v7, %v5342_v0 }
 0x6c9   :  { %v5347_v30 = vsel %vm5346_vm0, %v9960_v7, %v5343_v52  ;;  %v5064_v7 = vadd.f32 %v14381_v20, %v14389_v62  ;;  %v5067_v52 = vadd.f32 %v14383_v33, %v14389_v62 }
 0x6ca   :  { %v4996_v38 = vpop.f32.mrf.mxu3  ;;  %v5352_v18 = vsel %vm5349_vm1, %v5351_v49, %v5347_v30 }
 0x6cb   :  { %v5068_v9 = vpop.f32.mrf.mxu2 }
 0x6cc   :  { %v5312_v3 = vpop.f32.mrf.mxu1 }
 0x6cd   :  { %v5313_v12 = vadd.f32 %v5312_v3, %v14386_v35 }
 0x6cf   :  { %v5330_v24 = vadd.f32 %v5313_v12, %v5153_v19 }
 0x6d1   :  { %v9317_v28 = vmul.f32 -1.442695, %v5330_v24 }
 0x6d2   :  { %v5080_v26 = vpop.f32.mrf.mxu3 }
 0x6d3   :  { %9961 = vpow2.f32 %v9317_v28  ;;  %v5081_v10 = vadd.f32 %v5080_v26, %v5057_v47  ;;  %v5325_v54 = vpop.f32.mrf.mxu2 }
 0x6d4   :  { %v5314_v63 = vpop.f32.mrf.mxu1  ;;  %v5326_v48 = vadd.f32 %v5325_v54, %v14395_v36 }
 0x6d5   :  { %5097 = vst [vmem:[#allocation2 + $0x78] sm:$0xff] %v5081_v10 }
 0x6d6   :  { %v5369_v38 = vmul.f32 %v5352_v18, %v5326_v48  ;;  %v5378_v48 = vld [vmem:[#allocation2 + $0x38] sm:$0xc] }
 0x6d9   :  { %v9962_v34 = vpop.eup %9961 }
 0x6da   :  { %v5338_v55 = vadd.f32 1.0, %v9962_v34  ;;  %v5082_v44 = vpop.f32.mrf.mxu3 }
 0x6db   :  { %v5083_v27 = vadd.f32 %v5082_v44, %v5059_v32  ;;  %v5327_v59 = vpop.f32.mrf.mxu2 }
 0x6dc   :  { %9963 = vrcp.f32 %v5338_v55  ;;  %v5154_v43 = vld [vmem:[#allocation2 + $0x78] sm:$0x3]  ;;  %v5365_v60 = vand.u32 2147483648, %v5338_v55  ;;  %v5363_v47 = vand.u32 2147483647, %v5338_v55  ;;  %vm5359_vm3 = vweird.f32 %v5338_v55 }
 0x6dd   :  { %5100 = vst [vmem:[#allocation2 + $0x8] sm:$0xff] %v5083_v27  ;;  %v5370_v19 = vadd.f32 %v5369_v38, %v5154_v43 }
 0x6de   :  { %v5366_v28 = vor.u32 1.1754944e-38, %v5365_v60  ;;  %vm5364_vm5 = vcmp.eq.f32.partialorder %v5363_v47, 8.507059e+37 }
 0x6df   :  { %9965 = vtanh.f32 %v5370_v19 }
 0x6e2   :  { %v9964_v41 = vpop.eup %9963  ;;  %v5085_v9 = vpop.f32.mrf.mxu3 }
 0x6e3   :  { %v5355_v3 = vmul.f32 %v9964_v41, %v5338_v55  ;;  %v5086_v12 = vadd.f32 %v5085_v9, %v5062_v22  ;;  %vm5360_vm2 = vweird.f32 %v9964_v41  ;;  %v5377_v9 = vld [vmem:[#allocation2] sm:$0xc] }
 0x6e4   :  { %vm5361_vm4 = vmor %vm5359_vm3, %vm5360_vm2 }
 0x6e5   :  { %v5356_v1 = vsub.f32 1.0, %v5355_v3  ;;  %5103 = vst [vmem:[#allocation2 + $0x88] sm:$0xff] %v5086_v12  ;;  %v9966_v0 = vpop.eup %9965 }
 0x6e7   :  { %v5357_v24 = vmul.f32 %v9964_v41, %v5356_v1 }
 0x6e9   :  { %v5358_v39 = vadd.f32 %v9964_v41, %v5357_v24 }
 0x6ea   :  { %v5087_v26 = vpop.f32.mrf.mxu3 }
 0x6eb   :  { %v5362_v58 = vsel %vm5361_vm4, %v9964_v41, %v5358_v39  ;;  %v5088_v10 = vadd.f32 %v5087_v26, %v5064_v7 }
 0x6ec   :  { %v5367_v54 = vsel %vm5364_vm5, %v5366_v28, %v5362_v58 }
 0x6ed   :  { %v5372_v63 = vsub.f32 1.0, %v5367_v54  ;;  %5106 = vst [vmem:[#allocation2 + $0x28] sm:$0xff] %v5088_v10  ;;  %v5374_v32 = vmul.f32 0.0, %v5367_v54 }
 0x6ef   :  { %v5373_v34 = vmul.f32 %v9966_v0, %v5372_v63 }
 0x6f1   :  { %v14404_v44 = vadd.f32 %v5374_v32, %v5373_v34 }
 0x6f2   :  { %v5090_v20 = vpop.f32.mrf.mxu3 }
 0x6f3   :  { %5376 = vst [vmem:[#allocation3 + $0x8] sm:$0x3] %v14404_v44  ;;  %v5091_v55 = vadd.f32 %v5090_v20, %v5067_v52  ;;  %v5380_v17 = vpack.c.bf16 %v14404_v44, %v14404_v44 }
 0x6f5   :  { %5109 = vst [vmem:[#allocation2 + $0x30] sm:$0xff] %v5091_v55  ;;  %5389 = vmatmul.bf16.vlgmr.msra.gmra.mxu3 %v5380_v17  ;;  %5402 = vmatmul.bf16.vlgmr.msra.gmra.mxu0 %v5380_v17 }
 0x6f6   :  { %5415 = vmatmul.bf16.vlgmr.msrb.gmra.mxu1 %v5380_v17  ;;  %5619 = vmatpush.bf16.msra.mxu3 %v14125_v21 }
 0x6f7   :  { %5699 = vmatpush.bf16.msra.mxu0 %v13923_v40  ;;  %5712 = vmatpush.bf16.msrb.mxu1 %v14047_v31 }
 0x6fa   :  { %v5092_v33 = vpop.f32.mrf.mxu3  ;;  %5620 = vmatpush.bf16.msra.mxu3 %v14163_v23 }
 0x6fb   :  { %5700 = vmatpush.bf16.msra.mxu0 %v13956_v8  ;;  %5713 = vmatpush.bf16.msrb.mxu1 %v14068_v14 }
 0x6fe   :  { %5621 = vmatpush.bf16.msra.mxu3 %v14176_v42 }
 0x6ff   :  { %5701 = vmatpush.bf16.msra.mxu0 %v13978_v6  ;;  %5714 = vmatpush.bf16.msrb.mxu1 %v14114_v37 }
 0x702   :  { %5622 = vmatpush.bf16.msra.mxu3 %v14197_v50 }
 0x703   :  { %5702 = vmatpush.bf16.msra.mxu0 %v14011_v2  ;;  %5715 = vmatpush.bf16.msrb.mxu1 %v14138_v4 }
 0x706   :  { %5623 = vmatpush.bf16.msra.mxu3 %v14230_v5 }
 0x707   :  { %5703 = vmatpush.bf16.msra.mxu0 %v14038_v45  ;;  %5716 = vmatpush.bf16.msrb.mxu1 %v14165_v61 }
 0x70a   :  { %5624 = vmatpush.bf16.msra.mxu3 %v14256_v29 }
 0x70b   :  { %5704 = vmatpush.bf16.msra.mxu0 %v14059_v11  ;;  %5717 = vmatpush.bf16.msrb.mxu1 %v14203_v15 }
 0x70e   :  { %5625 = vmatpush.bf16.msra.mxu3 %v14274_v46 }
 0x70f   :  { %5705 = vmatpush.bf16.msra.mxu0 %v14078_v25  ;;  %5718 = vmatpush.bf16.msrb.mxu1 %v14232_v57 }
 0x712   :  { %5626 = vmatpush.bf16.msra.mxu3 %v14295_v56 }
 0x713   :  { %5706 = vmatpush.bf16.msra.mxu0 %v14103_v51  ;;  %5719 = vmatpush.bf16.msrb.mxu1 %v14270_v13 }
 0x772   :  { %v5403_v62 = vpop.f32.mrf.mxu0 }
 0x773   :  { %v5404_v27 = vadd.f32 %v5403_v62, %v14386_v35  ;;  %v5416_v59 = vpop.f32.mrf.mxu1 }
 0x774   :  { %v5417_v63 = vadd.f32 %v5416_v59, %v14395_v36 }
 0x775   :  { %v5423_v16 = vrot.slane %v5404_v27, 6 }
 0x776   :  { %v5467_v55 = vrot.slane %v5417_v63, 6 }
 0x777   :  { %v5427_v30 = vadd.f32 %v5423_v16, %v5378_v48 }
 0x778   :  { %v5390_v49 = vpop.f32.mrf.mxu3 }
 0x779   :  { %v9319_v22 = vmul.f32 -1.442695, %v5427_v30  ;;  %v5391_v43 = vadd.f32 %v5390_v49, %v14376_v53  ;;  %v5379_v30 = vld [vmem:[#allocation2 + $0x78] sm:$0xc] }
 0x77a   :  { %v5405_v18 = vpop.f32.mrf.mxu0 }
 0x77b   :  { %9967 = vpow2.f32 %v9319_v22  ;;  %v5422_v41 = vrot.slane %v5391_v43, 6  ;;  %v5418_v38 = vpop.f32.mrf.mxu1  ;;  %v5475_v18 = vrot.slane %v14404_v44, 6 }
 0x77d   :  { %v5426_v3 = vadd.f32 %v5422_v41, %v5377_v9 }
 0x77f   :  { %v9318_v12 = vmul.f32 -1.442695, %v5426_v3 }
 0x780   :  { %v5392_v19 = vpop.f32.mrf.mxu3 }
 0x781   :  { %v9968_v1 = vpop.eup %9967  ;;  %9969 = vpow2.f32 %v9318_v12 }
 0x782   :  { %v5435_v60 = vadd.f32 1.0, %v9968_v1 }
 0x784   :  { %9971 = vrcp.f32 %v5435_v60  ;;  %v5462_v27 = vand.u32 2147483648, %v5435_v60  ;;  %vm5456_vm11 = vweird.f32 %v5435_v60  ;;  %v5460_v48 = vand.u32 2147483647, %v5435_v60 }
 0x786   :  { %v5463_v22 = vor.u32 1.1754944e-38, %v5462_v27  ;;  %vm5461_vm13 = vcmp.eq.f32.partialorder %v5460_v48, 8.507059e+37 }
 0x787   :  { %v9970_v24 = vpop.eup %9969 }
 0x788   :  { %v5434_v47 = vadd.f32 1.0, %v9970_v24 }
 0x78a   :  { %9973 = vrcp.f32 %v5434_v47  ;;  %v9972_v7 = vpop.eup %9971  ;;  %v5447_v54 = vand.u32 2147483648, %v5434_v47  ;;  %v5445_v34 = vand.u32 2147483647, %v5434_v47  ;;  %vm5441_vm7 = vweird.f32 %v5434_v47 }
 0x78b   :  { %v5452_v39 = vmul.f32 %v9972_v7, %v5435_v60  ;;  %vm5457_vm10 = vweird.f32 %v9972_v7 }
 0x78c   :  { %v5448_v20 = vor.u32 1.1754944e-38, %v5447_v54  ;;  %vm5446_vm9 = vcmp.eq.f32.partialorder %v5445_v34, 8.507059e+37  ;;  %vm5458_vm12 = vmor %vm5456_vm11, %vm5457_vm10 }
 0x78d   :  { %v5453_v58 = vsub.f32 1.0, %v5452_v39 }
 0x78f   :  { %v5454_v32 = vmul.f32 %v9972_v7, %v5453_v58  ;;  %v5480_v58 = vld [vmem:[#allocation2] sm:$0x30] }
 0x790   :  { %v9974_v28 = vpop.eup %9973 }
 0x791   :  { %v5437_v26 = vmul.f32 %v9974_v28, %v5434_v47  ;;  %vm5442_vm6 = vweird.f32 %v9974_v28  ;;  %v5455_v33 = vadd.f32 %v9972_v7, %v5454_v32 }
 0x792   :  { %vm5443_vm8 = vmor %vm5441_vm7, %vm5442_vm6 }
 0x793   :  { %v5438_v10 = vsub.f32 1.0, %v5437_v26  ;;  %v5459_v49 = vsel %vm5458_vm12, %v9972_v7, %v5455_v33 }
 0x794   :  { %v5464_v43 = vsel %vm5461_vm13, %v5463_v22, %v5459_v49 }
 0x795   :  { %v5439_v0 = vmul.f32 %v9974_v28, %v5438_v10  ;;  %v5472_v41 = vsub.f32 1.0, %v5464_v43  ;;  %v5477_v3 = vmul.f32 %v5475_v18, %v5464_v43  ;;  %v5481_v10 = vld [vmem:[#allocation2 + $0x38] sm:$0x30] }
 0x797   :  { %v5440_v52 = vadd.f32 %v9974_v28, %v5439_v0 }
 0x799   :  { %v5444_v17 = vsel %vm5443_vm8, %v9974_v28, %v5440_v52 }
 0x79a   :  { %v5449_v62 = vsel %vm5446_vm9, %v5448_v20, %v5444_v17 }
 0x79b   :  { %v5469_v16 = vmul.f32 %v5467_v55, %v5449_v62 }
 0x79d   :  { %v5470_v59 = vadd.f32 %v5469_v16, %v5379_v30 }
 0x79f   :  { %9975 = vtanh.f32 %v5470_v59 }
 0x7a5   :  { %v9976_v38 = vpop.eup %9975 }
 0x7a6   :  { %v5473_v9 = vmul.f32 %v9976_v38, %v5472_v41 }
 0x7a8   :  { %v14437_v12 = vadd.f32 %v5477_v3, %v5473_v9 }
 0x7aa   :  { %5479 = vst [vmem:[#allocation3 + $0x8] sm:$0xc] %v14437_v12  ;;  %v5483_v19 = vpack.c.bf16 %v14437_v12, %v14437_v12 }
 0x7ac   :  { %v5485_v1 = vrot.slane %v5483_v19, 1 }
 0x7ae   :  { %5495 = vmatmul.bf16.vlgmr.msrb.gmra.mxu2 %v5485_v1  ;;  %5508 = vmatmul.bf16.vlgmr.msrb.gmra.mxu3 %v5485_v1 }
 0x7af   :  { %5521 = vmatmul.bf16.vlgmr.msrb.gmra.mxu0 %v5485_v1  ;;  %5725 = vmatpush.bf16.msrb.mxu2 %v14125_v21 }
 0x7b0   :  { %5793 = vmatpush.bf16.msrb.mxu3 %v13923_v40  ;;  %5806 = vmatpush.bf16.msrb.mxu0 %v14047_v31 }
 0x7b3   :  { %5726 = vmatpush.bf16.msrb.mxu2 %v14163_v23 }
 0x7b4   :  { %5794 = vmatpush.bf16.msrb.mxu3 %v13956_v8  ;;  %5807 = vmatpush.bf16.msrb.mxu0 %v14068_v14 }
 0x7b7   :  { %5727 = vmatpush.bf16.msrb.mxu2 %v14176_v42 }
 0x7b8   :  { %5795 = vmatpush.bf16.msrb.mxu3 %v13978_v6  ;;  %5808 = vmatpush.bf16.msrb.mxu0 %v14114_v37 }
 0x7bb   :  { %5728 = vmatpush.bf16.msrb.mxu2 %v14197_v50 }
 0x7bc   :  { %5796 = vmatpush.bf16.msrb.mxu3 %v14011_v2  ;;  %5809 = vmatpush.bf16.msrb.mxu0 %v14138_v4 }
 0x7bf   :  { %5729 = vmatpush.bf16.msrb.mxu2 %v14230_v5 }
 0x7c0   :  { %5797 = vmatpush.bf16.msrb.mxu3 %v14038_v45  ;;  %5810 = vmatpush.bf16.msrb.mxu0 %v14165_v61 }
 0x7c3   :  { %5730 = vmatpush.bf16.msrb.mxu2 %v14256_v29 }
 0x7c4   :  { %5798 = vmatpush.bf16.msrb.mxu3 %v14059_v11  ;;  %5811 = vmatpush.bf16.msrb.mxu0 %v14203_v15 }
 0x7c7   :  { %5731 = vmatpush.bf16.msrb.mxu2 %v14274_v46 }
 0x7c8   :  { %5799 = vmatpush.bf16.msrb.mxu3 %v14078_v25  ;;  %5812 = vmatpush.bf16.msrb.mxu0 %v14232_v57 }
 0x7cb   :  { %5732 = vmatpush.bf16.msrb.mxu2 %v14295_v56 }
 0x7cc   :  { %5800 = vmatpush.bf16.msrb.mxu3 %v14103_v51  ;;  %5813 = vmatpush.bf16.msrb.mxu0 %v14270_v13 }
 0x82c   :  { %v5522_v44 = vpop.f32.mrf.mxu0 }
 0x82d   :  { %v5523_v22 = vadd.f32 %v5522_v44, %v14395_v36 }
 0x82f   :  { %v5573_v3 = vrot.slane %v5523_v22, 4  ;;  %v5587_v22 = vld [vmem:[#allocation2 + $0x38] sm:$0xc0] }
 0x831   :  { %v5496_v60 = vpop.f32.mrf.mxu2  ;;  %v5509_v24 = vpop.f32.mrf.mxu3 }
 0x832   :  { %v5497_v47 = vadd.f32 %v5496_v60, %v14376_v53  ;;  %v5510_v7 = vadd.f32 %v5509_v24, %v14386_v35 }
 0x834   :  { %v5528_v39 = vrot.slane %v5497_v47, 4  ;;  %v5529_v28 = vrot.slane %v5510_v7, 4  ;;  %v5524_v26 = vpop.f32.mrf.mxu0  ;;  %v5482_v7 = vld [vmem:[#allocation2 + $0x78] sm:$0x30] }
 0x836   :  { %v5532_v54 = vadd.f32 %v5528_v39, %v5480_v58  ;;  %v5533_v63 = vadd.f32 %v5529_v28, %v5481_v10 }
 0x838   :  { %v9320_v0 = vmul.f32 -1.442695, %v5532_v54  ;;  %v9321_v34 = vmul.f32 -1.442695, %v5533_v63  ;;  %v5581_v54 = vrot.slane %v14437_v12, 6 }
 0x839   :  { %v5498_v32 = vpop.f32.mrf.mxu2  ;;  %v5511_v52 = vpop.f32.mrf.mxu3 }
 0x83a   :  { %9977 = vpow2.f32 %v9320_v0 }
 0x83b   :  { %9979 = vpow2.f32 %v9321_v34 }
 0x840   :  { %v9978_v20 = vpop.eup %9977 }
 0x841   :  { %v9980_v55 = vpop.eup %9979  ;;  %v5540_v17 = vadd.f32 1.0, %v9978_v20 }
 0x842   :  { %v5541_v33 = vadd.f32 1.0, %v9980_v55 }
 0x843   :  { %9981 = vrcp.f32 %v5540_v17  ;;  %v5553_v59 = vand.u32 2147483648, %v5540_v17  ;;  %v5551_v18 = vand.u32 2147483647, %v5540_v17  ;;  %vm5547_vm15 = vweird.f32 %v5540_v17 }
 0x844   :  { %9983 = vrcp.f32 %v5541_v33  ;;  %v5568_v47 = vand.u32 2147483648, %v5541_v33  ;;  %vm5562_vm3 = vweird.f32 %v5541_v33  ;;  %v5566_v39 = vand.u32 2147483647, %v5541_v33 }
 0x845   :  { %v5554_v9 = vor.u32 1.1754944e-38, %v5553_v59  ;;  %vm5552_vm1 = vcmp.eq.f32.partialorder %v5551_v18, 8.507059e+37 }
 0x846   :  { %v5569_v26 = vor.u32 1.1754944e-38, %v5568_v47  ;;  %vm5567_vm5 = vcmp.eq.f32.partialorder %v5566_v39, 8.507059e+37 }
 0x849   :  { %v9982_v62 = vpop.eup %9981 }
 0x84a   :  { %v9984_v27 = vpop.eup %9983  ;;  %v5543_v16 = vmul.f32 %v9982_v62, %v5540_v17  ;;  %vm5548_vm14 = vweird.f32 %v9982_v62 }
 0x84b   :  { %v5558_v48 = vmul.f32 %v9984_v27, %v5541_v33  ;;  %vm5549_vm0 = vmor %vm5547_vm15, %vm5548_vm14  ;;  %vm5563_vm2 = vweird.f32 %v9984_v27  ;;  %v5586_v33 = vld [vmem:[#allocation2] sm:$0xc0] }
 0x84c   :  { %v5544_v30 = vsub.f32 1.0, %v5543_v16  ;;  %vm5564_vm4 = vmor %vm5562_vm3, %vm5563_vm2 }
 0x84d   :  { %v5559_v49 = vsub.f32 1.0, %v5558_v48 }
 0x84e   :  { %v5545_v43 = vmul.f32 %v9982_v62, %v5544_v30 }
 0x84f   :  { %v5560_v41 = vmul.f32 %v9984_v27, %v5559_v49 }
 0x850   :  { %v5546_v38 = vadd.f32 %v9982_v62, %v5545_v43 }
 0x851   :  { %v5561_v60 = vadd.f32 %v9984_v27, %v5560_v41 }
 0x852   :  { %v5550_v19 = vsel %vm5549_vm0, %v9982_v62, %v5546_v38 }
 0x853   :  { %v5555_v1 = vsel %vm5552_vm1, %v5554_v9, %v5550_v19  ;;  %v5565_v28 = vsel %vm5564_vm4, %v9984_v27, %v5561_v60 }
 0x854   :  { %v5575_v24 = vmul.f32 %v5573_v3, %v5555_v1  ;;  %v5570_v58 = vsel %vm5567_vm5, %v5569_v26, %v5565_v28 }
 0x855   :  { %v5578_v10 = vsub.f32 1.0, %v5570_v58  ;;  %v5583_v34 = vmul.f32 %v5581_v54, %v5570_v58 }
 0x856   :  { %v5576_v44 = vadd.f32 %v5575_v24, %v5482_v7 }
 0x858   :  { %9985 = vtanh.f32 %v5576_v44 }
 0x85e   :  { %v9986_v63 = vpop.eup %9985 }
 0x85f   :  { %v5579_v0 = vmul.f32 %v9986_v63, %v5578_v10 }
 0x861   :  { %v14470_v32 = vadd.f32 %v5583_v34, %v5579_v0 }
 0x863   :  { %5585 = vst [vmem:[#allocation3 + $0x8] sm:$0x30] %v14470_v32  ;;  %v5589_v52 = vpack.c.bf16 %v14470_v32, %v14470_v32 }
 0x865   :  { %v5591_v20 = vrot.slane %v5589_v52, 2 }
 0x867   :  { %5601 = vmatmul.bf16.vlgmr.msra.gmra.mxu1 %v5591_v20  ;;  %5614 = vmatmul.bf16.vlgmr.msra.gmra.mxu2 %v5591_v20 }
 0x868   :  { %5627 = vmatmul.bf16.vlgmr.msra.gmra.mxu3 %v5591_v20  ;;  %5819 = vmatpush.bf16.msra.mxu1 %v14125_v21 }
 0x869   :  { %5899 = vmatpush.bf16.msra.mxu2 %v13923_v40  ;;  %5912 = vmatpush.bf16.msra.mxu3 %v14047_v31 }
 0x86c   :  { %5820 = vmatpush.bf16.msra.mxu1 %v14163_v23 }
 0x86d   :  { %5900 = vmatpush.bf16.msra.mxu2 %v13956_v8  ;;  %5913 = vmatpush.bf16.msra.mxu3 %v14068_v14 }
 0x870   :  { %5821 = vmatpush.bf16.msra.mxu1 %v14176_v42 }
 0x871   :  { %5901 = vmatpush.bf16.msra.mxu2 %v13978_v6  ;;  %5914 = vmatpush.bf16.msra.mxu3 %v14114_v37 }
 0x874   :  { %5822 = vmatpush.bf16.msra.mxu1 %v14197_v50 }
 0x875   :  { %5902 = vmatpush.bf16.msra.mxu2 %v14011_v2  ;;  %5915 = vmatpush.bf16.msra.mxu3 %v14138_v4 }
 0x878   :  { %5823 = vmatpush.bf16.msra.mxu1 %v14230_v5 }
 0x879   :  { %5903 = vmatpush.bf16.msra.mxu2 %v14038_v45  ;;  %5916 = vmatpush.bf16.msra.mxu3 %v14165_v61 }
 0x87c   :  { %5824 = vmatpush.bf16.msra.mxu1 %v14256_v29 }
 0x87d   :  { %5904 = vmatpush.bf16.msra.mxu2 %v14059_v11  ;;  %5917 = vmatpush.bf16.msra.mxu3 %v14203_v15 }
 0x880   :  { %5825 = vmatpush.bf16.msra.mxu1 %v14274_v46 }
 0x881   :  { %5905 = vmatpush.bf16.msra.mxu2 %v14078_v25  ;;  %5918 = vmatpush.bf16.msra.mxu3 %v14232_v57 }
 0x884   :  { %5826 = vmatpush.bf16.msra.mxu1 %v14295_v56 }
 0x885   :  { %5906 = vmatpush.bf16.msra.mxu2 %v14103_v51  ;;  %5919 = vmatpush.bf16.msra.mxu3 %v14270_v13 }
 0x8e4   :  { %v5602_v12 = vpop.f32.mrf.mxu1 }
 0x8e5   :  { %v5603_v55 = vadd.f32 %v5602_v12, %v14376_v53 }
 0x8e7   :  { %v5634_v17 = vrot.slane %v5603_v55, 2 }
 0x8e9   :  { %v5638_v62 = vadd.f32 %v5634_v17, %v5586_v33  ;;  %v5588_v17 = vld [vmem:[#allocation2 + $0x78] sm:$0xc0] }
 0x8ea   :  { %v5615_v27 = vpop.f32.mrf.mxu2 }
 0x8eb   :  { %v9322_v16 = vmul.f32 -1.442695, %v5638_v62  ;;  %v5616_v48 = vadd.f32 %v5615_v27, %v14386_v35  ;;  %v5628_v30 = vpop.f32.mrf.mxu3 }
 0x8ec   :  { %v5604_v59 = vpop.f32.mrf.mxu1  ;;  %v5629_v39 = vadd.f32 %v5628_v30, %v14395_v36 }
 0x8ed   :  { %9987 = vpow2.f32 %v9322_v16  ;;  %v5635_v49 = vrot.slane %v5616_v48, 2 }
 0x8ee   :  { %v5679_v34 = vrot.slane %v5629_v39, 2 }
 0x8ef   :  { %v5639_v43 = vadd.f32 %v5635_v49, %v5587_v22  ;;  %v5687_v49 = vrot.slane %v14470_v32, 6 }
 0x8f1   :  { %v9323_v18 = vmul.f32 -1.442695, %v5639_v43 }
 0x8f2   :  { %v5617_v41 = vpop.f32.mrf.mxu2 }
 0x8f3   :  { %v9988_v38 = vpop.eup %9987  ;;  %9989 = vpow2.f32 %v9323_v18  ;;  %v5630_v9 = vpop.f32.mrf.mxu3 }
 0x8f4   :  { %v5646_v3 = vadd.f32 1.0, %v9988_v38 }
 0x8f6   :  { %9991 = vrcp.f32 %v5646_v3  ;;  %v5659_v7 = vand.u32 2147483648, %v5646_v3  ;;  %v5657_v28 = vand.u32 2147483647, %v5646_v3  ;;  %vm5653_vm7 = vweird.f32 %v5646_v3 }
 0x8f8   :  { %v5660_v54 = vor.u32 1.1754944e-38, %v5659_v7  ;;  %vm5658_vm9 = vcmp.eq.f32.partialorder %v5657_v28, 8.507059e+37 }
 0x8f9   :  { %v9990_v19 = vpop.eup %9989 }
 0x8fa   :  { %v5647_v1 = vadd.f32 1.0, %v9990_v19 }
 0x8fc   :  { %v9992_v60 = vpop.eup %9991  ;;  %9993 = vrcp.f32 %v5647_v1  ;;  %v5674_v12 = vand.u32 2147483648, %v5647_v1  ;;  %v5672_v33 = vand.u32 2147483647, %v5647_v1  ;;  %vm5668_vm11 = vweird.f32 %v5647_v1 }
 0x8fd   :  { %v5649_v24 = vmul.f32 %v9992_v60, %v5646_v3  ;;  %vm5654_vm6 = vweird.f32 %v9992_v60 }
 0x8fe   :  { %vm5655_vm8 = vmor %vm5653_vm7, %vm5654_vm6  ;;  %v5675_v16 = vor.u32 1.1754944e-38, %v5674_v12  ;;  %vm5673_vm13 = vcmp.eq.f32.partialorder %v5672_v33, 8.507059e+37 }
 0x8ff   :  { %v5650_v47 = vsub.f32 1.0, %v5649_v24  ;;  %v5693_v24 = vld [vmem:[#allocation2 + $0x20] sm:$0x3] }
 0x901   :  { %v5651_v44 = vmul.f32 %v9992_v60, %v5650_v47 }
 0x902   :  { %v9994_v26 = vpop.eup %9993 }
 0x903   :  { %v5664_v58 = vmul.f32 %v9994_v26, %v5647_v1  ;;  %v5652_v10 = vadd.f32 %v9992_v60, %v5651_v44  ;;  %vm5669_vm10 = vweird.f32 %v9994_v26 }
 0x904   :  { %vm5670_vm12 = vmor %vm5668_vm11, %vm5669_vm10 }
 0x905   :  { %v5665_v63 = vsub.f32 1.0, %v5664_v58  ;;  %v5656_v0 = vsel %vm5655_vm8, %v9992_v60, %v5652_v10  ;;  %v5692_v60 = vld [vmem:[#allocation2 + $0x58] sm:$0x3] }
 0x906   :  { %v5661_v52 = vsel %vm5658_vm9, %v5660_v54, %v5656_v0 }
 0x907   :  { %v5666_v20 = vmul.f32 %v9994_v26, %v5665_v63  ;;  %v5681_v55 = vmul.f32 %v5679_v34, %v5661_v52 }
 0x909   :  { %v5667_v62 = vadd.f32 %v9994_v26, %v5666_v20  ;;  %v5682_v27 = vadd.f32 %v5681_v55, %v5588_v17 }
 0x90b   :  { %v5671_v48 = vsel %vm5670_vm12, %v9994_v26, %v5667_v62  ;;  %9995 = vtanh.f32 %v5682_v27 }
 0x90c   :  { %v5676_v30 = vsel %vm5673_vm13, %v5675_v16, %v5671_v48 }
 0x90d   :  { %v5684_v59 = vsub.f32 1.0, %v5676_v30  ;;  %v5689_v18 = vmul.f32 %v5687_v49, %v5676_v30 }
 0x911   :  { %v9996_v22 = vpop.eup %9995 }
 0x912   :  { %v5685_v43 = vmul.f32 %v9996_v22, %v5684_v59 }
 0x914   :  { %v14503_v41 = vadd.f32 %v5689_v18, %v5685_v43 }
 0x916   :  { %5691 = vst [vmem:[#allocation3 + $0x8] sm:$0xc0] %v14503_v41  ;;  %v5695_v38 = vpack.c.bf16 %v14503_v41, %v14503_v41 }
 0x918   :  { %v5697_v9 = vrot.slane %v5695_v38, 3 }
 0x91a   :  { %5707 = vmatmul.bf16.vlgmr.msra.gmra.mxu0 %v5697_v9  ;;  %5720 = vmatmul.bf16.vlgmr.msrb.gmra.mxu1 %v5697_v9 }
 0x91b   :  { %5733 = vmatmul.bf16.vlgmr.msrb.gmra.mxu2 %v5697_v9  ;;  %5925 = vmatpush.bf16.msra.mxu0 %v14125_v21 }
 0x91c   :  { %6005 = vmatpush.bf16.msrb.mxu1 %v13923_v40  ;;  %6018 = vmatpush.bf16.msrb.mxu2 %v14047_v31 }
 0x91f   :  { %5926 = vmatpush.bf16.msra.mxu0 %v14163_v23 }
 0x920   :  { %6006 = vmatpush.bf16.msrb.mxu1 %v13956_v8  ;;  %6019 = vmatpush.bf16.msrb.mxu2 %v14068_v14 }
 0x923   :  { %5927 = vmatpush.bf16.msra.mxu0 %v14176_v42 }
 0x924   :  { %6007 = vmatpush.bf16.msrb.mxu1 %v13978_v6  ;;  %6020 = vmatpush.bf16.msrb.mxu2 %v14114_v37 }
 0x927   :  { %5928 = vmatpush.bf16.msra.mxu0 %v14197_v50 }
 0x928   :  { %6008 = vmatpush.bf16.msrb.mxu1 %v14011_v2  ;;  %6021 = vmatpush.bf16.msrb.mxu2 %v14138_v4 }
 0x92b   :  { %5929 = vmatpush.bf16.msra.mxu0 %v14230_v5 }
 0x92c   :  { %6009 = vmatpush.bf16.msrb.mxu1 %v14038_v45  ;;  %6022 = vmatpush.bf16.msrb.mxu2 %v14165_v61 }
 0x92f   :  { %5930 = vmatpush.bf16.msra.mxu0 %v14256_v29 }
 0x930   :  { %6010 = vmatpush.bf16.msrb.mxu1 %v14059_v11  ;;  %6023 = vmatpush.bf16.msrb.mxu2 %v14203_v15 }
 0x933   :  { %5931 = vmatpush.bf16.msra.mxu0 %v14274_v46 }
 0x934   :  { %6011 = vmatpush.bf16.msrb.mxu1 %v14078_v25  ;;  %6024 = vmatpush.bf16.msrb.mxu2 %v14232_v57 }
 0x937   :  { %5932 = vmatpush.bf16.msra.mxu0 %v14295_v56 }
 0x938   :  { %6012 = vmatpush.bf16.msrb.mxu1 %v14103_v51  ;;  %6025 = vmatpush.bf16.msrb.mxu2 %v14270_v13 }
 0x997   :  { %v5708_v32 = vpop.f32.mrf.mxu0  ;;  %v5721_v3 = vpop.f32.mrf.mxu1 }
 0x998   :  { %v5709_v19 = vadd.f32 %v5708_v32, %v14376_v53  ;;  %v5722_v1 = vadd.f32 %v5721_v3, %v14386_v35  ;;  %v5694_v32 = vld [vmem:[#allocation2 + $0x8] sm:$0x3] }
 0x99a   :  { %v5738_v47 = vadd.f32 %v5709_v19, %v5692_v60  ;;  %v5739_v7 = vadd.f32 %v5722_v1, %v5693_v24 }
 0x99c   :  { %v9324_v39 = vmul.f32 -1.442695, %v5738_v47  ;;  %v9325_v44 = vmul.f32 -1.442695, %v5739_v7  ;;  %v5784_v7 = vrot.slane %v14503_v41, 6 }
 0x99e   :  { %9997 = vpow2.f32 %v9324_v39  ;;  %v5734_v28 = vpop.f32.mrf.mxu2 }
 0x99f   :  { %9999 = vpow2.f32 %v9325_v44  ;;  %v5710_v26 = vpop.f32.mrf.mxu0  ;;  %v5723_v58 = vpop.f32.mrf.mxu1  ;;  %v5735_v49 = vadd.f32 %v5734_v28, %v14395_v36 }
 0x9a4   :  { %v9998_v10 = vpop.eup %9997 }
 0x9a5   :  { %v10000_v54 = vpop.eup %9999  ;;  %v5746_v63 = vadd.f32 1.0, %v9998_v10 }
 0x9a6   :  { %v5747_v0 = vadd.f32 1.0, %v10000_v54  ;;  %v5736_v34 = vpop.f32.mrf.mxu2 }
 0x9a7   :  { %10001 = vrcp.f32 %v5746_v63  ;;  %v5759_v62 = vand.u32 2147483648, %v5746_v63  ;;  %v5757_v16 = vand.u32 2147483647, %v5746_v63  ;;  %vm5753_vm15 = vweird.f32 %v5746_v63 }
 0x9a8   :  { %10003 = vrcp.f32 %v5747_v0  ;;  %v5774_v38 = vand.u32 2147483648, %v5747_v0  ;;  %vm5768_vm3 = vweird.f32 %v5747_v0  ;;  %v5772_v3 = vand.u32 2147483647, %v5747_v0 }
 0x9a9   :  { %v5760_v59 = vor.u32 1.1754944e-38, %v5759_v62  ;;  %vm5758_vm1 = vcmp.eq.f32.partialorder %v5757_v16, 8.507059e+37  ;;  %v5789_v62 = vld [vmem:[#allocation2 + $0x58] sm:$0xc] }
 0x9aa   :  { %v5775_v60 = vor.u32 1.1754944e-38, %v5774_v38  ;;  %vm5773_vm5 = vcmp.eq.f32.partialorder %v5772_v3, 8.507059e+37 }
 0x9ad   :  { %v10002_v52 = vpop.eup %10001 }
 0x9ae   :  { %v10004_v20 = vpop.eup %10003  ;;  %v5749_v12 = vmul.f32 %v10002_v52, %v5746_v63  ;;  %vm5754_vm14 = vweird.f32 %v10002_v52 }
 0x9af   :  { %v5764_v55 = vmul.f32 %v10004_v20, %v5747_v0  ;;  %vm5755_vm0 = vmor %vm5753_vm15, %vm5754_vm14  ;;  %vm5769_vm2 = vweird.f32 %v10004_v20  ;;  %v5790_v0 = vld [vmem:[#allocation2 + $0x20] sm:$0xc] }
 0x9b0   :  { %v5750_v17 = vsub.f32 1.0, %v5749_v12  ;;  %vm5770_vm4 = vmor %vm5768_vm3, %vm5769_vm2 }
 0x9b1   :  { %v5765_v33 = vsub.f32 1.0, %v5764_v55 }
 0x9b2   :  { %v5751_v27 = vmul.f32 %v10002_v52, %v5750_v17 }
 0x9b3   :  { %v5766_v48 = vmul.f32 %v10004_v20, %v5765_v33 }
 0x9b4   :  { %v5752_v30 = vadd.f32 %v10002_v52, %v5751_v27 }
 0x9b5   :  { %v5767_v18 = vadd.f32 %v10004_v20, %v5766_v48 }
 0x9b6   :  { %v5756_v22 = vsel %vm5755_vm0, %v10002_v52, %v5752_v30 }
 0x9b7   :  { %v5761_v43 = vsel %vm5758_vm1, %v5760_v59, %v5756_v22  ;;  %v5771_v1 = vsel %vm5770_vm4, %v10004_v20, %v5767_v18 }
 0x9b8   :  { %v5778_v9 = vmul.f32 %v5761_v43, %v5735_v49  ;;  %v5776_v24 = vsel %vm5773_vm5, %v5775_v60, %v5771_v1 }
 0x9b9   :  { %v5781_v47 = vsub.f32 1.0, %v5776_v24  ;;  %v5786_v28 = vmul.f32 %v5784_v7, %v5776_v24 }
 0x9ba   :  { %v5779_v19 = vadd.f32 %v5778_v9, %v5694_v32 }
 0x9bc   :  { %10005 = vtanh.f32 %v5779_v19 }
 0x9c2   :  { %v10006_v39 = vpop.eup %10005 }
 0x9c3   :  { %v5782_v44 = vmul.f32 %v10006_v39, %v5781_v47 }
 0x9c5   :  { %v14536_v26 = vadd.f32 %v5786_v28, %v5782_v44 }
 0x9c7   :  { %5788 = vst [vmem:[#allocation3] sm:$0x3] %v14536_v26  ;;  %v5792_v58 = vpack.c.bf16 %v14536_v26, %v14536_v26 }
 0x9c9   :  { %5801 = vmatmul.bf16.vlgmr.msrb.gmra.mxu3 %v5792_v58  ;;  %5814 = vmatmul.bf16.vlgmr.msrb.gmra.mxu0 %v5792_v58 }
 0x9ca   :  { %5827 = vmatmul.bf16.vlgmr.msra.gmra.mxu1 %v5792_v58  ;;  %6031 = vmatpush.bf16.msrb.mxu3 %v14125_v21 }
 0x9cb   :  { %6111 = vmatpush.bf16.msrb.mxu0 %v13923_v40  ;;  %6124 = vmatpush.bf16.msra.mxu1 %v14047_v31 }
 0x9ce   :  { %6032 = vmatpush.bf16.msrb.mxu3 %v14163_v23 }
 0x9cf   :  { %6112 = vmatpush.bf16.msrb.mxu0 %v13956_v8  ;;  %6125 = vmatpush.bf16.msra.mxu1 %v14068_v14 }
 0x9d2   :  { %6033 = vmatpush.bf16.msrb.mxu3 %v14176_v42 }
 0x9d3   :  { %6113 = vmatpush.bf16.msrb.mxu0 %v13978_v6  ;;  %6126 = vmatpush.bf16.msra.mxu1 %v14114_v37 }
 0x9d6   :  { %6034 = vmatpush.bf16.msrb.mxu3 %v14197_v50 }
 0x9d7   :  { %6114 = vmatpush.bf16.msrb.mxu0 %v14011_v2  ;;  %6127 = vmatpush.bf16.msra.mxu1 %v14138_v4 }
 0x9da   :  { %6035 = vmatpush.bf16.msrb.mxu3 %v14230_v5 }
 0x9db   :  { %6115 = vmatpush.bf16.msrb.mxu0 %v14038_v45  ;;  %6128 = vmatpush.bf16.msra.mxu1 %v14165_v61 }
 0x9de   :  { %6036 = vmatpush.bf16.msrb.mxu3 %v14256_v29 }
 0x9df   :  { %6116 = vmatpush.bf16.msrb.mxu0 %v14059_v11  ;;  %6129 = vmatpush.bf16.msra.mxu1 %v14203_v15 }
 0x9e2   :  { %6037 = vmatpush.bf16.msrb.mxu3 %v14274_v46 }
 0x9e3   :  { %6117 = vmatpush.bf16.msrb.mxu0 %v14078_v25  ;;  %6130 = vmatpush.bf16.msra.mxu1 %v14232_v57 }
 0x9e6   :  { %6038 = vmatpush.bf16.msrb.mxu3 %v14295_v56 }
 0x9e7   :  { %6118 = vmatpush.bf16.msrb.mxu0 %v14103_v51  ;;  %6131 = vmatpush.bf16.msra.mxu1 %v14270_v13 }
 0xa46   :  { %v5815_v41 = vpop.f32.mrf.mxu0 }
 0xa47   :  { %v5816_v10 = vadd.f32 %v5815_v41, %v14386_v35  ;;  %v5828_v54 = vpop.f32.mrf.mxu1 }
 0xa48   :  { %v5829_v1 = vadd.f32 %v5828_v54, %v14395_v36 }
 0xa49   :  { %v5835_v63 = vrot.slane %v5816_v10, 6 }
 0xa4a   :  { %v5879_v44 = vrot.slane %v5829_v1, 6 }
 0xa4b   :  { %v5839_v34 = vadd.f32 %v5835_v63, %v5790_v0 }
 0xa4c   :  { %v5802_v52 = vpop.f32.mrf.mxu3 }
 0xa4d   :  { %v9327_v20 = vmul.f32 -1.442695, %v5839_v34  ;;  %v5803_v12 = vadd.f32 %v5802_v52, %v14376_v53  ;;  %v5791_v34 = vld [vmem:[#allocation2 + $0x8] sm:$0xc] }
 0xa4e   :  { %v5817_v55 = vpop.f32.mrf.mxu0 }
 0xa4f   :  { %10007 = vpow2.f32 %v9327_v20  ;;  %v5834_v17 = vrot.slane %v5803_v12, 6  ;;  %v5830_v33 = vpop.f32.mrf.mxu1  ;;  %v5887_v55 = vrot.slane %v14536_v26, 6 }
 0xa51   :  { %v5838_v27 = vadd.f32 %v5834_v17, %v5789_v62 }
 0xa53   :  { %v9326_v16 = vmul.f32 -1.442695, %v5838_v27 }
 0xa54   :  { %v5804_v48 = vpop.f32.mrf.mxu3 }
 0xa55   :  { %v10008_v30 = vpop.eup %10007  ;;  %10009 = vpow2.f32 %v9326_v16 }
 0xa56   :  { %v5847_v59 = vadd.f32 1.0, %v10008_v30 }
 0xa58   :  { %10011 = vrcp.f32 %v5847_v59  ;;  %v5874_v10 = vand.u32 2147483648, %v5847_v59  ;;  %vm5868_vm11 = vweird.f32 %v5847_v59  ;;  %v5872_v0 = vand.u32 2147483647, %v5847_v59 }
 0xa5a   :  { %v5875_v20 = vor.u32 1.1754944e-38, %v5874_v10  ;;  %vm5873_vm13 = vcmp.eq.f32.partialorder %v5872_v0, 8.507059e+37 }
 0xa5b   :  { %v10010_v49 = vpop.eup %10009 }
 0xa5c   :  { %v5846_v22 = vadd.f32 1.0, %v10010_v49 }
 0xa5e   :  { %10013 = vrcp.f32 %v5846_v22  ;;  %v10012_v43 = vpop.eup %10011  ;;  %v5859_v19 = vand.u32 2147483648, %v5846_v22  ;;  %v5857_v24 = vand.u32 2147483647, %v5846_v22  ;;  %vm5853_vm7 = vweird.f32 %v5846_v22 }
 0xa5f   :  { %v5864_v18 = vmul.f32 %v10012_v43, %v5847_v59  ;;  %vm5869_vm10 = vweird.f32 %v10012_v43 }
 0xa60   :  { %v5860_v39 = vor.u32 1.1754944e-38, %v5859_v19  ;;  %vm5858_vm9 = vcmp.eq.f32.partialorder %v5857_v24, 8.507059e+37  ;;  %vm5870_vm12 = vmor %vm5868_vm11, %vm5869_vm10 }
 0xa61   :  { %v5865_v32 = vsub.f32 1.0, %v5864_v18 }
 0xa63   :  { %v5866_v47 = vmul.f32 %v10012_v43, %v5865_v32  ;;  %v5892_v32 = vld [vmem:[#allocation2 + $0x58] sm:$0x30] }
 0xa64   :  { %v10014_v38 = vpop.eup %10013 }
 0xa65   :  { %v5849_v9 = vmul.f32 %v10014_v38, %v5846_v22  ;;  %vm5854_vm6 = vweird.f32 %v10014_v38  ;;  %v5867_v58 = vadd.f32 %v10012_v43, %v5866_v47 }
 0xa66   :  { %vm5855_vm8 = vmor %vm5853_vm7, %vm5854_vm6 }
 0xa67   :  { %v5850_v3 = vsub.f32 1.0, %v5849_v9  ;;  %v5871_v52 = vsel %vm5870_vm12, %v10012_v43, %v5867_v58 }
 0xa68   :  { %v5876_v12 = vsel %vm5873_vm13, %v5875_v20, %v5871_v52 }
 0xa69   :  { %v5851_v60 = vmul.f32 %v10014_v38, %v5850_v3  ;;  %v5884_v17 = vsub.f32 1.0, %v5876_v12  ;;  %v5889_v27 = vmul.f32 %v5887_v55, %v5876_v12  ;;  %v5893_v3 = vld [vmem:[#allocation2 + $0x20] sm:$0x30] }
 0xa6b   :  { %v5852_v7 = vadd.f32 %v10014_v38, %v5851_v60 }
 0xa6d   :  { %v5856_v28 = vsel %vm5855_vm8, %v10014_v38, %v5852_v7 }
 0xa6e   :  { %v5861_v41 = vsel %vm5858_vm9, %v5860_v39, %v5856_v28 }
 0xa6f   :  { %v5881_v63 = vmul.f32 %v5879_v44, %v5861_v41 }
 0xa71   :  { %v5882_v54 = vadd.f32 %v5881_v63, %v5791_v34 }
 0xa73   :  { %10015 = vtanh.f32 %v5882_v54 }
 0xa79   :  { %v10016_v33 = vpop.eup %10015 }
 0xa7a   :  { %v5885_v62 = vmul.f32 %v10016_v33, %v5884_v17 }
 0xa7c   :  { %v14569_v16 = vadd.f32 %v5889_v27, %v5885_v62 }
 0xa7e   :  { %5891 = vst [vmem:[#allocation3] sm:$0xc] %v14569_v16  ;;  %v5895_v48 = vpack.c.bf16 %v14569_v16, %v14569_v16 }
 0xa80   :  { %v5897_v30 = vrot.slane %v5895_v48, 1 }
 0xa82   :  { %5907 = vmatmul.bf16.vlgmr.msra.gmra.mxu2 %v5897_v30  ;;  %5920 = vmatmul.bf16.vlgmr.msra.gmra.mxu3 %v5897_v30 }
 0xa83   :  { %5933 = vmatmul.bf16.vlgmr.msra.gmra.mxu0 %v5897_v30  ;;  %6137 = vmatpush.bf16.msra.mxu2 %v14125_v21 }
 0xa84   :  { %6205 = vmatpush.bf16.msra.mxu3 %v13923_v40  ;;  %6218 = vmatpush.bf16.msra.mxu0 %v14047_v31 }
 0xa87   :  { %6138 = vmatpush.bf16.msra.mxu2 %v14163_v23 }
 0xa88   :  { %6206 = vmatpush.bf16.msra.mxu3 %v13956_v8  ;;  %6219 = vmatpush.bf16.msra.mxu0 %v14068_v14 }
 0xa8b   :  { %6139 = vmatpush.bf16.msra.mxu2 %v14176_v42 }
 0xa8c   :  { %6207 = vmatpush.bf16.msra.mxu3 %v13978_v6  ;;  %6220 = vmatpush.bf16.msra.mxu0 %v14114_v37 }
 0xa8f   :  { %6140 = vmatpush.bf16.msra.mxu2 %v14197_v50 }
 0xa90   :  { %6208 = vmatpush.bf16.msra.mxu3 %v14011_v2  ;;  %6221 = vmatpush.bf16.msra.mxu0 %v14138_v4 }
 0xa93   :  { %6141 = vmatpush.bf16.msra.mxu2 %v14230_v5 }
 0xa94   :  { %6209 = vmatpush.bf16.msra.mxu3 %v14038_v45  ;;  %6222 = vmatpush.bf16.msra.mxu0 %v14165_v61 }
 0xa97   :  { %6142 = vmatpush.bf16.msra.mxu2 %v14256_v29 }
 0xa98   :  { %6210 = vmatpush.bf16.msra.mxu3 %v14059_v11  ;;  %6223 = vmatpush.bf16.msra.mxu0 %v14203_v15 }
 0xa9b   :  { %6143 = vmatpush.bf16.msra.mxu2 %v14274_v46 }
 0xa9c   :  { %6211 = vmatpush.bf16.msra.mxu3 %v14078_v25  ;;  %6224 = vmatpush.bf16.msra.mxu0 %v14232_v57 }
 0xa9f   :  { %6144 = vmatpush.bf16.msra.mxu2 %v14295_v56 }
 0xaa0   :  { %6212 = vmatpush.bf16.msra.mxu3 %v14103_v51  ;;  %6225 = vmatpush.bf16.msra.mxu0 %v14270_v13 }
 0xb00   :  { %v5934_v26 = vpop.f32.mrf.mxu0 }
 0xb01   :  { %v5935_v20 = vadd.f32 %v5934_v26, %v14395_v36 }
 0xb03   :  { %v5985_v27 = vrot.slane %v5935_v20, 4  ;;  %v5999_v20 = vld [vmem:[#allocation2 + $0x20] sm:$0xc0] }
 0xb05   :  { %v5908_v59 = vpop.f32.mrf.mxu2  ;;  %v5921_v49 = vpop.f32.mrf.mxu3 }
 0xb06   :  { %v5909_v22 = vadd.f32 %v5908_v59, %v14376_v53  ;;  %v5922_v43 = vadd.f32 %v5921_v49, %v14386_v35 }
 0xb08   :  { %v5940_v18 = vrot.slane %v5909_v22, 4  ;;  %v5941_v38 = vrot.slane %v5922_v43, 4  ;;  %v5936_v9 = vpop.f32.mrf.mxu0  ;;  %v5894_v43 = vld [vmem:[#allocation2 + $0x8] sm:$0x30] }
 0xb0a   :  { %v5944_v19 = vadd.f32 %v5940_v18, %v5892_v32  ;;  %v5945_v1 = vadd.f32 %v5941_v38, %v5893_v3 }
 0xb0c   :  { %v9328_v60 = vmul.f32 -1.442695, %v5944_v19  ;;  %v9329_v24 = vmul.f32 -1.442695, %v5945_v1  ;;  %v5993_v19 = vrot.slane %v14569_v16, 6 }
 0xb0d   :  { %v5910_v47 = vpop.f32.mrf.mxu2  ;;  %v5923_v7 = vpop.f32.mrf.mxu3 }
 0xb0e   :  { %10017 = vpow2.f32 %v9328_v60 }
 0xb0f   :  { %10019 = vpow2.f32 %v9329_v24 }
 0xb14   :  { %v10018_v39 = vpop.eup %10017 }
 0xb15   :  { %v10020_v44 = vpop.eup %10019  ;;  %v5952_v28 = vadd.f32 1.0, %v10018_v39 }
 0xb16   :  { %v5953_v58 = vadd.f32 1.0, %v10020_v44 }
 0xb17   :  { %10021 = vrcp.f32 %v5952_v28  ;;  %v5965_v54 = vand.u32 2147483648, %v5952_v28  ;;  %v5963_v55 = vand.u32 2147483647, %v5952_v28  ;;  %vm5959_vm15 = vweird.f32 %v5952_v28 }
 0xb18   :  { %10023 = vrcp.f32 %v5953_v58  ;;  %v5980_v22 = vand.u32 2147483648, %v5953_v58  ;;  %vm5974_vm3 = vweird.f32 %v5953_v58  ;;  %v5978_v18 = vand.u32 2147483647, %v5953_v58 }
 0xb19   :  { %v5966_v62 = vor.u32 1.1754944e-38, %v5965_v54  ;;  %vm5964_vm1 = vcmp.eq.f32.partialorder %v5963_v55, 8.507059e+37 }
 0xb1a   :  { %v5981_v9 = vor.u32 1.1754944e-38, %v5980_v22  ;;  %vm5979_vm5 = vcmp.eq.f32.partialorder %v5978_v18, 8.507059e+37 }
 0xb1d   :  { %v10022_v41 = vpop.eup %10021 }
 0xb1e   :  { %v10024_v10 = vpop.eup %10023  ;;  %v5955_v63 = vmul.f32 %v10022_v41, %v5952_v28  ;;  %vm5960_vm14 = vweird.f32 %v10022_v41 }
 0xb1f   :  { %v5970_v0 = vmul.f32 %v10024_v10, %v5953_v58  ;;  %vm5961_vm0 = vmor %vm5959_vm15, %vm5960_vm14  ;;  %vm5975_vm2 = vweird.f32 %v10024_v10  ;;  %v5998_v58 = vld [vmem:[#allocation2 + $0x58] sm:$0xc0] }
 0xb20   :  { %v5956_v34 = vsub.f32 1.0, %v5955_v63  ;;  %vm5976_vm4 = vmor %vm5974_vm3, %vm5975_vm2 }
 0xb21   :  { %v5971_v52 = vsub.f32 1.0, %v5970_v0 }
 0xb22   :  { %v5957_v12 = vmul.f32 %v10022_v41, %v5956_v34 }
 0xb23   :  { %v5972_v17 = vmul.f32 %v10024_v10, %v5971_v52 }
 0xb24   :  { %v5958_v33 = vadd.f32 %v10022_v41, %v5957_v12 }
 0xb25   :  { %v5973_v59 = vadd.f32 %v10024_v10, %v5972_v17 }
 0xb26   :  { %v5962_v48 = vsel %vm5961_vm0, %v10022_v41, %v5958_v33 }
 0xb27   :  { %v5967_v30 = vsel %vm5964_vm1, %v5966_v62, %v5962_v48  ;;  %v5977_v38 = vsel %vm5976_vm4, %v10024_v10, %v5973_v59 }
 0xb28   :  { %v5987_v49 = vmul.f32 %v5985_v27, %v5967_v30  ;;  %v5982_v32 = vsel %vm5979_vm5, %v5981_v9, %v5977_v38 }
 0xb29   :  { %v5990_v3 = vsub.f32 1.0, %v5982_v32  ;;  %v5995_v24 = vmul.f32 %v5993_v19, %v5982_v32 }
 0xb2a   :  { %v5988_v26 = vadd.f32 %v5987_v49, %v5894_v43 }
 0xb2c   :  { %10025 = vtanh.f32 %v5988_v26 }
 0xb32   :  { %v10026_v1 = vpop.eup %10025 }
 0xb33   :  { %v5991_v60 = vmul.f32 %v10026_v1, %v5990_v3 }
 0xb35   :  { %v14602_v47 = vadd.f32 %v5995_v24, %v5991_v60 }
 0xb37   :  { %5997 = vst [vmem:[#allocation3] sm:$0x30] %v14602_v47  ;;  %v6001_v7 = vpack.c.bf16 %v14602_v47, %v14602_v47 }
 0xb39   :  { %v6003_v39 = vrot.slane %v6001_v7, 2 }
 0xb3b   :  { %6013 = vmatmul.bf16.vlgmr.msrb.gmra.mxu1 %v6003_v39  ;;  %6026 = vmatmul.bf16.vlgmr.msrb.gmra.mxu2 %v6003_v39 }
 0xb3c   :  { %6039 = vmatmul.bf16.vlgmr.msrb.gmra.mxu3 %v6003_v39  ;;  %6231 = vmatpush.bf16.msrb.mxu1 %v14125_v21 }
 0xb3d   :  { %6311 = vmatpush.bf16.msrb.mxu2 %v13923_v40  ;;  %6324 = vmatpush.bf16.msrb.mxu3 %v14047_v31 }
 0xb40   :  { %6232 = vmatpush.bf16.msrb.mxu1 %v14163_v23 }
 0xb41   :  { %6312 = vmatpush.bf16.msrb.mxu2 %v13956_v8  ;;  %6325 = vmatpush.bf16.msrb.mxu3 %v14068_v14 }
 0xb44   :  { %6233 = vmatpush.bf16.msrb.mxu1 %v14176_v42 }
 0xb45   :  { %6313 = vmatpush.bf16.msrb.mxu2 %v13978_v6  ;;  %6326 = vmatpush.bf16.msrb.mxu3 %v14114_v37 }
 0xb48   :  { %6234 = vmatpush.bf16.msrb.mxu1 %v14197_v50 }
 0xb49   :  { %6314 = vmatpush.bf16.msrb.mxu2 %v14011_v2  ;;  %6327 = vmatpush.bf16.msrb.mxu3 %v14138_v4 }
 0xb4c   :  { %6235 = vmatpush.bf16.msrb.mxu1 %v14230_v5 }
 0xb4d   :  { %6315 = vmatpush.bf16.msrb.mxu2 %v14038_v45  ;;  %6328 = vmatpush.bf16.msrb.mxu3 %v14165_v61 }
 0xb50   :  { %6236 = vmatpush.bf16.msrb.mxu1 %v14256_v29 }
 0xb51   :  { %6316 = vmatpush.bf16.msrb.mxu2 %v14059_v11  ;;  %6329 = vmatpush.bf16.msrb.mxu3 %v14203_v15 }
 0xb54   :  { %6237 = vmatpush.bf16.msrb.mxu1 %v14274_v46 }
 0xb55   :  { %6317 = vmatpush.bf16.msrb.mxu2 %v14078_v25  ;;  %6330 = vmatpush.bf16.msrb.mxu3 %v14232_v57 }
 0xb58   :  { %6238 = vmatpush.bf16.msrb.mxu1 %v14295_v56 }
 0xb59   :  { %6318 = vmatpush.bf16.msrb.mxu2 %v14103_v51  ;;  %6331 = vmatpush.bf16.msrb.mxu3 %v14270_v13 }
 0xbb8   :  { %v6014_v16 = vpop.f32.mrf.mxu1 }
 0xbb9   :  { %v6015_v44 = vadd.f32 %v6014_v16, %v14376_v53 }
 0xbbb   :  { %v6046_v28 = vrot.slane %v6015_v44, 2 }
 0xbbd   :  { %v6050_v41 = vadd.f32 %v6046_v28, %v5998_v58  ;;  %v6000_v28 = vld [vmem:[#allocation2 + $0x8] sm:$0xc0] }
 0xbbe   :  { %v6027_v10 = vpop.f32.mrf.mxu2 }
 0xbbf   :  { %v9330_v63 = vmul.f32 -1.442695, %v6050_v41  ;;  %v6028_v0 = vadd.f32 %v6027_v10, %v14386_v35  ;;  %v6040_v34 = vpop.f32.mrf.mxu3 }
 0xbc0   :  { %v6016_v54 = vpop.f32.mrf.mxu1  ;;  %v6041_v18 = vadd.f32 %v6040_v34, %v14395_v36 }
 0xbc1   :  { %10027 = vpow2.f32 %v9330_v63  ;;  %v6047_v52 = vrot.slane %v6028_v0, 2 }
 0xbc2   :  { %v6091_v24 = vrot.slane %v6041_v18, 2 }
 0xbc3   :  { %v6051_v12 = vadd.f32 %v6047_v52, %v5999_v20  ;;  %v6099_v52 = vrot.slane %v14602_v47, 6 }
 0xbc5   :  { %v9331_v55 = vmul.f32 -1.442695, %v6051_v12 }
 0xbc6   :  { %v6029_v17 = vpop.f32.mrf.mxu2 }
 0xbc7   :  { %v10028_v33 = vpop.eup %10027  ;;  %10029 = vpow2.f32 %v9331_v55  ;;  %v6042_v62 = vpop.f32.mrf.mxu3 }
 0xbc8   :  { %v6058_v27 = vadd.f32 1.0, %v10028_v33 }
 0xbca   :  { %10031 = vrcp.f32 %v6058_v27  ;;  %v6071_v43 = vand.u32 2147483648, %v6058_v27  ;;  %v6069_v38 = vand.u32 2147483647, %v6058_v27  ;;  %vm6065_vm7 = vweird.f32 %v6058_v27 }
 0xbcc   :  { %v6072_v19 = vor.u32 1.1754944e-38, %v6071_v43  ;;  %vm6070_vm9 = vcmp.eq.f32.partialorder %v6069_v38, 8.507059e+37 }
 0xbcd   :  { %v10030_v48 = vpop.eup %10029 }
 0xbce   :  { %v6059_v30 = vadd.f32 1.0, %v10030_v48 }
 0xbd0   :  { %v10032_v59 = vpop.eup %10031  ;;  %10033 = vrcp.f32 %v6059_v30  ;;  %v6086_v16 = vand.u32 2147483648, %v6059_v30  ;;  %v6084_v58 = vand.u32 2147483647, %v6059_v30  ;;  %vm6080_vm11 = vweird.f32 %v6059_v30 }
 0xbd1   :  { %v6061_v49 = vmul.f32 %v10032_v59, %v6058_v27  ;;  %vm6066_vm6 = vweird.f32 %v10032_v59 }
 0xbd2   :  { %vm6067_vm8 = vmor %vm6065_vm7, %vm6066_vm6  ;;  %v6087_v63 = vor.u32 1.1754944e-38, %v6086_v16  ;;  %vm6085_vm13 = vcmp.eq.f32.partialorder %v6084_v58, 8.507059e+37 }
 0xbd3   :  { %v6062_v22 = vsub.f32 1.0, %v6061_v49  ;;  %v6105_v49 = vld [vmem:[#allocation2 + $0x80] sm:$0x3] }
 0xbd5   :  { %v6063_v26 = vmul.f32 %v10032_v59, %v6062_v22 }
 0xbd6   :  { %v10034_v9 = vpop.eup %10033 }
 0xbd7   :  { %v6076_v32 = vmul.f32 %v10034_v9, %v6059_v30  ;;  %v6064_v3 = vadd.f32 %v10032_v59, %v6063_v26  ;;  %vm6081_vm10 = vweird.f32 %v10034_v9 }
 0xbd8   :  { %vm6082_vm12 = vmor %vm6080_vm11, %vm6081_vm10 }
 0xbd9   :  { %v6077_v1 = vsub.f32 1.0, %v6076_v32  ;;  %v6068_v60 = vsel %vm6067_vm8, %v10032_v59, %v6064_v3  ;;  %v6104_v59 = vld [vmem:[#allocation2 + $0x70] sm:$0x3] }
 0xbda   :  { %v6073_v7 = vsel %vm6070_vm9, %v6072_v19, %v6068_v60 }
 0xbdb   :  { %v6078_v39 = vmul.f32 %v10034_v9, %v6077_v1  ;;  %v6093_v44 = vmul.f32 %v6091_v24, %v6073_v7 }
 0xbdd   :  { %v6079_v41 = vadd.f32 %v10034_v9, %v6078_v39  ;;  %v6094_v10 = vadd.f32 %v6093_v44, %v6000_v28 }
 0xbdf   :  { %v6083_v0 = vsel %vm6082_vm12, %v10034_v9, %v6079_v41  ;;  %10035 = vtanh.f32 %v6094_v10 }
 0xbe0   :  { %v6088_v34 = vsel %vm6085_vm13, %v6087_v63, %v6083_v0 }
 0xbe1   :  { %v6096_v54 = vsub.f32 1.0, %v6088_v34  ;;  %v6101_v55 = vmul.f32 %v6099_v52, %v6088_v34 }
 0xbe5   :  { %v10036_v20 = vpop.eup %10035 }
 0xbe6   :  { %v6097_v12 = vmul.f32 %v10036_v20, %v6096_v54 }
 0xbe8   :  { %v14635_v17 = vadd.f32 %v6101_v55, %v6097_v12 }
 0xbea   :  { %6103 = vst [vmem:[#allocation3] sm:$0xc0] %v14635_v17  ;;  %v6107_v33 = vpack.c.bf16 %v14635_v17, %v14635_v17 }
 0xbec   :  { %v6109_v62 = vrot.slane %v6107_v33, 3 }
 0xbee   :  { %6119 = vmatmul.bf16.vlgmr.msrb.gmra.mxu0 %v6109_v62  ;;  %6132 = vmatmul.bf16.vlgmr.msra.gmra.mxu1 %v6109_v62 }
 0xbef   :  { %6145 = vmatmul.bf16.vlgmr.msra.gmra.mxu2 %v6109_v62  ;;  %6337 = vmatpush.bf16.msrb.mxu0 %v14125_v21 }
 0xbf0   :  { %6417 = vmatpush.bf16.msra.mxu1 %v13923_v40  ;;  %6430 = vmatpush.bf16.msra.mxu2 %v14047_v31 }
 0xbf3   :  { %6338 = vmatpush.bf16.msrb.mxu0 %v14163_v23 }
 0xbf4   :  { %6418 = vmatpush.bf16.msra.mxu1 %v13956_v8  ;;  %6431 = vmatpush.bf16.msra.mxu2 %v14068_v14 }
 0xbf7   :  { %6339 = vmatpush.bf16.msrb.mxu0 %v14176_v42 }
 0xbf8   :  { %6419 = vmatpush.bf16.msra.mxu1 %v13978_v6  ;;  %6432 = vmatpush.bf16.msra.mxu2 %v14114_v37 }
 0xbfb   :  { %6340 = vmatpush.bf16.msrb.mxu0 %v14197_v50 }
 0xbfc   :  { %6420 = vmatpush.bf16.msra.mxu1 %v14011_v2  ;;  %6433 = vmatpush.bf16.msra.mxu2 %v14138_v4 }
 0xbff   :  { %6341 = vmatpush.bf16.msrb.mxu0 %v14230_v5 }
 0xc00   :  { %6421 = vmatpush.bf16.msra.mxu1 %v14038_v45  ;;  %6434 = vmatpush.bf16.msra.mxu2 %v14165_v61 }
 0xc03   :  { %6342 = vmatpush.bf16.msrb.mxu0 %v14256_v29 }
 0xc04   :  { %6422 = vmatpush.bf16.msra.mxu1 %v14059_v11  ;;  %6435 = vmatpush.bf16.msra.mxu2 %v14203_v15 }
 0xc07   :  { %6343 = vmatpush.bf16.msrb.mxu0 %v14274_v46 }
 0xc08   :  { %6423 = vmatpush.bf16.msra.mxu1 %v14078_v25  ;;  %6436 = vmatpush.bf16.msra.mxu2 %v14232_v57 }
 0xc0b   :  { %6344 = vmatpush.bf16.msrb.mxu0 %v14295_v56 }
 0xc0c   :  { %6424 = vmatpush.bf16.msra.mxu1 %v14103_v51  ;;  %6437 = vmatpush.bf16.msra.mxu2 %v14270_v13 }
 0xc6b   :  { %v6120_v47 = vpop.f32.mrf.mxu0  ;;  %v6133_v27 = vpop.f32.mrf.mxu1 }
 0xc6c   :  { %v6121_v48 = vadd.f32 %v6120_v47, %v14376_v53  ;;  %v6134_v30 = vadd.f32 %v6133_v27, %v14386_v35  ;;  %v6106_v47 = vld [vmem:[#allocation2 + $0x88] sm:$0x3] }
 0xc6e   :  { %v6150_v22 = vadd.f32 %v6121_v48, %v6104_v59  ;;  %v6151_v43 = vadd.f32 %v6134_v30, %v6105_v49 }
 0xc70   :  { %v9332_v18 = vmul.f32 -1.442695, %v6150_v22  ;;  %v9333_v26 = vmul.f32 -1.442695, %v6151_v43  ;;  %v6196_v43 = vrot.slane %v14635_v17, 6 }
 0xc72   :  { %10037 = vpow2.f32 %v9332_v18  ;;  %v6146_v38 = vpop.f32.mrf.mxu2 }
 0xc73   :  { %10039 = vpow2.f32 %v9333_v26  ;;  %v6122_v9 = vpop.f32.mrf.mxu0  ;;  %v6135_v32 = vpop.f32.mrf.mxu1  ;;  %v6147_v52 = vadd.f32 %v6146_v38, %v14395_v36 }
 0xc78   :  { %v10038_v3 = vpop.eup %10037 }
 0xc79   :  { %v10040_v19 = vpop.eup %10039  ;;  %v6158_v1 = vadd.f32 1.0, %v10038_v3 }
 0xc7a   :  { %v6159_v60 = vadd.f32 1.0, %v10040_v19  ;;  %v6148_v24 = vpop.f32.mrf.mxu2 }
 0xc7b   :  { %10041 = vrcp.f32 %v6158_v1  ;;  %v6171_v41 = vand.u32 2147483648, %v6158_v1  ;;  %v6169_v63 = vand.u32 2147483647, %v6158_v1  ;;  %vm6165_vm15 = vweird.f32 %v6158_v1 }
 0xc7c   :  { %10043 = vrcp.f32 %v6159_v60  ;;  %v6186_v33 = vand.u32 2147483648, %v6159_v60  ;;  %vm6180_vm3 = vweird.f32 %v6159_v60  ;;  %v6184_v27 = vand.u32 2147483647, %v6159_v60 }
 0xc7d   :  { %v6172_v54 = vor.u32 1.1754944e-38, %v6171_v41  ;;  %vm6170_vm1 = vcmp.eq.f32.partialorder %v6169_v63, 8.507059e+37  ;;  %v6201_v41 = vld [vmem:[#allocation2 + $0x70] sm:$0xc] }
 0xc7e   :  { %v6187_v59 = vor.u32 1.1754944e-38, %v6186_v33  ;;  %vm6185_vm5 = vcmp.eq.f32.partialorder %v6184_v27, 8.507059e+37 }
 0xc81   :  { %v10042_v7 = vpop.eup %10041 }
 0xc82   :  { %v10044_v39 = vpop.eup %10043  ;;  %v6161_v16 = vmul.f32 %v10042_v7, %v6158_v1  ;;  %vm6166_vm14 = vweird.f32 %v10042_v7 }
 0xc83   :  { %v6176_v44 = vmul.f32 %v10044_v39, %v6159_v60  ;;  %vm6167_vm0 = vmor %vm6165_vm15, %vm6166_vm14  ;;  %vm6181_vm2 = vweird.f32 %v10044_v39  ;;  %v6202_v60 = vld [vmem:[#allocation2 + $0x80] sm:$0xc] }
 0xc84   :  { %v6162_v28 = vsub.f32 1.0, %v6161_v16  ;;  %vm6182_vm4 = vmor %vm6180_vm3, %vm6181_vm2 }
 0xc85   :  { %v6177_v58 = vsub.f32 1.0, %v6176_v44 }
 0xc86   :  { %v6163_v10 = vmul.f32 %v10042_v7, %v6162_v28 }
 0xc87   :  { %v6178_v0 = vmul.f32 %v10044_v39, %v6177_v58 }
 0xc88   :  { %v6164_v34 = vadd.f32 %v10042_v7, %v6163_v10 }
 0xc89   :  { %v6179_v55 = vadd.f32 %v10044_v39, %v6178_v0 }
 0xc8a   :  { %v6168_v20 = vsel %vm6167_vm0, %v10042_v7, %v6164_v34 }
 0xc8b   :  { %v6173_v12 = vsel %vm6170_vm1, %v6172_v54, %v6168_v20  ;;  %v6183_v30 = vsel %vm6182_vm4, %v10044_v39, %v6179_v55 }
 0xc8c   :  { %v6190_v62 = vmul.f32 %v6173_v12, %v6147_v52  ;;  %v6188_v49 = vsel %vm6185_vm5, %v6187_v59, %v6183_v30 }
 0xc8d   :  { %v6193_v22 = vsub.f32 1.0, %v6188_v49  ;;  %v6198_v38 = vmul.f32 %v6196_v43, %v6188_v49 }
 0xc8e   :  { %v6191_v48 = vadd.f32 %v6190_v62, %v6106_v47 }
 0xc90   :  { %10045 = vtanh.f32 %v6191_v48 }
 0xc96   :  { %v10046_v18 = vpop.eup %10045 }
 0xc97   :  { %v6194_v26 = vmul.f32 %v10046_v18, %v6193_v22 }
 0xc99   :  { %v14668_v9 = vadd.f32 %v6198_v38, %v6194_v26 }
 0xc9b   :  { %6200 = vst [vmem:[#allocation3 + $0x10] sm:$0x3] %v14668_v9  ;;  %v6204_v32 = vpack.c.bf16 %v14668_v9, %v14668_v9 }
 0xc9d   :  { %6213 = vmatmul.bf16.vlgmr.msra.gmra.mxu3 %v6204_v32  ;;  %6226 = vmatmul.bf16.vlgmr.msra.gmra.mxu0 %v6204_v32 }
 0xc9e   :  { %6239 = vmatmul.bf16.vlgmr.msrb.gmra.mxu1 %v6204_v32  ;;  %6443 = vmatpush.bf16.msra.mxu3 %v14125_v21 }
 0xc9f   :  { %6523 = vmatpush.bf16.msra.mxu0 %v13923_v40  ;;  %6536 = vmatpush.bf16.msrb.mxu1 %v14047_v31 }
 0xca2   :  { %6444 = vmatpush.bf16.msra.mxu3 %v14163_v23 }
 0xca3   :  { %6524 = vmatpush.bf16.msra.mxu0 %v13956_v8  ;;  %6537 = vmatpush.bf16.msrb.mxu1 %v14068_v14 }
 0xca6   :  { %6445 = vmatpush.bf16.msra.mxu3 %v14176_v42 }
 0xca7   :  { %6525 = vmatpush.bf16.msra.mxu0 %v13978_v6  ;;  %6538 = vmatpush.bf16.msrb.mxu1 %v14114_v37 }
 0xcaa   :  { %6446 = vmatpush.bf16.msra.mxu3 %v14197_v50 }
 0xcab   :  { %6526 = vmatpush.bf16.msra.mxu0 %v14011_v2  ;;  %6539 = vmatpush.bf16.msrb.mxu1 %v14138_v4 }
 0xcae   :  { %6447 = vmatpush.bf16.msra.mxu3 %v14230_v5 }
 0xcaf   :  { %6527 = vmatpush.bf16.msra.mxu0 %v14038_v45  ;;  %6540 = vmatpush.bf16.msrb.mxu1 %v14165_v61 }
 0xcb2   :  { %6448 = vmatpush.bf16.msra.mxu3 %v14256_v29 }
 0xcb3   :  { %6528 = vmatpush.bf16.msra.mxu0 %v14059_v11  ;;  %6541 = vmatpush.bf16.msrb.mxu1 %v14203_v15 }
 0xcb6   :  { %6449 = vmatpush.bf16.msra.mxu3 %v14274_v46 }
 0xcb7   :  { %6529 = vmatpush.bf16.msra.mxu0 %v14078_v25  ;;  %6542 = vmatpush.bf16.msrb.mxu1 %v14232_v57 }
 0xcba   :  { %6450 = vmatpush.bf16.msra.mxu3 %v14295_v56 }
 0xcbb   :  { %6530 = vmatpush.bf16.msra.mxu0 %v14103_v51  ;;  %6543 = vmatpush.bf16.msrb.mxu1 %v14270_v13 }
 0xd1a   :  { %v6227_v17 = vpop.f32.mrf.mxu0 }
 0xd1b   :  { %v6228_v3 = vadd.f32 %v6227_v17, %v14386_v35  ;;  %v6240_v19 = vpop.f32.mrf.mxu1 }
 0xd1c   :  { %v6241_v30 = vadd.f32 %v6240_v19, %v14395_v36 }
 0xd1d   :  { %v6247_v1 = vrot.slane %v6228_v3, 6 }
 0xd1e   :  { %v6291_v26 = vrot.slane %v6241_v30, 6 }
 0xd1f   :  { %v6251_v24 = vadd.f32 %v6247_v1, %v6202_v60 }
 0xd20   :  { %v6214_v7 = vpop.f32.mrf.mxu3 }
 0xd21   :  { %v9335_v39 = vmul.f32 -1.442695, %v6251_v24  ;;  %v6215_v16 = vadd.f32 %v6214_v7, %v14376_v53  ;;  %v6203_v24 = vld [vmem:[#allocation2 + $0x88] sm:$0xc] }
 0xd22   :  { %v6229_v44 = vpop.f32.mrf.mxu0 }
 0xd23   :  { %10047 = vpow2.f32 %v9335_v39  ;;  %v6246_v28 = vrot.slane %v6215_v16, 6  ;;  %v6242_v58 = vpop.f32.mrf.mxu1  ;;  %v6299_v44 = vrot.slane %v14668_v9, 6 }
 0xd25   :  { %v6250_v10 = vadd.f32 %v6246_v28, %v6201_v41 }
 0xd27   :  { %v9334_v63 = vmul.f32 -1.442695, %v6250_v10 }
 0xd28   :  { %v6216_v0 = vpop.f32.mrf.mxu3 }
 0xd29   :  { %v10048_v34 = vpop.eup %10047  ;;  %10049 = vpow2.f32 %v9334_v63 }
 0xd2a   :  { %v6259_v54 = vadd.f32 1.0, %v10048_v34 }
 0xd2c   :  { %10051 = vrcp.f32 %v6259_v54  ;;  %v6286_v3 = vand.u32 2147483648, %v6259_v54  ;;  %vm6280_vm11 = vweird.f32 %v6259_v54  ;;  %v6284_v60 = vand.u32 2147483647, %v6259_v54 }
 0xd2e   :  { %v6287_v39 = vor.u32 1.1754944e-38, %v6286_v3  ;;  %vm6285_vm13 = vcmp.eq.f32.partialorder %v6284_v60, 8.507059e+37 }
 0xd2f   :  { %v10050_v52 = vpop.eup %10049 }
 0xd30   :  { %v6258_v20 = vadd.f32 1.0, %v10050_v52 }
 0xd32   :  { %10053 = vrcp.f32 %v6258_v20  ;;  %v10052_v12 = vpop.eup %10051  ;;  %v6271_v48 = vand.u32 2147483648, %v6258_v20  ;;  %v6269_v49 = vand.u32 2147483647, %v6258_v20  ;;  %vm6265_vm7 = vweird.f32 %v6258_v20 }
 0xd33   :  { %v6276_v55 = vmul.f32 %v10052_v12, %v6259_v54  ;;  %vm6281_vm10 = vweird.f32 %v10052_v12 }
 0xd34   :  { %v6272_v18 = vor.u32 1.1754944e-38, %v6271_v48  ;;  %vm6270_vm9 = vcmp.eq.f32.partialorder %v6269_v49, 8.507059e+37  ;;  %vm6282_vm12 = vmor %vm6280_vm11, %vm6281_vm10 }
 0xd35   :  { %v6277_v47 = vsub.f32 1.0, %v6276_v55 }
 0xd37   :  { %v6278_v22 = vmul.f32 %v10052_v12, %v6277_v47  ;;  %v6304_v47 = vld [vmem:[#allocation2 + $0x70] sm:$0x30] }
 0xd38   :  { %v10054_v33 = vpop.eup %10053 }
 0xd39   :  { %v6261_v62 = vmul.f32 %v10054_v33, %v6258_v20  ;;  %vm6266_vm6 = vweird.f32 %v10054_v33  ;;  %v6279_v32 = vadd.f32 %v10052_v12, %v6278_v22 }
 0xd3a   :  { %vm6267_vm8 = vmor %vm6265_vm7, %vm6266_vm6 }
 0xd3b   :  { %v6262_v27 = vsub.f32 1.0, %v6261_v62  ;;  %v6283_v7 = vsel %vm6282_vm12, %v10052_v12, %v6279_v32 }
 0xd3c   :  { %v6288_v16 = vsel %vm6285_vm13, %v6287_v39, %v6283_v7 }
 0xd3d   :  { %v6263_v59 = vmul.f32 %v10054_v33, %v6262_v27  ;;  %v6296_v28 = vsub.f32 1.0, %v6288_v16  ;;  %v6301_v10 = vmul.f32 %v6299_v44, %v6288_v16  ;;  %v6305_v27 = vld [vmem:[#allocation2 + $0x80] sm:$0x30] }
 0xd3f   :  { %v6264_v43 = vadd.f32 %v10054_v33, %v6263_v59 }
 0xd41   :  { %v6268_v38 = vsel %vm6267_vm8, %v10054_v33, %v6264_v43 }
 0xd42   :  { %v6273_v17 = vsel %vm6270_vm9, %v6272_v18, %v6268_v38 }
 0xd43   :  { %v6293_v1 = vmul.f32 %v6291_v26, %v6273_v17 }
 0xd45   :  { %v6294_v19 = vadd.f32 %v6293_v1, %v6203_v24 }
 0xd47   :  { %10055 = vtanh.f32 %v6294_v19 }
 0xd4d   :  { %v10056_v58 = vpop.eup %10055 }
 0xd4e   :  { %v6297_v41 = vmul.f32 %v10056_v58, %v6296_v28 }
 0xd50   :  { %v14701_v63 = vadd.f32 %v6301_v10, %v6297_v41 }
 0xd52   :  { %6303 = vst [vmem:[#allocation3 + $0x10] sm:$0xc] %v14701_v63  ;;  %v6307_v0 = vpack.c.bf16 %v14701_v63, %v14701_v63 }
 0xd54   :  { %v6309_v34 = vrot.slane %v6307_v0, 1 }
 0xd56   :  { %6319 = vmatmul.bf16.vlgmr.msrb.gmra.mxu2 %v6309_v34  ;;  %6332 = vmatmul.bf16.vlgmr.msrb.gmra.mxu3 %v6309_v34 }
 0xd57   :  { %6345 = vmatmul.bf16.vlgmr.msrb.gmra.mxu0 %v6309_v34  ;;  %6549 = vmatpush.bf16.msrb.mxu2 %v14125_v21 }
 0xd58   :  { %6617 = vmatpush.bf16.msrb.mxu3 %v13923_v40  ;;  %6630 = vmatpush.bf16.msrb.mxu0 %v14047_v31 }
 0xd5b   :  { %6550 = vmatpush.bf16.msrb.mxu2 %v14163_v23 }
 0xd5c   :  { %6618 = vmatpush.bf16.msrb.mxu3 %v13956_v8  ;;  %6631 = vmatpush.bf16.msrb.mxu0 %v14068_v14 }
 0xd5f   :  { %6551 = vmatpush.bf16.msrb.mxu2 %v14176_v42 }
 0xd60   :  { %6619 = vmatpush.bf16.msrb.mxu3 %v13978_v6  ;;  %6632 = vmatpush.bf16.msrb.mxu0 %v14114_v37 }
 0xd63   :  { %6552 = vmatpush.bf16.msrb.mxu2 %v14197_v50 }
 0xd64   :  { %6620 = vmatpush.bf16.msrb.mxu3 %v14011_v2  ;;  %6633 = vmatpush.bf16.msrb.mxu0 %v14138_v4 }
 0xd67   :  { %6553 = vmatpush.bf16.msrb.mxu2 %v14230_v5 }
 0xd68   :  { %6621 = vmatpush.bf16.msrb.mxu3 %v14038_v45  ;;  %6634 = vmatpush.bf16.msrb.mxu0 %v14165_v61 }
 0xd6b   :  { %6554 = vmatpush.bf16.msrb.mxu2 %v14256_v29 }
 0xd6c   :  { %6622 = vmatpush.bf16.msrb.mxu3 %v14059_v11  ;;  %6635 = vmatpush.bf16.msrb.mxu0 %v14203_v15 }
 0xd6f   :  { %6555 = vmatpush.bf16.msrb.mxu2 %v14274_v46 }
 0xd70   :  { %6623 = vmatpush.bf16.msrb.mxu3 %v14078_v25  ;;  %6636 = vmatpush.bf16.msrb.mxu0 %v14232_v57 }
 0xd73   :  { %6556 = vmatpush.bf16.msrb.mxu2 %v14295_v56 }
 0xd74   :  { %6624 = vmatpush.bf16.msrb.mxu3 %v14103_v51  ;;  %6637 = vmatpush.bf16.msrb.mxu0 %v14270_v13 }
 0xdd4   :  { %v6346_v9 = vpop.f32.mrf.mxu0 }
 0xdd5   :  { %v6347_v39 = vadd.f32 %v6346_v9, %v14395_v36 }
 0xdd7   :  { %v6397_v10 = vrot.slane %v6347_v39, 4  ;;  %v6411_v39 = vld [vmem:[#allocation2 + $0x80] sm:$0xc0] }
 0xdd9   :  { %v6320_v54 = vpop.f32.mrf.mxu2  ;;  %v6333_v52 = vpop.f32.mrf.mxu3 }
 0xdda   :  { %v6321_v20 = vadd.f32 %v6320_v54, %v14376_v53  ;;  %v6334_v12 = vadd.f32 %v6333_v52, %v14386_v35 }
 0xddc   :  { %v6352_v55 = vrot.slane %v6321_v20, 4  ;;  %v6353_v33 = vrot.slane %v6334_v12, 4  ;;  %v6348_v62 = vpop.f32.mrf.mxu0  ;;  %v6306_v12 = vld [vmem:[#allocation2 + $0x88] sm:$0x30] }
 0xdde   :  { %v6356_v48 = vadd.f32 %v6352_v55, %v6304_v47  ;;  %v6357_v30 = vadd.f32 %v6353_v33, %v6305_v27 }
 0xde0   :  { %v9336_v59 = vmul.f32 -1.442695, %v6356_v48  ;;  %v9337_v49 = vmul.f32 -1.442695, %v6357_v30  ;;  %v6405_v48 = vrot.slane %v14701_v63, 6 }
 0xde1   :  { %v6322_v22 = vpop.f32.mrf.mxu2  ;;  %v6335_v43 = vpop.f32.mrf.mxu3 }
 0xde2   :  { %10057 = vpow2.f32 %v9336_v59 }
 0xde3   :  { %10059 = vpow2.f32 %v9337_v49 }
 0xde8   :  { %v10058_v18 = vpop.eup %10057 }
 0xde9   :  { %v10060_v26 = vpop.eup %10059  ;;  %v6364_v38 = vadd.f32 1.0, %v10058_v18 }
 0xdea   :  { %v6365_v32 = vadd.f32 1.0, %v10060_v26 }
 0xdeb   :  { %10061 = vrcp.f32 %v6364_v38  ;;  %v6377_v19 = vand.u32 2147483648, %v6364_v38  ;;  %v6375_v44 = vand.u32 2147483647, %v6364_v38  ;;  %vm6371_vm15 = vweird.f32 %v6364_v38 }
 0xdec   :  { %10063 = vrcp.f32 %v6365_v32  ;;  %v6392_v20 = vand.u32 2147483648, %v6365_v32  ;;  %vm6386_vm3 = vweird.f32 %v6365_v32  ;;  %v6390_v55 = vand.u32 2147483647, %v6365_v32 }
 0xded   :  { %v6378_v41 = vor.u32 1.1754944e-38, %v6377_v19  ;;  %vm6376_vm1 = vcmp.eq.f32.partialorder %v6375_v44, 8.507059e+37 }
 0xdee   :  { %v6393_v62 = vor.u32 1.1754944e-38, %v6392_v20  ;;  %vm6391_vm5 = vcmp.eq.f32.partialorder %v6390_v55, 8.507059e+37 }
 0xdf1   :  { %v10062_v17 = vpop.eup %10061 }
 0xdf2   :  { %v10064_v3 = vpop.eup %10063  ;;  %v6367_v1 = vmul.f32 %v10062_v17, %v6364_v38  ;;  %vm6372_vm14 = vweird.f32 %v10062_v17 }
 0xdf3   :  { %v6382_v60 = vmul.f32 %v10064_v3, %v6365_v32  ;;  %vm6373_vm0 = vmor %vm6371_vm15, %vm6372_vm14  ;;  %vm6387_vm2 = vweird.f32 %v10064_v3  ;;  %v6410_v32 = vld [vmem:[#allocation2 + $0x70] sm:$0xc0] }
 0xdf4   :  { %v6368_v24 = vsub.f32 1.0, %v6367_v1  ;;  %vm6388_vm4 = vmor %vm6386_vm3, %vm6387_vm2 }
 0xdf5   :  { %v6383_v7 = vsub.f32 1.0, %v6382_v60 }
 0xdf6   :  { %v6369_v16 = vmul.f32 %v10062_v17, %v6368_v24 }
 0xdf7   :  { %v6384_v28 = vmul.f32 %v10064_v3, %v6383_v7 }
 0xdf8   :  { %v6370_v58 = vadd.f32 %v10062_v17, %v6369_v16 }
 0xdf9   :  { %v6385_v54 = vadd.f32 %v10064_v3, %v6384_v28 }
 0xdfa   :  { %v6374_v0 = vsel %vm6373_vm0, %v10062_v17, %v6370_v58 }
 0xdfb   :  { %v6379_v34 = vsel %vm6376_vm1, %v6378_v41, %v6374_v0  ;;  %v6389_v33 = vsel %vm6388_vm4, %v10064_v3, %v6385_v54 }
 0xdfc   :  { %v6399_v52 = vmul.f32 %v6397_v10, %v6379_v34  ;;  %v6394_v47 = vsel %vm6391_vm5, %v6393_v62, %v6389_v33 }
 0xdfd   :  { %v6402_v27 = vsub.f32 1.0, %v6394_v47  ;;  %v6407_v49 = vmul.f32 %v6405_v48, %v6394_v47 }
 0xdfe   :  { %v6400_v9 = vadd.f32 %v6399_v52, %v6306_v12 }
 0xe00   :  { %10065 = vtanh.f32 %v6400_v9 }
 0xe06   :  { %v10066_v30 = vpop.eup %10065 }
 0xe07   :  { %v6403_v59 = vmul.f32 %v10066_v30, %v6402_v27 }
 0xe09   :  { %v14734_v22 = vadd.f32 %v6407_v49, %v6403_v59 }
 0xe0b   :  { %6409 = vst [vmem:[#allocation3 + $0x10] sm:$0x30] %v14734_v22  ;;  %v6413_v43 = vpack.c.bf16 %v14734_v22, %v14734_v22 }
 0xe0d   :  { %v6415_v18 = vrot.slane %v6413_v43, 2 }
 0xe0f   :  { %6425 = vmatmul.bf16.vlgmr.msra.gmra.mxu1 %v6415_v18  ;;  %6438 = vmatmul.bf16.vlgmr.msra.gmra.mxu2 %v6415_v18 }
 0xe10   :  { %6451 = vmatmul.bf16.vlgmr.msra.gmra.mxu3 %v6415_v18  ;;  %6643 = vmatpush.bf16.msra.mxu1 %v14125_v21 }
 0xe11   :  { %6723 = vmatpush.bf16.msra.mxu2 %v13923_v40  ;;  %6736 = vmatpush.bf16.msra.mxu3 %v14047_v31 }
 0xe14   :  { %6644 = vmatpush.bf16.msra.mxu1 %v14163_v23 }
 0xe15   :  { %6724 = vmatpush.bf16.msra.mxu2 %v13956_v8  ;;  %6737 = vmatpush.bf16.msra.mxu3 %v14068_v14 }
 0xe18   :  { %6645 = vmatpush.bf16.msra.mxu1 %v14176_v42 }
 0xe19   :  { %6725 = vmatpush.bf16.msra.mxu2 %v13978_v6  ;;  %6738 = vmatpush.bf16.msra.mxu3 %v14114_v37 }
 0xe1c   :  { %6646 = vmatpush.bf16.msra.mxu1 %v14197_v50 }
 0xe1d   :  { %6726 = vmatpush.bf16.msra.mxu2 %v14011_v2  ;;  %6739 = vmatpush.bf16.msra.mxu3 %v14138_v4 }
 0xe20   :  { %6647 = vmatpush.bf16.msra.mxu1 %v14230_v5 }
 0xe21   :  { %6727 = vmatpush.bf16.msra.mxu2 %v14038_v45  ;;  %6740 = vmatpush.bf16.msra.mxu3 %v14165_v61 }
 0xe24   :  { %6648 = vmatpush.bf16.msra.mxu1 %v14256_v29 }
 0xe25   :  { %6728 = vmatpush.bf16.msra.mxu2 %v14059_v11  ;;  %6741 = vmatpush.bf16.msra.mxu3 %v14203_v15 }
 0xe28   :  { %6649 = vmatpush.bf16.msra.mxu1 %v14274_v46 }
 0xe29   :  { %6729 = vmatpush.bf16.msra.mxu2 %v14078_v25  ;;  %6742 = vmatpush.bf16.msra.mxu3 %v14232_v57 }
 0xe2c   :  { %6650 = vmatpush.bf16.msra.mxu1 %v14295_v56 }
 0xe2d   :  { %6730 = vmatpush.bf16.msra.mxu2 %v14103_v51  ;;  %6743 = vmatpush.bf16.msra.mxu3 %v14270_v13 }
 0xe8c   :  { %v6426_v63 = vpop.f32.mrf.mxu1 }
 0xe8d   :  { %v6427_v26 = vadd.f32 %v6426_v63, %v14376_v53 }
 0xe8f   :  { %v6458_v38 = vrot.slane %v6427_v26, 2 }
 0xe91   :  { %v6462_v17 = vadd.f32 %v6458_v38, %v6410_v32  ;;  %v6412_v38 = vld [vmem:[#allocation2 + $0x88] sm:$0xc0] }
 0xe92   :  { %v6439_v3 = vpop.f32.mrf.mxu2 }
 0xe93   :  { %v9338_v1 = vmul.f32 -1.442695, %v6462_v17  ;;  %v6440_v60 = vadd.f32 %v6439_v3, %v14386_v35  ;;  %v6452_v24 = vpop.f32.mrf.mxu3 }
 0xe94   :  { %v6428_v19 = vpop.f32.mrf.mxu1  ;;  %v6453_v55 = vadd.f32 %v6452_v24, %v14395_v36 }
 0xe95   :  { %10067 = vpow2.f32 %v9338_v1  ;;  %v6459_v7 = vrot.slane %v6440_v60, 2 }
 0xe96   :  { %v6503_v49 = vrot.slane %v6453_v55, 2 }
 0xe97   :  { %v6463_v16 = vadd.f32 %v6459_v7, %v6411_v39  ;;  %v6511_v7 = vrot.slane %v14734_v22, 6 }
 0xe99   :  { %v9339_v44 = vmul.f32 -1.442695, %v6463_v16 }
 0xe9a   :  { %v6441_v28 = vpop.f32.mrf.mxu2 }
 0xe9b   :  { %v10068_v58 = vpop.eup %10067  ;;  %10069 = vpow2.f32 %v9339_v44  ;;  %v6454_v41 = vpop.f32.mrf.mxu3 }
 0xe9c   :  { %v6470_v10 = vadd.f32 1.0, %v10068_v58 }
 0xe9e   :  { %10071 = vrcp.f32 %v6470_v10  ;;  %v6483_v12 = vand.u32 2147483648, %v6470_v10  ;;  %v6481_v33 = vand.u32 2147483647, %v6470_v10  ;;  %vm6477_vm7 = vweird.f32 %v6470_v10 }
 0xea0   :  { %v6484_v48 = vor.u32 1.1754944e-38, %v6483_v12  ;;  %vm6482_vm9 = vcmp.eq.f32.partialorder %v6481_v33, 8.507059e+37 }
 0xea1   :  { %v10070_v0 = vpop.eup %10069 }
 0xea2   :  { %v6471_v34 = vadd.f32 1.0, %v10070_v0 }
 0xea4   :  { %v10072_v54 = vpop.eup %10071  ;;  %10073 = vrcp.f32 %v6471_v34  ;;  %v6498_v63 = vand.u32 2147483648, %v6471_v34  ;;  %v6496_v32 = vand.u32 2147483647, %v6471_v34  ;;  %vm6492_vm11 = vweird.f32 %v6471_v34 }
 0xea5   :  { %v6473_v52 = vmul.f32 %v10072_v54, %v6470_v10  ;;  %vm6478_vm6 = vweird.f32 %v10072_v54 }
 0xea6   :  { %vm6479_vm8 = vmor %vm6477_vm7, %vm6478_vm6  ;;  %v6499_v1 = vor.u32 1.1754944e-38, %v6498_v63  ;;  %vm6497_vm13 = vcmp.eq.f32.partialorder %v6496_v32, 8.507059e+37 }
 0xea7   :  { %v6474_v20 = vsub.f32 1.0, %v6473_v52  ;;  %v6517_v52 = vld [vmem:[#allocation2 + $0x50] sm:$0x3] }
 0xea9   :  { %v6475_v9 = vmul.f32 %v10072_v54, %v6474_v20 }
 0xeaa   :  { %v10074_v62 = vpop.eup %10073 }
 0xeab   :  { %v6488_v47 = vmul.f32 %v10074_v62, %v6471_v34  ;;  %v6476_v27 = vadd.f32 %v10072_v54, %v6475_v9  ;;  %vm6493_vm10 = vweird.f32 %v10074_v62 }
 0xeac   :  { %vm6494_vm12 = vmor %vm6492_vm11, %vm6493_vm10 }
 0xead   :  { %v6489_v30 = vsub.f32 1.0, %v6488_v47  ;;  %v6480_v59 = vsel %vm6479_vm8, %v10072_v54, %v6476_v27  ;;  %v6516_v54 = vld [vmem:[#allocation2 + $0x40] sm:$0x3] }
 0xeae   :  { %v6485_v43 = vsel %vm6482_vm9, %v6484_v48, %v6480_v59 }
 0xeaf   :  { %v6490_v18 = vmul.f32 %v10074_v62, %v6489_v30  ;;  %v6505_v26 = vmul.f32 %v6503_v49, %v6485_v43 }
 0xeb1   :  { %v6491_v17 = vadd.f32 %v10074_v62, %v6490_v18  ;;  %v6506_v3 = vadd.f32 %v6505_v26, %v6412_v38 }
 0xeb3   :  { %v6495_v60 = vsel %vm6494_vm12, %v10074_v62, %v6491_v17  ;;  %10075 = vtanh.f32 %v6506_v3 }
 0xeb4   :  { %v6500_v24 = vsel %vm6497_vm13, %v6499_v1, %v6495_v60 }
 0xeb5   :  { %v6508_v19 = vsub.f32 1.0, %v6500_v24  ;;  %v6513_v44 = vmul.f32 %v6511_v7, %v6500_v24 }
 0xeb9   :  { %v10076_v39 = vpop.eup %10075 }
 0xeba   :  { %v6509_v16 = vmul.f32 %v10076_v39, %v6508_v19 }
 0xebc   :  { %v14767_v28 = vadd.f32 %v6513_v44, %v6509_v16 }
 0xebe   :  { %6515 = vst [vmem:[#allocation3 + $0x10] sm:$0xc0] %v14767_v28  ;;  %v6519_v58 = vpack.c.bf16 %v14767_v28, %v14767_v28 }
 0xec0   :  { %v6521_v41 = vrot.slane %v6519_v58, 3 }
 0xec2   :  { %6531 = vmatmul.bf16.vlgmr.msra.gmra.mxu0 %v6521_v41  ;;  %6544 = vmatmul.bf16.vlgmr.msrb.gmra.mxu1 %v6521_v41 }
 0xec3   :  { %6557 = vmatmul.bf16.vlgmr.msrb.gmra.mxu2 %v6521_v41  ;;  %6749 = vmatpush.bf16.msra.mxu0 %v14125_v21 }
 0xec4   :  { %6829 = vmatpush.bf16.msrb.mxu1 %v13923_v40  ;;  %6842 = vmatpush.bf16.msrb.mxu2 %v14047_v31 }
 0xec7   :  { %6750 = vmatpush.bf16.msra.mxu0 %v14163_v23 }
 0xec8   :  { %6830 = vmatpush.bf16.msrb.mxu1 %v13956_v8  ;;  %6843 = vmatpush.bf16.msrb.mxu2 %v14068_v14 }
 0xecb   :  { %6751 = vmatpush.bf16.msra.mxu0 %v14176_v42 }
 0xecc   :  { %6831 = vmatpush.bf16.msrb.mxu1 %v13978_v6  ;;  %6844 = vmatpush.bf16.msrb.mxu2 %v14114_v37 }
 0xecf   :  { %6752 = vmatpush.bf16.msra.mxu0 %v14197_v50 }
 0xed0   :  { %6832 = vmatpush.bf16.msrb.mxu1 %v14011_v2  ;;  %6845 = vmatpush.bf16.msrb.mxu2 %v14138_v4 }
 0xed3   :  { %6753 = vmatpush.bf16.msra.mxu0 %v14230_v5 }
 0xed4   :  { %6833 = vmatpush.bf16.msrb.mxu1 %v14038_v45  ;;  %6846 = vmatpush.bf16.msrb.mxu2 %v14165_v61 }
 0xed7   :  { %6754 = vmatpush.bf16.msra.mxu0 %v14256_v29 }
 0xed8   :  { %6834 = vmatpush.bf16.msrb.mxu1 %v14059_v11  ;;  %6847 = vmatpush.bf16.msrb.mxu2 %v14203_v15 }
 0xedb   :  { %6755 = vmatpush.bf16.msra.mxu0 %v14274_v46 }
 0xedc   :  { %6835 = vmatpush.bf16.msrb.mxu1 %v14078_v25  ;;  %6848 = vmatpush.bf16.msrb.mxu2 %v14232_v57 }
 0xedf   :  { %6756 = vmatpush.bf16.msra.mxu0 %v14295_v56 }
 0xee0   :  { %6836 = vmatpush.bf16.msrb.mxu1 %v14103_v51  ;;  %6849 = vmatpush.bf16.msrb.mxu2 %v14270_v13 }
 0xf3f   :  { %v6532_v22 = vpop.f32.mrf.mxu0  ;;  %v6545_v10 = vpop.f32.mrf.mxu1 }
 0xf40   :  { %v6533_v0 = vadd.f32 %v6532_v22, %v14376_v53  ;;  %v6546_v34 = vadd.f32 %v6545_v10, %v14386_v35  ;;  %v6518_v22 = vld [vmem:[#allocation2 + $0x28] sm:$0x3] }
 0xf42   :  { %v6562_v20 = vadd.f32 %v6533_v0, %v6516_v54  ;;  %v6563_v12 = vadd.f32 %v6546_v34, %v6517_v52 }
 0xf44   :  { %v9340_v55 = vmul.f32 -1.442695, %v6562_v20  ;;  %v9341_v9 = vmul.f32 -1.442695, %v6563_v12  ;;  %v6608_v12 = vrot.slane %v14767_v28, 6 }
 0xf46   :  { %10077 = vpow2.f32 %v9340_v55  ;;  %v6558_v33 = vpop.f32.mrf.mxu2 }
 0xf47   :  { %10079 = vpow2.f32 %v9341_v9  ;;  %v6534_v62 = vpop.f32.mrf.mxu0  ;;  %v6547_v47 = vpop.f32.mrf.mxu1  ;;  %v6559_v7 = vadd.f32 %v6558_v33, %v14395_v36 }
 0xf4c   :  { %v10078_v27 = vpop.eup %10077 }
 0xf4d   :  { %v10080_v48 = vpop.eup %10079  ;;  %v6570_v30 = vadd.f32 1.0, %v10078_v27 }
 0xf4e   :  { %v6571_v59 = vadd.f32 1.0, %v10080_v48  ;;  %v6560_v49 = vpop.f32.mrf.mxu2 }
 0xf4f   :  { %10081 = vrcp.f32 %v6570_v30  ;;  %v6583_v17 = vand.u32 2147483648, %v6570_v30  ;;  %v6581_v1 = vand.u32 2147483647, %v6570_v30  ;;  %vm6577_vm15 = vweird.f32 %v6570_v30 }
 0xf50   :  { %10083 = vrcp.f32 %v6571_v59  ;;  %v6598_v58 = vand.u32 2147483648, %v6571_v59  ;;  %vm6592_vm3 = vweird.f32 %v6571_v59  ;;  %v6596_v10 = vand.u32 2147483647, %v6571_v59 }
 0xf51   :  { %v6584_v19 = vor.u32 1.1754944e-38, %v6583_v17  ;;  %vm6582_vm1 = vcmp.eq.f32.partialorder %v6581_v1, 8.507059e+37 }
 0xf52   :  { %v6599_v54 = vor.u32 1.1754944e-38, %v6598_v58  ;;  %vm6597_vm5 = vcmp.eq.f32.partialorder %v6596_v10, 8.507059e+37 }
 0xf55   :  { %v10082_v43 = vpop.eup %10081 }
 0xf56   :  { %v10084_v18 = vpop.eup %10083  ;;  %v6573_v63 = vmul.f32 %v10082_v43, %v6570_v30  ;;  %vm6578_vm14 = vweird.f32 %v10082_v43 }
 0xf57   :  { %v6588_v26 = vmul.f32 %v10084_v18, %v6571_v59  ;;  %vm6579_vm0 = vmor %vm6577_vm15, %vm6578_vm14  ;;  %vm6593_vm2 = vweird.f32 %v10084_v18 }
 0xf58   :  { %v6574_v38 = vsub.f32 1.0, %v6573_v63  ;;  %vm6594_vm4 = vmor %vm6592_vm3, %vm6593_vm2 }
 0xf59   :  { %v6589_v32 = vsub.f32 1.0, %v6588_v26 }
 0xf5a   :  { %v6575_v3 = vmul.f32 %v10082_v43, %v6574_v38 }
 0xf5b   :  { %v6590_v60 = vmul.f32 %v10084_v18, %v6589_v32 }
 0xf5c   :  { %v6576_v24 = vadd.f32 %v10082_v43, %v6575_v3 }
 0xf5d   :  { %v6591_v44 = vadd.f32 %v10084_v18, %v6590_v60 }
 0xf5e   :  { %v6580_v39 = vsel %vm6579_vm0, %v10082_v43, %v6576_v24 }
 0xf5f   :  { %v6585_v16 = vsel %vm6582_vm1, %v6584_v19, %v6580_v39  ;;  %v6595_v34 = vsel %vm6594_vm4, %v10084_v18, %v6591_v44 }
 0xf60   :  { %v6602_v41 = vmul.f32 %v6585_v16, %v6559_v7  ;;  %v6600_v52 = vsel %vm6597_vm5, %v6599_v54, %v6595_v34 }
 0xf61   :  { %v6605_v20 = vsub.f32 1.0, %v6600_v52  ;;  %v6610_v33 = vmul.f32 %v6608_v12, %v6600_v52 }
 0xf62   :  { %v6603_v0 = vadd.f32 %v6602_v41, %v6518_v22  ;;  %v6615_v22 = vld [vmem:[#allocation2 + $0x28] sm:$0xc] }
 0xf64   :  { %10085 = vtanh.f32 %v6603_v0 }
 0xf6a   :  { %v10086_v55 = vpop.eup %10085 }
 0xf6b   :  { %v6606_v9 = vmul.f32 %v10086_v55, %v6605_v20 }
 0xf6d   :  { %v14800_v62 = vadd.f32 %v6610_v33, %v6606_v9 }
 0xf6f   :  { %6612 = vst [vmem:[#allocation3 + $0x20] sm:$0x3] %v14800_v62  ;;  %v6616_v47 = vpack.c.bf16 %v14800_v62, %v14800_v62  ;;  %v6711_v52 = vrot.slane %v14800_v62, 6 }
 0xf71   :  { %6625 = vmatmul.bf16.vlgmr.msrb.gmra.mxu3 %v6616_v47  ;;  %6638 = vmatmul.bf16.vlgmr.msrb.gmra.mxu0 %v6616_v47 }
 0xf72   :  { %6651 = vmatmul.bf16.vlgmr.msra.gmra.mxu1 %v6616_v47  ;;  %6855 = vmatpush.bf16.msrb.mxu3 %v14125_v21 }
 0xf73   :  { %6935 = vmatpush.bf16.msrb.mxu0 %v13923_v40  ;;  %6948 = vmatpush.bf16.msra.mxu1 %v14047_v31 }
 0xf76   :  { %6856 = vmatpush.bf16.msrb.mxu3 %v14163_v23 }
 0xf77   :  { %6936 = vmatpush.bf16.msrb.mxu0 %v13956_v8  ;;  %6949 = vmatpush.bf16.msra.mxu1 %v14068_v14 }
 0xf7a   :  { %6857 = vmatpush.bf16.msrb.mxu3 %v14176_v42 }
 0xf7b   :  { %6937 = vmatpush.bf16.msrb.mxu0 %v13978_v6  ;;  %6950 = vmatpush.bf16.msra.mxu1 %v14114_v37 }
 0xf7e   :  { %6858 = vmatpush.bf16.msrb.mxu3 %v14197_v50 }
 0xf7f   :  { %6938 = vmatpush.bf16.msrb.mxu0 %v14011_v2  ;;  %6951 = vmatpush.bf16.msra.mxu1 %v14138_v4 }
 0xf82   :  { %6859 = vmatpush.bf16.msrb.mxu3 %v14230_v5 }
 0xf83   :  { %6939 = vmatpush.bf16.msrb.mxu0 %v14038_v45  ;;  %6952 = vmatpush.bf16.msra.mxu1 %v14165_v61  ;;  %v6614_v45 = vld [vmem:[#allocation2 + $0x50] sm:$0xc] }
 0xf86   :  { %6860 = vmatpush.bf16.msrb.mxu3 %v14256_v29 }
 0xf87   :  { %6940 = vmatpush.bf16.msrb.mxu0 %v14059_v11  ;;  %6953 = vmatpush.bf16.msra.mxu1 %v14203_v15  ;;  %v6613_v15 = vld [vmem:[#allocation2 + $0x40] sm:$0xc] }
 0xf8a   :  { %6861 = vmatpush.bf16.msrb.mxu3 %v14274_v46 }
 0xf8b   :  { %6941 = vmatpush.bf16.msrb.mxu0 %v14078_v25  ;;  %6954 = vmatpush.bf16.msra.mxu1 %v14232_v57 }
 0xf8e   :  { %6862 = vmatpush.bf16.msrb.mxu3 %v14295_v56 }
 0xf8f   :  { %6942 = vmatpush.bf16.msrb.mxu0 %v14103_v51  ;;  %6955 = vmatpush.bf16.msra.mxu1 %v14270_v13 }
 0xfee   :  { %v6639_v40 = vpop.f32.mrf.mxu0 }
 0xfef   :  { %v6640_v8 = vadd.f32 %v6639_v40, %v14386_v35  ;;  %v6652_v6 = vpop.f32.mrf.mxu1 }
 0xff0   :  { %v6653_v32 = vadd.f32 %v6652_v6, %v14395_v36 }
 0xff1   :  { %v6659_v2 = vrot.slane %v6640_v8, 6 }
 0xff2   :  { %v6703_v19 = vrot.slane %v6653_v32, 6 }
 0xff3   :  { %v6663_v31 = vadd.f32 %v6659_v2, %v6614_v45 }
 0xff4   :  { %v6626_v11 = vpop.f32.mrf.mxu3 }
 0xff5   :  { %v9343_v14 = vmul.f32 -1.442695, %v6663_v31  ;;  %v6627_v37 = vadd.f32 %v6626_v11, %v14376_v53  ;;  %v6716_v31 = vld [vmem:[#allocation2 + $0x40] sm:$0x30] }
 0xff6   :  { %v6641_v25 = vpop.f32.mrf.mxu0 }
 0xff7   :  { %10087 = vpow2.f32 %v9343_v14  ;;  %v6658_v4 = vrot.slane %v6627_v37, 6  ;;  %v6654_v61 = vpop.f32.mrf.mxu1  ;;  %v9905_v37 = vld [vmem:[#allocation4 + $0x38] sm:$0xff] }
 0xff9   :  { %v6662_v57 = vadd.f32 %v6658_v4, %v6613_v15  ;;  %v9903_v4 = vld [vmem:[#allocation4 + $0x28] sm:$0xff] }
 0xffb   :  { %v9342_v51 = vmul.f32 -1.442695, %v6662_v57 }
 0xffc   :  { %v6628_v28 = vpop.f32.mrf.mxu3 }
 0xffd   :  { %v10088_v13 = vpop.eup %10087  ;;  %10089 = vpow2.f32 %v9342_v51  ;;  %v9902_v28 = vld [vmem:[#allocation4 + $0x20] sm:$0xff] }
 0xffe   :  { %v6671_v27 = vadd.f32 1.0, %v10088_v13  ;;  %v9901_v13 = vld [vmem:[#allocation4 + $0x18] sm:$0xff] }
0x1000   :  { %10091 = vrcp.f32 %v6671_v27  ;;  %v6698_v44 = vand.u32 2147483648, %v6671_v27  ;;  %vm6692_vm11 = vweird.f32 %v6671_v27  ;;  %v6696_v41 = vand.u32 2147483647, %v6671_v27 }
0x1002   :  { %v6699_v34 = vor.u32 1.1754944e-38, %v6698_v44  ;;  %vm6697_vm13 = vcmp.eq.f32.partialorder %v6696_v41, 8.507059e+37  ;;  %v6718_v41 = vld [vmem:[#allocation2 + $0x28] sm:$0x30] }
0x1003   :  { %v10090_v48 = vpop.eup %10089 }
0x1004   :  { %v6670_v30 = vadd.f32 1.0, %v10090_v48 }
0x1006   :  { %10093 = vrcp.f32 %v6670_v30  ;;  %v10092_v59 = vpop.eup %10091  ;;  %v6683_v38 = vand.u32 2147483648, %v6670_v30  ;;  %v6681_v3 = vand.u32 2147483647, %v6670_v30  ;;  %vm6677_vm7 = vweird.f32 %v6670_v30 }
0x1007   :  { %v6688_v49 = vmul.f32 %v10092_v59, %v6671_v27  ;;  %vm6693_vm10 = vweird.f32 %v10092_v59 }
0x1008   :  { %v6684_v24 = vor.u32 1.1754944e-38, %v6683_v38  ;;  %vm6682_vm9 = vcmp.eq.f32.partialorder %v6681_v3, 8.507059e+37  ;;  %vm6694_vm12 = vmor %vm6692_vm11, %vm6693_vm10 }
0x1009   :  { %v6689_v63 = vsub.f32 1.0, %v6688_v49 }
0x100b   :  { %v6690_v1 = vmul.f32 %v10092_v59, %v6689_v63 }
0x100c   :  { %v10094_v43 = vpop.eup %10093 }
0x100d   :  { %v6673_v18 = vmul.f32 %v10094_v43, %v6670_v30  ;;  %vm6678_vm6 = vweird.f32 %v10094_v43  ;;  %v6691_v39 = vadd.f32 %v10092_v59, %v6690_v1 }
0x100e   :  { %vm6679_vm8 = vmor %vm6677_vm7, %vm6678_vm6 }
0x100f   :  { %v6674_v26 = vsub.f32 1.0, %v6673_v18  ;;  %v6695_v0 = vsel %vm6694_vm12, %v10092_v59, %v6691_v39  ;;  %v9900_v59 = vld [vmem:[#allocation4 + $0x10] sm:$0xff] }
0x1010   :  { %v6700_v54 = vsel %vm6697_vm13, %v6699_v34, %v6695_v0 }
0x1011   :  { %v6675_v17 = vmul.f32 %v10094_v43, %v6674_v26  ;;  %v6708_v20 = vsub.f32 1.0, %v6700_v54  ;;  %v6713_v9 = vmul.f32 %v6711_v52, %v6700_v54 }
0x1013   :  { %v6676_v60 = vadd.f32 %v10094_v43, %v6675_v17  ;;  %v9899_v17 = vld [vmem:[#allocation4 + $0x8] sm:$0xff] }
0x1015   :  { %v6680_v7 = vsel %vm6679_vm8, %v10094_v43, %v6676_v60 }
0x1016   :  { %v6685_v16 = vsel %vm6682_vm9, %v6684_v24, %v6680_v7  ;;  %v9898_v7 = vld [vmem:[#allocation4] sm:$0xff] }
0x1017   :  { %v6705_v58 = vmul.f32 %v6703_v19, %v6685_v16 }
0x1019   :  { %v6706_v10 = vadd.f32 %v6705_v58, %v6615_v22 }
0x101b   :  { %10095 = vtanh.f32 %v6706_v10 }
0x1021   :  { %v10096_v12 = vpop.eup %10095 }
0x1022   :  { %v6709_v55 = vmul.f32 %v10096_v12, %v6708_v20 }
0x1024   :  { %v14833_v33 = vadd.f32 %v6713_v9, %v6709_v55 }
0x1026   :  { %6715 = vst [vmem:[#allocation3 + $0x20] sm:$0xc] %v14833_v33  ;;  %v6719_v47 = vpack.c.bf16 %v14833_v33, %v14833_v33  ;;  %v6817_v20 = vrot.slane %v14833_v33, 6 }
0x1028   :  { %v6721_v40 = vrot.slane %v6719_v47, 1 }
0x102a   :  { %6731 = vmatmul.bf16.vlgmr.msra.gmra.mxu2 %v6721_v40  ;;  %6744 = vmatmul.bf16.vlgmr.msra.gmra.mxu3 %v6721_v40 }
0x102b   :  { %6757 = vmatmul.bf16.vlgmr.msra.gmra.mxu0 %v6721_v40  ;;  %6961 = vmatpush.bf16.msra.mxu2 %v14125_v21 }
0x102c   :  { %7102 = vmatpush.bf16.msra.mxu3 %v9905_v37  ;;  %v6823_v37 = vld [vmem:[#allocation2 + $0x50] sm:$0xc0] }
0x102f   :  { %6962 = vmatpush.bf16.msra.mxu2 %v14163_v23 }
0x1033   :  { %6963 = vmatpush.bf16.msra.mxu2 %v14176_v42 }
0x1037   :  { %6964 = vmatpush.bf16.msra.mxu2 %v14197_v50  ;;  %v6717_v50 = vld [vmem:[#allocation2 + $0x50] sm:$0x30] }
0x103b   :  { %6965 = vmatpush.bf16.msra.mxu2 %v14230_v5 }
0x103f   :  { %6966 = vmatpush.bf16.msra.mxu2 %v14256_v29 }
0x1043   :  { %6967 = vmatpush.bf16.msra.mxu2 %v14274_v46 }
0x1047   :  { %6968 = vmatpush.bf16.msra.mxu2 %v14295_v56  ;;  %v9904_v56 = vld [vmem:[#allocation4 + $0x30] sm:$0xff] }
0x1048   :  { %7103 = vmatpush.bf16.msra.mxu3 %v9904_v56 }
0x104c   :  { %7104 = vmatpush.bf16.msra.mxu3 %v9903_v4 }
0x1050   :  { %7105 = vmatpush.bf16.msra.mxu3 %v9902_v28 }
0x1054   :  { %7106 = vmatpush.bf16.msra.mxu3 %v9901_v13 }
0x1058   :  { %7107 = vmatpush.bf16.msra.mxu3 %v9900_v59 }
0x105c   :  { %7108 = vmatpush.bf16.msra.mxu3 %v9899_v17 }
0x1060   :  { %7109 = vmatpush.bf16.msra.mxu3 %v9898_v7 }
0x10a8   :  { %v6758_v62 = vpop.f32.mrf.mxu0 }
0x10a9   :  { %v6759_v26 = vadd.f32 %v6758_v62, %v14395_v36 }
0x10ab   :  { %v6809_v24 = vrot.slane %v6759_v26, 4 }
0x10ad   :  { %v6732_v8 = vpop.f32.mrf.mxu2  ;;  %v6745_v6 = vpop.f32.mrf.mxu3 }
0x10ae   :  { %v6733_v2 = vadd.f32 %v6732_v8, %v14376_v53  ;;  %v6746_v21 = vadd.f32 %v6745_v6, %v14386_v35  ;;  %v7026_v8 = vld [vmem:[#allocation3] sm:$0xff]  ;;  %v7025_v6 = vld [vmem:[#allocation3 + $0x8] sm:$0xff] }
0x10b0   :  { %v6764_v23 = vrot.slane %v6733_v2, 4  ;;  %v6765_v45 = vrot.slane %v6746_v21, 4  ;;  %v6760_v42 = vpop.f32.mrf.mxu0  ;;  %v7031_v2 = vpack.c.bf16 %v7026_v8, %v7025_v6 }
0x10b2   :  { %v6768_v11 = vadd.f32 %v6764_v23, %v6716_v31  ;;  %v6769_v5 = vadd.f32 %v6765_v45, %v6717_v50  ;;  %v6822_v45 = vld [vmem:[#allocation2 + $0x40] sm:$0xc0] }
0x10b4   :  { %v9344_v14 = vmul.f32 -1.442695, %v6768_v11  ;;  %v9345_v29 = vmul.f32 -1.442695, %v6769_v5 }
0x10b5   :  { %v6734_v46 = vpop.f32.mrf.mxu2  ;;  %v6747_v25 = vpop.f32.mrf.mxu3 }
0x10b6   :  { %10097 = vpow2.f32 %v9344_v14 }
0x10b7   :  { %10099 = vpow2.f32 %v9345_v29 }
0x10bc   :  { %v10098_v61 = vpop.eup %10097 }
0x10bd   :  { %v10100_v15 = vpop.eup %10099  ;;  %v6776_v57 = vadd.f32 1.0, %v10098_v61 }
0x10be   :  { %v6777_v51 = vadd.f32 1.0, %v10100_v15 }
0x10bf   :  { %10101 = vrcp.f32 %v6776_v57  ;;  %v6789_v18 = vand.u32 2147483648, %v6776_v57  ;;  %v6787_v32 = vand.u32 2147483647, %v6776_v57  ;;  %vm6783_vm15 = vweird.f32 %v6776_v57 }
0x10c0   :  { %10103 = vrcp.f32 %v6777_v51  ;;  %v6804_v58 = vand.u32 2147483648, %v6777_v51  ;;  %vm6798_vm3 = vweird.f32 %v6777_v51  ;;  %v6802_v22 = vand.u32 2147483647, %v6777_v51 }
0x10c1   :  { %v6790_v60 = vor.u32 1.1754944e-38, %v6789_v18  ;;  %vm6788_vm1 = vcmp.eq.f32.partialorder %v6787_v32, 8.507059e+37 }
0x10c2   :  { %v6805_v34 = vor.u32 1.1754944e-38, %v6804_v58  ;;  %vm6803_vm5 = vcmp.eq.f32.partialorder %v6802_v22, 8.507059e+37 }
0x10c5   :  { %v10102_v27 = vpop.eup %10101 }
0x10c6   :  { %v10104_v48 = vpop.eup %10103  ;;  %v6779_v30 = vmul.f32 %v10102_v27, %v6776_v57  ;;  %vm6784_vm14 = vweird.f32 %v10102_v27 }
0x10c7   :  { %v6794_v49 = vmul.f32 %v10104_v48, %v6777_v51  ;;  %vm6785_vm0 = vmor %vm6783_vm15, %vm6784_vm14  ;;  %vm6799_vm2 = vweird.f32 %v10104_v48  ;;  %v14860_v51 = vld [vmem:[%s14911_s14] ss:$0 sm:$0xff] }
0x10c8   :  { %v6780_v43 = vsub.f32 1.0, %v6779_v30  ;;  %vm6800_vm4 = vmor %vm6798_vm3, %vm6799_vm2 }
0x10c9   :  { %v6795_v63 = vsub.f32 1.0, %v6794_v49 }
0x10ca   :  { %v6781_v38 = vmul.f32 %v10102_v27, %v6780_v43 }
0x10cb   :  { %v6796_v3 = vmul.f32 %v10104_v48, %v6795_v63 }
0x10cc   :  { %v6782_v1 = vadd.f32 %v10102_v27, %v6781_v38 }
0x10cd   :  { %v6797_v16 = vadd.f32 %v10104_v48, %v6796_v3 }
0x10ce   :  { %v6786_v19 = vsel %vm6785_vm0, %v10102_v27, %v6782_v1 }
0x10cf   :  { %v6791_v39 = vsel %vm6788_vm1, %v6790_v60, %v6786_v19  ;;  %v6801_v0 = vsel %vm6800_vm4, %v10104_v48, %v6797_v16 }
0x10d0   :  { %v6811_v44 = vmul.f32 %v6809_v24, %v6791_v39  ;;  %v6806_v54 = vsel %vm6803_vm5, %v6805_v34, %v6801_v0 }
0x10d1   :  { %v6814_v52 = vsub.f32 1.0, %v6806_v54  ;;  %v6819_v9 = vmul.f32 %v6817_v20, %v6806_v54 }
0x10d2   :  { %v6812_v10 = vadd.f32 %v6811_v44, %v6718_v41 }
0x10d4   :  { %10105 = vtanh.f32 %v6812_v10  ;;  %v6824_v10 = vld [vmem:[#allocation2 + $0x28] sm:$0xc0] }
0x10da   :  { %v10106_v12 = vpop.eup %10105 }
0x10db   :  { %v6815_v55 = vmul.f32 %v10106_v12, %v6814_v52 }
0x10dd   :  { %v14850_v47 = vadd.f32 %v6819_v9, %v6815_v55 }
0x10df   :  { %6821 = vst [vmem:[#allocation3 + $0x20] sm:$0x30] %v14850_v47  ;;  %v6825_v40 = vpack.c.bf16 %v14850_v47, %v14850_v47  ;;  %v6923_v6 = vrot.slane %v14850_v47, 6 }
0x10e1   :  { %v6827_v62 = vrot.slane %v6825_v40, 2 }
0x10e3   :  { %6837 = vmatmul.bf16.vlgmr.msrb.gmra.mxu1 %v6827_v62  ;;  %6850 = vmatmul.bf16.vlgmr.msrb.gmra.mxu2 %v6827_v62 }
0x10e4   :  { %6863 = vmatmul.bf16.vlgmr.msrb.gmra.mxu3 %v6827_v62 }
0x10f4   :  { %7110 = vmatmul.bf16.vlgmr.msra.gmra.mxu3 %v7031_v2 }
0x1160   :  { %v6838_v21 = vpop.f32.mrf.mxu1 }
0x1161   :  { %v6839_v33 = vadd.f32 %v6838_v21, %v14376_v53 }
0x1163   :  { %v6870_v23 = vrot.slane %v6839_v33, 2 }
0x1165   :  { %v6874_v42 = vadd.f32 %v6870_v23, %v6822_v45 }
0x1166   :  { %v6851_v31 = vpop.f32.mrf.mxu2 }
0x1167   :  { %v9346_v50 = vmul.f32 -1.442695, %v6874_v42  ;;  %v6852_v11 = vadd.f32 %v6851_v31, %v14386_v35  ;;  %v6864_v5 = vpop.f32.mrf.mxu3 }
0x1168   :  { %v6840_v14 = vpop.f32.mrf.mxu1  ;;  %v6865_v43 = vadd.f32 %v6864_v5, %v14395_v36 }
0x1169   :  { %10107 = vpow2.f32 %v9346_v50  ;;  %v6871_v29 = vrot.slane %v6852_v11, 2 }
0x116a   :  { %v6915_v7 = vrot.slane %v6865_v43, 2 }
0x116b   :  { %v6875_v46 = vadd.f32 %v6871_v29, %v6823_v37 }
0x116d   :  { %v9347_v25 = vmul.f32 -1.442695, %v6875_v46 }
0x116e   :  { %v6853_v56 = vpop.f32.mrf.mxu2 }
0x116f   :  { %v10108_v4 = vpop.eup %10107  ;;  %10109 = vpow2.f32 %v9347_v25  ;;  %v6866_v61 = vpop.f32.mrf.mxu3 }
0x1170   :  { %v6882_v15 = vadd.f32 1.0, %v10108_v4 }
0x1172   :  { %10111 = vrcp.f32 %v6882_v15  ;;  %v6895_v18 = vand.u32 2147483648, %v6882_v15  ;;  %v6893_v26 = vand.u32 2147483647, %v6882_v15  ;;  %vm6889_vm7 = vweird.f32 %v6882_v15 }
0x1174   :  { %v6896_v1 = vor.u32 1.1754944e-38, %v6895_v18  ;;  %vm6894_vm9 = vcmp.eq.f32.partialorder %v6893_v26, 8.507059e+37 }
0x1175   :  { %v10110_v57 = vpop.eup %10109 }
0x1176   :  { %v6883_v28 = vadd.f32 1.0, %v10110_v57 }
0x1177   :  { %v7111_v13 = vpop.f32.mrf.mxu3 }
0x1178   :  { %v10112_v27 = vpop.eup %10111  ;;  %10113 = vrcp.f32 %v6883_v28  ;;  %v7112_v30 = vadd.f32 %v14860_v51, %v7111_v13  ;;  %v6910_v41 = vand.u32 2147483648, %v6883_v28  ;;  %v6908_v0 = vand.u32 2147483647, %v6883_v28 }
0x1179   :  { %v6885_v48 = vmul.f32 %v10112_v27, %v6882_v15  ;;  %vm6890_vm6 = vweird.f32 %v10112_v27  ;;  %vm6904_vm11 = vweird.f32 %v6883_v28 }
0x117a   :  { %v9382_v49 = vmul.f32 -1.442695, %v7112_v30  ;;  %vm6891_vm8 = vmor %vm6889_vm7, %vm6890_vm6  ;;  %v6911_v20 = vor.u32 1.1754944e-38, %v6910_v41  ;;  %vm6909_vm13 = vcmp.eq.f32.partialorder %v6908_v0, 8.507059e+37 }
0x117b   :  { %v6886_v59 = vsub.f32 1.0, %v6885_v48 }
0x117c   :  { %10115 = vpow2.f32 %v9382_v49 }
0x117d   :  { %v6887_v63 = vmul.f32 %v10112_v27, %v6886_v59 }
0x117e   :  { %v10114_v38 = vpop.eup %10113 }
0x117f   :  { %v6900_v32 = vmul.f32 %v10114_v38, %v6883_v28  ;;  %v6888_v17 = vadd.f32 %v10112_v27, %v6887_v63  ;;  %v7113_v3 = vpop.f32.mrf.mxu3  ;;  %vm6905_vm10 = vweird.f32 %v10114_v38  ;;  %v7027_v28 = vld [vmem:[#allocation3 + $0x10] sm:$0xff] }
0x1180   :  { %v7114_v60 = vadd.f32 %v14860_v51, %v7113_v3  ;;  %vm6906_vm12 = vmor %vm6904_vm11, %vm6905_vm10 }
0x1181   :  { %v6901_v24 = vsub.f32 1.0, %v6900_v32  ;;  %v6892_v19 = vsel %vm6891_vm8, %v10112_v27, %v6888_v17  ;;  %v6929_v32 = vld [vmem:[#allocation2 + $0x48] sm:$0x3] }
0x1182   :  { %v6897_v39 = vsel %vm6894_vm9, %v6896_v1, %v6892_v19  ;;  %v9383_v16 = vmul.f32 -1.442695, %v7114_v60  ;;  %v10116_v44 = vpop.eup %10115 }
0x1183   :  { %v6902_v58 = vmul.f32 %v10114_v38, %v6901_v24  ;;  %v6917_v22 = vmul.f32 %v6915_v7, %v6897_v39  ;;  %v7144_v34 = vadd.f32 1.0, %v10116_v44 }
0x1184   :  { %10117 = vpow2.f32 %v9383_v16 }
0x1185   :  { %v6903_v54 = vadd.f32 %v10114_v38, %v6902_v58  ;;  %v6918_v52 = vadd.f32 %v6917_v22, %v6824_v10  ;;  %10119 = vrcp.f32 %v7144_v34  ;;  %v7161_v31 = vand.u32 2147483648, %v7144_v34 }
0x1186   :  { %v7159_v11 = vand.u32 2147483647, %v7144_v34  ;;  %vm7155_vm15 = vweird.f32 %v7144_v34 }
0x1187   :  { %v6907_v12 = vsel %vm6906_vm12, %v10114_v38, %v6903_v54  ;;  %10121 = vtanh.f32 %v6918_v52  ;;  %v7162_v47 = vor.u32 1.1754944e-38, %v7161_v31  ;;  %v6928_v38 = vld [vmem:[#allocation2 + $0x10] sm:$0x3] }
0x1188   :  { %v6912_v55 = vsel %vm6909_vm13, %v6911_v20, %v6907_v12  ;;  %vm7160_vm1 = vcmp.eq.f32.partialorder %v7159_v11, 8.507059e+37 }
0x1189   :  { %v6920_v8 = vsub.f32 1.0, %v6912_v55  ;;  %v6925_v23 = vmul.f32 %v6923_v6, %v6912_v55 }
0x118a   :  { %v10118_v9 = vpop.eup %10117 }
0x118b   :  { %v7145_v40 = vadd.f32 1.0, %v10118_v9  ;;  %v10120_v62 = vpop.eup %10119 }
0x118c   :  { %v7151_v21 = vmul.f32 %v10120_v62, %v7144_v34  ;;  %vm7156_vm14 = vweird.f32 %v10120_v62 }
0x118d   :  { %v10122_v2 = vpop.eup %10121  ;;  %10123 = vrcp.f32 %v7145_v40  ;;  %vm7157_vm0 = vmor %vm7155_vm15, %vm7156_vm14  ;;  %v7176_v61 = vand.u32 2147483648, %v7145_v40  ;;  %v7174_v57 = vand.u32 2147483647, %v7145_v40  ;;  %vm7170_vm3 = vweird.f32 %v7145_v40 }
0x118e   :  { %v6921_v33 = vmul.f32 %v10122_v2, %v6920_v8  ;;  %v7152_v45 = vsub.f32 1.0, %v7151_v21 }
0x118f   :  { %v7177_v30 = vor.u32 1.1754944e-38, %v7176_v61  ;;  %vm7175_vm5 = vcmp.eq.f32.partialorder %v7174_v57, 8.507059e+37 }
0x1190   :  { %v14866_v42 = vadd.f32 %v6925_v23, %v6921_v33  ;;  %v7153_v50 = vmul.f32 %v10120_v62, %v7152_v45 }
0x1192   :  { %6927 = vst [vmem:[#allocation3 + $0x20] sm:$0xc0] %v14866_v42  ;;  %v6931_v5 = vpack.c.bf16 %v14866_v42, %v14866_v42  ;;  %v7154_v29 = vadd.f32 %v10120_v62, %v7153_v50 }
0x1193   :  { %v10124_v14 = vpop.eup %10123 }
0x1194   :  { %v7166_v37 = vmul.f32 %v10124_v14, %v7145_v40  ;;  %v6933_v46 = vrot.slane %v6931_v5, 3  ;;  %v7158_v25 = vsel %vm7157_vm0, %v10120_v62, %v7154_v29  ;;  %vm7171_vm2 = vweird.f32 %v10124_v14 }
0x1195   :  { %v7163_v56 = vsel %vm7160_vm1, %v7162_v47, %v7158_v25  ;;  %vm7172_vm4 = vmor %vm7170_vm3, %vm7171_vm2 }
0x1196   :  { %v7167_v4 = vsub.f32 1.0, %v7166_v37  ;;  %6943 = vmatmul.bf16.vlgmr.msrb.gmra.mxu0 %v6933_v46  ;;  %6956 = vmatmul.bf16.vlgmr.msra.gmra.mxu1 %v6933_v46  ;;  %7240 = vst [vmem:[%s14912_s15] sm:$0xff] %v7163_v56 }
0x1197   :  { %6969 = vmatmul.bf16.vlgmr.msra.gmra.mxu2 %v6933_v46  ;;  %v6930_v46 = vld [vmem:[#allocation2 + $0x30] sm:$0x3] }
0x1198   :  { %v7168_v15 = vmul.f32 %v10124_v14, %v7167_v4 }
0x1199   :  { %v7028_v13 = vld [vmem:[#allocation3 + $0x20] sm:$0xff] }
0x119a   :  { %v7169_v27 = vadd.f32 %v10124_v14, %v7168_v15  ;;  %v7032_v48 = vpack.c.bf16 %v7028_v13, %v7027_v28 }
0x119c   :  { %v7173_v59 = vsel %vm7172_vm4, %v10124_v14, %v7169_v27  ;;  %7115 = vmatmul.bf16.gmra.mxu3 %v7032_v48 }
0x119d   :  { %v7178_v49 = vsel %vm7175_vm5, %v7177_v30, %v7173_v59  ;;  %v7020_v59 = vrot.slane %v14866_v42, 6 }
0x119e   :  { %7241 = vst [vmem:[%s14912_s15 + $0x8] sm:$0xff] %v7178_v49 }
0x1213   :  { %v6944_v43 = vpop.f32.mrf.mxu0  ;;  %v6957_v18 = vpop.f32.mrf.mxu1 }
0x1214   :  { %v6945_v63 = vadd.f32 %v6944_v43, %v14376_v53  ;;  %v6958_v26 = vadd.f32 %v6957_v18, %v14386_v35 }
0x1216   :  { %v6974_v17 = vadd.f32 %v6945_v63, %v6928_v38  ;;  %v6975_v3 = vadd.f32 %v6958_v26, %v6929_v32 }
0x1218   :  { %v9348_v1 = vmul.f32 -1.442695, %v6974_v17  ;;  %v9349_v60 = vmul.f32 -1.442695, %v6975_v3 }
0x121a   :  { %10125 = vpow2.f32 %v9348_v1  ;;  %v6970_v24 = vpop.f32.mrf.mxu2 }
0x121b   :  { %10127 = vpow2.f32 %v9349_v60  ;;  %v6946_v19 = vpop.f32.mrf.mxu0  ;;  %v6959_v7 = vpop.f32.mrf.mxu1  ;;  %v6971_v31 = vadd.f32 %v6970_v24, %v14395_v36 }
0x121f   :  { %v7116_v39 = vpop.f32.mrf.mxu3 }
0x1220   :  { %v10126_v16 = vpop.eup %10125  ;;  %v7117_v44 = vadd.f32 %v14860_v51, %v7116_v39 }
0x1221   :  { %v10128_v58 = vpop.eup %10127  ;;  %v6982_v41 = vadd.f32 1.0, %v10126_v16 }
0x1222   :  { %v6983_v53 = vadd.f32 1.0, %v10128_v58  ;;  %v9384_v22 = vmul.f32 -1.442695, %v7117_v44  ;;  %v6972_v35 = vpop.f32.mrf.mxu2  ;;  %v10152_v58 = vld [vmem:[#allocation3 + $0x28] sm:$0xff] }
0x1223   :  { %10129 = vrcp.f32 %v6982_v41  ;;  %v6995_v8 = vand.u32 2147483648, %v6982_v41  ;;  %v6993_v2 = vand.u32 2147483647, %v6982_v41  ;;  %vm6989_vm7 = vweird.f32 %v6982_v41 }
0x1224   :  { %10131 = vrcp.f32 %v6983_v53  ;;  %v7010_v47 = vand.u32 2147483648, %v6983_v53  ;;  %vm7004_vm11 = vweird.f32 %v6983_v53  ;;  %v7008_v25 = vand.u32 2147483647, %v6983_v53 }
0x1225   :  { %10133 = vpow2.f32 %v9384_v22  ;;  %v6996_v23 = vor.u32 1.1754944e-38, %v6995_v8  ;;  %vm6994_vm9 = vcmp.eq.f32.partialorder %v6993_v2, 8.507059e+37 }
0x1226   :  { %v7011_v57 = vor.u32 1.1754944e-38, %v7010_v47  ;;  %vm7009_vm13 = vcmp.eq.f32.partialorder %v7008_v25, 8.507059e+37 }
0x1227   :  { %v7118_v10 = vpop.f32.mrf.mxu3 }
0x1228   :  { %v7119_v0 = vadd.f32 %v14860_v51, %v7118_v10 }
0x1229   :  { %v10130_v34 = vpop.eup %10129 }
0x122a   :  { %v10132_v54 = vpop.eup %10131  ;;  %v6985_v52 = vmul.f32 %v10130_v34, %v6982_v41  ;;  %v9385_v20 = vmul.f32 -1.442695, %v7119_v0  ;;  %vm6990_vm6 = vweird.f32 %v10130_v34 }
0x122b   :  { %v10134_v12 = vpop.eup %10133  ;;  %v7000_v55 = vmul.f32 %v10132_v54, %v6983_v53  ;;  %vm6991_vm8 = vmor %vm6989_vm7, %vm6990_vm6  ;;  %vm7005_vm10 = vweird.f32 %v10132_v54 }
0x122c   :  { %v6986_v9 = vsub.f32 1.0, %v6985_v52  ;;  %v7146_v40 = vadd.f32 1.0, %v10134_v12  ;;  %10135 = vpow2.f32 %v9385_v20  ;;  %vm7006_vm12 = vmor %vm7004_vm11, %vm7005_vm10 }
0x122d   :  { %v7001_v62 = vsub.f32 1.0, %v7000_v55 }
0x122e   :  { %v6987_v6 = vmul.f32 %v10130_v34, %v6986_v9  ;;  %10137 = vrcp.f32 %v7146_v40  ;;  %v7191_v36 = vand.u32 2147483648, %v7146_v40  ;;  %v7189_v13 = vand.u32 2147483647, %v7146_v40 }
0x122f   :  { %v7002_v21 = vmul.f32 %v10132_v54, %v7001_v62  ;;  %vm7185_vm15 = vweird.f32 %v7146_v40 }
0x1230   :  { %v6988_v33 = vadd.f32 %v10130_v34, %v6987_v6  ;;  %v7192_v49 = vor.u32 1.1754944e-38, %v7191_v36  ;;  %vm7190_vm1 = vcmp.eq.f32.partialorder %v7189_v13, 8.507059e+37 }
0x1231   :  { %v7003_v5 = vadd.f32 %v10132_v54, %v7002_v21 }
0x1232   :  { %v10136_v45 = vpop.eup %10135  ;;  %v6992_v50 = vsel %vm6991_vm8, %v10130_v34, %v6988_v33 }
0x1233   :  { %v6997_v11 = vsel %vm6994_vm9, %v6996_v23, %v6992_v50  ;;  %v7147_v14 = vadd.f32 1.0, %v10136_v45  ;;  %v7007_v61 = vsel %vm7006_vm12, %v10132_v54, %v7003_v5 }
0x1234   :  { %v10138_v29 = vpop.eup %10137  ;;  %v7014_v37 = vmul.f32 %v6997_v11, %v6971_v31  ;;  %v7012_v27 = vsel %vm7009_vm13, %v7011_v57, %v7007_v61 }
0x1235   :  { %v7181_v56 = vmul.f32 %v10138_v29, %v7146_v40  ;;  %10139 = vrcp.f32 %v7147_v14  ;;  %vm7186_vm14 = vweird.f32 %v10138_v29  ;;  %v7017_v43 = vsub.f32 1.0, %v7012_v27 }
0x1236   :  { %v7015_v4 = vadd.f32 %v7014_v37, %v6930_v46  ;;  %vm7187_vm0 = vmor %vm7185_vm15, %vm7186_vm14  ;;  %v7022_v17 = vmul.f32 %v7020_v59, %v7012_v27  ;;  %v7206_v1 = vand.u32 2147483648, %v7147_v14  ;;  %v7204_v42 = vand.u32 2147483647, %v7147_v14 }
0x1237   :  { %v7182_v15 = vsub.f32 1.0, %v7181_v56  ;;  %vm7200_vm3 = vweird.f32 %v7147_v14 }
0x1238   :  { %10141 = vtanh.f32 %v7015_v4  ;;  %v7207_v7 = vor.u32 1.1754944e-38, %v7206_v1  ;;  %vm7205_vm5 = vcmp.eq.f32.partialorder %v7204_v42, 8.507059e+37 }
0x1239   :  { %v7183_v28 = vmul.f32 %v10138_v29, %v7182_v15 }
0x123b   :  { %v7184_v48 = vadd.f32 %v10138_v29, %v7183_v28  ;;  %v10140_v30 = vpop.eup %10139 }
0x123c   :  { %v7196_v63 = vmul.f32 %v10140_v30, %v7147_v14  ;;  %vm7201_vm2 = vweird.f32 %v10140_v30 }
0x123d   :  { %v7188_v18 = vsel %vm7187_vm0, %v10138_v29, %v7184_v48  ;;  %vm7202_vm4 = vmor %vm7200_vm3, %vm7201_vm2 }
0x123e   :  { %v10142_v26 = vpop.eup %10141  ;;  %v7193_v38 = vsel %vm7190_vm1, %v7192_v49, %v7188_v18  ;;  %v7197_v3 = vsub.f32 1.0, %v7196_v63 }
0x123f   :  { %v7018_v32 = vmul.f32 %v10142_v26, %v7017_v43  ;;  %7242 = vst [vmem:[%s14912_s15 + $0x10] sm:$0xff] %v7193_v38 }
0x1240   :  { %v7198_v24 = vmul.f32 %v10140_v30, %v7197_v3 }
0x1241   :  { %v7023_v60 = vadd.f32 %v7022_v17, %v7018_v32 }
0x1242   :  { %v7199_v19 = vadd.f32 %v10140_v30, %v7198_v24 }
0x1243   :  { %7024 = vst [vmem:[#allocation3 + $0x18] sm:$0x3] %v7023_v60 }
0x1244   :  { %v7203_v39 = vsel %vm7202_vm4, %v10140_v30, %v7199_v19 }
0x1245   :  { %v7208_v16 = vsel %vm7205_vm5, %v7207_v7, %v7203_v39 }
0x1246   :  { %7243 = vst [vmem:[%s14912_s15 + $0x18] sm:$0xff] %v7208_v16 }
0x124a   :  { %v7029_v44 = vld [vmem:[#allocation3 + $0x18] sm:$0xff] }
0x124b   :  { %v7033_v41 = vpack.c.bf16 %v10152_v58, %v7029_v44 }
0x124d   :  { %7120 = vmatmul.bf16.gmra.mxu3 %v7033_v41 }
0x12d0   :  { %v7121_v53 = vpop.f32.mrf.mxu3 }
0x12d1   :  { %v7122_v22 = vadd.f32 %v14860_v51, %v7121_v53 }
0x12d3   :  { %v9386_v35 = vmul.f32 -1.442695, %v7122_v22 }
0x12d5   :  { %10143 = vpow2.f32 %v9386_v35 }
0x12d8   :  { %v7123_v10 = vpop.f32.mrf.mxu3 }
0x12d9   :  { %v7124_v0 = vadd.f32 %v14860_v51, %v7123_v10 }
0x12db   :  { %v10144_v34 = vpop.eup %10143  ;;  %v9387_v54 = vmul.f32 -1.442695, %v7124_v0 }
0x12dc   :  { %v7148_v52 = vadd.f32 1.0, %v10144_v34 }
0x12dd   :  { %10145 = vpow2.f32 %v9387_v54 }
0x12de   :  { %10147 = vrcp.f32 %v7148_v52  ;;  %v7221_v62 = vand.u32 2147483648, %v7148_v52  ;;  %v7219_v6 = vand.u32 2147483647, %v7148_v52  ;;  %vm7215_vm7 = vweird.f32 %v7148_v52 }
0x12e0   :  { %v7222_v51 = vor.u32 1.1754944e-38, %v7221_v62  ;;  %vm7220_vm9 = vcmp.eq.f32.partialorder %v7219_v6, 8.507059e+37 }
0x12e3   :  { %v10146_v20 = vpop.eup %10145 }
0x12e4   :  { %v10148_v12 = vpop.eup %10147  ;;  %v7149_v55 = vadd.f32 1.0, %v10146_v20 }
0x12e5   :  { %v7211_v9 = vmul.f32 %v10148_v12, %v7148_v52  ;;  %vm7216_vm6 = vweird.f32 %v10148_v12 }
0x12e6   :  { %10149 = vrcp.f32 %v7149_v55  ;;  %vm7217_vm8 = vmor %vm7215_vm7, %vm7216_vm6  ;;  %v7236_v50 = vand.u32 2147483648, %v7149_v55  ;;  %v7234_v5 = vand.u32 2147483647, %v7149_v55  ;;  %vm7230_vm11 = vweird.f32 %v7149_v55 }
0x12e7   :  { %v7212_v40 = vsub.f32 1.0, %v7211_v9 }
0x12e8   :  { %v7237_v29 = vor.u32 1.1754944e-38, %v7236_v50  ;;  %vm7235_vm13 = vcmp.eq.f32.partialorder %v7234_v5, 8.507059e+37 }
0x12e9   :  { %v7213_v8 = vmul.f32 %v10148_v12, %v7212_v40 }
0x12eb   :  { %v7214_v2 = vadd.f32 %v10148_v12, %v7213_v8 }
0x12ec   :  { %v10150_v21 = vpop.eup %10149 }
0x12ed   :  { %v7218_v33 = vsel %vm7217_vm8, %v10148_v12, %v7214_v2  ;;  %v7226_v23 = vmul.f32 %v10150_v21, %v7149_v55  ;;  %vm7231_vm10 = vweird.f32 %v10150_v21 }
0x12ee   :  { %v7223_v45 = vsel %vm7220_vm9, %v7222_v51, %v7218_v33  ;;  %vm7232_vm12 = vmor %vm7230_vm11, %vm7231_vm10 }
0x12ef   :  { %7244 = vst [vmem:[%s14912_s15 + $0x20] sm:$0xff] %v7223_v45  ;;  %v7227_v31 = vsub.f32 1.0, %v7226_v23 }
0x12f1   :  { %v7228_v11 = vmul.f32 %v10150_v21, %v7227_v31 }
0x12f3   :  { %v7229_v14 = vadd.f32 %v10150_v21, %v7228_v11 }
0x12f5   :  { %v7233_v47 = vsel %vm7232_vm12, %v10150_v21, %v7229_v14 }
0x12f6   :  { %v7238_v37 = vsel %vm7235_vm13, %v7237_v29, %v7233_v47 }
0x12f7   :  { %7245 = vst [vmem:[%s14912_s15 + $0x28] sm:$0xff] %v7238_v37 }
0x12f8   :  { %7250 = vsyncpa [#allocation5], 1 }

</bundles_post_ra>
